<compile_context>
chip_gen: v5e
topology: v5e:2x2
jax: 0.10.0
libtpu: 0.0.40
codegen_flags: <defaults>
</compile_context>

<pallas_src>
import functools

import jax
import jax.numpy as jnp
from jax.experimental import pallas as pl
from jax.experimental.pallas import tpu as pltpu


def _vmem_capacity_bytes():
    """Physical VMEM of the attached TPU; conservative (v7x-sized) fallback."""
    try:
        return int(pltpu.get_tpu_info().vmem_capacity_bytes)
    except Exception:
        return 64 * 1024 * 1024


# --------------------------------------------------------------------------
# Kernel 1: y = relu(x @ w + b)   — full-K weight block, one step per N tile.
# --------------------------------------------------------------------------
def _linear_relu_kernel(x_ref, w_ref, b_ref, o_ref):
    y = jnp.dot(x_ref[...], w_ref[...], preferred_element_type=jnp.float32)
    y = jnp.maximum(y + b_ref[...], 0.0)          # bias folded into the only step
    o_ref[...] = y.astype(o_ref.dtype)


def linear_relu(x, w, b2d, *, tn):
    """x: (M, K), w: (K, N), b2d: (1, N) -> relu(x @ w + b)."""
    M, K = x.shape
    K2, N = w.shape
    assert K == K2 and b2d.shape == (1, N) and N % tn == 0

    # Double-buffered pipeline buffers (f32) + margin for compiler scratch.
    vmem_limit = 2 * 4 * (K * tn + M * K + M * tn + tn) + (16 << 20)

    return pl.pallas_call(
        _linear_relu_kernel,
        out_shape=jax.ShapeDtypeStruct((M, N), jnp.float32),
        grid_spec=pltpu.PrefetchScalarGridSpec(
            num_scalar_prefetch=0,
            grid=(N // tn,),
            in_specs=[
                pl.BlockSpec((M, K), lambda j: (0, 0)),    # activations, resident
                pl.BlockSpec((K, tn), lambda j: (0, j)),   # full-K weight stripe
                pl.BlockSpec((1, tn), lambda j: (0, j)),   # bias stripe
            ],
            out_specs=pl.BlockSpec((M, tn), lambda j: (0, j)),
        ),
        compiler_params=pltpu.CompilerParams(
            dimension_semantics=("parallel",),
            vmem_limit_bytes=int(vmem_limit),
        ),
    )(x, w, b2d)


# --------------------------------------------------------------------------
# Kernel 2: fused  relu(x @ w2 + b2) @ w3  — per-N-tile partial contributions.
# --------------------------------------------------------------------------
def _fused_l2_l3_kernel(x_ref, w2_ref, b2_ref, w3_ref, part_ref):
    h = jnp.dot(x_ref[...], w2_ref[...], preferred_element_type=jnp.float32)
    h = jnp.maximum(h + b2_ref[...], 0.0)                       # layer-2 tile
    p = jnp.dot(h, w3_ref[...], preferred_element_type=jnp.float32)  # layer-3 partial
    part_ref[...] = p[None].astype(part_ref.dtype)


def fused_linear_relu_linear(x, w2, b2_2d, w3, b3, *, tn):
    """relu(x @ w2 + b2) @ w3 + b3 without materializing a third pallas_call."""
    M, K = x.shape
    K2a, N2 = w2.shape
    K2b, C = w3.shape
    assert K == K2a and N2 == K2b and b2_2d.shape == (1, N2) and b3.shape == (C,)
    assert N2 % tn == 0
    nb = N2 // tn

    vmem_limit = 2 * 4 * (K * tn + M * K + tn + tn * C + M * C) + (16 << 20)

    partials = pl.pallas_call(
        _fused_l2_l3_kernel,
        out_shape=jax.ShapeDtypeStruct((nb, M, C), jnp.float32),
        grid_spec=pltpu.PrefetchScalarGridSpec(
            num_scalar_prefetch=0,
            grid=(nb,),
            in_specs=[
                pl.BlockSpec((M, K), lambda j: (0, 0)),    # layer-1 output, resident
                pl.BlockSpec((K, tn), lambda j: (0, j)),   # full-K w2 stripe
                pl.BlockSpec((1, tn), lambda j: (0, j)),   # b2 stripe
                pl.BlockSpec((tn, C), lambda j: (j, 0)),   # matching w3 K-slice
            ],
            out_specs=pl.BlockSpec((1, M, C), lambda j: (j, 0, 0)),
        ),
        compiler_params=pltpu.CompilerParams(
            dimension_semantics=("parallel",),             # v7x: dual-TC w2 streaming
            vmem_limit_bytes=int(vmem_limit),
        ),
    )(x, w2, b2_2d, w3)

    # Tiny (nb, M, 10) reduction; keeps the weight-streaming axis parallel instead
    # of forcing a sequential in-kernel accumulation over w2 stripes.
    return partials.sum(axis=0) + b3


# --------------------------------------------------------------------------
# Parameters & forward
# --------------------------------------------------------------------------
def init_vgg_classifier_params(key, inp, hidden=4096, num_classes=10):
    """Deterministic synthetic parameters, PyTorch nn.Linear (out, in) convention."""
    keys = jax.random.split(key, 6)

    def linear(kw, kb, fan_in, fan_out):
        bound = 1.0 / jnp.sqrt(jnp.float32(fan_in))
        w = jax.random.uniform(kw, (fan_out, fan_in), jnp.float32, -bound, bound)
        b = jax.random.uniform(kb, (fan_out,), jnp.float32, -bound, bound)
        return w, b

    w1, b1 = linear(keys[0], keys[1], inp, hidden)
    w2, b2 = linear(keys[2], keys[3], hidden, hidden)
    w3, b3 = linear(keys[4], keys[5], hidden, num_classes)
    return {"w1": w1, "b1": b1, "w2": w2, "b2": b2, "w3": w3, "b3": b3}


def prepare_params(params):
    """One-time (K, N) transposition so no 64-MiB transpose sits on the hot path.

    # TODO(synk): casting the weights to bf16 here would halve HBM traffic (~2x
    # end-to-end, since the kernel is HBM-bound) at a small accuracy cost.
    """
    return {
        "w1": jnp.asarray(params["w1"].T),
        "b1": jnp.asarray(params["b1"]).reshape(1, -1),
        "w2": jnp.asarray(params["w2"].T),
        "b2": jnp.asarray(params["b2"]).reshape(1, -1),
        "w3": jnp.asarray(params["w3"].T),
        "b3": jnp.asarray(params["b3"]),
    }


def vgg_classifier_forward(x_nchw, fp, *, tn1, tn2):
    """Forward pass of VGGClassifier (eval mode: Dropout = identity)."""
    B = x_nchw.shape[0]
    x = x_nchw.reshape(B, -1)                                   # == torch view(B, -1)
    h = linear_relu(x, fp["w1"], fp["b1"], tn=tn1)              # Linear + ReLU
    return fused_linear_relu_linear(                            # Linear + ReLU + Linear
        h, fp["w2"], fp["b2"], fp["w3"], fp["b3"], tn=tn2
    )


if __name__ == "__main__":
    key = jax.random.PRNGKey(0)
    k_x, k_p = jax.random.split(key)

    # Small input consistent with the module: batch=2, C=4, H=W=16 -> inp=1024.
    B, C, H, W = 2, 4, 16, 16
    inp = C * H * W
    x = jax.random.normal(k_x, (B, C, H, W), jnp.float32)

    params = init_vgg_classifier_params(k_p, inp)
    fp = prepare_params(params)

    # Per-generation tile choice: 1024-wide full-K w2 stripes on 128-MiB-VMEM chips
    # (v5e/v6e), 512-wide on v7x (64 MiB VMEM) so 2x double-buffered tiles still fit.
    vmem = _vmem_capacity_bytes()
    tn2 = 1024 if vmem >= (100 << 20) else 512
    tn1 = 1024

    fwd = jax.jit(functools.partial(vgg_classifier_forward, tn1=tn1, tn2=tn2))
    out = jax.block_until_ready(fwd(x, fp))
    assert out.shape == (B, 10), out.shape

    # Reference check in plain JAX (dropout identity in eval mode).
    xf = x.reshape(B, -1)
    ref = jnp.maximum(xf @ params["w1"].T + params["b1"], 0.0)
    ref = jnp.maximum(ref @ params["w2"].T + params["b2"], 0.0)
    ref = ref @ params["w3"].T + params["b3"]
    assert jnp.allclose(out, ref, atol=1e-3, rtol=1e-3), float(
        jnp.max(jnp.abs(out - ref))
    )

    print("KERNEL_OK")
</pallas_src>

<mosaic_0001>
module attributes {stable_mosaic.version = 11 : i64} {
  func.func @_fused_l2_l3_kernel(%arg0: i32, %arg1: memref<2x4096xf32, #tpu.memory_space<vmem>>, %arg2: memref<4096x512xf32, #tpu.memory_space<vmem>>, %arg3: memref<1x512xf32, #tpu.memory_space<vmem>>, %arg4: memref<512x10xf32, #tpu.memory_space<vmem>>, %arg5: memref<1x2x10xf32, #tpu.memory_space<vmem>>) attributes {dimension_semantics = [#tpu.dimension_semantics<parallel>], iteration_bounds = array<i64: 8>, scalar_prefetch = 0 : i64, scratch_operands = 0 : i64, tpu.core_type = #tpu.core_type<tc>, window_params = [{pipeline_mode = #tpu.pipeline_mode<synchronous>, transform_indices = @transform_0, window_bounds = array<i64: 2, 4096>}, {transform_indices = @transform_1, window_bounds = array<i64: 4096, 512>}, {transform_indices = @transform_2, window_bounds = array<i64: 1, 512>}, {transform_indices = @transform_3, window_bounds = array<i64: 512, 10>}, {transform_indices = @transform_4, window_bounds = array<i64: 1, 2, 10>}]} {
    %c0 = arith.constant 0 : index
    %c0_0 = arith.constant 0 : index
    %0 = vector.load %arg1[%c0, %c0_0] : memref<2x4096xf32, #tpu.memory_space<vmem>>, vector<2x4096xf32>
    %c0_1 = arith.constant 0 : index
    %c0_2 = arith.constant 0 : index
    %1 = vector.load %arg2[%c0_1, %c0_2] : memref<4096x512xf32, #tpu.memory_space<vmem>>, vector<4096x512xf32>
    %cst = arith.constant dense<0.000000e+00> : vector<2x512xf32>
    %2 = tpu.matmul %0, %1, %cst {dimension_numbers = #tpu.dot_dimension_numbers<[1], [0], [0], [1], [0, 0, 1, 1], [], []>} : vector<2x4096xf32>, vector<4096x512xf32>, vector<2x512xf32> -> vector<2x512xf32>
    %c0_3 = arith.constant 0 : index
    %c0_4 = arith.constant 0 : index
    %3 = vector.load %arg3[%c0_3, %c0_4] : memref<1x512xf32, #tpu.memory_space<vmem>>, vector<1x512xf32>
    %4 = vector.broadcast %3 : vector<1x512xf32> to vector<2x512xf32>
    %5 = arith.addf %2, %4 : vector<2x512xf32>
    %cst_5 = arith.constant 0.000000e+00 : f32
    %6 = vector.broadcast %cst_5 : f32 to vector<2x512xf32>
    %7 = arith.maximumf %5, %6 : vector<2x512xf32>
    %c0_6 = arith.constant 0 : index
    %c0_7 = arith.constant 0 : index
    %8 = vector.load %arg4[%c0_6, %c0_7] : memref<512x10xf32, #tpu.memory_space<vmem>>, vector<512x10xf32>
    %cst_8 = arith.constant dense<0.000000e+00> : vector<2x10xf32>
    %9 = tpu.matmul %7, %8, %cst_8 {dimension_numbers = #tpu.dot_dimension_numbers<[1], [0], [0], [1], [0, 0, 1, 1], [], []>} : vector<2x512xf32>, vector<512x10xf32>, vector<2x10xf32> -> vector<2x10xf32>
    %10 = vector.shape_cast %9 : vector<2x10xf32> to vector<1x2x10xf32>
    %c0_9 = arith.constant 0 : index
    %c0_10 = arith.constant 0 : index
    %c0_11 = arith.constant 0 : index
    %11 = vector.load %arg5[%c0_9, %c0_10, %c0_11] : memref<1x2x10xf32, #tpu.memory_space<vmem>>, vector<1x2x10xf32>
    tpu.vector_store %arg5[%c0_9, %c0_10, %c0_11], %10 {strides = array<i32>} : memref<1x2x10xf32, #tpu.memory_space<vmem>>, vector<1x2x10xf32>,
    return
  }
  func.func @transform_0(%arg0: i32) -> (i32, i32) {
    %c0_i32 = arith.constant 0 : i32
    %c0_i32_0 = arith.constant 0 : i32
    %c0_i32_1 = arith.constant 0 : i32
    return %c0_i32, %c0_i32_0 : i32, i32
  }
  func.func @transform_1(%arg0: i32) -> (i32, i32) {
    %c0_i32 = arith.constant 0 : i32
    %c0_i32_0 = arith.constant 0 : i32
    return %c0_i32, %arg0 : i32, i32
  }
  func.func @transform_2(%arg0: i32) -> (i32, i32) {
    %c0_i32 = arith.constant 0 : i32
    %c0_i32_0 = arith.constant 0 : i32
    return %c0_i32, %arg0 : i32, i32
  }
  func.func @transform_3(%arg0: i32) -> (i32, i32) {
    %c0_i32 = arith.constant 0 : i32
    %c0_i32_0 = arith.constant 0 : i32
    return %arg0, %c0_i32 : i32, i32
  }
  func.func @transform_4(%arg0: i32) -> (i32, i32, i32) {
    %c0_i32 = arith.constant 0 : i32
    %c0_i32_0 = arith.constant 0 : i32
    %c0_i32_1 = arith.constant 0 : i32
    return %arg0, %c0_i32, %c0_i32_0 : i32, i32, i32
  }
}

module attributes {stable_mosaic.version = 11 : i64} {
  func.func @_linear_relu_kernel(%arg0: i32, %arg1: memref<2x1024xf32, #tpu.memory_space<vmem>>, %arg2: memref<1024x1024xf32, #tpu.memory_space<vmem>>, %arg3: memref<1x1024xf32, #tpu.memory_space<vmem>>, %arg4: memref<2x1024xf32, #tpu.memory_space<vmem>>) attributes {dimension_semantics = [#tpu.dimension_semantics<parallel>], iteration_bounds = array<i64: 4>, scalar_prefetch = 0 : i64, scratch_operands = 0 : i64, tpu.core_type = #tpu.core_type<tc>, window_params = [{pipeline_mode = #tpu.pipeline_mode<synchronous>, transform_indices = @transform_0, window_bounds = array<i64: 2, 1024>}, {transform_indices = @transform_1, window_bounds = array<i64: 1024, 1024>}, {transform_indices = @transform_2, window_bounds = array<i64: 1, 1024>}, {transform_indices = @transform_3, window_bounds = array<i64: 2, 1024>}]} {
    %c0 = arith.constant 0 : index
    %c0_0 = arith.constant 0 : index
    %0 = vector.load %arg1[%c0, %c0_0] : memref<2x1024xf32, #tpu.memory_space<vmem>>, vector<2x1024xf32>
    %c0_1 = arith.constant 0 : index
    %c0_2 = arith.constant 0 : index
    %1 = vector.load %arg2[%c0_1, %c0_2] : memref<1024x1024xf32, #tpu.memory_space<vmem>>, vector<1024x1024xf32>
    %cst = arith.constant dense<0.000000e+00> : vector<2x1024xf32>
    %2 = tpu.matmul %0, %1, %cst {dimension_numbers = #tpu.dot_dimension_numbers<[1], [0], [0], [1], [0, 0, 1, 1], [], []>} : vector<2x1024xf32>, vector<1024x1024xf32>, vector<2x1024xf32> -> vector<2x1024xf32>
    %c0_3 = arith.constant 0 : index
    %c0_4 = arith.constant 0 : index
    %3 = vector.load %arg3[%c0_3, %c0_4] : memref<1x1024xf32, #tpu.memory_space<vmem>>, vector<1x1024xf32>
    %4 = vector.broadcast %3 : vector<1x1024xf32> to vector<2x1024xf32>
    %5 = arith.addf %2, %4 : vector<2x1024xf32>
    %cst_5 = arith.constant 0.000000e+00 : f32
    %6 = vector.broadcast %cst_5 : f32 to vector<2x1024xf32>
    %7 = arith.maximumf %5, %6 : vector<2x1024xf32>
    %c0_6 = arith.constant 0 : index
    %c0_7 = arith.constant 0 : index
    %8 = vector.load %arg4[%c0_6, %c0_7] : memref<2x1024xf32, #tpu.memory_space<vmem>>, vector<2x1024xf32>
    tpu.vector_store %arg4[%c0_6, %c0_7], %7 {strides = array<i32>} : memref<2x1024xf32, #tpu.memory_space<vmem>>, vector<2x1024xf32>,
    return
  }
  func.func @transform_0(%arg0: i32) -> (i32, i32) {
    %c0_i32 = arith.constant 0 : i32
    %c0_i32_0 = arith.constant 0 : i32
    %c0_i32_1 = arith.constant 0 : i32
    return %c0_i32, %c0_i32_0 : i32, i32
  }
  func.func @transform_1(%arg0: i32) -> (i32, i32) {
    %c0_i32 = arith.constant 0 : i32
    %c0_i32_0 = arith.constant 0 : i32
    return %c0_i32, %arg0 : i32, i32
  }
  func.func @transform_2(%arg0: i32) -> (i32, i32) {
    %c0_i32 = arith.constant 0 : i32
    %c0_i32_0 = arith.constant 0 : i32
    return %c0_i32, %arg0 : i32, i32
  }
  func.func @transform_3(%arg0: i32) -> (i32, i32) {
    %c0_i32 = arith.constant 0 : i32
    %c0_i32_0 = arith.constant 0 : i32
    return %c0_i32, %arg0 : i32, i32
  }
}

</mosaic_0001>

<bundles_post_ra>
// kernel: vgg_classifier_forward.2
= control target key start
LH: loop header
LB: loop body
LE: loop exit
PB: predicated region body
PF: predicated region fallthrough
CT: control target
= control target key end

     0   :  { %8 = vsyncpa [#allocation3], 0  ;;  %s4286_s0 = inlined_call_operand.vmem [shape: f32[2,1024], index: 0, kind: input, shape index: {}]   ;;  %s4287_s1 = inlined_call_operand.hbm [shape: f32[1024,4096], index: 1, kind: input, shape index: {}]   ;;  %s4288_s2 = inlined_call_operand.hbm [shape: f32[1,4096], index: 2, kind: input, shape index: {}]   ;;  %s4289_s3 = inlined_call_operand.vmem [shape: f32[2,4096], index: 3, kind: output, shape index: {}]  }
   0x1   :  { %10 = vsyncpa [#allocation3 + $0x1], 0 }
   0x2   :  { %11 = vsyncpa [#allocation5], 0 }
   0x3   :  { %13 = vsyncpa [#allocation5 + $0x1], 0  ;;  %s2917_s12 = smov 0   ;;  %s2919_s13 = smov 0  }
   0x4   :  { %s2921_s14 = smov 0   ;;  %s2923_s15 = smov 0  }
   0x5 LB: > { %s2705_s16 = sadd.s32 4294967295, %s2892_s15   ;;  %s2937_s17 = sadd.s32 1, %s2892_s15   ;;  %s2892_s15 = sphi %s2923_s15, %s4297_s15   ;;  %s2888_s14 = sphi %s2921_s14, %s4296_s14   ;;  %s2884_s13 = sphi %s2919_s13, %s4295_s13   ;;  %s2880_s12 = sphi %s2917_s12, %s4294_s12  }
   0x6   : > { %s44_s18 = ssub.s32 %s2892_s15, %s2937_s17  ;;  %s47_s19 = sadd.s32 1, %s2888_s14 }
   0x7   : > { %p45_p0 = scmp.eq.s32.totalorder %s44_s18, 0  ;;  %p54_p1 = scmp.ne.s32.totalorder %s2888_s14, %s2884_s13 }
   0x8   : > { %p55_p2 = scmp.eq.s32.totalorder %s2892_s15, 0  ;;  %p60_p3 = scmp.ne.s32.totalorder %s2884_s13, %s2880_s12 }
   0x9   : > { %s2947_s20 = scalar_select %p45_p0, %s2888_s14, %s47_s19  }
   0xa   : > { %p2949_p4 = por %p55_p2, %p54_p1  ;;  %p61_p5 = scmp.eq.s32.totalorder %s2705_s16, 0 }
   0xb   : > { %p2733_p6 = scmp.lt.s32.totalorder %s2892_s15, 4  ;;  %s2961_s23 = sand.u32 1, %s2888_s14  }
   0xc   : > { %p2956_p7 = por %p61_p5, %p60_p3  ;;  %s2709_s24 = sshll.u32 %s2961_s23, 13 }
   0xd   : > { %s2721_s25 = sshll.u32 %s2892_s15, 6  ;;  %s143_s29 = scalar_lea.vmem [#allocation2], %s2709_s24 }
   0xe   : > { %s148_s28 = scalar_lea.hbm %s4287_s1, %s2721_s25  ;;  %s151_s30 = sshll.u32 %s143_s29, 4  ;;  %s152_s30 = int_to_ptr.vmem [resolvable:$true] %s151_s30 }
   0xf   : > { %s149_s4 = sshll.u32 %s148_s28, 4  ;;  %p2970_p8 = pnand %p2733_p6, %p2949_p4  ;;  %s150_s4 = int_to_ptr.hbm [resolvable:$true] %s149_s4 }
  0x10   : > { %s140_s6 = scalar_lea.sflag [#allocation3], %s2961_s23  ;;  %s2794_s7 = sshra.s32 %s150_s4, 4  ;;  %s2795_s7 = int_to_ptr.hbm [resolvable:$true] %s2794_s7 }
  0x11   : > { %s2796_s8 = scalar_lea.hbm %s2795_s7, 8192  ;;  %p2798_p10 = pneg %p2970_p8 }
  0x12   : > { %p2797_p9 = scmp.ne.s32.totalorder %s2795_s7, %s2796_s8  ;;  %s2801_s11 = scalar_lea.hbm %s4287_s1, 32768 }
  0x13   : > { %p2802_p13 = scmp.lt.s32.totalorder %s2795_s7, %s4287_s1  ;;  %p2803_p0 = scmp.lt.s32.totalorder %s2801_s11, %s2796_s8 }
  0x14   : > { %p2799_p11 = pnand %p2798_p10, %p2797_p9 }
  0x15   : > { %p2804_p1 = por %p2803_p0, %p2802_p13 }
  0x16   : > { %p2800_p12 = pneg %p2799_p11 }
  0x18   : > { %p2805_p2 = pnand %p2804_p1, %p2800_p12 }
  0x1a   : > { %2808 = shalt.err (!%p2805_p2)
}
  0x1b   : > { %s2894_s19 = smov 4096   ;;  %s2895_s21 = smov 1024  }
  0x1c   : > { %s2896_s24 = smov 64   ;;  %p2714_p3 = scmp.ge.s32.totalorder %s2892_s15, 1 }
  0x1d   : > { %2729 = dma.hbm_to_vmem [thread:$0]  (!%p2970_p8), %s150_s4, 131072, %s152_s30, %s140_s6, %s2894_s19, %s2895_s21, %s2896_s24  }
  0x1e   : > { %p178_p4 = scmp.lt.s32.totalorder %s2892_s15, 5  ;;  %s2712_s25 = sshll.u32 %s2961_s23, 3 }
  0x1f   : > { %s2713_s27 = sshll.u32 %s2892_s15, 3  ;;  %s165_s28 = scalar_lea.vmem [#allocation4], %s2712_s25 }
  0x20   : > { %p2991_p5 = pnand %p2714_p3, %p178_p4  ;;  %s173_s29 = sshll.u32 %s165_s28, 4  ;;  %s174_s29 = int_to_ptr.vmem [resolvable:$true] %s173_s29 }
  0x21   : > { %s169_s9 = scalar_lea.hbm %s4288_s2, %s2713_s27  ;;  %s162_s11 = scalar_lea.sflag [#allocation5], %s2961_s23 }
  0x22   : > { %s171_s10 = sshll.u32 %s169_s9, 4  ;;  %s2831_s18 = scalar_lea.hbm %s4288_s2, 32  ;;  %s172_s10 = int_to_ptr.hbm [resolvable:$true] %s171_s10 }
  0x23   : > { %s2824_s30 = sshra.s32 %s172_s10, 4  ;;  %s2825_s30 = int_to_ptr.hbm [resolvable:$true] %s2824_s30 }
  0x24   : > { %s2826_s4 = scalar_lea.hbm %s2825_s30, 8  ;;  %p2832_p12 = scmp.lt.s32.totalorder %s2825_s30, %s4288_s2 }
  0x25   : > { %p2827_p6 = scmp.ne.s32.totalorder %s2825_s30, %s2826_s4  ;;  %p2833_p13 = scmp.lt.s32.totalorder %s2831_s18, %s2826_s4 }
  0x27   : > { %p2829_p9 = pnand %p2827_p6, %p2798_p10  ;;  %p2834_p0 = por %p2833_p13, %p2832_p12 }
  0x29   : > { %p2830_p11 = pneg %p2829_p9 }
  0x2b   : > { %p2835_p1 = pnand %p2834_p0, %p2830_p11 }
  0x2d   : > { %2838 = shalt.err (!%p2835_p1)
}
  0x2e   : > { %2732 = dma.hbm_to_vmem [thread:$0]  (!%p2970_p8), %s172_s10, 128, %s174_s29, %s162_s11  }
  0x2f   : > { %182 = sbr.rel (%p2991_p5) target bundleno = 898 (0x382), region = 32  ;;  %s184_s23 = sand.u32 (!%p2991_p5), 1, %s2884_s13  }
  0x30   : > { %s2715_s24 = sshll.u32 (!%p2991_p5), %s184_s23, 13  ;;  %s185_s25 = scalar_lea.sflag (!%p2991_p5), [#allocation3], %s184_s23 }
  0x31   : > { %s3014_s27 = scalar_lea.vmem (!%p2991_p5), [#allocation2], %s2715_s24 }
  0x34   : > { %2871 = dma.done.wait (%p2956_p7), %s185_s25, 131072  }
  0x35   : > { %2873 = vsyncadd (%p2956_p7), %s185_s25, 4294836224  ;;  %s2716_s28 = sshll.u32 %s184_s23, 3  ;;  %s195_s7 = scalar_lea.sflag [#allocation5], %s184_s23 }
  0x36   : > { %s3020_s5 = scalar_lea.vmem [#allocation4], %s2716_s28 }
  0x37   : > { %2875 = dma.done.wait (%p2956_p7), %s195_s7, 128  }
  0x38   : > { %2877 = vsyncadd (%p2956_p7), %s195_s7, 4294967168  ;;  %v613_v0 = vld [vmem:[%s3014_s27 + $0xbc0] sm:$0xff]  ;;  %s3936_s9 = sshll.u32 %s2705_s16, 3  ;;  %vm2602_vm0 = vcmask 1041408   ;;  %vm2604_vm1 = vcmask 1045508   ;;  %vm2606_vm2 = vcmask 1043456  }
  0x39   : > { %v357_v1 = vld [vmem:[%s3014_s27 + $0x3c0] sm:$0xff]  ;;  %1340 = vmatpush.msra.mxu2 %v613_v0  ;;  %p230_p7 = scmp.lt.s32.totalorder %s3936_s9, 31 }
  0x3a   : > { %v605_v2 = vld [vmem:[%s3014_s27 + $0xb80] sm:$0xff]  ;;  %1300 = vmatpush.msra.mxu0 %v357_v1 }
  0x3b   : > { %v741_v3 = vld [vmem:[%s3014_s27 + $0xfc0] sm:$0xff]  ;;  %1341 = vmatpush.msra.mxu2 %v605_v2  ;;  %s4299_s9 = smov (!%p230_p7, %s3936_s9), 31 }
  0x3c   : > { %v349_v4 = vld [vmem:[%s3014_s27 + $0x380] sm:$0xff]  ;;  %1360 = vmatpush.msra.mxu3 %v741_v3  ;;  %s2718_s15 = sshll.u32 %s4299_s9, 1 }
  0x3d   : > { %v485_v5 = vld [vmem:[%s3014_s27 + $0x7c0] sm:$0xff]  ;;  %1301 = vmatpush.msra.mxu0 %v349_v4  ;;  %s3983_s11 = scalar_lea.vmem %s4289_s3, %s2718_s15 }
  0x3e   : > { %1320 = vmatpush.msra.mxu1 %v485_v5  ;;  %v597_v6 = vld [vmem:[%s3014_s27 + $0xb40] sm:$0xff] }
  0x3f   : > { %v733_v7 = vld [vmem:[%s3014_s27 + $0xf80] sm:$0xff]  ;;  %1342 = vmatpush.msra.mxu2 %v597_v6 }
  0x40   : > { %v341_v8 = vld [vmem:[%s3014_s27 + $0x340] sm:$0xff]  ;;  %1361 = vmatpush.msra.mxu3 %v733_v7 }
  0x41   : > { %v477_v9 = vld [vmem:[%s3014_s27 + $0x780] sm:$0xff]  ;;  %1302 = vmatpush.msra.mxu0 %v341_v8 }
  0x42   : > { %v725_v10 = vld [vmem:[%s3014_s27 + $0xf40] sm:$0xff]  ;;  %1321 = vmatpush.msra.mxu1 %v477_v9 }
  0x43   : > { %v589_v11 = vld [vmem:[%s3014_s27 + $0xb00] sm:$0xff]  ;;  %1362 = vmatpush.msra.mxu3 %v725_v10 }
  0x44   : > { %v333_v12 = vld [vmem:[%s3014_s27 + $0x300] sm:$0xff]  ;;  %1343 = vmatpush.msra.mxu2 %v589_v11 }
  0x45   : > { %v469_v13 = vld [vmem:[%s3014_s27 + $0x740] sm:$0xff]  ;;  %1303 = vmatpush.msra.mxu0 %v333_v12 }
  0x46   : > { %v717_v14 = vld [vmem:[%s3014_s27 + $0xf00] sm:$0xff]  ;;  %1322 = vmatpush.msra.mxu1 %v469_v13 }
  0x47   : > { %v461_v15 = vld [vmem:[%s3014_s27 + $0x700] sm:$0xff]  ;;  %1363 = vmatpush.msra.mxu3 %v717_v14 }
  0x48   : > { %v581_v16 = vld [vmem:[%s3014_s27 + $0xac0] sm:$0xff]  ;;  %1323 = vmatpush.msra.mxu1 %v461_v15 }
  0x49   : > { %v325_v17 = vld [vmem:[%s3014_s27 + $0x2c0] sm:$0xff]  ;;  %1344 = vmatpush.msra.mxu2 %v581_v16 }
  0x4a   : > { %v709_v18 = vld [vmem:[%s3014_s27 + $0xec0] sm:$0xff]  ;;  %1304 = vmatpush.msra.mxu0 %v325_v17 }
  0x4b   : > { %v453_v19 = vld [vmem:[%s3014_s27 + $0x6c0] sm:$0xff]  ;;  %1364 = vmatpush.msra.mxu3 %v709_v18 }
  0x4c   : > { %v573_v20 = vld [vmem:[%s3014_s27 + $0xa80] sm:$0xff]  ;;  %1324 = vmatpush.msra.mxu1 %v453_v19 }
  0x4d   : > { %v317_v21 = vld [vmem:[%s3014_s27 + $0x280] sm:$0xff]  ;;  %1345 = vmatpush.msra.mxu2 %v573_v20 }
  0x4e   : > { %v701_v22 = vld [vmem:[%s3014_s27 + $0xe80] sm:$0xff]  ;;  %1305 = vmatpush.msra.mxu0 %v317_v21 }
  0x4f   : > { %v445_v23 = vld [vmem:[%s3014_s27 + $0x680] sm:$0xff]  ;;  %1365 = vmatpush.msra.mxu3 %v701_v22 }
  0x50   : > { %v565_v24 = vld [vmem:[%s3014_s27 + $0xa40] sm:$0xff]  ;;  %1325 = vmatpush.msra.mxu1 %v445_v23 }
  0x51   : > { %v309_v25 = vld [vmem:[%s3014_s27 + $0x240] sm:$0xff]  ;;  %1346 = vmatpush.msra.mxu2 %v565_v24  ;;  %v235_v24 = vld [vmem:[%s4286_s0] sm:$0xff] }
  0x52   : > { %v693_v26 = vld [vmem:[%s3014_s27 + $0xe40] sm:$0xff]  ;;  %1306 = vmatpush.msra.mxu0 %v309_v25  ;;  %1281 = vst [vmem:[#allocation1] ss:$4 sm:$0xff] %v235_v24 }
  0x53   : > { %v437_v27 = vld [vmem:[%s3014_s27 + $0x640] sm:$0xff]  ;;  %1366 = vmatpush.msra.mxu3 %v693_v26 }
  0x54   : > { %v557_v28 = vld [vmem:[%s3014_s27 + $0xa00] sm:$0xff]  ;;  %1326 = vmatpush.msra.mxu1 %v437_v27 }
  0x55   : > { %v301_v29 = vld [vmem:[%s3014_s27 + $0x200] sm:$0xff]  ;;  %1347 = vmatpush.msra.mxu2 %v557_v28 }
  0x56   : > { %v685_v30 = vld [vmem:[%s3014_s27 + $0xe00] sm:$0xff]  ;;  %1307 = vmatpush.msra.mxu0 %v301_v29 }
  0x57   : > { %v429_v31 = vld [vmem:[%s3014_s27 + $0x600] sm:$0xff]  ;;  %1367 = vmatpush.msra.mxu3 %v685_v30 }
  0x58   : > { %v549_v32 = vld [vmem:[%s3014_s27 + $0x9c0] sm:$0xff]  ;;  %1327 = vmatpush.msra.mxu1 %v429_v31 }
  0x59   : > { %v293_v33 = vld [vmem:[%s3014_s27 + $0x1c0] sm:$0xff]  ;;  %1348 = vmatpush.msra.mxu2 %v549_v32 }
  0x5a   : > { %v677_v34 = vld [vmem:[%s3014_s27 + $0xdc0] sm:$0xff]  ;;  %1308 = vmatpush.msra.mxu0 %v293_v33 }
  0x5b   : > { %v421_v35 = vld [vmem:[%s3014_s27 + $0x5c0] sm:$0xff]  ;;  %1368 = vmatpush.msra.mxu3 %v677_v34 }
  0x5c   : > { %v541_v36 = vld [vmem:[%s3014_s27 + $0x980] sm:$0xff]  ;;  %1328 = vmatpush.msra.mxu1 %v421_v35 }
  0x5d   : > { %v285_v37 = vld [vmem:[%s3014_s27 + $0x180] sm:$0xff]  ;;  %1349 = vmatpush.msra.mxu2 %v541_v36 }
  0x5e   : > { %v669_v38 = vld [vmem:[%s3014_s27 + $0xd80] sm:$0xff]  ;;  %1309 = vmatpush.msra.mxu0 %v285_v37 }
  0x5f   : > { %v413_v39 = vld [vmem:[%s3014_s27 + $0x580] sm:$0xff]  ;;  %1369 = vmatpush.msra.mxu3 %v669_v38 }
  0x60   : > { %v533_v40 = vld [vmem:[%s3014_s27 + $0x940] sm:$0xff]  ;;  %1329 = vmatpush.msra.mxu1 %v413_v39 }
  0x61   : > { %v277_v41 = vld [vmem:[%s3014_s27 + $0x140] sm:$0xff]  ;;  %1350 = vmatpush.msra.mxu2 %v533_v40 }
  0x62   : > { %v661_v42 = vld [vmem:[%s3014_s27 + $0xd40] sm:$0xff]  ;;  %1310 = vmatpush.msra.mxu0 %v277_v41 }
  0x63   : > { %v405_v43 = vld [vmem:[%s3014_s27 + $0x540] sm:$0xff]  ;;  %1370 = vmatpush.msra.mxu3 %v661_v42 }
  0x64   : > { %v525_v44 = vld [vmem:[%s3014_s27 + $0x900] sm:$0xff]  ;;  %1330 = vmatpush.msra.mxu1 %v405_v43 }
  0x65   : > { %v269_v45 = vld [vmem:[%s3014_s27 + $0x100] sm:$0xff]  ;;  %1351 = vmatpush.msra.mxu2 %v525_v44 }
  0x66   : > { %v653_v46 = vld [vmem:[%s3014_s27 + $0xd00] sm:$0xff]  ;;  %1311 = vmatpush.msra.mxu0 %v269_v45 }
  0x67   : > { %v397_v47 = vld [vmem:[%s3014_s27 + $0x500] sm:$0xff]  ;;  %1371 = vmatpush.msra.mxu3 %v653_v46 }
  0x68   : > { %v517_v48 = vld [vmem:[%s3014_s27 + $0x8c0] sm:$0xff]  ;;  %1331 = vmatpush.msra.mxu1 %v397_v47 }
  0x69   : > { %v261_v49 = vld [vmem:[%s3014_s27 + $0xc0] sm:$0xff]  ;;  %1352 = vmatpush.msra.mxu2 %v517_v48 }
  0x6a   : > { %v645_v50 = vld [vmem:[%s3014_s27 + $0xcc0] sm:$0xff]  ;;  %1312 = vmatpush.msra.mxu0 %v261_v49 }
  0x6b   : > { %v389_v51 = vld [vmem:[%s3014_s27 + $0x4c0] sm:$0xff]  ;;  %1372 = vmatpush.msra.mxu3 %v645_v50 }
  0x6c   : > { %v509_v52 = vld [vmem:[%s3014_s27 + $0x880] sm:$0xff]  ;;  %1332 = vmatpush.msra.mxu1 %v389_v51 }
  0x6d   : > { %v253_v53 = vld [vmem:[%s3014_s27 + $0x80] sm:$0xff]  ;;  %1353 = vmatpush.msra.mxu2 %v509_v52 }
  0x6e   : > { %v637_v54 = vld [vmem:[%s3014_s27 + $0xc80] sm:$0xff]  ;;  %1313 = vmatpush.msra.mxu0 %v253_v53 }
  0x6f   : > { %v381_v55 = vld [vmem:[%s3014_s27 + $0x480] sm:$0xff]  ;;  %1373 = vmatpush.msra.mxu3 %v637_v54 }
  0x70   : > { %v501_v56 = vld [vmem:[%s3014_s27 + $0x840] sm:$0xff]  ;;  %1333 = vmatpush.msra.mxu1 %v381_v55 }
  0x71   : > { %v245_v57 = vld [vmem:[%s3014_s27 + $0x40] sm:$0xff]  ;;  %1354 = vmatpush.msra.mxu2 %v501_v56 }
  0x72   : > { %v629_v58 = vld [vmem:[%s3014_s27 + $0xc40] sm:$0xff]  ;;  %1314 = vmatpush.msra.mxu0 %v245_v57 }
  0x73   : > { %v373_v59 = vld [vmem:[%s3014_s27 + $0x440] sm:$0xff]  ;;  %1374 = vmatpush.msra.mxu3 %v629_v58 }
  0x74   : > { %v493_v60 = vld [vmem:[%s3014_s27 + $0x800] sm:$0xff]  ;;  %1334 = vmatpush.msra.mxu1 %v373_v59 }
  0x75   : > { %v237_v61 = vld [vmem:[%s3014_s27] sm:$0xff]  ;;  %1355 = vmatpush.msra.mxu2 %v493_v60 }
  0x76   : > { %v1125_v62 = vld [vmem:[%s3014_s27 + $0x1bc0] sm:$0xff]  ;;  %1315 = vmatpush.msra.mxu0 %v237_v61 }
  0x77   : > { %v621_v63 = vld [vmem:[%s3014_s27 + $0xc00] sm:$0xff]  ;;  %1420 = vmatpush.msrb.mxu2 %v1125_v62  ;;  %v3156_v62 = vld.sshfl [vmem:[#allocation1 + $0x10] sm:$0xff pattern:$0x73625140] }
  0x78   : > { %v869_v0 = vld [vmem:[%s3014_s27 + $0x13c0] sm:$0xff]  ;;  %1375 = vmatpush.msra.mxu3 %v621_v63  ;;  %1356 = vmatmul.f32.vlgmr.msra.gmra.mxu2 %v3156_v62 }
  0x79   : > { %v1253_v1 = vld [vmem:[%s3014_s27 + $0x1fc0] sm:$0xff]  ;;  %1380 = vmatpush.msrb.mxu0 %v869_v0  ;;  %v614_v0 = vld [vmem:[%s3014_s27 + $0xbc8] sm:$0xff] }
  0x7a   : > { %v1117_v2 = vld [vmem:[%s3014_s27 + $0x1b80] sm:$0xff]  ;;  %1440 = vmatpush.msrb.mxu3 %v1253_v1 }
  0x7b   : > { %v365_v3 = vld [vmem:[%s3014_s27 + $0x400] sm:$0xff]  ;;  %1421 = vmatpush.msrb.mxu2 %v1117_v2 }
  0x7c   : > { %v861_v4 = vld [vmem:[%s3014_s27 + $0x1380] sm:$0xff]  ;;  %1335 = vmatpush.msra.mxu1 %v365_v3  ;;  %v3162_v3 = vld.sshfl [vmem:[#allocation1] sm:$0xff pattern:$0x73625140] }
  0x7d   : > { %v997_v5 = vld [vmem:[%s3014_s27 + $0x17c0] sm:$0xff]  ;;  %1381 = vmatpush.msrb.mxu0 %v861_v4  ;;  %v3165_v4 = vld.sshfl [vmem:[#allocation1 + $0x18] sm:$0xff pattern:$0x73625140] }
  0x7e   : > { %v1109_v6 = vld [vmem:[%s3014_s27 + $0x1b40] sm:$0xff]  ;;  %1400 = vmatpush.msrb.mxu1 %v997_v5  ;;  %v358_v5 = vld [vmem:[%s3014_s27 + $0x3c8] sm:$0xff]  ;;  %1316 = vmatmul.f32.vlgmr.msra.gmra.mxu0 %v3162_v3 }
  0x7f   : > { %v1245_v7 = vld [vmem:[%s3014_s27 + $0x1f80] sm:$0xff]  ;;  %1422 = vmatpush.msrb.mxu2 %v1109_v6  ;;  %v606_v6 = vld [vmem:[%s3014_s27 + $0xb88] sm:$0xff]  ;;  %1376 = vmatmul.f32.vlgmr.msra.gmra.mxu3 %v3165_v4 }
  0x80   : > { %v853_v8 = vld [vmem:[%s3014_s27 + $0x1340] sm:$0xff]  ;;  %1441 = vmatpush.msrb.mxu3 %v1245_v7  ;;  %v742_v7 = vld [vmem:[%s3014_s27 + $0xfc8] sm:$0xff] }
  0x81   : > { %v989_v9 = vld [vmem:[%s3014_s27 + $0x1780] sm:$0xff]  ;;  %1382 = vmatpush.msrb.mxu0 %v853_v8 }
  0x82   : > { %v1101_v10 = vld [vmem:[%s3014_s27 + $0x1b00] sm:$0xff]  ;;  %1401 = vmatpush.msrb.mxu1 %v989_v9  ;;  %v350_v9 = vld [vmem:[%s3014_s27 + $0x388] sm:$0xff] }
  0x83   : > { %v1237_v11 = vld [vmem:[%s3014_s27 + $0x1f40] sm:$0xff]  ;;  %1423 = vmatpush.msrb.mxu2 %v1101_v10 }
  0x84   : > { %v845_v12 = vld [vmem:[%s3014_s27 + $0x1300] sm:$0xff]  ;;  %1442 = vmatpush.msrb.mxu3 %v1237_v11  ;;  %v598_v11 = vld [vmem:[%s3014_s27 + $0xb48] sm:$0xff] }
  0x85   : > { %v981_v13 = vld [vmem:[%s3014_s27 + $0x1740] sm:$0xff]  ;;  %1383 = vmatpush.msrb.mxu0 %v845_v12  ;;  %v486_v12 = vld [vmem:[%s3014_s27 + $0x7c8] sm:$0xff] }
  0x86   : > { %v1093_v14 = vld [vmem:[%s3014_s27 + $0x1ac0] sm:$0xff]  ;;  %1402 = vmatpush.msrb.mxu1 %v981_v13  ;;  %v734_v13 = vld [vmem:[%s3014_s27 + $0xf88] sm:$0xff] }
  0x87   : > { %v1229_v15 = vld [vmem:[%s3014_s27 + $0x1f00] sm:$0xff]  ;;  %1424 = vmatpush.msrb.mxu2 %v1093_v14  ;;  %v342_v14 = vld [vmem:[%s3014_s27 + $0x348] sm:$0xff] }
  0x88   : > { %v837_v16 = vld [vmem:[%s3014_s27 + $0x12c0] sm:$0xff]  ;;  %1443 = vmatpush.msrb.mxu3 %v1229_v15  ;;  %v590_v15 = vld [vmem:[%s3014_s27 + $0xb08] sm:$0xff] }
  0x89   : > { %v973_v17 = vld [vmem:[%s3014_s27 + $0x1700] sm:$0xff]  ;;  %1384 = vmatpush.msrb.mxu0 %v837_v16  ;;  %v478_v16 = vld [vmem:[%s3014_s27 + $0x788] sm:$0xff] }
  0x8a   : > { %v1085_v18 = vld [vmem:[%s3014_s27 + $0x1a80] sm:$0xff]  ;;  %1403 = vmatpush.msrb.mxu1 %v973_v17  ;;  %v726_v17 = vld [vmem:[%s3014_s27 + $0xf48] sm:$0xff] }
  0x8b   : > { %v1221_v19 = vld [vmem:[%s3014_s27 + $0x1ec0] sm:$0xff]  ;;  %1425 = vmatpush.msrb.mxu2 %v1085_v18 }
  0x8c   : > { %v829_v20 = vld [vmem:[%s3014_s27 + $0x1280] sm:$0xff]  ;;  %1444 = vmatpush.msrb.mxu3 %v1221_v19  ;;  %v334_v19 = vld [vmem:[%s3014_s27 + $0x308] sm:$0xff] }
  0x8d   : > { %v965_v21 = vld [vmem:[%s3014_s27 + $0x16c0] sm:$0xff]  ;;  %1385 = vmatpush.msrb.mxu0 %v829_v20  ;;  %v470_v20 = vld [vmem:[%s3014_s27 + $0x748] sm:$0xff] }
  0x8e   : > { %v1077_v22 = vld [vmem:[%s3014_s27 + $0x1a40] sm:$0xff]  ;;  %1404 = vmatpush.msrb.mxu1 %v965_v21  ;;  %v582_v21 = vld [vmem:[%s3014_s27 + $0xac8] sm:$0xff] }
  0x8f   : > { %v1213_v23 = vld [vmem:[%s3014_s27 + $0x1e80] sm:$0xff]  ;;  %1426 = vmatpush.msrb.mxu2 %v1077_v22  ;;  %v718_v22 = vld [vmem:[%s3014_s27 + $0xf08] sm:$0xff] }
  0x90   : > { %v821_v25 = vld [vmem:[%s3014_s27 + $0x1240] sm:$0xff]  ;;  %1445 = vmatpush.msrb.mxu3 %v1213_v23 }
  0x91   : > { %v957_v26 = vld [vmem:[%s3014_s27 + $0x1680] sm:$0xff]  ;;  %1386 = vmatpush.msrb.mxu0 %v821_v25  ;;  %v326_v25 = vld [vmem:[%s3014_s27 + $0x2c8] sm:$0xff] }
  0x92   : > { %v1069_v27 = vld [vmem:[%s3014_s27 + $0x1a00] sm:$0xff]  ;;  %1405 = vmatpush.msrb.mxu1 %v957_v26  ;;  %v462_v26 = vld [vmem:[%s3014_s27 + $0x708] sm:$0xff] }
  0x93   : > { %v1205_v28 = vld [vmem:[%s3014_s27 + $0x1e40] sm:$0xff]  ;;  %1427 = vmatpush.msrb.mxu2 %v1069_v27  ;;  %v574_v27 = vld [vmem:[%s3014_s27 + $0xa88] sm:$0xff] }
  0x94   : > { %v813_v29 = vld [vmem:[%s3014_s27 + $0x1200] sm:$0xff]  ;;  %1446 = vmatpush.msrb.mxu3 %v1205_v28  ;;  %v710_v28 = vld [vmem:[%s3014_s27 + $0xec8] sm:$0xff] }
  0x95   : > { %v949_v30 = vld [vmem:[%s3014_s27 + $0x1640] sm:$0xff]  ;;  %1387 = vmatpush.msrb.mxu0 %v813_v29 }
  0x96   : > { %v1061_v31 = vld [vmem:[%s3014_s27 + $0x19c0] sm:$0xff]  ;;  %1406 = vmatpush.msrb.mxu1 %v949_v30  ;;  %v318_v30 = vld [vmem:[%s3014_s27 + $0x288] sm:$0xff] }
  0x97   : > { %v1197_v32 = vld [vmem:[%s3014_s27 + $0x1e00] sm:$0xff]  ;;  %1428 = vmatpush.msrb.mxu2 %v1061_v31  ;;  %v454_v31 = vld [vmem:[%s3014_s27 + $0x6c8] sm:$0xff] }
  0x98   : > { %v805_v33 = vld [vmem:[%s3014_s27 + $0x11c0] sm:$0xff]  ;;  %1447 = vmatpush.msrb.mxu3 %v1197_v32  ;;  %v566_v32 = vld [vmem:[%s3014_s27 + $0xa48] sm:$0xff] }
  0x99   : > { %v941_v34 = vld [vmem:[%s3014_s27 + $0x1600] sm:$0xff]  ;;  %1388 = vmatpush.msrb.mxu0 %v805_v33  ;;  %v702_v33 = vld [vmem:[%s3014_s27 + $0xe88] sm:$0xff] }
  0x9a   : > { %v1053_v35 = vld [vmem:[%s3014_s27 + $0x1980] sm:$0xff]  ;;  %1407 = vmatpush.msrb.mxu1 %v941_v34  ;;  %v310_v34 = vld [vmem:[%s3014_s27 + $0x248] sm:$0xff] }
  0x9b   : > { %v1189_v36 = vld [vmem:[%s3014_s27 + $0x1dc0] sm:$0xff]  ;;  %1429 = vmatpush.msrb.mxu2 %v1053_v35  ;;  %v446_v35 = vld [vmem:[%s3014_s27 + $0x688] sm:$0xff] }
  0x9c   : > { %v236_v37 = vld [vmem:[%s4286_s0 + $0x8] sm:$0xff]  ;;  %1448 = vmatpush.msrb.mxu3 %v1189_v36  ;;  %v558_v36 = vld [vmem:[%s3014_s27 + $0xa08] sm:$0xff] }
  0x9d   : > { %v797_v38 = vld [vmem:[%s3014_s27 + $0x1180] sm:$0xff]  ;;  %1283 = vst [vmem:[#allocation1 + $0x20] ss:$4 sm:$0xff] %v236_v37  ;;  %v694_v37 = vld [vmem:[%s3014_s27 + $0xe48] sm:$0xff] }
  0x9e   : > { %v933_v39 = vld [vmem:[%s3014_s27 + $0x15c0] sm:$0xff]  ;;  %1389 = vmatpush.msrb.mxu0 %v797_v38  ;;  %v302_v38 = vld [vmem:[%s3014_s27 + $0x208] sm:$0xff] }
  0x9f   : > { %v1045_v40 = vld [vmem:[%s3014_s27 + $0x1940] sm:$0xff]  ;;  %1408 = vmatpush.msrb.mxu1 %v933_v39  ;;  %v438_v39 = vld [vmem:[%s3014_s27 + $0x648] sm:$0xff] }
  0xa0   : > { %v1181_v41 = vld [vmem:[%s3014_s27 + $0x1d80] sm:$0xff]  ;;  %1430 = vmatpush.msrb.mxu2 %v1045_v40  ;;  %v550_v40 = vld [vmem:[%s3014_s27 + $0x9c8] sm:$0xff] }
  0xa1   : > { %v789_v42 = vld [vmem:[%s3014_s27 + $0x1140] sm:$0xff]  ;;  %1449 = vmatpush.msrb.mxu3 %v1181_v41  ;;  %v686_v41 = vld [vmem:[%s3014_s27 + $0xe08] sm:$0xff] }
  0xa2   : > { %v925_v43 = vld [vmem:[%s3014_s27 + $0x1580] sm:$0xff]  ;;  %1390 = vmatpush.msrb.mxu0 %v789_v42  ;;  %v294_v42 = vld [vmem:[%s3014_s27 + $0x1c8] sm:$0xff] }
  0xa3   : > { %v1037_v44 = vld [vmem:[%s3014_s27 + $0x1900] sm:$0xff]  ;;  %1409 = vmatpush.msrb.mxu1 %v925_v43  ;;  %v430_v43 = vld [vmem:[%s3014_s27 + $0x608] sm:$0xff] }
  0xa4   : > { %v1173_v45 = vld [vmem:[%s3014_s27 + $0x1d40] sm:$0xff]  ;;  %1431 = vmatpush.msrb.mxu2 %v1037_v44  ;;  %v3184_v18 = vld.sshfl [vmem:[#allocation1 + $0x30] sm:$0xff pattern:$0x73625140] }
  0xa5   : > { %v781_v46 = vld [vmem:[%s3014_s27 + $0x1100] sm:$0xff]  ;;  %1450 = vmatpush.msrb.mxu3 %v1173_v45  ;;  %v3190_v23 = vld.sshfl [vmem:[#allocation1 + $0x20] sm:$0xff pattern:$0x73625140]  ;;  %v542_v44 = vld [vmem:[%s3014_s27 + $0x988] sm:$0xff] }
  0xa6   : > { %v917_v47 = vld [vmem:[%s3014_s27 + $0x1540] sm:$0xff]  ;;  %1391 = vmatpush.msrb.mxu0 %v781_v46  ;;  %v3193_v24 = vld.sshfl [vmem:[#allocation1 + $0x38] sm:$0xff pattern:$0x73625140]  ;;  %v678_v45 = vld [vmem:[%s3014_s27 + $0xdc8] sm:$0xff] }
  0xa7   : > { %v1029_v48 = vld [vmem:[%s3014_s27 + $0x18c0] sm:$0xff]  ;;  %1410 = vmatpush.msrb.mxu1 %v917_v47  ;;  %v286_v46 = vld [vmem:[%s3014_s27 + $0x188] sm:$0xff] }
  0xa8   : > { %v1165_v49 = vld [vmem:[%s3014_s27 + $0x1d00] sm:$0xff]  ;;  %1432 = vmatpush.msrb.mxu2 %v1029_v48  ;;  %v422_v47 = vld [vmem:[%s3014_s27 + $0x5c8] sm:$0xff] }
  0xa9   : > { %v773_v50 = vld [vmem:[%s3014_s27 + $0x10c0] sm:$0xff]  ;;  %1451 = vmatpush.msrb.mxu3 %v1165_v49  ;;  %v534_v48 = vld [vmem:[%s3014_s27 + $0x948] sm:$0xff] }
  0xaa   : > { %v909_v51 = vld [vmem:[%s3014_s27 + $0x1500] sm:$0xff]  ;;  %1392 = vmatpush.msrb.mxu0 %v773_v50  ;;  %v670_v49 = vld [vmem:[%s3014_s27 + $0xd88] sm:$0xff] }
  0xab   : > { %v1021_v52 = vld [vmem:[%s3014_s27 + $0x1880] sm:$0xff]  ;;  %1411 = vmatpush.msrb.mxu1 %v909_v51  ;;  %v278_v50 = vld [vmem:[%s3014_s27 + $0x148] sm:$0xff] }
  0xac   : > { %v1157_v53 = vld [vmem:[%s3014_s27 + $0x1cc0] sm:$0xff]  ;;  %1433 = vmatpush.msrb.mxu2 %v1021_v52  ;;  %v414_v51 = vld [vmem:[%s3014_s27 + $0x588] sm:$0xff] }
  0xad   : > { %v765_v54 = vld [vmem:[%s3014_s27 + $0x1080] sm:$0xff]  ;;  %1452 = vmatpush.msrb.mxu3 %v1157_v53  ;;  %v526_v52 = vld [vmem:[%s3014_s27 + $0x908] sm:$0xff] }
  0xae   : > { %v901_v55 = vld [vmem:[%s3014_s27 + $0x14c0] sm:$0xff]  ;;  %1393 = vmatpush.msrb.mxu0 %v765_v54  ;;  %v662_v53 = vld [vmem:[%s3014_s27 + $0xd48] sm:$0xff] }
  0xaf   : > { %v1013_v56 = vld [vmem:[%s3014_s27 + $0x1840] sm:$0xff]  ;;  %1412 = vmatpush.msrb.mxu1 %v901_v55  ;;  %v270_v54 = vld [vmem:[%s3014_s27 + $0x108] sm:$0xff] }
  0xb0   : > { %v1149_v57 = vld [vmem:[%s3014_s27 + $0x1c80] sm:$0xff]  ;;  %1434 = vmatpush.msrb.mxu2 %v1013_v56  ;;  %v406_v55 = vld [vmem:[%s3014_s27 + $0x548] sm:$0xff] }
  0xb1   : > { %v757_v58 = vld [vmem:[%s3014_s27 + $0x1040] sm:$0xff]  ;;  %1453 = vmatpush.msrb.mxu3 %v1149_v57  ;;  %v518_v56 = vld [vmem:[%s3014_s27 + $0x8c8] sm:$0xff] }
  0xb2   : > { %v893_v59 = vld [vmem:[%s3014_s27 + $0x1480] sm:$0xff]  ;;  %1394 = vmatpush.msrb.mxu0 %v757_v58  ;;  %v654_v57 = vld [vmem:[%s3014_s27 + $0xd08] sm:$0xff] }
  0xb3   : > { %v1005_v60 = vld [vmem:[%s3014_s27 + $0x1800] sm:$0xff]  ;;  %1413 = vmatpush.msrb.mxu1 %v893_v59  ;;  %v262_v58 = vld [vmem:[%s3014_s27 + $0xc8] sm:$0xff] }
  0xb4   : > { %v1141_v61 = vld [vmem:[%s3014_s27 + $0x1c40] sm:$0xff]  ;;  %1435 = vmatpush.msrb.mxu2 %v1005_v60  ;;  %v398_v59 = vld [vmem:[%s3014_s27 + $0x508] sm:$0xff] }
  0xb5   : > { %v749_v63 = vld [vmem:[%s3014_s27 + $0x1000] sm:$0xff]  ;;  %1454 = vmatpush.msrb.mxu3 %v1141_v61  ;;  %1436 = vmatmul.f32.vlgmr.msrb.gmra.mxu2 %v3184_v18  ;;  %v510_v60 = vld [vmem:[%s3014_s27 + $0x888] sm:$0xff] }
  0xb6   : > { %v885_v1 = vld [vmem:[%s3014_s27 + $0x1440] sm:$0xff]  ;;  %1395 = vmatpush.msrb.mxu0 %v749_v63  ;;  %1500 = vmatpush.msra.mxu2 %v614_v0  ;;  %v646_v61 = vld [vmem:[%s3014_s27 + $0xcc8] sm:$0xff] }
  0xb7   : > { %v1133_v2 = vld [vmem:[%s3014_s27 + $0x1c00] sm:$0xff]  ;;  %1414 = vmatpush.msrb.mxu1 %v885_v1  ;;  %1396 = vmatmul.f32.vlgmr.msrb.gmra.mxu0 %v3190_v23  ;;  %v254_v63 = vld [vmem:[%s3014_s27 + $0x88] sm:$0xff] }
  0xb8   : > { %1455 = vmatpush.msrb.mxu3 %v1133_v2  ;;  %v877_v8 = vld [vmem:[%s3014_s27 + $0x1400] sm:$0xff]  ;;  %1460 = vmatpush.msra.mxu0 %v358_v5  ;;  %v390_v0 = vld [vmem:[%s3014_s27 + $0x4c8] sm:$0xff] }
  0xb9   : > { %v3174_v10 = vld.sshfl [vmem:[#allocation1 + $0x8] sm:$0xff pattern:$0x73625140]  ;;  %1501 = vmatpush.msra.mxu2 %v606_v6  ;;  %1415 = vmatpush.msrb.mxu1 %v877_v8  ;;  %v502_v1 = vld [vmem:[%s3014_s27 + $0x848] sm:$0xff] }
  0xba   : > { %1520 = vmatpush.msra.mxu3 %v742_v7  ;;  %1461 = vmatpush.msra.mxu0 %v350_v9  ;;  %v3200_v29 = vld.sshfl [vmem:[#allocation1 + $0x28] sm:$0xff pattern:$0x73625140]  ;;  %v638_v2 = vld [vmem:[%s3014_s27 + $0xc88] sm:$0xff] }
  0xbb   : > { %1336 = vmatmul.f32.vlgmr.msra.gmra.mxu1 %v3174_v10  ;;  %1502 = vmatpush.msra.mxu2 %v598_v11  ;;  %v246_v5 = vld [vmem:[%s3014_s27 + $0x48] sm:$0xff] }
  0xbc   : > { %1480 = vmatpush.msra.mxu1 %v486_v12  ;;  %1521 = vmatpush.msra.mxu3 %v734_v13  ;;  %v382_v6 = vld [vmem:[%s3014_s27 + $0x488] sm:$0xff] }
  0xbd   : > { %1462 = vmatpush.msra.mxu0 %v342_v14  ;;  %1503 = vmatpush.msra.mxu2 %v590_v15  ;;  %v494_v7 = vld [vmem:[%s3014_s27 + $0x808] sm:$0xff] }
  0xbe   : > { %1481 = vmatpush.msra.mxu1 %v478_v16  ;;  %1522 = vmatpush.msra.mxu3 %v726_v17  ;;  %v630_v8 = vld [vmem:[%s3014_s27 + $0xc48] sm:$0xff] }
  0xbf   : > { %1463 = vmatpush.msra.mxu0 %v334_v19  ;;  %1504 = vmatpush.msra.mxu2 %v582_v21  ;;  %v1126_v9 = vld [vmem:[%s3014_s27 + $0x1bc8] sm:$0xff] }
  0xc0   : > { %1482 = vmatpush.msra.mxu1 %v470_v20  ;;  %1523 = vmatpush.msra.mxu3 %v718_v22  ;;  %v238_v11 = vld [vmem:[%s3014_s27 + $0x8] sm:$0xff] }
  0xc1   : > { %1456 = vmatmul.f32.vlgmr.msrb.gmra.mxu3 %v3193_v24  ;;  %1464 = vmatpush.msra.mxu0 %v326_v25  ;;  %v374_v12 = vld [vmem:[%s3014_s27 + $0x448] sm:$0xff] }
  0xc2   : > { %1483 = vmatpush.msra.mxu1 %v462_v26  ;;  %1505 = vmatpush.msra.mxu2 %v574_v27  ;;  %v622_v13 = vld [vmem:[%s3014_s27 + $0xc08] sm:$0xff] }
  0xc3   : > { %1524 = vmatpush.msra.mxu3 %v710_v28  ;;  %1416 = vmatmul.f32.vlgmr.msrb.gmra.mxu1 %v3200_v29  ;;  %v870_v14 = vld [vmem:[%s3014_s27 + $0x13c8] sm:$0xff] }
  0xc4   : > { %1465 = vmatpush.msra.mxu0 %v318_v30  ;;  %1484 = vmatpush.msra.mxu1 %v454_v31  ;;  %v1118_v15 = vld [vmem:[%s3014_s27 + $0x1b88] sm:$0xff] }
  0xc5   : > { %1506 = vmatpush.msra.mxu2 %v566_v32  ;;  %1525 = vmatpush.msra.mxu3 %v702_v33  ;;  %v1254_v16 = vld [vmem:[%s3014_s27 + $0x1fc8] sm:$0xff] }
  0xc6   : > { %1466 = vmatpush.msra.mxu0 %v310_v34  ;;  %1485 = vmatpush.msra.mxu1 %v446_v35  ;;  %v366_v17 = vld [vmem:[%s3014_s27 + $0x408] sm:$0xff] }
  0xc7   : > { %1507 = vmatpush.msra.mxu2 %v558_v36  ;;  %1526 = vmatpush.msra.mxu3 %v694_v37  ;;  %v862_v19 = vld [vmem:[%s3014_s27 + $0x1388] sm:$0xff] }
  0xc8   : > { %1467 = vmatpush.msra.mxu0 %v302_v38  ;;  %1486 = vmatpush.msra.mxu1 %v438_v39  ;;  %v998_v20 = vld [vmem:[%s3014_s27 + $0x17c8] sm:$0xff] }
  0xc9   : > { %1508 = vmatpush.msra.mxu2 %v550_v40  ;;  %1527 = vmatpush.msra.mxu3 %v686_v41  ;;  %v1110_v21 = vld [vmem:[%s3014_s27 + $0x1b48] sm:$0xff] }
  0xca   : > { %1468 = vmatpush.msra.mxu0 %v294_v42  ;;  %1487 = vmatpush.msra.mxu1 %v430_v43  ;;  %v1246_v22 = vld [vmem:[%s3014_s27 + $0x1f88] sm:$0xff] }
  0xcb   : > { %1509 = vmatpush.msra.mxu2 %v542_v44  ;;  %1528 = vmatpush.msra.mxu3 %v678_v45  ;;  %v854_v25 = vld [vmem:[%s3014_s27 + $0x1348] sm:$0xff] }
  0xcc   : > { %1469 = vmatpush.msra.mxu0 %v286_v46  ;;  %1488 = vmatpush.msra.mxu1 %v422_v47  ;;  %v990_v26 = vld [vmem:[%s3014_s27 + $0x1788] sm:$0xff] }
  0xcd   : > { %1510 = vmatpush.msra.mxu2 %v534_v48  ;;  %1529 = vmatpush.msra.mxu3 %v670_v49  ;;  %v1102_v27 = vld [vmem:[%s3014_s27 + $0x1b08] sm:$0xff] }
  0xce   : > { %1470 = vmatpush.msra.mxu0 %v278_v50  ;;  %1489 = vmatpush.msra.mxu1 %v414_v51  ;;  %v1238_v28 = vld [vmem:[%s3014_s27 + $0x1f48] sm:$0xff] }
  0xcf   : > { %1511 = vmatpush.msra.mxu2 %v526_v52  ;;  %1530 = vmatpush.msra.mxu3 %v662_v53  ;;  %v846_v30 = vld [vmem:[%s3014_s27 + $0x1308] sm:$0xff] }
  0xd0   : > { %1471 = vmatpush.msra.mxu0 %v270_v54  ;;  %1490 = vmatpush.msra.mxu1 %v406_v55  ;;  %v982_v31 = vld [vmem:[%s3014_s27 + $0x1748] sm:$0xff] }
  0xd1   : > { %1512 = vmatpush.msra.mxu2 %v518_v56  ;;  %1531 = vmatpush.msra.mxu3 %v654_v57  ;;  %v1094_v32 = vld [vmem:[%s3014_s27 + $0x1ac8] sm:$0xff] }
  0xd2   : > { %1472 = vmatpush.msra.mxu0 %v262_v58  ;;  %1491 = vmatpush.msra.mxu1 %v398_v59  ;;  %v1230_v33 = vld [vmem:[%s3014_s27 + $0x1f08] sm:$0xff] }
  0xd3   : > { %1513 = vmatpush.msra.mxu2 %v510_v60  ;;  %1532 = vmatpush.msra.mxu3 %v646_v61  ;;  %v838_v34 = vld [vmem:[%s3014_s27 + $0x12c8] sm:$0xff] }
  0xd4   : > { %1473 = vmatpush.msra.mxu0 %v254_v63  ;;  %1492 = vmatpush.msra.mxu1 %v390_v0  ;;  %v974_v35 = vld [vmem:[%s3014_s27 + $0x1708] sm:$0xff] }
  0xd5   : > { %1514 = vmatpush.msra.mxu2 %v502_v1  ;;  %1533 = vmatpush.msra.mxu3 %v638_v2  ;;  %v1086_v36 = vld [vmem:[%s3014_s27 + $0x1a88] sm:$0xff] }
  0xd6   : > { %1474 = vmatpush.msra.mxu0 %v246_v5  ;;  %1493 = vmatpush.msra.mxu1 %v382_v6  ;;  %v1222_v37 = vld [vmem:[%s3014_s27 + $0x1ec8] sm:$0xff] }
  0xd7   : > { %1515 = vmatpush.msra.mxu2 %v494_v7  ;;  %1534 = vmatpush.msra.mxu3 %v630_v8  ;;  %v830_v38 = vld [vmem:[%s3014_s27 + $0x1288] sm:$0xff] }
  0xd8   : > { %1475 = vmatpush.msra.mxu0 %v238_v11  ;;  %1494 = vmatpush.msra.mxu1 %v374_v12  ;;  %v966_v39 = vld [vmem:[%s3014_s27 + $0x16c8] sm:$0xff] }
  0xd9   : > { %1580 = vmatpush.msrb.mxu2 %v1126_v9  ;;  %1535 = vmatpush.msra.mxu3 %v622_v13  ;;  %v1078_v40 = vld [vmem:[%s3014_s27 + $0x1a48] sm:$0xff] }
  0xda   : > { %1540 = vmatpush.msrb.mxu0 %v870_v14  ;;  %1495 = vmatpush.msra.mxu1 %v366_v17  ;;  %v1214_v41 = vld [vmem:[%s3014_s27 + $0x1e88] sm:$0xff] }
  0xdb   : > { %1581 = vmatpush.msrb.mxu2 %v1118_v15  ;;  %1600 = vmatpush.msrb.mxu3 %v1254_v16  ;;  %v822_v42 = vld [vmem:[%s3014_s27 + $0x1248] sm:$0xff]  ;;  %v615_v16 = vld [vmem:[%s3014_s27 + $0xbd0] sm:$0xff] }
  0xdc   : > { %1541 = vmatpush.msrb.mxu0 %v862_v19  ;;  %1560 = vmatpush.msrb.mxu1 %v998_v20  ;;  %v958_v43 = vld [vmem:[%s3014_s27 + $0x1688] sm:$0xff]  ;;  %v359_v19 = vld [vmem:[%s3014_s27 + $0x3d0] sm:$0xff] }
  0xdd   : > { %1582 = vmatpush.msrb.mxu2 %v1110_v21  ;;  %1601 = vmatpush.msrb.mxu3 %v1246_v22  ;;  %v1070_v44 = vld [vmem:[%s3014_s27 + $0x1a08] sm:$0xff]  ;;  %v607_v20 = vld [vmem:[%s3014_s27 + $0xb90] sm:$0xff] }
  0xde   : > { %1542 = vmatpush.msrb.mxu0 %v854_v25  ;;  %1561 = vmatpush.msrb.mxu1 %v990_v26  ;;  %v1206_v45 = vld [vmem:[%s3014_s27 + $0x1e48] sm:$0xff]  ;;  %v743_v21 = vld [vmem:[%s3014_s27 + $0xfd0] sm:$0xff] }
  0xdf   : > { %1583 = vmatpush.msrb.mxu2 %v1102_v27  ;;  %1602 = vmatpush.msrb.mxu3 %v1238_v28  ;;  %v814_v46 = vld [vmem:[%s3014_s27 + $0x1208] sm:$0xff]  ;;  %v351_v25 = vld [vmem:[%s3014_s27 + $0x390] sm:$0xff] }
  0xe0   : > { %1543 = vmatpush.msrb.mxu0 %v846_v30  ;;  %1562 = vmatpush.msrb.mxu1 %v982_v31  ;;  %v950_v47 = vld [vmem:[%s3014_s27 + $0x1648] sm:$0xff]  ;;  %v487_v26 = vld [vmem:[%s3014_s27 + $0x7d0] sm:$0xff] }
  0xe1   : > { %1584 = vmatpush.msrb.mxu2 %v1094_v32  ;;  %1603 = vmatpush.msrb.mxu3 %v1230_v33  ;;  %v1062_v48 = vld [vmem:[%s3014_s27 + $0x19c8] sm:$0xff]  ;;  %v735_v27 = vld [vmem:[%s3014_s27 + $0xf90] sm:$0xff] }
  0xe2   : > { %1544 = vmatpush.msrb.mxu0 %v838_v34  ;;  %1563 = vmatpush.msrb.mxu1 %v974_v35  ;;  %v1198_v49 = vld [vmem:[%s3014_s27 + $0x1e08] sm:$0xff]  ;;  %v343_v28 = vld [vmem:[%s3014_s27 + $0x350] sm:$0xff] }
  0xe3   : > { %1585 = vmatpush.msrb.mxu2 %v1086_v36  ;;  %1604 = vmatpush.msrb.mxu3 %v1222_v37  ;;  %v806_v50 = vld [vmem:[%s3014_s27 + $0x11c8] sm:$0xff]  ;;  %v727_v30 = vld [vmem:[%s3014_s27 + $0xf50] sm:$0xff] }
  0xe4   : > { %1545 = vmatpush.msrb.mxu0 %v830_v38  ;;  %1564 = vmatpush.msrb.mxu1 %v966_v39  ;;  %v942_v51 = vld [vmem:[%s3014_s27 + $0x1608] sm:$0xff]  ;;  %v335_v31 = vld [vmem:[%s3014_s27 + $0x310] sm:$0xff] }
  0xe5   : > { %1586 = vmatpush.msrb.mxu2 %v1078_v40  ;;  %1605 = vmatpush.msrb.mxu3 %v1214_v41  ;;  %v1054_v52 = vld [vmem:[%s3014_s27 + $0x1988] sm:$0xff]  ;;  %v583_v32 = vld [vmem:[%s3014_s27 + $0xad0] sm:$0xff] }
  0xe6   : > { %1546 = vmatpush.msrb.mxu0 %v822_v42  ;;  %1565 = vmatpush.msrb.mxu1 %v958_v43  ;;  %v1190_v53 = vld [vmem:[%s3014_s27 + $0x1dc8] sm:$0xff]  ;;  %v471_v33 = vld [vmem:[%s3014_s27 + $0x750] sm:$0xff] }
  0xe7   : > { %1587 = vmatpush.msrb.mxu2 %v1070_v44  ;;  %1606 = vmatpush.msrb.mxu3 %v1206_v45  ;;  %v798_v54 = vld [vmem:[%s3014_s27 + $0x1188] sm:$0xff]  ;;  %v719_v34 = vld [vmem:[%s3014_s27 + $0xf10] sm:$0xff] }
  0xe8   : > { %1547 = vmatpush.msrb.mxu0 %v814_v46  ;;  %1566 = vmatpush.msrb.mxu1 %v950_v47  ;;  %v934_v55 = vld [vmem:[%s3014_s27 + $0x15c8] sm:$0xff]  ;;  %v575_v35 = vld [vmem:[%s3014_s27 + $0xa90] sm:$0xff] }
  0xe9   : > { %1588 = vmatpush.msrb.mxu2 %v1062_v48  ;;  %1607 = vmatpush.msrb.mxu3 %v1198_v49  ;;  %v1046_v56 = vld [vmem:[%s3014_s27 + $0x1948] sm:$0xff]  ;;  %v463_v36 = vld [vmem:[%s3014_s27 + $0x710] sm:$0xff] }
  0xea   : > { %1548 = vmatpush.msrb.mxu0 %v806_v50  ;;  %1567 = vmatpush.msrb.mxu1 %v942_v51  ;;  %v1182_v57 = vld [vmem:[%s3014_s27 + $0x1d88] sm:$0xff]  ;;  %v711_v37 = vld [vmem:[%s3014_s27 + $0xed0] sm:$0xff] }
  0xeb   : > { %1589 = vmatpush.msrb.mxu2 %v1054_v52  ;;  %1608 = vmatpush.msrb.mxu3 %v1190_v53  ;;  %v790_v58 = vld [vmem:[%s3014_s27 + $0x1148] sm:$0xff]  ;;  %v319_v38 = vld [vmem:[%s3014_s27 + $0x290] sm:$0xff] }
  0xec   : > { %v926_v59 = vld [vmem:[%s3014_s27 + $0x1588] sm:$0xff]  ;;  %1549 = vmatpush.msrb.mxu0 %v798_v54  ;;  %1568 = vmatpush.msrb.mxu1 %v934_v55  ;;  %v567_v39 = vld [vmem:[%s3014_s27 + $0xa50] sm:$0xff] }
  0xed   : > { %v1038_v60 = vld [vmem:[%s3014_s27 + $0x1908] sm:$0xff]  ;;  %1590 = vmatpush.msrb.mxu2 %v1046_v56  ;;  %1609 = vmatpush.msrb.mxu3 %v1182_v57  ;;  %v455_v40 = vld [vmem:[%s3014_s27 + $0x6d0] sm:$0xff] }
  0xee   : > { %v1174_v61 = vld [vmem:[%s3014_s27 + $0x1d48] sm:$0xff]  ;;  %1550 = vmatpush.msrb.mxu0 %v790_v58  ;;  %1569 = vmatpush.msrb.mxu1 %v926_v59  ;;  %v703_v41 = vld [vmem:[%s3014_s27 + $0xe90] sm:$0xff] }
  0xef   : > { %v782_v63 = vld [vmem:[%s3014_s27 + $0x1108] sm:$0xff]  ;;  %1591 = vmatpush.msrb.mxu2 %v1038_v60  ;;  %1610 = vmatpush.msrb.mxu3 %v1174_v61  ;;  %v311_v42 = vld [vmem:[%s3014_s27 + $0x250] sm:$0xff] }
  0xf0   : > { %v918_v0 = vld [vmem:[%s3014_s27 + $0x1548] sm:$0xff]  ;;  %1516 = vmatmul.f32.vlgmr.msra.gmra.mxu2 %v3156_v62  ;;  %1551 = vmatpush.msrb.mxu0 %v782_v63  ;;  %v559_v43 = vld [vmem:[%s3014_s27 + $0xa10] sm:$0xff] }
  0xf1   : > { %v1030_v1 = vld [vmem:[%s3014_s27 + $0x18c8] sm:$0xff]  ;;  %1570 = vmatpush.msrb.mxu1 %v918_v0  ;;  %1476 = vmatmul.f32.vlgmr.msra.gmra.mxu0 %v3162_v3  ;;  %v447_v44 = vld [vmem:[%s3014_s27 + $0x690] sm:$0xff] }
  0xf2   : > { %v1166_v2 = vld [vmem:[%s3014_s27 + $0x1d08] sm:$0xff]  ;;  %1592 = vmatpush.msrb.mxu2 %v1030_v1  ;;  %1536 = vmatmul.f32.vlgmr.msra.gmra.mxu3 %v3165_v4  ;;  %v695_v45 = vld [vmem:[%s3014_s27 + $0xe50] sm:$0xff] }
  0xf3   : > { %v774_v5 = vld [vmem:[%s3014_s27 + $0x10c8] sm:$0xff]  ;;  %1611 = vmatpush.msrb.mxu3 %v1166_v2  ;;  %1496 = vmatmul.f32.vlgmr.msra.gmra.mxu1 %v3174_v10  ;;  %v303_v46 = vld [vmem:[%s3014_s27 + $0x210] sm:$0xff] }
  0xf4   : > { %v910_v6 = vld [vmem:[%s3014_s27 + $0x1508] sm:$0xff]  ;;  %1552 = vmatpush.msrb.mxu0 %v774_v5  ;;  %v551_v47 = vld [vmem:[%s3014_s27 + $0x9d0] sm:$0xff] }
  0xf5   : > { %v1022_v7 = vld [vmem:[%s3014_s27 + $0x1888] sm:$0xff]  ;;  %1571 = vmatpush.msrb.mxu1 %v910_v6  ;;  %v439_v48 = vld [vmem:[%s3014_s27 + $0x650] sm:$0xff] }
  0xf6   : > { %v1158_v8 = vld [vmem:[%s3014_s27 + $0x1cc8] sm:$0xff]  ;;  %1593 = vmatpush.msrb.mxu2 %v1022_v7  ;;  %v687_v49 = vld [vmem:[%s3014_s27 + $0xe10] sm:$0xff] }
  0xf7   : > { %v766_v62 = vld [vmem:[%s3014_s27 + $0x1088] sm:$0xff]  ;;  %1612 = vmatpush.msrb.mxu3 %v1158_v8  ;;  %v295_v50 = vld [vmem:[%s3014_s27 + $0x1d0] sm:$0xff] }
  0xf8   : > { %v902_v9 = vld [vmem:[%s3014_s27 + $0x14c8] sm:$0xff]  ;;  %1553 = vmatpush.msrb.mxu0 %v766_v62  ;;  %v543_v51 = vld [vmem:[%s3014_s27 + $0x990] sm:$0xff] }
  0xf9   : > { %v1014_v11 = vld [vmem:[%s3014_s27 + $0x1848] sm:$0xff]  ;;  %1572 = vmatpush.msrb.mxu1 %v902_v9  ;;  %v431_v52 = vld [vmem:[%s3014_s27 + $0x610] sm:$0xff] }
  0xfa   : > { %v1150_v12 = vld [vmem:[%s3014_s27 + $0x1c88] sm:$0xff]  ;;  %1594 = vmatpush.msrb.mxu2 %v1014_v11  ;;  %v679_v53 = vld [vmem:[%s3014_s27 + $0xdd0] sm:$0xff] }
  0xfb   : > { %v758_v3 = vld [vmem:[%s3014_s27 + $0x1048] sm:$0xff]  ;;  %1613 = vmatpush.msrb.mxu3 %v1150_v12  ;;  %v287_v54 = vld [vmem:[%s3014_s27 + $0x190] sm:$0xff] }
  0xfc   : > { %v894_v13 = vld [vmem:[%s3014_s27 + $0x1488] sm:$0xff]  ;;  %1554 = vmatpush.msrb.mxu0 %v758_v3  ;;  %v535_v55 = vld [vmem:[%s3014_s27 + $0x950] sm:$0xff] }
  0xfd   : > { %v1006_v4 = vld [vmem:[%s3014_s27 + $0x1808] sm:$0xff]  ;;  %1573 = vmatpush.msrb.mxu1 %v894_v13  ;;  %v423_v56 = vld [vmem:[%s3014_s27 + $0x5d0] sm:$0xff] }
  0xfe   : > { %v1142_v14 = vld [vmem:[%s3014_s27 + $0x1c48] sm:$0xff]  ;;  %1595 = vmatpush.msrb.mxu2 %v1006_v4  ;;  %v671_v57 = vld [vmem:[%s3014_s27 + $0xd90] sm:$0xff] }
  0xff   : > { %v750_v15 = vld [vmem:[%s3014_s27 + $0x1008] sm:$0xff]  ;;  %1614 = vmatpush.msrb.mxu3 %v1142_v14  ;;  %1596 = vmatmul.f32.vlgmr.msrb.gmra.mxu2 %v3184_v18  ;;  %v599_v18 = vld [vmem:[%s3014_s27 + $0xb50] sm:$0xff] }
 0x100   : > { %v886_v17 = vld [vmem:[%s3014_s27 + $0x1448] sm:$0xff]  ;;  %1555 = vmatpush.msrb.mxu0 %v750_v15  ;;  %1660 = vmatpush.msra.mxu2 %v615_v16  ;;  %v279_v58 = vld [vmem:[%s3014_s27 + $0x150] sm:$0xff] }
 0x101   : > { %v1134_v10 = vld [vmem:[%s3014_s27 + $0x1c08] sm:$0xff]  ;;  %1574 = vmatpush.msrb.mxu1 %v886_v17  ;;  %1556 = vmatmul.f32.vlgmr.msrb.gmra.mxu0 %v3190_v23  ;;  %v591_v23 = vld [vmem:[%s3014_s27 + $0xb10] sm:$0xff] }
 0x102   : > { %1615 = vmatpush.msrb.mxu3 %v1134_v10  ;;  %v878_v22 = vld [vmem:[%s3014_s27 + $0x1408] sm:$0xff]  ;;  %1620 = vmatpush.msra.mxu0 %v359_v19  ;;  %v527_v59 = vld [vmem:[%s3014_s27 + $0x910] sm:$0xff] }
 0x103   : > { %1616 = vmatmul.f32.vlgmr.msrb.gmra.mxu3 %v3193_v24  ;;  %1661 = vmatpush.msra.mxu2 %v607_v20  ;;  %v479_v24 = vld [vmem:[%s3014_s27 + $0x790] sm:$0xff] }
 0x104   : > { %1680 = vmatpush.msra.mxu3 %v743_v21  ;;  %1575 = vmatpush.msrb.mxu1 %v878_v22  ;;  %v415_v60 = vld [vmem:[%s3014_s27 + $0x590] sm:$0xff] }
 0x105   : > { %1621 = vmatpush.msra.mxu0 %v351_v25  ;;  %1576 = vmatmul.f32.vlgmr.msrb.gmra.mxu1 %v3200_v29  ;;  %v327_v29 = vld [vmem:[%s3014_s27 + $0x2d0] sm:$0xff] }
 0x106   : > { %1662 = vmatpush.msra.mxu2 %v599_v18  ;;  %1640 = vmatpush.msra.mxu1 %v487_v26  ;;  %v663_v61 = vld [vmem:[%s3014_s27 + $0xd50] sm:$0xff] }
 0x107   : > { %1681 = vmatpush.msra.mxu3 %v735_v27  ;;  %1622 = vmatpush.msra.mxu0 %v343_v28  ;;  %v271_v63 = vld [vmem:[%s3014_s27 + $0x110] sm:$0xff] }
 0x108   : > { %1663 = vmatpush.msra.mxu2 %v591_v23  ;;  %1641 = vmatpush.msra.mxu1 %v479_v24  ;;  %v519_v0 = vld [vmem:[%s3014_s27 + $0x8d0] sm:$0xff] }
 0x109   : > { %1682 = vmatpush.msra.mxu3 %v727_v30  ;;  %1623 = vmatpush.msra.mxu0 %v335_v31  ;;  %v407_v1 = vld [vmem:[%s3014_s27 + $0x550] sm:$0xff] }
 0x10a   : > { %1664 = vmatpush.msra.mxu2 %v583_v32  ;;  %1642 = vmatpush.msra.mxu1 %v471_v33  ;;  %v655_v2 = vld [vmem:[%s3014_s27 + $0xd10] sm:$0xff] }
 0x10b   : > { %1683 = vmatpush.msra.mxu3 %v719_v34  ;;  %1624 = vmatpush.msra.mxu0 %v327_v29  ;;  %v263_v5 = vld [vmem:[%s3014_s27 + $0xd0] sm:$0xff] }
 0x10c   : > { %1665 = vmatpush.msra.mxu2 %v575_v35  ;;  %1643 = vmatpush.msra.mxu1 %v463_v36  ;;  %v511_v6 = vld [vmem:[%s3014_s27 + $0x890] sm:$0xff] }
 0x10d   : > { %1684 = vmatpush.msra.mxu3 %v711_v37  ;;  %1625 = vmatpush.msra.mxu0 %v319_v38  ;;  %v399_v7 = vld [vmem:[%s3014_s27 + $0x510] sm:$0xff] }
 0x10e   : > { %1666 = vmatpush.msra.mxu2 %v567_v39  ;;  %1644 = vmatpush.msra.mxu1 %v455_v40  ;;  %v647_v8 = vld [vmem:[%s3014_s27 + $0xcd0] sm:$0xff] }
 0x10f   : > { %1685 = vmatpush.msra.mxu3 %v703_v41  ;;  %1626 = vmatpush.msra.mxu0 %v311_v42  ;;  %v255_v62 = vld [vmem:[%s3014_s27 + $0x90] sm:$0xff] }
 0x110   : > { %1667 = vmatpush.msra.mxu2 %v559_v43  ;;  %1645 = vmatpush.msra.mxu1 %v447_v44  ;;  %v503_v9 = vld [vmem:[%s3014_s27 + $0x850] sm:$0xff] }
 0x111   : > { %1686 = vmatpush.msra.mxu3 %v695_v45  ;;  %1627 = vmatpush.msra.mxu0 %v303_v46  ;;  %v391_v11 = vld [vmem:[%s3014_s27 + $0x4d0] sm:$0xff] }
 0x112   : > { %1668 = vmatpush.msra.mxu2 %v551_v47  ;;  %1646 = vmatpush.msra.mxu1 %v439_v48  ;;  %v639_v12 = vld [vmem:[%s3014_s27 + $0xc90] sm:$0xff] }
 0x113   : > { %1687 = vmatpush.msra.mxu3 %v687_v49  ;;  %1628 = vmatpush.msra.mxu0 %v295_v50  ;;  %v247_v3 = vld [vmem:[%s3014_s27 + $0x50] sm:$0xff] }
 0x114   : > { %1669 = vmatpush.msra.mxu2 %v543_v51  ;;  %1647 = vmatpush.msra.mxu1 %v431_v52  ;;  %v495_v13 = vld [vmem:[%s3014_s27 + $0x810] sm:$0xff] }
 0x115   : > { %1688 = vmatpush.msra.mxu3 %v679_v53  ;;  %1629 = vmatpush.msra.mxu0 %v287_v54  ;;  %v383_v4 = vld [vmem:[%s3014_s27 + $0x490] sm:$0xff] }
 0x116   : > { %1670 = vmatpush.msra.mxu2 %v535_v55  ;;  %1648 = vmatpush.msra.mxu1 %v423_v56  ;;  %v631_v14 = vld [vmem:[%s3014_s27 + $0xc50] sm:$0xff] }
 0x117   : > { %1689 = vmatpush.msra.mxu3 %v671_v57  ;;  %1630 = vmatpush.msra.mxu0 %v279_v58  ;;  %v1127_v15 = vld [vmem:[%s3014_s27 + $0x1bd0] sm:$0xff] }
 0x118   : > { %1671 = vmatpush.msra.mxu2 %v527_v59  ;;  %1649 = vmatpush.msra.mxu1 %v415_v60  ;;  %v239_v16 = vld [vmem:[%s3014_s27 + $0x10] sm:$0xff] }
 0x119   : > { %1690 = vmatpush.msra.mxu3 %v663_v61  ;;  %1631 = vmatpush.msra.mxu0 %v271_v63  ;;  %v375_v17 = vld [vmem:[%s3014_s27 + $0x450] sm:$0xff] }
 0x11a   : > { %1672 = vmatpush.msra.mxu2 %v519_v0  ;;  %1650 = vmatpush.msra.mxu1 %v407_v1  ;;  %v623_v10 = vld [vmem:[%s3014_s27 + $0xc10] sm:$0xff] }
 0x11b   : > { %1691 = vmatpush.msra.mxu3 %v655_v2  ;;  %1632 = vmatpush.msra.mxu0 %v263_v5  ;;  %v871_v19 = vld [vmem:[%s3014_s27 + $0x13d0] sm:$0xff] }
 0x11c   : > { %1673 = vmatpush.msra.mxu2 %v511_v6  ;;  %1651 = vmatpush.msra.mxu1 %v399_v7  ;;  %v1119_v20 = vld [vmem:[%s3014_s27 + $0x1b90] sm:$0xff] }
 0x11d   : > { %1692 = vmatpush.msra.mxu3 %v647_v8  ;;  %1633 = vmatpush.msra.mxu0 %v255_v62  ;;  %v1255_v21 = vld [vmem:[%s3014_s27 + $0x1fd0] sm:$0xff] }
 0x11e   : > { %1674 = vmatpush.msra.mxu2 %v503_v9  ;;  %1652 = vmatpush.msra.mxu1 %v391_v11  ;;  %v367_v22 = vld [vmem:[%s3014_s27 + $0x410] sm:$0xff] }
 0x11f   : > { %1693 = vmatpush.msra.mxu3 %v639_v12  ;;  %1634 = vmatpush.msra.mxu0 %v247_v3  ;;  %v863_v25 = vld [vmem:[%s3014_s27 + $0x1390] sm:$0xff] }
 0x120   : > { %1675 = vmatpush.msra.mxu2 %v495_v13  ;;  %1653 = vmatpush.msra.mxu1 %v383_v4  ;;  %v999_v18 = vld [vmem:[%s3014_s27 + $0x17d0] sm:$0xff] }
 0x121   : > { %1694 = vmatpush.msra.mxu3 %v631_v14  ;;  %1635 = vmatpush.msra.mxu0 %v239_v16  ;;  %v1111_v26 = vld [vmem:[%s3014_s27 + $0x1b50] sm:$0xff]  ;;  %v616_v16 = vld [vmem:[%s3014_s27 + $0xbd8] sm:$0xff] }
 0x122   : > { %1740 = vmatpush.msrb.mxu2 %v1127_v15  ;;  %1654 = vmatpush.msra.mxu1 %v375_v17  ;;  %v1247_v27 = vld [vmem:[%s3014_s27 + $0x1f90] sm:$0xff] }
 0x123   : > { %1695 = vmatpush.msra.mxu3 %v623_v10  ;;  %1700 = vmatpush.msrb.mxu0 %v871_v19  ;;  %v855_v28 = vld [vmem:[%s3014_s27 + $0x1350] sm:$0xff]  ;;  %v3448_v19 = vld.sshfl [vmem:[#allocation1 + $0x10] sm:$0xff pattern:$0x73625140] }
 0x124   : > { %1741 = vmatpush.msrb.mxu2 %v1119_v20  ;;  %1655 = vmatpush.msra.mxu1 %v367_v22  ;;  %v991_v23 = vld [vmem:[%s3014_s27 + $0x1790] sm:$0xff]  ;;  %v360_v20 = vld [vmem:[%s3014_s27 + $0x3d8] sm:$0xff] }
 0x125   : > { %1760 = vmatpush.msrb.mxu3 %v1255_v21  ;;  %1701 = vmatpush.msrb.mxu0 %v863_v25  ;;  %v1103_v24 = vld [vmem:[%s3014_s27 + $0x1b10] sm:$0xff]  ;;  %v608_v21 = vld [vmem:[%s3014_s27 + $0xb98] sm:$0xff] }
 0x126   : > { %1720 = vmatpush.msrb.mxu1 %v999_v18  ;;  %v1239_v30 = vld [vmem:[%s3014_s27 + $0x1f50] sm:$0xff]  ;;  %1742 = vmatpush.msrb.mxu2 %v1111_v26  ;;  %v744_v22 = vld [vmem:[%s3014_s27 + $0xfd8] sm:$0xff] }
 0x127   : > { %1761 = vmatpush.msrb.mxu3 %v1247_v27  ;;  %v847_v31 = vld [vmem:[%s3014_s27 + $0x1310] sm:$0xff]  ;;  %1702 = vmatpush.msrb.mxu0 %v855_v28  ;;  %v3454_v25 = vld.sshfl [vmem:[#allocation1] sm:$0xff pattern:$0x73625140] }
 0x128   : > { %v983_v32 = vld [vmem:[%s3014_s27 + $0x1750] sm:$0xff]  ;;  %1721 = vmatpush.msrb.mxu1 %v991_v23  ;;  %1743 = vmatpush.msrb.mxu2 %v1103_v24  ;;  %v352_v26 = vld [vmem:[%s3014_s27 + $0x398] sm:$0xff] }
 0x129   : > { %v1095_v33 = vld [vmem:[%s3014_s27 + $0x1ad0] sm:$0xff]  ;;  %1762 = vmatpush.msrb.mxu3 %v1239_v30  ;;  %1703 = vmatpush.msrb.mxu0 %v847_v31  ;;  %v600_v28 = vld [vmem:[%s3014_s27 + $0xb58] sm:$0xff] }
 0x12a   : > { %v1231_v34 = vld [vmem:[%s3014_s27 + $0x1f10] sm:$0xff]  ;;  %1722 = vmatpush.msrb.mxu1 %v983_v32  ;;  %1744 = vmatpush.msrb.mxu2 %v1095_v33  ;;  %v488_v23 = vld [vmem:[%s3014_s27 + $0x7d8] sm:$0xff]  ;;  %v3467_v32 = vld.sshfl [vmem:[#allocation1 + $0x8] sm:$0xff pattern:$0x73625140] }
 0x12b   : > { %v839_v29 = vld [vmem:[%s3014_s27 + $0x12d0] sm:$0xff]  ;;  %1763 = vmatpush.msrb.mxu3 %v1231_v34  ;;  %1676 = vmatmul.f32.vlgmr.msra.gmra.mxu2 %v3448_v19  ;;  %v736_v24 = vld [vmem:[%s3014_s27 + $0xf98] sm:$0xff] }
 0x12c   : > { %v975_v35 = vld [vmem:[%s3014_s27 + $0x1710] sm:$0xff]  ;;  %1704 = vmatpush.msrb.mxu0 %v839_v29  ;;  %v344_v30 = vld [vmem:[%s3014_s27 + $0x358] sm:$0xff]  ;;  %1656 = vmatmul.f32.vlgmr.msra.gmra.mxu1 %v3467_v32 }
 0x12d   : > { %v1087_v36 = vld [vmem:[%s3014_s27 + $0x1a90] sm:$0xff]  ;;  %1723 = vmatpush.msrb.mxu1 %v975_v35  ;;  %1636 = vmatmul.f32.vlgmr.msra.gmra.mxu0 %v3454_v25  ;;  %v592_v31 = vld [vmem:[%s3014_s27 + $0xb18] sm:$0xff] }
 0x12e   : > { %v1223_v37 = vld [vmem:[%s3014_s27 + $0x1ed0] sm:$0xff]  ;;  %1745 = vmatpush.msrb.mxu2 %v1087_v36  ;;  %v480_v33 = vld [vmem:[%s3014_s27 + $0x798] sm:$0xff] }
 0x12f   : > { %v831_v38 = vld [vmem:[%s3014_s27 + $0x1290] sm:$0xff]  ;;  %1764 = vmatpush.msrb.mxu3 %v1223_v37  ;;  %v728_v34 = vld [vmem:[%s3014_s27 + $0xf58] sm:$0xff] }
 0x130   : > { %v967_v39 = vld [vmem:[%s3014_s27 + $0x16d0] sm:$0xff]  ;;  %1705 = vmatpush.msrb.mxu0 %v831_v38  ;;  %v336_v29 = vld [vmem:[%s3014_s27 + $0x318] sm:$0xff]  ;;  %v3476_v38 = vld.sshfl [vmem:[#allocation1 + $0x30] sm:$0xff pattern:$0x73625140] }
 0x131   : > { %v1079_v40 = vld [vmem:[%s3014_s27 + $0x1a50] sm:$0xff]  ;;  %1724 = vmatpush.msrb.mxu1 %v967_v39  ;;  %v472_v35 = vld [vmem:[%s3014_s27 + $0x758] sm:$0xff] }
 0x132   : > { %v1215_v41 = vld [vmem:[%s3014_s27 + $0x1e90] sm:$0xff]  ;;  %1746 = vmatpush.msrb.mxu2 %v1079_v40  ;;  %v584_v36 = vld [vmem:[%s3014_s27 + $0xad8] sm:$0xff] }
 0x133   : > { %v823_v42 = vld [vmem:[%s3014_s27 + $0x1250] sm:$0xff]  ;;  %1765 = vmatpush.msrb.mxu3 %v1215_v41  ;;  %v720_v37 = vld [vmem:[%s3014_s27 + $0xf18] sm:$0xff] }
 0x134   : > { %v959_v43 = vld [vmem:[%s3014_s27 + $0x1690] sm:$0xff]  ;;  %1706 = vmatpush.msrb.mxu0 %v823_v42  ;;  %v328_v39 = vld [vmem:[%s3014_s27 + $0x2d8] sm:$0xff] }
 0x135   : > { %v1071_v44 = vld [vmem:[%s3014_s27 + $0x1a10] sm:$0xff]  ;;  %1725 = vmatpush.msrb.mxu1 %v959_v43  ;;  %v464_v40 = vld [vmem:[%s3014_s27 + $0x718] sm:$0xff] }
 0x136   : > { %v1207_v45 = vld [vmem:[%s3014_s27 + $0x1e50] sm:$0xff]  ;;  %1747 = vmatpush.msrb.mxu2 %v1071_v44  ;;  %v576_v41 = vld [vmem:[%s3014_s27 + $0xa98] sm:$0xff] }
 0x137   : > { %v815_v46 = vld [vmem:[%s3014_s27 + $0x1210] sm:$0xff]  ;;  %1766 = vmatpush.msrb.mxu3 %v1207_v45  ;;  %v3482_v42 = vld.sshfl [vmem:[#allocation1 + $0x20] sm:$0xff pattern:$0x73625140] }
 0x138   : > { %v951_v47 = vld [vmem:[%s3014_s27 + $0x1650] sm:$0xff]  ;;  %1707 = vmatpush.msrb.mxu0 %v815_v46  ;;  %v712_v43 = vld [vmem:[%s3014_s27 + $0xed8] sm:$0xff] }
 0x139   : > { %v1063_v48 = vld [vmem:[%s3014_s27 + $0x19d0] sm:$0xff]  ;;  %1726 = vmatpush.msrb.mxu1 %v951_v47  ;;  %v320_v45 = vld [vmem:[%s3014_s27 + $0x298] sm:$0xff] }
 0x13a   : > { %v1199_v49 = vld [vmem:[%s3014_s27 + $0x1e10] sm:$0xff]  ;;  %1748 = vmatpush.msrb.mxu2 %v1063_v48  ;;  %v456_v46 = vld [vmem:[%s3014_s27 + $0x6d8] sm:$0xff] }
 0x13b   : > { %v807_v50 = vld [vmem:[%s3014_s27 + $0x11d0] sm:$0xff]  ;;  %1767 = vmatpush.msrb.mxu3 %v1199_v49  ;;  %v568_v47 = vld [vmem:[%s3014_s27 + $0xa58] sm:$0xff]  ;;  %v3493_v49 = vld.sshfl [vmem:[#allocation1 + $0x28] sm:$0xff pattern:$0x73625140] }
 0x13c   : > { %v943_v51 = vld [vmem:[%s3014_s27 + $0x1610] sm:$0xff]  ;;  %1708 = vmatpush.msrb.mxu0 %v807_v50  ;;  %v704_v48 = vld [vmem:[%s3014_s27 + $0xe98] sm:$0xff] }
 0x13d   : > { %v1055_v52 = vld [vmem:[%s3014_s27 + $0x1990] sm:$0xff]  ;;  %1727 = vmatpush.msrb.mxu1 %v943_v51  ;;  %v312_v50 = vld [vmem:[%s3014_s27 + $0x258] sm:$0xff] }
 0x13e   : > { %v1191_v53 = vld [vmem:[%s3014_s27 + $0x1dd0] sm:$0xff]  ;;  %1749 = vmatpush.msrb.mxu2 %v1055_v52  ;;  %v448_v51 = vld [vmem:[%s3014_s27 + $0x698] sm:$0xff] }
 0x13f   : > { %v799_v54 = vld [vmem:[%s3014_s27 + $0x1190] sm:$0xff]  ;;  %1768 = vmatpush.msrb.mxu3 %v1191_v53  ;;  %v560_v52 = vld [vmem:[%s3014_s27 + $0xa18] sm:$0xff] }
 0x140   : > { %v935_v55 = vld [vmem:[%s3014_s27 + $0x15d0] sm:$0xff]  ;;  %1709 = vmatpush.msrb.mxu0 %v799_v54  ;;  %v696_v53 = vld [vmem:[%s3014_s27 + $0xe58] sm:$0xff] }
 0x141   : > { %v1047_v56 = vld [vmem:[%s3014_s27 + $0x1950] sm:$0xff]  ;;  %1728 = vmatpush.msrb.mxu1 %v935_v55  ;;  %v304_v54 = vld [vmem:[%s3014_s27 + $0x218] sm:$0xff] }
 0x142   : > { %v1183_v57 = vld [vmem:[%s3014_s27 + $0x1d90] sm:$0xff]  ;;  %1750 = vmatpush.msrb.mxu2 %v1047_v56  ;;  %v440_v55 = vld [vmem:[%s3014_s27 + $0x658] sm:$0xff] }
 0x143   : > { %v791_v58 = vld [vmem:[%s3014_s27 + $0x1150] sm:$0xff]  ;;  %1769 = vmatpush.msrb.mxu3 %v1183_v57  ;;  %v552_v56 = vld [vmem:[%s3014_s27 + $0x9d8] sm:$0xff] }
 0x144   : > { %v927_v59 = vld [vmem:[%s3014_s27 + $0x1590] sm:$0xff]  ;;  %1710 = vmatpush.msrb.mxu0 %v791_v58  ;;  %v688_v57 = vld [vmem:[%s3014_s27 + $0xe18] sm:$0xff] }
 0x145   : > { %v1039_v60 = vld [vmem:[%s3014_s27 + $0x1910] sm:$0xff]  ;;  %1729 = vmatpush.msrb.mxu1 %v927_v59  ;;  %v296_v58 = vld [vmem:[%s3014_s27 + $0x1d8] sm:$0xff] }
 0x146   : > { %v1175_v61 = vld [vmem:[%s3014_s27 + $0x1d50] sm:$0xff]  ;;  %1751 = vmatpush.msrb.mxu2 %v1039_v60  ;;  %v432_v59 = vld [vmem:[%s3014_s27 + $0x618] sm:$0xff] }
 0x147   : > { %v783_v63 = vld [vmem:[%s3014_s27 + $0x1110] sm:$0xff]  ;;  %1770 = vmatpush.msrb.mxu3 %v1175_v61  ;;  %v544_v60 = vld [vmem:[%s3014_s27 + $0x998] sm:$0xff] }
 0x148   : > { %v919_v0 = vld [vmem:[%s3014_s27 + $0x1550] sm:$0xff]  ;;  %1711 = vmatpush.msrb.mxu0 %v783_v63  ;;  %v680_v61 = vld [vmem:[%s3014_s27 + $0xdd8] sm:$0xff] }
 0x149   : > { %v1031_v1 = vld [vmem:[%s3014_s27 + $0x18d0] sm:$0xff]  ;;  %1730 = vmatpush.msrb.mxu1 %v919_v0  ;;  %v288_v63 = vld [vmem:[%s3014_s27 + $0x198] sm:$0xff] }
 0x14a   : > { %v1167_v2 = vld [vmem:[%s3014_s27 + $0x1d10] sm:$0xff]  ;;  %1752 = vmatpush.msrb.mxu2 %v1031_v1  ;;  %v424_v0 = vld [vmem:[%s3014_s27 + $0x5d8] sm:$0xff] }
 0x14b   : > { %v775_v5 = vld [vmem:[%s3014_s27 + $0x10d0] sm:$0xff]  ;;  %1771 = vmatpush.msrb.mxu3 %v1167_v2  ;;  %v536_v1 = vld [vmem:[%s3014_s27 + $0x958] sm:$0xff] }
 0x14c   : > { %v911_v6 = vld [vmem:[%s3014_s27 + $0x1510] sm:$0xff]  ;;  %1712 = vmatpush.msrb.mxu0 %v775_v5  ;;  %v672_v2 = vld [vmem:[%s3014_s27 + $0xd98] sm:$0xff] }
 0x14d   : > { %v1023_v7 = vld [vmem:[%s3014_s27 + $0x1890] sm:$0xff]  ;;  %1731 = vmatpush.msrb.mxu1 %v911_v6  ;;  %v280_v5 = vld [vmem:[%s3014_s27 + $0x158] sm:$0xff] }
 0x14e   : > { %v1159_v8 = vld [vmem:[%s3014_s27 + $0x1cd0] sm:$0xff]  ;;  %1753 = vmatpush.msrb.mxu2 %v1023_v7  ;;  %v416_v6 = vld [vmem:[%s3014_s27 + $0x598] sm:$0xff] }
 0x14f   : > { %v767_v62 = vld [vmem:[%s3014_s27 + $0x1090] sm:$0xff]  ;;  %1772 = vmatpush.msrb.mxu3 %v1159_v8  ;;  %v528_v7 = vld [vmem:[%s3014_s27 + $0x918] sm:$0xff] }
 0x150   : > { %v903_v9 = vld [vmem:[%s3014_s27 + $0x14d0] sm:$0xff]  ;;  %1713 = vmatpush.msrb.mxu0 %v767_v62  ;;  %v664_v8 = vld [vmem:[%s3014_s27 + $0xd58] sm:$0xff] }
 0x151   : > { %v1015_v11 = vld [vmem:[%s3014_s27 + $0x1850] sm:$0xff]  ;;  %1732 = vmatpush.msrb.mxu1 %v903_v9  ;;  %v272_v62 = vld [vmem:[%s3014_s27 + $0x118] sm:$0xff] }
 0x152   : > { %v1151_v12 = vld [vmem:[%s3014_s27 + $0x1c90] sm:$0xff]  ;;  %1754 = vmatpush.msrb.mxu2 %v1015_v11  ;;  %v408_v9 = vld [vmem:[%s3014_s27 + $0x558] sm:$0xff] }
 0x153   : > { %v759_v3 = vld [vmem:[%s3014_s27 + $0x1050] sm:$0xff]  ;;  %1773 = vmatpush.msrb.mxu3 %v1151_v12  ;;  %v520_v11 = vld [vmem:[%s3014_s27 + $0x8d8] sm:$0xff] }
 0x154   : > { %v895_v13 = vld [vmem:[%s3014_s27 + $0x1490] sm:$0xff]  ;;  %1714 = vmatpush.msrb.mxu0 %v759_v3  ;;  %v656_v12 = vld [vmem:[%s3014_s27 + $0xd18] sm:$0xff] }
 0x155   : > { %v1007_v4 = vld [vmem:[%s3014_s27 + $0x1810] sm:$0xff]  ;;  %1733 = vmatpush.msrb.mxu1 %v895_v13  ;;  %v264_v3 = vld [vmem:[%s3014_s27 + $0xd8] sm:$0xff] }
 0x156   : > { %v1143_v14 = vld [vmem:[%s3014_s27 + $0x1c50] sm:$0xff]  ;;  %1755 = vmatpush.msrb.mxu2 %v1007_v4  ;;  %v400_v13 = vld [vmem:[%s3014_s27 + $0x518] sm:$0xff] }
 0x157   : > { %v751_v15 = vld [vmem:[%s3014_s27 + $0x1010] sm:$0xff]  ;;  %1774 = vmatpush.msrb.mxu3 %v1143_v14  ;;  %1756 = vmatmul.f32.vlgmr.msrb.gmra.mxu2 %v3476_v38  ;;  %v512_v4 = vld [vmem:[%s3014_s27 + $0x898] sm:$0xff] }
 0x158   : > { %v887_v17 = vld [vmem:[%s3014_s27 + $0x1450] sm:$0xff]  ;;  %1715 = vmatpush.msrb.mxu0 %v751_v15  ;;  %1820 = vmatpush.msra.mxu2 %v616_v16  ;;  %v648_v14 = vld [vmem:[%s3014_s27 + $0xcd8] sm:$0xff] }
 0x159   : > { %v1135_v10 = vld [vmem:[%s3014_s27 + $0x1c10] sm:$0xff]  ;;  %1734 = vmatpush.msrb.mxu1 %v887_v17  ;;  %1716 = vmatmul.f32.vlgmr.msrb.gmra.mxu0 %v3482_v42  ;;  %v256_v15 = vld [vmem:[%s3014_s27 + $0x98] sm:$0xff] }
 0x15a   : > { %1775 = vmatpush.msrb.mxu3 %v1135_v10  ;;  %v879_v18 = vld [vmem:[%s3014_s27 + $0x1410] sm:$0xff]  ;;  %1780 = vmatpush.msra.mxu0 %v360_v20  ;;  %v392_v16 = vld [vmem:[%s3014_s27 + $0x4d8] sm:$0xff] }
 0x15b   : > { %v3459_v27 = vld.sshfl [vmem:[#allocation1 + $0x18] sm:$0xff pattern:$0x73625140]  ;;  %1821 = vmatpush.msra.mxu2 %v608_v21  ;;  %1735 = vmatpush.msrb.mxu1 %v879_v18  ;;  %v504_v17 = vld [vmem:[%s3014_s27 + $0x858] sm:$0xff] }
 0x15c   : > { %1696 = vmatmul.f32.vlgmr.msra.gmra.mxu3 %v3459_v27  ;;  %1781 = vmatpush.msra.mxu0 %v352_v26  ;;  %v3486_v44 = vld.sshfl [vmem:[#allocation1 + $0x38] sm:$0xff pattern:$0x73625140]  ;;  %v640_v10 = vld [vmem:[%s3014_s27 + $0xc98] sm:$0xff] }
 0x15d   : > { %1840 = vmatpush.msra.mxu3 %v744_v22  ;;  %1822 = vmatpush.msra.mxu2 %v600_v28  ;;  %v248_v20 = vld [vmem:[%s3014_s27 + $0x58] sm:$0xff] }
 0x15e   : > { %1800 = vmatpush.msra.mxu1 %v488_v23  ;;  %1782 = vmatpush.msra.mxu0 %v344_v30  ;;  %v384_v21 = vld [vmem:[%s3014_s27 + $0x498] sm:$0xff] }
 0x15f   : > { %1841 = vmatpush.msra.mxu3 %v736_v24  ;;  %1823 = vmatpush.msra.mxu2 %v592_v31  ;;  %v496_v22 = vld [vmem:[%s3014_s27 + $0x818] sm:$0xff] }
 0x160   : > { %1801 = vmatpush.msra.mxu1 %v480_v33  ;;  %1783 = vmatpush.msra.mxu0 %v336_v29  ;;  %v632_v18 = vld [vmem:[%s3014_s27 + $0xc58] sm:$0xff] }
 0x161   : > { %1842 = vmatpush.msra.mxu3 %v728_v34  ;;  %1824 = vmatpush.msra.mxu2 %v584_v36  ;;  %v1128_v26 = vld [vmem:[%s3014_s27 + $0x1bd8] sm:$0xff] }
 0x162   : > { %1802 = vmatpush.msra.mxu1 %v472_v35  ;;  %1784 = vmatpush.msra.mxu0 %v328_v39  ;;  %v240_v28 = vld [vmem:[%s3014_s27 + $0x18] sm:$0xff] }
 0x163   : > { %1843 = vmatpush.msra.mxu3 %v720_v37  ;;  %1825 = vmatpush.msra.mxu2 %v576_v41  ;;  %v376_v23 = vld [vmem:[%s3014_s27 + $0x458] sm:$0xff] }
 0x164   : > { %1776 = vmatmul.f32.vlgmr.msrb.gmra.mxu3 %v3486_v44  ;;  %1803 = vmatpush.msra.mxu1 %v464_v40  ;;  %v624_v24 = vld [vmem:[%s3014_s27 + $0xc18] sm:$0xff] }
 0x165   : > { %1844 = vmatpush.msra.mxu3 %v712_v43  ;;  %1736 = vmatmul.f32.vlgmr.msrb.gmra.mxu1 %v3493_v49  ;;  %v872_v30 = vld [vmem:[%s3014_s27 + $0x13d8] sm:$0xff] }
 0x166   : > { %1785 = vmatpush.msra.mxu0 %v320_v45  ;;  %1804 = vmatpush.msra.mxu1 %v456_v46  ;;  %v1120_v31 = vld [vmem:[%s3014_s27 + $0x1b98] sm:$0xff] }
 0x167   : > { %1826 = vmatpush.msra.mxu2 %v568_v47  ;;  %1845 = vmatpush.msra.mxu3 %v704_v48  ;;  %v1256_v33 = vld [vmem:[%s3014_s27 + $0x1fd8] sm:$0xff] }
 0x168   : > { %1786 = vmatpush.msra.mxu0 %v312_v50  ;;  %1805 = vmatpush.msra.mxu1 %v448_v51  ;;  %v368_v34 = vld [vmem:[%s3014_s27 + $0x418] sm:$0xff] }
 0x169   : > { %1827 = vmatpush.msra.mxu2 %v560_v52  ;;  %1846 = vmatpush.msra.mxu3 %v696_v53  ;;  %v864_v29 = vld [vmem:[%s3014_s27 + $0x1398] sm:$0xff] }
 0x16a   : > { %1787 = vmatpush.msra.mxu0 %v304_v54  ;;  %1806 = vmatpush.msra.mxu1 %v440_v55  ;;  %v1000_v35 = vld [vmem:[%s3014_s27 + $0x17d8] sm:$0xff] }
 0x16b   : > { %1828 = vmatpush.msra.mxu2 %v552_v56  ;;  %1847 = vmatpush.msra.mxu3 %v688_v57  ;;  %v1112_v36 = vld [vmem:[%s3014_s27 + $0x1b58] sm:$0xff] }
 0x16c   : > { %1788 = vmatpush.msra.mxu0 %v296_v58  ;;  %1807 = vmatpush.msra.mxu1 %v432_v59  ;;  %v1248_v37 = vld [vmem:[%s3014_s27 + $0x1f98] sm:$0xff] }
 0x16d   : > { %1829 = vmatpush.msra.mxu2 %v544_v60  ;;  %1848 = vmatpush.msra.mxu3 %v680_v61  ;;  %v856_v39 = vld [vmem:[%s3014_s27 + $0x1358] sm:$0xff] }
 0x16e   : > { %1789 = vmatpush.msra.mxu0 %v288_v63  ;;  %1808 = vmatpush.msra.mxu1 %v424_v0  ;;  %v992_v40 = vld [vmem:[%s3014_s27 + $0x1798] sm:$0xff] }
 0x16f   : > { %1830 = vmatpush.msra.mxu2 %v536_v1  ;;  %1849 = vmatpush.msra.mxu3 %v672_v2  ;;  %v1104_v41 = vld [vmem:[%s3014_s27 + $0x1b18] sm:$0xff] }
 0x170   : > { %1790 = vmatpush.msra.mxu0 %v280_v5  ;;  %1809 = vmatpush.msra.mxu1 %v416_v6  ;;  %v1240_v43 = vld [vmem:[%s3014_s27 + $0x1f58] sm:$0xff] }
 0x171   : > { %1831 = vmatpush.msra.mxu2 %v528_v7  ;;  %1850 = vmatpush.msra.mxu3 %v664_v8  ;;  %v848_v45 = vld [vmem:[%s3014_s27 + $0x1318] sm:$0xff] }
 0x172   : > { %1791 = vmatpush.msra.mxu0 %v272_v62  ;;  %1810 = vmatpush.msra.mxu1 %v408_v9  ;;  %v984_v46 = vld [vmem:[%s3014_s27 + $0x1758] sm:$0xff] }
 0x173   : > { %1832 = vmatpush.msra.mxu2 %v520_v11  ;;  %1851 = vmatpush.msra.mxu3 %v656_v12  ;;  %v1096_v47 = vld [vmem:[%s3014_s27 + $0x1ad8] sm:$0xff] }
 0x174   : > { %1792 = vmatpush.msra.mxu0 %v264_v3  ;;  %1811 = vmatpush.msra.mxu1 %v400_v13  ;;  %v1232_v48 = vld [vmem:[%s3014_s27 + $0x1f18] sm:$0xff] }
 0x175   : > { %1833 = vmatpush.msra.mxu2 %v512_v4  ;;  %1852 = vmatpush.msra.mxu3 %v648_v14  ;;  %v840_v50 = vld [vmem:[%s3014_s27 + $0x12d8] sm:$0xff] }
 0x176   : > { %1793 = vmatpush.msra.mxu0 %v256_v15  ;;  %1812 = vmatpush.msra.mxu1 %v392_v16  ;;  %v976_v51 = vld [vmem:[%s3014_s27 + $0x1718] sm:$0xff] }
 0x177   : > { %1834 = vmatpush.msra.mxu2 %v504_v17  ;;  %1853 = vmatpush.msra.mxu3 %v640_v10  ;;  %v1088_v52 = vld [vmem:[%s3014_s27 + $0x1a98] sm:$0xff] }
 0x178   : > { %1794 = vmatpush.msra.mxu0 %v248_v20  ;;  %1813 = vmatpush.msra.mxu1 %v384_v21  ;;  %v1224_v53 = vld [vmem:[%s3014_s27 + $0x1ed8] sm:$0xff] }
 0x179   : > { %1835 = vmatpush.msra.mxu2 %v496_v22  ;;  %1854 = vmatpush.msra.mxu3 %v632_v18  ;;  %v832_v54 = vld [vmem:[%s3014_s27 + $0x1298] sm:$0xff] }
 0x17a   : > { %1795 = vmatpush.msra.mxu0 %v240_v28  ;;  %1814 = vmatpush.msra.mxu1 %v376_v23  ;;  %v968_v55 = vld [vmem:[%s3014_s27 + $0x16d8] sm:$0xff] }
 0x17b   : > { %1900 = vmatpush.msrb.mxu2 %v1128_v26  ;;  %1855 = vmatpush.msra.mxu3 %v624_v24  ;;  %v1080_v56 = vld [vmem:[%s3014_s27 + $0x1a58] sm:$0xff] }
 0x17c   : > { %1860 = vmatpush.msrb.mxu0 %v872_v30  ;;  %1815 = vmatpush.msra.mxu1 %v368_v34  ;;  %v1216_v57 = vld [vmem:[%s3014_s27 + $0x1e98] sm:$0xff] }
 0x17d   : > { %1901 = vmatpush.msrb.mxu2 %v1120_v31  ;;  %1920 = vmatpush.msrb.mxu3 %v1256_v33  ;;  %v824_v58 = vld [vmem:[%s3014_s27 + $0x1258] sm:$0xff]  ;;  %v617_v33 = vld [vmem:[%s3014_s27 + $0xbe0] sm:$0xff] }
 0x17e   : > { %1861 = vmatpush.msrb.mxu0 %v864_v29  ;;  %1880 = vmatpush.msrb.mxu1 %v1000_v35  ;;  %v960_v59 = vld [vmem:[%s3014_s27 + $0x1698] sm:$0xff]  ;;  %v361_v29 = vld [vmem:[%s3014_s27 + $0x3e0] sm:$0xff] }
 0x17f   : > { %1902 = vmatpush.msrb.mxu2 %v1112_v36  ;;  %1921 = vmatpush.msrb.mxu3 %v1248_v37  ;;  %v1072_v60 = vld [vmem:[%s3014_s27 + $0x1a18] sm:$0xff]  ;;  %v609_v35 = vld [vmem:[%s3014_s27 + $0xba0] sm:$0xff] }
 0x180   : > { %1862 = vmatpush.msrb.mxu0 %v856_v39  ;;  %1881 = vmatpush.msrb.mxu1 %v992_v40  ;;  %v1208_v61 = vld [vmem:[%s3014_s27 + $0x1e58] sm:$0xff]  ;;  %v745_v36 = vld [vmem:[%s3014_s27 + $0xfe0] sm:$0xff] }
 0x181   : > { %1903 = vmatpush.msrb.mxu2 %v1104_v41  ;;  %1922 = vmatpush.msrb.mxu3 %v1240_v43  ;;  %v816_v63 = vld [vmem:[%s3014_s27 + $0x1218] sm:$0xff]  ;;  %v353_v39 = vld [vmem:[%s3014_s27 + $0x3a0] sm:$0xff] }
 0x182   : > { %1863 = vmatpush.msrb.mxu0 %v848_v45  ;;  %1882 = vmatpush.msrb.mxu1 %v984_v46  ;;  %v952_v0 = vld [vmem:[%s3014_s27 + $0x1658] sm:$0xff]  ;;  %v489_v40 = vld [vmem:[%s3014_s27 + $0x7e0] sm:$0xff] }
 0x183   : > { %1904 = vmatpush.msrb.mxu2 %v1096_v47  ;;  %1923 = vmatpush.msrb.mxu3 %v1232_v48  ;;  %v1064_v1 = vld [vmem:[%s3014_s27 + $0x19d8] sm:$0xff]  ;;  %v737_v41 = vld [vmem:[%s3014_s27 + $0xfa0] sm:$0xff] }
 0x184   : > { %1864 = vmatpush.msrb.mxu0 %v840_v50  ;;  %1883 = vmatpush.msrb.mxu1 %v976_v51  ;;  %v1200_v2 = vld [vmem:[%s3014_s27 + $0x1e18] sm:$0xff]  ;;  %v345_v43 = vld [vmem:[%s3014_s27 + $0x360] sm:$0xff] }
 0x185   : > { %1905 = vmatpush.msrb.mxu2 %v1088_v52  ;;  %1924 = vmatpush.msrb.mxu3 %v1224_v53  ;;  %v808_v5 = vld [vmem:[%s3014_s27 + $0x11d8] sm:$0xff]  ;;  %v729_v45 = vld [vmem:[%s3014_s27 + $0xf60] sm:$0xff] }
 0x186   : > { %1865 = vmatpush.msrb.mxu0 %v832_v54  ;;  %1884 = vmatpush.msrb.mxu1 %v968_v55  ;;  %v944_v6 = vld [vmem:[%s3014_s27 + $0x1618] sm:$0xff]  ;;  %v337_v46 = vld [vmem:[%s3014_s27 + $0x320] sm:$0xff] }
 0x187   : > { %1906 = vmatpush.msrb.mxu2 %v1080_v56  ;;  %1925 = vmatpush.msrb.mxu3 %v1216_v57  ;;  %v1056_v7 = vld [vmem:[%s3014_s27 + $0x1998] sm:$0xff]  ;;  %v585_v47 = vld [vmem:[%s3014_s27 + $0xae0] sm:$0xff] }
 0x188   : > { %1866 = vmatpush.msrb.mxu0 %v824_v58  ;;  %1885 = vmatpush.msrb.mxu1 %v960_v59  ;;  %v1192_v8 = vld [vmem:[%s3014_s27 + $0x1dd8] sm:$0xff]  ;;  %v473_v48 = vld [vmem:[%s3014_s27 + $0x760] sm:$0xff] }
 0x189   : > { %1907 = vmatpush.msrb.mxu2 %v1072_v60  ;;  %1926 = vmatpush.msrb.mxu3 %v1208_v61  ;;  %v800_v62 = vld [vmem:[%s3014_s27 + $0x1198] sm:$0xff]  ;;  %v721_v50 = vld [vmem:[%s3014_s27 + $0xf20] sm:$0xff] }
 0x18a   : > { %1867 = vmatpush.msrb.mxu0 %v816_v63  ;;  %1886 = vmatpush.msrb.mxu1 %v952_v0  ;;  %v936_v9 = vld [vmem:[%s3014_s27 + $0x15d8] sm:$0xff]  ;;  %v577_v51 = vld [vmem:[%s3014_s27 + $0xaa0] sm:$0xff] }
 0x18b   : > { %1908 = vmatpush.msrb.mxu2 %v1064_v1  ;;  %1927 = vmatpush.msrb.mxu3 %v1200_v2  ;;  %v1048_v11 = vld [vmem:[%s3014_s27 + $0x1958] sm:$0xff]  ;;  %v465_v52 = vld [vmem:[%s3014_s27 + $0x720] sm:$0xff] }
 0x18c   : > { %1868 = vmatpush.msrb.mxu0 %v808_v5  ;;  %1887 = vmatpush.msrb.mxu1 %v944_v6  ;;  %v1184_v12 = vld [vmem:[%s3014_s27 + $0x1d98] sm:$0xff]  ;;  %v713_v53 = vld [vmem:[%s3014_s27 + $0xee0] sm:$0xff] }
 0x18d   : > { %1909 = vmatpush.msrb.mxu2 %v1056_v7  ;;  %1928 = vmatpush.msrb.mxu3 %v1192_v8  ;;  %v792_v3 = vld [vmem:[%s3014_s27 + $0x1158] sm:$0xff]  ;;  %v321_v54 = vld [vmem:[%s3014_s27 + $0x2a0] sm:$0xff] }
 0x18e   : > { %v928_v13 = vld [vmem:[%s3014_s27 + $0x1598] sm:$0xff]  ;;  %1869 = vmatpush.msrb.mxu0 %v800_v62  ;;  %1888 = vmatpush.msrb.mxu1 %v936_v9  ;;  %v569_v55 = vld [vmem:[%s3014_s27 + $0xa60] sm:$0xff] }
 0x18f   : > { %v1040_v4 = vld [vmem:[%s3014_s27 + $0x1918] sm:$0xff]  ;;  %1910 = vmatpush.msrb.mxu2 %v1048_v11  ;;  %1929 = vmatpush.msrb.mxu3 %v1184_v12  ;;  %v457_v56 = vld [vmem:[%s3014_s27 + $0x6e0] sm:$0xff] }
 0x190   : > { %v1176_v14 = vld [vmem:[%s3014_s27 + $0x1d58] sm:$0xff]  ;;  %1870 = vmatpush.msrb.mxu0 %v792_v3  ;;  %1889 = vmatpush.msrb.mxu1 %v928_v13  ;;  %v705_v57 = vld [vmem:[%s3014_s27 + $0xea0] sm:$0xff] }
 0x191   : > { %v784_v15 = vld [vmem:[%s3014_s27 + $0x1118] sm:$0xff]  ;;  %1911 = vmatpush.msrb.mxu2 %v1040_v4  ;;  %1930 = vmatpush.msrb.mxu3 %v1176_v14  ;;  %v313_v58 = vld [vmem:[%s3014_s27 + $0x260] sm:$0xff] }
 0x192   : > { %v920_v16 = vld [vmem:[%s3014_s27 + $0x1558] sm:$0xff]  ;;  %1836 = vmatmul.f32.vlgmr.msra.gmra.mxu2 %v3448_v19  ;;  %1871 = vmatpush.msrb.mxu0 %v784_v15  ;;  %v561_v59 = vld [vmem:[%s3014_s27 + $0xa20] sm:$0xff] }
 0x193   : > { %v1032_v17 = vld [vmem:[%s3014_s27 + $0x18d8] sm:$0xff]  ;;  %1890 = vmatpush.msrb.mxu1 %v920_v16  ;;  %1796 = vmatmul.f32.vlgmr.msra.gmra.mxu0 %v3454_v25  ;;  %v449_v60 = vld [vmem:[%s3014_s27 + $0x6a0] sm:$0xff] }
 0x194   : > { %v1168_v10 = vld [vmem:[%s3014_s27 + $0x1d18] sm:$0xff]  ;;  %1912 = vmatpush.msrb.mxu2 %v1032_v17  ;;  %1856 = vmatmul.f32.vlgmr.msra.gmra.mxu3 %v3459_v27  ;;  %v697_v61 = vld [vmem:[%s3014_s27 + $0xe60] sm:$0xff] }
 0x195   : > { %v776_v20 = vld [vmem:[%s3014_s27 + $0x10d8] sm:$0xff]  ;;  %1931 = vmatpush.msrb.mxu3 %v1168_v10  ;;  %1816 = vmatmul.f32.vlgmr.msra.gmra.mxu1 %v3467_v32  ;;  %v305_v63 = vld [vmem:[%s3014_s27 + $0x220] sm:$0xff] }
 0x196   : > { %v912_v21 = vld [vmem:[%s3014_s27 + $0x1518] sm:$0xff]  ;;  %1872 = vmatpush.msrb.mxu0 %v776_v20  ;;  %v553_v0 = vld [vmem:[%s3014_s27 + $0x9e0] sm:$0xff] }
 0x197   : > { %v1024_v22 = vld [vmem:[%s3014_s27 + $0x1898] sm:$0xff]  ;;  %1891 = vmatpush.msrb.mxu1 %v912_v21  ;;  %v441_v1 = vld [vmem:[%s3014_s27 + $0x660] sm:$0xff] }
 0x198   : > { %v1160_v18 = vld [vmem:[%s3014_s27 + $0x1cd8] sm:$0xff]  ;;  %1913 = vmatpush.msrb.mxu2 %v1024_v22  ;;  %v689_v2 = vld [vmem:[%s3014_s27 + $0xe20] sm:$0xff] }
 0x199   : > { %v768_v19 = vld [vmem:[%s3014_s27 + $0x1098] sm:$0xff]  ;;  %1932 = vmatpush.msrb.mxu3 %v1160_v18  ;;  %v297_v5 = vld [vmem:[%s3014_s27 + $0x1e0] sm:$0xff] }
 0x19a   : > { %v904_v26 = vld [vmem:[%s3014_s27 + $0x14d8] sm:$0xff]  ;;  %1873 = vmatpush.msrb.mxu0 %v768_v19  ;;  %v545_v6 = vld [vmem:[%s3014_s27 + $0x9a0] sm:$0xff] }
 0x19b   : > { %v1016_v28 = vld [vmem:[%s3014_s27 + $0x1858] sm:$0xff]  ;;  %1892 = vmatpush.msrb.mxu1 %v904_v26  ;;  %v433_v7 = vld [vmem:[%s3014_s27 + $0x620] sm:$0xff] }
 0x19c   : > { %v1152_v23 = vld [vmem:[%s3014_s27 + $0x1c98] sm:$0xff]  ;;  %1914 = vmatpush.msrb.mxu2 %v1016_v28  ;;  %v681_v8 = vld [vmem:[%s3014_s27 + $0xde0] sm:$0xff] }
 0x19d   : > { %v760_v25 = vld [vmem:[%s3014_s27 + $0x1058] sm:$0xff]  ;;  %1933 = vmatpush.msrb.mxu3 %v1152_v23  ;;  %v289_v62 = vld [vmem:[%s3014_s27 + $0x1a0] sm:$0xff] }
 0x19e   : > { %v896_v24 = vld [vmem:[%s3014_s27 + $0x1498] sm:$0xff]  ;;  %1874 = vmatpush.msrb.mxu0 %v760_v25  ;;  %v537_v9 = vld [vmem:[%s3014_s27 + $0x960] sm:$0xff] }
 0x19f   : > { %v1008_v27 = vld [vmem:[%s3014_s27 + $0x1818] sm:$0xff]  ;;  %1893 = vmatpush.msrb.mxu1 %v896_v24  ;;  %v425_v11 = vld [vmem:[%s3014_s27 + $0x5e0] sm:$0xff] }
 0x1a0   : > { %v1144_v30 = vld [vmem:[%s3014_s27 + $0x1c58] sm:$0xff]  ;;  %1915 = vmatpush.msrb.mxu2 %v1008_v27  ;;  %v673_v12 = vld [vmem:[%s3014_s27 + $0xda0] sm:$0xff] }
 0x1a1   : > { %v752_v31 = vld [vmem:[%s3014_s27 + $0x1018] sm:$0xff]  ;;  %1934 = vmatpush.msrb.mxu3 %v1144_v30  ;;  %1916 = vmatmul.f32.vlgmr.msrb.gmra.mxu2 %v3476_v38  ;;  %v601_v38 = vld [vmem:[%s3014_s27 + $0xb60] sm:$0xff] }
 0x1a2   : > { %v888_v34 = vld [vmem:[%s3014_s27 + $0x1458] sm:$0xff]  ;;  %1875 = vmatpush.msrb.mxu0 %v752_v31  ;;  %1980 = vmatpush.msra.mxu2 %v617_v33  ;;  %v281_v3 = vld [vmem:[%s3014_s27 + $0x160] sm:$0xff] }
 0x1a3   : > { %v1136_v32 = vld [vmem:[%s3014_s27 + $0x1c18] sm:$0xff]  ;;  %1894 = vmatpush.msrb.mxu1 %v888_v34  ;;  %1876 = vmatmul.f32.vlgmr.msrb.gmra.mxu0 %v3482_v42  ;;  %v593_v42 = vld [vmem:[%s3014_s27 + $0xb20] sm:$0xff] }
 0x1a4   : > { %1935 = vmatpush.msrb.mxu3 %v1136_v32  ;;  %v880_v37 = vld [vmem:[%s3014_s27 + $0x1418] sm:$0xff]  ;;  %1940 = vmatpush.msra.mxu0 %v361_v29  ;;  %v529_v13 = vld [vmem:[%s3014_s27 + $0x920] sm:$0xff] }
 0x1a5   : > { %1936 = vmatmul.f32.vlgmr.msrb.gmra.mxu3 %v3486_v44  ;;  %1981 = vmatpush.msra.mxu2 %v609_v35  ;;  %v481_v44 = vld [vmem:[%s3014_s27 + $0x7a0] sm:$0xff] }
 0x1a6   : > { %2000 = vmatpush.msra.mxu3 %v745_v36  ;;  %1895 = vmatpush.msrb.mxu1 %v880_v37  ;;  %v417_v4 = vld [vmem:[%s3014_s27 + $0x5a0] sm:$0xff] }
 0x1a7   : > { %1941 = vmatpush.msra.mxu0 %v353_v39  ;;  %1896 = vmatmul.f32.vlgmr.msrb.gmra.mxu1 %v3493_v49  ;;  %v329_v49 = vld [vmem:[%s3014_s27 + $0x2e0] sm:$0xff] }
 0x1a8   : > { %1982 = vmatpush.msra.mxu2 %v601_v38  ;;  %1960 = vmatpush.msra.mxu1 %v489_v40  ;;  %v665_v14 = vld [vmem:[%s3014_s27 + $0xd60] sm:$0xff] }
 0x1a9   : > { %2001 = vmatpush.msra.mxu3 %v737_v41  ;;  %1942 = vmatpush.msra.mxu0 %v345_v43  ;;  %v273_v15 = vld [vmem:[%s3014_s27 + $0x120] sm:$0xff] }
 0x1aa   : > { %1983 = vmatpush.msra.mxu2 %v593_v42  ;;  %1961 = vmatpush.msra.mxu1 %v481_v44  ;;  %v521_v16 = vld [vmem:[%s3014_s27 + $0x8e0] sm:$0xff] }
 0x1ab   : > { %2002 = vmatpush.msra.mxu3 %v729_v45  ;;  %1943 = vmatpush.msra.mxu0 %v337_v46  ;;  %v409_v17 = vld [vmem:[%s3014_s27 + $0x560] sm:$0xff] }
 0x1ac   : > { %1984 = vmatpush.msra.mxu2 %v585_v47  ;;  %1962 = vmatpush.msra.mxu1 %v473_v48  ;;  %v657_v10 = vld [vmem:[%s3014_s27 + $0xd20] sm:$0xff] }
 0x1ad   : > { %2003 = vmatpush.msra.mxu3 %v721_v50  ;;  %1944 = vmatpush.msra.mxu0 %v329_v49  ;;  %v265_v20 = vld [vmem:[%s3014_s27 + $0xe0] sm:$0xff] }
 0x1ae   : > { %1985 = vmatpush.msra.mxu2 %v577_v51  ;;  %1963 = vmatpush.msra.mxu1 %v465_v52  ;;  %v513_v21 = vld [vmem:[%s3014_s27 + $0x8a0] sm:$0xff] }
 0x1af   : > { %2004 = vmatpush.msra.mxu3 %v713_v53  ;;  %1945 = vmatpush.msra.mxu0 %v321_v54  ;;  %v401_v22 = vld [vmem:[%s3014_s27 + $0x520] sm:$0xff] }
 0x1b0   : > { %1986 = vmatpush.msra.mxu2 %v569_v55  ;;  %1964 = vmatpush.msra.mxu1 %v457_v56  ;;  %v649_v18 = vld [vmem:[%s3014_s27 + $0xce0] sm:$0xff] }
 0x1b1   : > { %2005 = vmatpush.msra.mxu3 %v705_v57  ;;  %1946 = vmatpush.msra.mxu0 %v313_v58  ;;  %v257_v19 = vld [vmem:[%s3014_s27 + $0xa0] sm:$0xff] }
 0x1b2   : > { %1987 = vmatpush.msra.mxu2 %v561_v59  ;;  %1965 = vmatpush.msra.mxu1 %v449_v60  ;;  %v505_v26 = vld [vmem:[%s3014_s27 + $0x860] sm:$0xff] }
 0x1b3   : > { %2006 = vmatpush.msra.mxu3 %v697_v61  ;;  %1947 = vmatpush.msra.mxu0 %v305_v63  ;;  %v393_v28 = vld [vmem:[%s3014_s27 + $0x4e0] sm:$0xff] }
 0x1b4   : > { %1988 = vmatpush.msra.mxu2 %v553_v0  ;;  %1966 = vmatpush.msra.mxu1 %v441_v1  ;;  %v641_v23 = vld [vmem:[%s3014_s27 + $0xca0] sm:$0xff] }
 0x1b5   : > { %2007 = vmatpush.msra.mxu3 %v689_v2  ;;  %1948 = vmatpush.msra.mxu0 %v297_v5  ;;  %v249_v25 = vld [vmem:[%s3014_s27 + $0x60] sm:$0xff] }
 0x1b6   : > { %1989 = vmatpush.msra.mxu2 %v545_v6  ;;  %1967 = vmatpush.msra.mxu1 %v433_v7  ;;  %v497_v24 = vld [vmem:[%s3014_s27 + $0x820] sm:$0xff] }
 0x1b7   : > { %2008 = vmatpush.msra.mxu3 %v681_v8  ;;  %1949 = vmatpush.msra.mxu0 %v289_v62  ;;  %v385_v27 = vld [vmem:[%s3014_s27 + $0x4a0] sm:$0xff] }
 0x1b8   : > { %1990 = vmatpush.msra.mxu2 %v537_v9  ;;  %1968 = vmatpush.msra.mxu1 %v425_v11  ;;  %v633_v30 = vld [vmem:[%s3014_s27 + $0xc60] sm:$0xff] }
 0x1b9   : > { %2009 = vmatpush.msra.mxu3 %v673_v12  ;;  %1950 = vmatpush.msra.mxu0 %v281_v3  ;;  %v1129_v31 = vld [vmem:[%s3014_s27 + $0x1be0] sm:$0xff] }
 0x1ba   : > { %1991 = vmatpush.msra.mxu2 %v529_v13  ;;  %1969 = vmatpush.msra.mxu1 %v417_v4  ;;  %v241_v33 = vld [vmem:[%s3014_s27 + $0x20] sm:$0xff] }
 0x1bb   : > { %2010 = vmatpush.msra.mxu3 %v665_v14  ;;  %1951 = vmatpush.msra.mxu0 %v273_v15  ;;  %v377_v34 = vld [vmem:[%s3014_s27 + $0x460] sm:$0xff] }
 0x1bc   : > { %1992 = vmatpush.msra.mxu2 %v521_v16  ;;  %1970 = vmatpush.msra.mxu1 %v409_v17  ;;  %v625_v32 = vld [vmem:[%s3014_s27 + $0xc20] sm:$0xff] }
 0x1bd   : > { %2011 = vmatpush.msra.mxu3 %v657_v10  ;;  %1952 = vmatpush.msra.mxu0 %v265_v20  ;;  %v873_v29 = vld [vmem:[%s3014_s27 + $0x13e0] sm:$0xff] }
 0x1be   : > { %1993 = vmatpush.msra.mxu2 %v513_v21  ;;  %1971 = vmatpush.msra.mxu1 %v401_v22  ;;  %v1121_v35 = vld [vmem:[%s3014_s27 + $0x1ba0] sm:$0xff] }
 0x1bf   : > { %2012 = vmatpush.msra.mxu3 %v649_v18  ;;  %1953 = vmatpush.msra.mxu0 %v257_v19  ;;  %v1257_v36 = vld [vmem:[%s3014_s27 + $0x1fe0] sm:$0xff] }
 0x1c0   : > { %1994 = vmatpush.msra.mxu2 %v505_v26  ;;  %1972 = vmatpush.msra.mxu1 %v393_v28  ;;  %v369_v37 = vld [vmem:[%s3014_s27 + $0x420] sm:$0xff] }
 0x1c1   : > { %2013 = vmatpush.msra.mxu3 %v641_v23  ;;  %1954 = vmatpush.msra.mxu0 %v249_v25  ;;  %v865_v39 = vld [vmem:[%s3014_s27 + $0x13a0] sm:$0xff] }
 0x1c2   : > { %1995 = vmatpush.msra.mxu2 %v497_v24  ;;  %1973 = vmatpush.msra.mxu1 %v385_v27  ;;  %v1001_v38 = vld [vmem:[%s3014_s27 + $0x17e0] sm:$0xff] }
 0x1c3   : > { %2014 = vmatpush.msra.mxu3 %v633_v30  ;;  %1955 = vmatpush.msra.mxu0 %v241_v33  ;;  %v1113_v40 = vld [vmem:[%s3014_s27 + $0x1b60] sm:$0xff] }
 0x1c4   : > { %2060 = vmatpush.msrb.mxu2 %v1129_v31  ;;  %1974 = vmatpush.msra.mxu1 %v377_v34  ;;  %v1249_v41 = vld [vmem:[%s3014_s27 + $0x1fa0] sm:$0xff]  ;;  %v3732_v31 = vpop.f32.mrf.mxu0  ;;  %v618_v34 = vld [vmem:[%s3014_s27 + $0xbe8] sm:$0xff] }
 0x1c5   : > { %2015 = vmatpush.msra.mxu3 %v625_v32  ;;  %2020 = vmatpush.msrb.mxu0 %v873_v29  ;;  %v857_v43 = vld [vmem:[%s3014_s27 + $0x1360] sm:$0xff] }
 0x1c6   : > { %2061 = vmatpush.msrb.mxu2 %v1121_v35  ;;  %1975 = vmatpush.msra.mxu1 %v369_v37  ;;  %v993_v42 = vld [vmem:[%s3014_s27 + $0x17a0] sm:$0xff]  ;;  %v3738_v35 = vpop.f32.mrf.mxu1  ;;  %v362_v37 = vld [vmem:[%s3014_s27 + $0x3e8] sm:$0xff] }
 0x1c7   : > { %2080 = vmatpush.msrb.mxu3 %v1257_v36  ;;  %2021 = vmatpush.msrb.mxu0 %v865_v39  ;;  %v1105_v44 = vld [vmem:[%s3014_s27 + $0x1b20] sm:$0xff]  ;;  %v3740_v36 = vld.sshfl [vmem:[#allocation1 + $0x10] sm:$0xff pattern:$0x73625140]  ;;  %v3744_v39 = vpop.f32.mrf.mxu2 }
 0x1c8   : > { %2040 = vmatpush.msrb.mxu1 %v1001_v38  ;;  %v1241_v45 = vld [vmem:[%s3014_s27 + $0x1f60] sm:$0xff]  ;;  %2062 = vmatpush.msrb.mxu2 %v1113_v40  ;;  %v610_v38 = vld [vmem:[%s3014_s27 + $0xba8] sm:$0xff] }
 0x1c9   : > { %2081 = vmatpush.msrb.mxu3 %v1249_v41  ;;  %v849_v46 = vld [vmem:[%s3014_s27 + $0x1320] sm:$0xff]  ;;  %2022 = vmatpush.msrb.mxu0 %v857_v43  ;;  %v746_v40 = vld [vmem:[%s3014_s27 + $0xfe8] sm:$0xff]  ;;  %v3748_v41 = vld.sshfl [vmem:[#allocation1] sm:$0xff pattern:$0x73625140] }
 0x1ca   : > { %v985_v47 = vld [vmem:[%s3014_s27 + $0x1760] sm:$0xff]  ;;  %2041 = vmatpush.msrb.mxu1 %v993_v42  ;;  %2063 = vmatpush.msrb.mxu2 %v1105_v44  ;;  %v354_v42 = vld [vmem:[%s3014_s27 + $0x3a8] sm:$0xff]  ;;  %v3753_v44 = vld.sshfl [vmem:[#allocation1 + $0x18] sm:$0xff pattern:$0x73625140] }
 0x1cb   : > { %v1097_v48 = vld [vmem:[%s3014_s27 + $0x1ae0] sm:$0xff]  ;;  %2082 = vmatpush.msrb.mxu3 %v1241_v45  ;;  %2023 = vmatpush.msrb.mxu0 %v849_v46  ;;  %v602_v45 = vld [vmem:[%s3014_s27 + $0xb68] sm:$0xff]  ;;  %v3757_v46 = vpop.f32.mrf.mxu3 }
 0x1cc   : > { %v1233_v50 = vld [vmem:[%s3014_s27 + $0x1f20] sm:$0xff]  ;;  %2042 = vmatpush.msrb.mxu1 %v985_v47  ;;  %2064 = vmatpush.msrb.mxu2 %v1097_v48  ;;  %v490_v47 = vld [vmem:[%s3014_s27 + $0x7e8] sm:$0xff] }
 0x1cd   : > { %v841_v49 = vld [vmem:[%s3014_s27 + $0x12e0] sm:$0xff]  ;;  %2083 = vmatpush.msrb.mxu3 %v1233_v50  ;;  %1996 = vmatmul.f32.vlgmr.msra.gmra.mxu2 %v3740_v36  ;;  %v738_v48 = vld [vmem:[%s3014_s27 + $0xfa8] sm:$0xff] }
 0x1ce   : > { %v977_v51 = vld [vmem:[%s3014_s27 + $0x1720] sm:$0xff]  ;;  %2024 = vmatpush.msrb.mxu0 %v841_v49  ;;  %2016 = vmatmul.f32.vlgmr.msra.gmra.mxu3 %v3753_v44  ;;  %v346_v50 = vld [vmem:[%s3014_s27 + $0x368] sm:$0xff] }
 0x1cf   : > { %v1089_v52 = vld [vmem:[%s3014_s27 + $0x1aa0] sm:$0xff]  ;;  %2043 = vmatpush.msrb.mxu1 %v977_v51  ;;  %1956 = vmatmul.f32.vlgmr.msra.gmra.mxu0 %v3748_v41  ;;  %v594_v49 = vld [vmem:[%s3014_s27 + $0xb28] sm:$0xff] }
 0x1d0   : > { %v1225_v53 = vld [vmem:[%s3014_s27 + $0x1ee0] sm:$0xff]  ;;  %2065 = vmatpush.msrb.mxu2 %v1089_v52  ;;  %v482_v52 = vld [vmem:[%s3014_s27 + $0x7a8] sm:$0xff] }
 0x1d1   : > { %v833_v54 = vld [vmem:[%s3014_s27 + $0x12a0] sm:$0xff]  ;;  %2084 = vmatpush.msrb.mxu3 %v1225_v53  ;;  %v730_v53 = vld [vmem:[%s3014_s27 + $0xf68] sm:$0xff] }
 0x1d2   : > { %v969_v55 = vld [vmem:[%s3014_s27 + $0x16e0] sm:$0xff]  ;;  %2025 = vmatpush.msrb.mxu0 %v833_v54  ;;  %v3768_v54 = vpop.f32.mrf.mxu0 }
 0x1d3   : > { %v1081_v56 = vld [vmem:[%s3014_s27 + $0x1a60] sm:$0xff]  ;;  %2044 = vmatpush.msrb.mxu1 %v969_v55  ;;  %v338_v55 = vld [vmem:[%s3014_s27 + $0x328] sm:$0xff] }
 0x1d4   : > { %v1217_v57 = vld [vmem:[%s3014_s27 + $0x1ea0] sm:$0xff]  ;;  %2066 = vmatpush.msrb.mxu2 %v1081_v56  ;;  %v474_v56 = vld [vmem:[%s3014_s27 + $0x768] sm:$0xff] }
 0x1d5   : > { %v825_v58 = vld [vmem:[%s3014_s27 + $0x1260] sm:$0xff]  ;;  %2085 = vmatpush.msrb.mxu3 %v1217_v57  ;;  %v586_v57 = vld [vmem:[%s3014_s27 + $0xae8] sm:$0xff] }
 0x1d6   : > { %v961_v59 = vld [vmem:[%s3014_s27 + $0x16a0] sm:$0xff]  ;;  %2026 = vmatpush.msrb.mxu0 %v825_v58  ;;  %v722_v58 = vld [vmem:[%s3014_s27 + $0xf28] sm:$0xff] }
 0x1d7   : > { %v1073_v60 = vld [vmem:[%s3014_s27 + $0x1a20] sm:$0xff]  ;;  %2045 = vmatpush.msrb.mxu1 %v961_v59  ;;  %v3774_v59 = vpop.f32.mrf.mxu1 }
 0x1d8   : > { %v1209_v61 = vld [vmem:[%s3014_s27 + $0x1e60] sm:$0xff]  ;;  %2067 = vmatpush.msrb.mxu2 %v1073_v60  ;;  %v3776_v60 = vld.sshfl [vmem:[#allocation1 + $0x30] sm:$0xff pattern:$0x73625140] }
 0x1d9   : > { %v817_v63 = vld [vmem:[%s3014_s27 + $0x1220] sm:$0xff]  ;;  %2086 = vmatpush.msrb.mxu3 %v1209_v61  ;;  %v330_v61 = vld [vmem:[%s3014_s27 + $0x2e8] sm:$0xff] }
 0x1da   : > { %v953_v0 = vld [vmem:[%s3014_s27 + $0x1660] sm:$0xff]  ;;  %2027 = vmatpush.msrb.mxu0 %v817_v63  ;;  %v3780_v63 = vpop.f32.mrf.mxu2 }
 0x1db   : > { %v1065_v1 = vld [vmem:[%s3014_s27 + $0x19e0] sm:$0xff]  ;;  %2046 = vmatpush.msrb.mxu1 %v953_v0  ;;  %v466_v0 = vld [vmem:[%s3014_s27 + $0x728] sm:$0xff] }
 0x1dc   : > { %v1201_v2 = vld [vmem:[%s3014_s27 + $0x1e20] sm:$0xff]  ;;  %2068 = vmatpush.msrb.mxu2 %v1065_v1  ;;  %v578_v1 = vld [vmem:[%s3014_s27 + $0xaa8] sm:$0xff] }
 0x1dd   : > { %v809_v5 = vld [vmem:[%s3014_s27 + $0x11e0] sm:$0xff]  ;;  %2087 = vmatpush.msrb.mxu3 %v1201_v2  ;;  %v3784_v2 = vld.sshfl [vmem:[#allocation1 + $0x20] sm:$0xff pattern:$0x73625140] }
 0x1de   : > { %v945_v6 = vld [vmem:[%s3014_s27 + $0x1620] sm:$0xff]  ;;  %2028 = vmatpush.msrb.mxu0 %v809_v5  ;;  %v714_v5 = vld [vmem:[%s3014_s27 + $0xee8] sm:$0xff] }
 0x1df   : > { %v1057_v7 = vld [vmem:[%s3014_s27 + $0x19a0] sm:$0xff]  ;;  %2047 = vmatpush.msrb.mxu1 %v945_v6  ;;  %v3788_v6 = vld.sshfl [vmem:[#allocation1 + $0x38] sm:$0xff pattern:$0x73625140] }
 0x1e0   : > { %v1193_v8 = vld [vmem:[%s3014_s27 + $0x1de0] sm:$0xff]  ;;  %2069 = vmatpush.msrb.mxu2 %v1057_v7  ;;  %v322_v7 = vld [vmem:[%s3014_s27 + $0x2a8] sm:$0xff] }
 0x1e1   : > { %v801_v62 = vld [vmem:[%s3014_s27 + $0x11a0] sm:$0xff]  ;;  %2088 = vmatpush.msrb.mxu3 %v1193_v8  ;;  %v458_v8 = vld [vmem:[%s3014_s27 + $0x6e8] sm:$0xff] }
 0x1e2   : > { %v937_v9 = vld [vmem:[%s3014_s27 + $0x15e0] sm:$0xff]  ;;  %2029 = vmatpush.msrb.mxu0 %v801_v62  ;;  %v3793_v62 = vpop.f32.mrf.mxu3 }
 0x1e3   : > { %v1049_v11 = vld [vmem:[%s3014_s27 + $0x1960] sm:$0xff]  ;;  %2048 = vmatpush.msrb.mxu1 %v937_v9  ;;  %v570_v9 = vld [vmem:[%s3014_s27 + $0xa68] sm:$0xff] }
 0x1e4   : > { %v1185_v12 = vld [vmem:[%s3014_s27 + $0x1da0] sm:$0xff]  ;;  %2070 = vmatpush.msrb.mxu2 %v1049_v11  ;;  %v706_v11 = vld [vmem:[%s3014_s27 + $0xea8] sm:$0xff] }
 0x1e5   : > { %v793_v3 = vld [vmem:[%s3014_s27 + $0x1160] sm:$0xff]  ;;  %2089 = vmatpush.msrb.mxu3 %v1185_v12  ;;  %v3797_v12 = vpop.f32.mrf.mxu0 }
 0x1e6   : > { %v929_v13 = vld [vmem:[%s3014_s27 + $0x15a0] sm:$0xff]  ;;  %2030 = vmatpush.msrb.mxu0 %v793_v3 }
 0x1e7   : > { %v1041_v4 = vld [vmem:[%s3014_s27 + $0x1920] sm:$0xff]  ;;  %2049 = vmatpush.msrb.mxu1 %v929_v13  ;;  %v314_v13 = vld [vmem:[%s3014_s27 + $0x268] sm:$0xff] }
 0x1e8   : > { %v1177_v14 = vld [vmem:[%s3014_s27 + $0x1d60] sm:$0xff]  ;;  %2071 = vmatpush.msrb.mxu2 %v1041_v4  ;;  %v450_v4 = vld [vmem:[%s3014_s27 + $0x6a8] sm:$0xff] }
 0x1e9   : > { %v785_v15 = vld [vmem:[%s3014_s27 + $0x1120] sm:$0xff]  ;;  %2090 = vmatpush.msrb.mxu3 %v1177_v14  ;;  %v562_v14 = vld [vmem:[%s3014_s27 + $0xa28] sm:$0xff] }
 0x1ea   : > { %v921_v16 = vld [vmem:[%s3014_s27 + $0x1560] sm:$0xff]  ;;  %2031 = vmatpush.msrb.mxu0 %v785_v15  ;;  %v698_v15 = vld [vmem:[%s3014_s27 + $0xe68] sm:$0xff] }
 0x1eb   : > { %v1033_v17 = vld [vmem:[%s3014_s27 + $0x18e0] sm:$0xff]  ;;  %2050 = vmatpush.msrb.mxu1 %v921_v16  ;;  %v306_v16 = vld [vmem:[%s3014_s27 + $0x228] sm:$0xff] }
 0x1ec   : > { %v1169_v10 = vld [vmem:[%s3014_s27 + $0x1d20] sm:$0xff]  ;;  %2072 = vmatpush.msrb.mxu2 %v1033_v17  ;;  %v442_v17 = vld [vmem:[%s3014_s27 + $0x668] sm:$0xff] }
 0x1ed   : > { %v777_v20 = vld [vmem:[%s3014_s27 + $0x10e0] sm:$0xff]  ;;  %2091 = vmatpush.msrb.mxu3 %v1169_v10  ;;  %v3808_v10 = vpop.f32.mrf.mxu1 }
 0x1ee   : > { %v913_v21 = vld [vmem:[%s3014_s27 + $0x1520] sm:$0xff]  ;;  %2032 = vmatpush.msrb.mxu0 %v777_v20  ;;  %v554_v20 = vld [vmem:[%s3014_s27 + $0x9e8] sm:$0xff] }
 0x1ef   : > { %v1025_v22 = vld [vmem:[%s3014_s27 + $0x18a0] sm:$0xff]  ;;  %2051 = vmatpush.msrb.mxu1 %v913_v21  ;;  %v690_v21 = vld [vmem:[%s3014_s27 + $0xe28] sm:$0xff] }
 0x1f0   : > { %v1161_v18 = vld [vmem:[%s3014_s27 + $0x1ce0] sm:$0xff]  ;;  %2073 = vmatpush.msrb.mxu2 %v1025_v22  ;;  %v3812_v22 = vpop.f32.mrf.mxu2 }
 0x1f1   : > { %v769_v19 = vld [vmem:[%s3014_s27 + $0x10a0] sm:$0xff]  ;;  %2092 = vmatpush.msrb.mxu3 %v1161_v18  ;;  %v298_v18 = vld [vmem:[%s3014_s27 + $0x1e8] sm:$0xff] }
 0x1f2   : > { %v905_v26 = vld [vmem:[%s3014_s27 + $0x14e0] sm:$0xff]  ;;  %2033 = vmatpush.msrb.mxu0 %v769_v19  ;;  %v434_v19 = vld [vmem:[%s3014_s27 + $0x628] sm:$0xff] }
 0x1f3   : > { %v1017_v28 = vld [vmem:[%s3014_s27 + $0x1860] sm:$0xff]  ;;  %2052 = vmatpush.msrb.mxu1 %v905_v26  ;;  %v546_v26 = vld [vmem:[%s3014_s27 + $0x9a8] sm:$0xff] }
 0x1f4   : > { %v1153_v23 = vld [vmem:[%s3014_s27 + $0x1ca0] sm:$0xff]  ;;  %2074 = vmatpush.msrb.mxu2 %v1017_v28  ;;  %v682_v28 = vld [vmem:[%s3014_s27 + $0xde8] sm:$0xff] }
 0x1f5   : > { %v761_v25 = vld [vmem:[%s3014_s27 + $0x1060] sm:$0xff]  ;;  %2093 = vmatpush.msrb.mxu3 %v1153_v23  ;;  %v290_v23 = vld [vmem:[%s3014_s27 + $0x1a8] sm:$0xff] }
 0x1f6   : > { %v897_v24 = vld [vmem:[%s3014_s27 + $0x14a0] sm:$0xff]  ;;  %2034 = vmatpush.msrb.mxu0 %v761_v25  ;;  %v426_v25 = vld [vmem:[%s3014_s27 + $0x5e8] sm:$0xff] }
 0x1f7   : > { %v1009_v27 = vld [vmem:[%s3014_s27 + $0x1820] sm:$0xff]  ;;  %2053 = vmatpush.msrb.mxu1 %v897_v24  ;;  %v3820_v24 = vpop.f32.mrf.mxu3 }
 0x1f8   : > { %v1145_v30 = vld [vmem:[%s3014_s27 + $0x1c60] sm:$0xff]  ;;  %2075 = vmatpush.msrb.mxu2 %v1009_v27  ;;  %v538_v27 = vld [vmem:[%s3014_s27 + $0x968] sm:$0xff] }
 0x1f9   : > { %v753_v33 = vld [vmem:[%s3014_s27 + $0x1020] sm:$0xff]  ;;  %2094 = vmatpush.msrb.mxu3 %v1145_v30  ;;  %2076 = vmatmul.f32.vlgmr.msrb.gmra.mxu2 %v3776_v60  ;;  %v674_v30 = vld [vmem:[%s3014_s27 + $0xda8] sm:$0xff] }
 0x1fa   : > { %v889_v32 = vld [vmem:[%s3014_s27 + $0x1460] sm:$0xff]  ;;  %2035 = vmatpush.msrb.mxu0 %v753_v33  ;;  %2140 = vmatpush.msra.mxu2 %v618_v34  ;;  %v282_v33 = vld [vmem:[%s3014_s27 + $0x168] sm:$0xff] }
 0x1fb   : > { %v1137_v29 = vld [vmem:[%s3014_s27 + $0x1c20] sm:$0xff]  ;;  %2054 = vmatpush.msrb.mxu1 %v889_v32  ;;  %2036 = vmatmul.f32.vlgmr.msrb.gmra.mxu0 %v3784_v2  ;;  %v418_v34 = vld [vmem:[%s3014_s27 + $0x5a8] sm:$0xff] }
 0x1fc   : > { %2095 = vmatpush.msrb.mxu3 %v1137_v29  ;;  %v881_v43 = vld [vmem:[%s3014_s27 + $0x1420] sm:$0xff]  ;;  %2100 = vmatpush.msra.mxu0 %v362_v37  ;;  %v530_v32 = vld [vmem:[%s3014_s27 + $0x928] sm:$0xff]  ;;  %v3828_v37 = vpop.f32.mrf.mxu0 }
 0x1fd   : > { %2141 = vmatpush.msra.mxu2 %v610_v38  ;;  %2055 = vmatpush.msrb.mxu1 %v881_v43  ;;  %v3763_v51 = vld.sshfl [vmem:[#allocation1 + $0x8] sm:$0xff pattern:$0x73625140]  ;;  %v666_v29 = vld [vmem:[%s3014_s27 + $0xd68] sm:$0xff] }
 0x1fe   : > { %2160 = vmatpush.msra.mxu3 %v746_v40  ;;  %2101 = vmatpush.msra.mxu0 %v354_v42  ;;  %v3799_v3 = vld.sshfl [vmem:[#allocation1 + $0x28] sm:$0xff pattern:$0x73625140]  ;;  %v274_v38 = vld [vmem:[%s3014_s27 + $0x128] sm:$0xff] }
 0x1ff   : > { %1976 = vmatmul.f32.vlgmr.msra.gmra.mxu1 %v3763_v51  ;;  %2142 = vmatpush.msra.mxu2 %v602_v45  ;;  %v410_v40 = vld [vmem:[%s3014_s27 + $0x568] sm:$0xff] }
 0x200   : > { %2120 = vmatpush.msra.mxu1 %v490_v47  ;;  %2161 = vmatpush.msra.mxu3 %v738_v48  ;;  %v522_v43 = vld [vmem:[%s3014_s27 + $0x8e8] sm:$0xff]  ;;  %v3836_v48 = vpop.f32.mrf.mxu1 }
 0x201   : > { %2102 = vmatpush.msra.mxu0 %v346_v50  ;;  %2143 = vmatpush.msra.mxu2 %v594_v49  ;;  %v658_v42 = vld [vmem:[%s3014_s27 + $0xd28] sm:$0xff] }
 0x202   : > { %2121 = vmatpush.msra.mxu1 %v482_v52  ;;  %2162 = vmatpush.msra.mxu3 %v730_v53  ;;  %v266_v45 = vld [vmem:[%s3014_s27 + $0xe8] sm:$0xff]  ;;  %v3840_v52 = vpop.f32.mrf.mxu2 }
 0x203   : > { %2103 = vmatpush.msra.mxu0 %v338_v55  ;;  %2144 = vmatpush.msra.mxu2 %v586_v57  ;;  %v402_v47 = vld [vmem:[%s3014_s27 + $0x528] sm:$0xff] }
 0x204   : > { %2122 = vmatpush.msra.mxu1 %v474_v56  ;;  %2163 = vmatpush.msra.mxu3 %v722_v58  ;;  %v514_v50 = vld [vmem:[%s3014_s27 + $0x8a8] sm:$0xff] }
 0x205   : > { %2096 = vmatmul.f32.vlgmr.msrb.gmra.mxu3 %v3788_v6  ;;  %2104 = vmatpush.msra.mxu0 %v330_v61  ;;  %v650_v49 = vld [vmem:[%s3014_s27 + $0xce8] sm:$0xff] }
 0x206   : > { %2123 = vmatpush.msra.mxu1 %v466_v0  ;;  %2145 = vmatpush.msra.mxu2 %v578_v1  ;;  %v258_v53 = vld [vmem:[%s3014_s27 + $0xa8] sm:$0xff] }
 0x207   : > { %2164 = vmatpush.msra.mxu3 %v714_v5  ;;  %2056 = vmatmul.f32.vlgmr.msrb.gmra.mxu1 %v3799_v3  ;;  %v394_v55 = vld [vmem:[%s3014_s27 + $0x4e8] sm:$0xff]  ;;  %v3852_v5 = vpop.f32.mrf.mxu3 }
 0x208   : > { %2105 = vmatpush.msra.mxu0 %v322_v7  ;;  %2124 = vmatpush.msra.mxu1 %v458_v8  ;;  %v506_v56 = vld [vmem:[%s3014_s27 + $0x868] sm:$0xff] }
 0x209   : > { %2146 = vmatpush.msra.mxu2 %v570_v9  ;;  %2165 = vmatpush.msra.mxu3 %v706_v11  ;;  %v642_v57 = vld [vmem:[%s3014_s27 + $0xca8] sm:$0xff]  ;;  %v1637_v9 = vpop.f32.mrf.mxu0 }
 0x20a   : > { %2106 = vmatpush.msra.mxu0 %v314_v13  ;;  %2125 = vmatpush.msra.mxu1 %v450_v4  ;;  %v3847_v58 = vld [vmem:[%s3020_s5] sm:$0xff] }
 0x20b   : > { %2147 = vmatpush.msra.mxu2 %v562_v14  ;;  %2166 = vmatpush.msra.mxu3 %v698_v15  ;;  %v250_v61 = vld [vmem:[%s3014_s27 + $0x68] sm:$0xff]  ;;  %v1264_v1 = vperm.slane %v3847_v58, 1  ;;  %v1265_v4 = vperm.slane %v3847_v58, 2 }
 0x20c   : > { %2107 = vmatpush.msra.mxu0 %v306_v16  ;;  %2126 = vmatpush.msra.mxu1 %v442_v17  ;;  %v386_v0 = vld [vmem:[%s3014_s27 + $0x4a8] sm:$0xff] }
 0x20d   : > { %2148 = vmatpush.msra.mxu2 %v554_v20  ;;  %2167 = vmatpush.msra.mxu3 %v690_v21  ;;  %v498_v7 = vld [vmem:[%s3014_s27 + $0x828] sm:$0xff]  ;;  %v1478_v20 = vadd.f32 %v3797_v12, %v1264_v1  ;;  %v1657_v21 = vpop.f32.mrf.mxu1 }
 0x20e   : > { %2108 = vmatpush.msra.mxu0 %v298_v18  ;;  %2127 = vmatpush.msra.mxu1 %v434_v19  ;;  %v634_v8 = vld [vmem:[%s3014_s27 + $0xc68] sm:$0xff] }
 0x20f   : > { %2149 = vmatpush.msra.mxu2 %v546_v26  ;;  %2168 = vmatpush.msra.mxu3 %v682_v28  ;;  %v1130_v11 = vld [vmem:[%s3014_s27 + $0x1be8] sm:$0xff]  ;;  %v1677_v26 = vpop.f32.mrf.mxu2 }
 0x210   : > { %2109 = vmatpush.msra.mxu0 %v290_v23  ;;  %2128 = vmatpush.msra.mxu1 %v426_v25  ;;  %v242_v13 = vld [vmem:[%s3014_s27 + $0x28] sm:$0xff]  ;;  %v1263_v25 = vperm.slane %v3847_v58, 0 }
 0x211   : > { %2150 = vmatpush.msra.mxu2 %v538_v27  ;;  %2169 = vmatpush.msra.mxu3 %v674_v30  ;;  %v378_v14 = vld [vmem:[%s3014_s27 + $0x468] sm:$0xff]  ;;  %v1638_v27 = vadd.f32 %v1637_v9, %v1265_v4 }
 0x212   : > { %2110 = vmatpush.msra.mxu0 %v282_v33  ;;  %2129 = vmatpush.msra.mxu1 %v418_v34  ;;  %v626_v15 = vld [vmem:[%s3014_s27 + $0xc28] sm:$0xff] }
 0x213   : > { %2151 = vmatpush.msra.mxu2 %v530_v32  ;;  %2170 = vmatpush.msra.mxu3 %v666_v29  ;;  %v874_v16 = vld [vmem:[%s3014_s27 + $0x13e8] sm:$0xff]  ;;  %v1498_v32 = vadd.f32 %v3808_v10, %v1478_v20  ;;  %v1697_v29 = vpop.f32.mrf.mxu3 }
 0x214   : > { %2111 = vmatpush.msra.mxu0 %v274_v38  ;;  %2130 = vmatpush.msra.mxu1 %v410_v40  ;;  %v1122_v17 = vld [vmem:[%s3014_s27 + $0x1ba8] sm:$0xff] }
 0x215   : > { %2152 = vmatpush.msra.mxu2 %v522_v43  ;;  %2171 = vmatpush.msra.mxu3 %v658_v42  ;;  %v1258_v18 = vld [vmem:[%s3014_s27 + $0x1fe8] sm:$0xff] }
 0x216   : > { %2112 = vmatpush.msra.mxu0 %v266_v45  ;;  %2131 = vmatpush.msra.mxu1 %v402_v47  ;;  %v370_v19 = vld [vmem:[%s3014_s27 + $0x428] sm:$0xff]  ;;  %v1318_v45 = vadd.f32 %v3732_v31, %v1263_v25  ;;  %v1658_v47 = vadd.f32 %v1657_v21, %v1638_v27 }
 0x217   : > { %2153 = vmatpush.msra.mxu2 %v514_v50  ;;  %2172 = vmatpush.msra.mxu3 %v650_v49  ;;  %v866_v28 = vld [vmem:[%s3014_s27 + $0x13a8] sm:$0xff]  ;;  %v1717_v49 = vpop.f32.mrf.mxu0 }
 0x218   : > { %2113 = vmatpush.msra.mxu0 %v258_v53  ;;  %2132 = vmatpush.msra.mxu1 %v394_v55  ;;  %v1002_v23 = vld [vmem:[%s3014_s27 + $0x17e8] sm:$0xff]  ;;  %v1338_v1 = vadd.f32 %v3738_v35, %v1318_v45 }
 0x219   : > { %2154 = vmatpush.msra.mxu2 %v506_v56  ;;  %2173 = vmatpush.msra.mxu3 %v642_v57  ;;  %v1114_v12 = vld [vmem:[%s3014_s27 + $0x1b68] sm:$0xff]  ;;  %v1518_v56 = vadd.f32 %v3812_v22, %v1498_v32 }
 0x21a   : > { %2114 = vmatpush.msra.mxu0 %v250_v61  ;;  %2133 = vmatpush.msra.mxu1 %v386_v0  ;;  %v1250_v30 = vld [vmem:[%s3014_s27 + $0x1fa8] sm:$0xff]  ;;  %v1358_v21 = vadd.f32 %v3744_v39, %v1338_v1 }
 0x21b   : > { %2155 = vmatpush.msra.mxu2 %v498_v7  ;;  %2174 = vmatpush.msra.mxu3 %v634_v8  ;;  %v858_v33 = vld [vmem:[%s3014_s27 + $0x1368] sm:$0xff]  ;;  %v1678_v7 = vadd.f32 %v1677_v26, %v1658_v47  ;;  %v3889_v8 = vpop.f32.mrf.mxu1 }
 0x21c   : > { %2115 = vmatpush.msra.mxu0 %v242_v13  ;;  %2134 = vmatpush.msra.mxu1 %v378_v14  ;;  %v994_v34 = vld [vmem:[%s3014_s27 + $0x17a8] sm:$0xff]  ;;  %v1538_v14 = vadd.f32 %v3820_v24, %v1518_v56 }
 0x21d   : > { %2220 = vmatpush.msrb.mxu2 %v1130_v11  ;;  %2175 = vmatpush.msra.mxu3 %v626_v15  ;;  %v1106_v38 = vld [vmem:[%s3014_s27 + $0x1b28] sm:$0xff]  ;;  %v3893_v11 = vpop.f32.mrf.mxu2 }
 0x21e   : > { %2180 = vmatpush.msrb.mxu0 %v874_v16  ;;  %2135 = vmatpush.msra.mxu1 %v370_v19  ;;  %v1242_v40 = vld [vmem:[%s3014_s27 + $0x1f68] sm:$0xff]  ;;  %v1266_v16 = vperm.slane %v3847_v58, 3  ;;  %v3904_v19 = vpop.f32.mrf.mxu3  ;;  %v1558_v25 = vadd.f32 %v3828_v37, %v1538_v14 }
 0x21f   : > { %2221 = vmatpush.msrb.mxu2 %v1122_v17  ;;  %2240 = vmatpush.msrb.mxu3 %v1258_v18  ;;  %v850_v43 = vld [vmem:[%s3014_s27 + $0x1328] sm:$0xff]  ;;  %v1698_v18 = vadd.f32 %v1697_v29, %v1678_v7 }
 0x220   : > { %2181 = vmatpush.msrb.mxu0 %v866_v28  ;;  %2200 = vmatpush.msrb.mxu1 %v1002_v23  ;;  %v986_v42 = vld [vmem:[%s3014_s27 + $0x1768] sm:$0xff]  ;;  %v1797_v23 = vpop.f32.mrf.mxu0  ;;  %v1578_v47 = vadd.f32 %v3836_v48, %v1558_v25  ;;  %v363_v25 = vld [vmem:[%s3014_s27 + $0x3f0] sm:$0xff] }
 0x221   : > { %2222 = vmatpush.msrb.mxu2 %v1114_v12  ;;  %2241 = vmatpush.msrb.mxu3 %v1250_v30  ;;  %v1098_v10 = vld [vmem:[%s3014_s27 + $0x1ae8] sm:$0xff]  ;;  %v1798_v12 = vadd.f32 %v1797_v23, %v1266_v16  ;;  %v1718_v32 = vadd.f32 %v1717_v49, %v1698_v18 }
 0x222   : > { %2182 = vmatpush.msrb.mxu0 %v858_v33  ;;  %2201 = vmatpush.msrb.mxu1 %v994_v34  ;;  %v1234_v50 = vld [vmem:[%s3014_s27 + $0x1f28] sm:$0xff]  ;;  %v1378_v34 = vadd.f32 %v3757_v46, %v1358_v21 }
 0x223   : > { %2223 = vmatpush.msrb.mxu2 %v1106_v38  ;;  %2242 = vmatpush.msrb.mxu3 %v1242_v40  ;;  %v842_v53 = vld [vmem:[%s3014_s27 + $0x12e8] sm:$0xff]  ;;  %v1817_v38 = vpop.f32.mrf.mxu1 }
 0x224   : > { %v978_v55 = vld [vmem:[%s3014_s27 + $0x1728] sm:$0xff]  ;;  %2183 = vmatpush.msrb.mxu0 %v850_v43  ;;  %2202 = vmatpush.msrb.mxu1 %v986_v42  ;;  %v1818_v42 = vadd.f32 %v1817_v38, %v1798_v12  ;;  %v747_v12 = vld [vmem:[%s3014_s27 + $0xff0] sm:$0xff] }
 0x225   : > { %v1090_v57 = vld [vmem:[%s3014_s27 + $0x1aa8] sm:$0xff]  ;;  %2224 = vmatpush.msrb.mxu2 %v1098_v10  ;;  %2243 = vmatpush.msrb.mxu3 %v1234_v50  ;;  %v1837_v45 = vpop.f32.mrf.mxu2 }
 0x226   : > { %v1226_v31 = vld [vmem:[%s3014_s27 + $0x1ee8] sm:$0xff]  ;;  %2184 = vmatpush.msrb.mxu0 %v842_v53  ;;  %2203 = vmatpush.msrb.mxu1 %v978_v55  ;;  %v1838_v49 = vadd.f32 %v1837_v45, %v1818_v42  ;;  %v1398_v53 = vadd.f32 %v3768_v54, %v1378_v34  ;;  %v1738_v55 = vadd.f32 %v3889_v8, %v1718_v32  ;;  %v355_v34 = vld [vmem:[%s3014_s27 + $0x3b0] sm:$0xff] }
 0x227   : > { %v834_v61 = vld [vmem:[%s3014_s27 + $0x12a8] sm:$0xff]  ;;  %2225 = vmatpush.msrb.mxu2 %v1090_v57  ;;  %2244 = vmatpush.msrb.mxu3 %v1226_v31  ;;  %v1857_v57 = vpop.f32.mrf.mxu3  ;;  %v483_v42 = vld [vmem:[%s3014_s27 + $0x7b0] sm:$0xff] }
 0x228   : > { %v970_v0 = vld [vmem:[%s3014_s27 + $0x16e8] sm:$0xff]  ;;  %2185 = vmatpush.msrb.mxu0 %v834_v61  ;;  %v1858_v61 = vadd.f32 %v1857_v57, %v1838_v49  ;;  %2156 = vmatmul.f32.vlgmr.msra.gmra.mxu2 %v3740_v36  ;;  %v1877_v8 = vpop.f32.mrf.mxu0  ;;  %v731_v45 = vld [vmem:[%s3014_s27 + $0xf70] sm:$0xff] }
 0x229   : > { %v1082_v22 = vld [vmem:[%s3014_s27 + $0x1a68] sm:$0xff]  ;;  %2204 = vmatpush.msrb.mxu1 %v970_v0  ;;  %v1598_v0 = vadd.f32 %v3840_v52, %v1578_v47  ;;  %v1758_v52 = vadd.f32 %v3893_v11, %v1738_v55  ;;  %2116 = vmatmul.f32.vlgmr.msra.gmra.mxu0 %v3748_v41  ;;  %v723_v49 = vld [vmem:[%s3014_s27 + $0xf30] sm:$0xff] }
 0x22a   : > { %v1218_v9 = vld [vmem:[%s3014_s27 + $0x1ea8] sm:$0xff]  ;;  %2226 = vmatpush.msrb.mxu2 %v1082_v22  ;;  %v1418_v22 = vadd.f32 %v3774_v59, %v1398_v53  ;;  %2176 = vmatmul.f32.vlgmr.msra.gmra.mxu3 %v3753_v44  ;;  %v331_v53 = vld [vmem:[%s3014_s27 + $0x2f0] sm:$0xff] }
 0x22b   : > { %v826_v13 = vld [vmem:[%s3014_s27 + $0x1268] sm:$0xff]  ;;  %2245 = vmatpush.msrb.mxu3 %v1218_v9  ;;  %v1878_v9 = vadd.f32 %v1877_v8, %v1858_v61  ;;  %v1618_v14 = vadd.f32 %v3852_v5, %v1598_v0  ;;  %2136 = vmatmul.f32.vlgmr.msra.gmra.mxu1 %v3763_v51  ;;  %v1897_v44 = vpop.f32.mrf.mxu1  ;;  %v1778_v5 = vadd.f32 %v3904_v19, %v1758_v52  ;;  %v579_v55 = vld [vmem:[%s3014_s27 + $0xab0] sm:$0xff] }
 0x22c   : > { %v962_v4 = vld [vmem:[%s3014_s27 + $0x16a8] sm:$0xff]  ;;  %2186 = vmatpush.msrb.mxu0 %v826_v13  ;;  %v1438_v16 = vadd.f32 %v3780_v63, %v1418_v22  ;;  %v323_v57 = vld [vmem:[%s3014_s27 + $0x2b0] sm:$0xff] }
 0x22d   : > { %v1074_v35 = vld [vmem:[%s3014_s27 + $0x1a28] sm:$0xff]  ;;  %2205 = vmatpush.msrb.mxu1 %v962_v4  ;;  %v1898_v21 = vadd.f32 %v1897_v44, %v1878_v9  ;;  %v2581_v18 = vmax.f32 %v1618_v14, 0.0  ;;  %v2582_v23 = vmax.f32 %v1778_v5, 0.0  ;;  %v459_v61 = vld [vmem:[%s3014_s27 + $0x6f0] sm:$0xff] }
 0x22e   : > { %v1210_v15 = vld [vmem:[%s3014_s27 + $0x1e68] sm:$0xff]  ;;  %2227 = vmatpush.msrb.mxu2 %v1074_v35  ;;  %v707_v0 = vld [vmem:[%s3014_s27 + $0xeb0] sm:$0xff] }
 0x22f   : > { %v818_v17 = vld [vmem:[%s3014_s27 + $0x1228] sm:$0xff]  ;;  %2246 = vmatpush.msrb.mxu3 %v1210_v15  ;;  %v1917_v15 = vpop.f32.mrf.mxu2  ;;  %v1937_v19 = vpop.f32.mrf.mxu3  ;;  %v699_v8 = vld [vmem:[%s3014_s27 + $0xe70] sm:$0xff] }
 0x230   : > { %v954_v20 = vld [vmem:[%s3014_s27 + $0x1668] sm:$0xff]  ;;  %2187 = vmatpush.msrb.mxu0 %v818_v17  ;;  %v307_v22 = vld [vmem:[%s3014_s27 + $0x230] sm:$0xff] }
 0x231   : > { %v1066_v24 = vld [vmem:[%s3014_s27 + $0x19e8] sm:$0xff]  ;;  %2206 = vmatpush.msrb.mxu1 %v954_v20  ;;  %v555_v52 = vld [vmem:[%s3014_s27 + $0x9f0] sm:$0xff] }
 0x232   : > { %v1202_v26 = vld [vmem:[%s3014_s27 + $0x1e28] sm:$0xff]  ;;  %2228 = vmatpush.msrb.mxu2 %v1066_v24  ;;  %v619_v24 = vld [vmem:[%s3014_s27 + $0xbf0] sm:$0xff] }
 0x233   : > { %v810_v58 = vld [vmem:[%s3014_s27 + $0x11e8] sm:$0xff]  ;;  %2247 = vmatpush.msrb.mxu3 %v1202_v26  ;;  %v1918_v26 = vadd.f32 %v1917_v15, %v1898_v21  ;;  %v691_v9 = vld [vmem:[%s3014_s27 + $0xe30] sm:$0xff] }
 0x234   : > { %v946_v28 = vld [vmem:[%s3014_s27 + $0x1628] sm:$0xff]  ;;  %2188 = vmatpush.msrb.mxu0 %v810_v58  ;;  %v435_v14 = vld [vmem:[%s3014_s27 + $0x630] sm:$0xff] }
 0x235   : > { %v1058_v39 = vld [vmem:[%s3014_s27 + $0x19a8] sm:$0xff]  ;;  %2207 = vmatpush.msrb.mxu1 %v946_v28  ;;  %v1458_v28 = vadd.f32 %v3793_v62, %v1438_v16  ;;  %v675_v44 = vld [vmem:[%s3014_s27 + $0xdb0] sm:$0xff] }
 0x236   : > { %v1194_v27 = vld [vmem:[%s3014_s27 + $0x1de8] sm:$0xff]  ;;  %2229 = vmatpush.msrb.mxu2 %v1058_v39  ;;  %v1938_v39 = vadd.f32 %v1937_v19, %v1918_v26  ;;  %v283_v15 = vld [vmem:[%s3014_s27 + $0x170] sm:$0xff] }
 0x237   : > { %v802_v30 = vld [vmem:[%s3014_s27 + $0x11a8] sm:$0xff]  ;;  %2248 = vmatpush.msrb.mxu3 %v1194_v27  ;;  %v611_v27 = vld [vmem:[%s3014_s27 + $0xbb0] sm:$0xff]  ;;  %v2580_v32 = vmax.f32 %v1458_v28, 0.0 }
 0x238   : > { %v938_v33 = vld [vmem:[%s3014_s27 + $0x15e8] sm:$0xff]  ;;  %2189 = vmatpush.msrb.mxu0 %v802_v30  ;;  %v2596_v30 = vrot.slane %v2581_v18, 6  ;;  %v2583_v62 = vmax.f32 %v1938_v39, 0.0  ;;  %v531_v16 = vld [vmem:[%s3014_s27 + $0x930] sm:$0xff] }
 0x239   : > { %v1050_v29 = vld [vmem:[%s3014_s27 + $0x1968] sm:$0xff]  ;;  %2208 = vmatpush.msrb.mxu1 %v938_v33  ;;  %v419_v5 = vld [vmem:[%s3014_s27 + $0x5b0] sm:$0xff] }
 0x23a   : > { %v1186_v37 = vld [vmem:[%s3014_s27 + $0x1da8] sm:$0xff]  ;;  %2230 = vmatpush.msrb.mxu2 %v1050_v29  ;;  %v2597_v29 = vrot.slane %v2582_v23, 4  ;;  %v2598_v38 = vrot.slane %v2583_v62, 2  ;;  %v523_v21 = vld [vmem:[%s3014_s27 + $0x8f0] sm:$0xff] }
 0x23b   : > { %v794_v40 = vld [vmem:[%s3014_s27 + $0x1168] sm:$0xff]  ;;  %2249 = vmatpush.msrb.mxu3 %v1186_v37  ;;  %v491_v37 = vld [vmem:[%s3014_s27 + $0x7f0] sm:$0xff] }
 0x23c   : > { %v930_v43 = vld [vmem:[%s3014_s27 + $0x15a8] sm:$0xff]  ;;  %2190 = vmatpush.msrb.mxu0 %v794_v40  ;;  %v347_v40 = vld [vmem:[%s3014_s27 + $0x370] sm:$0xff]  ;;  %v2605_v47 = vsel %vm2604_vm1, %v2597_v29, %v2598_v38 }
 0x23d   : > { %v1042_v46 = vld [vmem:[%s3014_s27 + $0x1928] sm:$0xff]  ;;  %2209 = vmatpush.msrb.mxu1 %v930_v43  ;;  %v2603_v43 = vsel %vm2602_vm0, %v2580_v32, %v2596_v30  ;;  %v659_v18 = vld [vmem:[%s3014_s27 + $0xd30] sm:$0xff] }
 0x23e   : > { %v1178_v10 = vld [vmem:[%s3014_s27 + $0x1d68] sm:$0xff]  ;;  %2231 = vmatpush.msrb.mxu2 %v1042_v46  ;;  %v339_v46 = vld [vmem:[%s3014_s27 + $0x330] sm:$0xff] }
 0x23f   : > { %v786_v50 = vld [vmem:[%s3014_s27 + $0x1128] sm:$0xff]  ;;  %2250 = vmatpush.msrb.mxu3 %v1178_v10  ;;  %v587_v10 = vld [vmem:[%s3014_s27 + $0xaf0] sm:$0xff] }
 0x240   : > { %v922_v56 = vld [vmem:[%s3014_s27 + $0x1568] sm:$0xff]  ;;  %2191 = vmatpush.msrb.mxu0 %v786_v50  ;;  %v2607_v50 = vsel %vm2606_vm2, %v2603_v43, %v2605_v47  ;;  %v403_v26 = vld [vmem:[%s3014_s27 + $0x530] sm:$0xff] }
 0x241   : > { %v1034_v48 = vld [vmem:[%s3014_s27 + $0x18e8] sm:$0xff]  ;;  %2210 = vmatpush.msrb.mxu1 %v922_v56  ;;  %2613 = vst [vmem:[%s3983_s11] sm:$0xff] %v2607_v50  ;;  %v467_v56 = vld [vmem:[%s3014_s27 + $0x730] sm:$0xff] }
 0x242   : > { %v1170_v31 = vld [vmem:[%s3014_s27 + $0x1d28] sm:$0xff]  ;;  %2232 = vmatpush.msrb.mxu2 %v1034_v48  ;;  %v715_v48 = vld [vmem:[%s3014_s27 + $0xef0] sm:$0xff] }
 0x243   : > { %v778_v54 = vld [vmem:[%s3014_s27 + $0x10e8] sm:$0xff]  ;;  %2251 = vmatpush.msrb.mxu3 %v1170_v31  ;;  %v571_v31 = vld [vmem:[%s3014_s27 + $0xa70] sm:$0xff] }
 0x244   : > { %v914_v1 = vld [vmem:[%s3014_s27 + $0x1528] sm:$0xff]  ;;  %2192 = vmatpush.msrb.mxu0 %v778_v54  ;;  %v315_v54 = vld [vmem:[%s3014_s27 + $0x270] sm:$0xff] }
 0x245   : > { %v1026_v7 = vld [vmem:[%s3014_s27 + $0x18a8] sm:$0xff]  ;;  %2211 = vmatpush.msrb.mxu1 %v914_v1  ;;  %v563_v1 = vld [vmem:[%s3014_s27 + $0xa30] sm:$0xff] }
 0x246   : > { %v1162_v36 = vld [vmem:[%s3014_s27 + $0x1ce8] sm:$0xff]  ;;  %2233 = vmatpush.msrb.mxu2 %v1026_v7  ;;  %v451_v7 = vld [vmem:[%s3014_s27 + $0x6b0] sm:$0xff] }
 0x247   : > { %v770_v13 = vld [vmem:[%s3014_s27 + $0x10a8] sm:$0xff]  ;;  %2252 = vmatpush.msrb.mxu3 %v1162_v36  ;;  %v443_v36 = vld [vmem:[%s3014_s27 + $0x670] sm:$0xff] }
 0x248   : > { %v906_v4 = vld [vmem:[%s3014_s27 + $0x14e8] sm:$0xff]  ;;  %2193 = vmatpush.msrb.mxu0 %v770_v13  ;;  %v299_v13 = vld [vmem:[%s3014_s27 + $0x1f0] sm:$0xff] }
 0x249   : > { %v1018_v59 = vld [vmem:[%s3014_s27 + $0x1868] sm:$0xff]  ;;  %2212 = vmatpush.msrb.mxu1 %v906_v4  ;;  %v547_v4 = vld [vmem:[%s3014_s27 + $0x9b0] sm:$0xff] }
 0x24a   : > { %v1154_v11 = vld [vmem:[%s3014_s27 + $0x1ca8] sm:$0xff]  ;;  %2234 = vmatpush.msrb.mxu2 %v1018_v59  ;;  %v683_v59 = vld [vmem:[%s3014_s27 + $0xdf0] sm:$0xff] }
 0x24b   : > { %v762_v41 = vld [vmem:[%s3014_s27 + $0x1068] sm:$0xff]  ;;  %2253 = vmatpush.msrb.mxu3 %v1154_v11  ;;  %v291_v11 = vld [vmem:[%s3014_s27 + $0x1b0] sm:$0xff] }
 0x24c   : > { %v898_v35 = vld [vmem:[%s3014_s27 + $0x14a8] sm:$0xff]  ;;  %2194 = vmatpush.msrb.mxu0 %v762_v41  ;;  %v539_v41 = vld [vmem:[%s3014_s27 + $0x970] sm:$0xff] }
 0x24d   : > { %v1010_v17 = vld [vmem:[%s3014_s27 + $0x1828] sm:$0xff]  ;;  %2213 = vmatpush.msrb.mxu1 %v898_v35  ;;  %v427_v35 = vld [vmem:[%s3014_s27 + $0x5f0] sm:$0xff] }
 0x24e   : > { %v1146_v20 = vld [vmem:[%s3014_s27 + $0x1c68] sm:$0xff]  ;;  %2235 = vmatpush.msrb.mxu2 %v1010_v17  ;;  %v667_v17 = vld [vmem:[%s3014_s27 + $0xd70] sm:$0xff] }
 0x24f   : > { %v754_v51 = vld [vmem:[%s3014_s27 + $0x1028] sm:$0xff]  ;;  %2254 = vmatpush.msrb.mxu3 %v1146_v20  ;;  %2236 = vmatmul.f32.vlgmr.msrb.gmra.mxu2 %v3776_v60  ;;  %v603_v60 = vld [vmem:[%s3014_s27 + $0xb70] sm:$0xff] }
 0x250   : > { %v890_v63 = vld [vmem:[%s3014_s27 + $0x1468] sm:$0xff]  ;;  %2195 = vmatpush.msrb.mxu0 %v754_v51  ;;  %2300 = vmatpush.msra.mxu2 %v619_v24  ;;  %v275_v20 = vld [vmem:[%s3014_s27 + $0x130] sm:$0xff] }
 0x251   : > { %v1138_v58 = vld [vmem:[%s3014_s27 + $0x1c28] sm:$0xff]  ;;  %2214 = vmatpush.msrb.mxu1 %v890_v63  ;;  %2196 = vmatmul.f32.vlgmr.msrb.gmra.mxu0 %v3784_v2  ;;  %v739_v2 = vld [vmem:[%s3014_s27 + $0xfb0] sm:$0xff] }
 0x252   : > { %2255 = vmatpush.msrb.mxu3 %v1138_v58  ;;  %v882_v33 = vld [vmem:[%s3014_s27 + $0x1428] sm:$0xff]  ;;  %2260 = vmatpush.msra.mxu0 %v363_v25  ;;  %v411_v51 = vld [vmem:[%s3014_s27 + $0x570] sm:$0xff] }
 0x253   : > { %2256 = vmatmul.f32.vlgmr.msrb.gmra.mxu3 %v3788_v6  ;;  %2301 = vmatpush.msra.mxu2 %v611_v27  ;;  %v595_v6 = vld [vmem:[%s3014_s27 + $0xb30] sm:$0xff] }
 0x254   : > { %2320 = vmatpush.msra.mxu3 %v747_v12  ;;  %2215 = vmatpush.msrb.mxu1 %v882_v33  ;;  %v267_v24 = vld [vmem:[%s3014_s27 + $0xf0] sm:$0xff] }
 0x255   : > { %2261 = vmatpush.msra.mxu0 %v355_v34  ;;  %2216 = vmatmul.f32.vlgmr.msrb.gmra.mxu1 %v3799_v3  ;;  %v475_v3 = vld [vmem:[%s3014_s27 + $0x770] sm:$0xff] }
 0x256   : > { %2302 = vmatpush.msra.mxu2 %v603_v60  ;;  %2280 = vmatpush.msra.mxu1 %v491_v37  ;;  %v515_v63 = vld [vmem:[%s3014_s27 + $0x8b0] sm:$0xff] }
 0x257   : > { %2321 = vmatpush.msra.mxu3 %v739_v2  ;;  %2262 = vmatpush.msra.mxu0 %v347_v40  ;;  %v651_v19 = vld [vmem:[%s3014_s27 + $0xcf0] sm:$0xff] }
 0x258   : > { %2303 = vmatpush.msra.mxu2 %v595_v6  ;;  %2281 = vmatpush.msra.mxu1 %v483_v42  ;;  %v259_v58 = vld [vmem:[%s3014_s27 + $0xb0] sm:$0xff] }
 0x259   : > { %2322 = vmatpush.msra.mxu3 %v731_v45  ;;  %2263 = vmatpush.msra.mxu0 %v339_v46  ;;  %v507_v28 = vld [vmem:[%s3014_s27 + $0x870] sm:$0xff] }
 0x25a   : > { %2304 = vmatpush.msra.mxu2 %v587_v10  ;;  %2282 = vmatpush.msra.mxu1 %v475_v3  ;;  %v395_v23 = vld [vmem:[%s3014_s27 + $0x4f0] sm:$0xff] }
 0x25b   : > { %2323 = vmatpush.msra.mxu3 %v723_v49  ;;  %2264 = vmatpush.msra.mxu0 %v331_v53  ;;  %v643_v25 = vld [vmem:[%s3014_s27 + $0xcb0] sm:$0xff] }
 0x25c   : > { %2305 = vmatpush.msra.mxu2 %v579_v55  ;;  %2283 = vmatpush.msra.mxu1 %v467_v56  ;;  %v251_v39 = vld [vmem:[%s3014_s27 + $0x70] sm:$0xff] }
 0x25d   : > { %2324 = vmatpush.msra.mxu3 %v715_v48  ;;  %2265 = vmatpush.msra.mxu0 %v323_v57  ;;  %v499_v27 = vld [vmem:[%s3014_s27 + $0x830] sm:$0xff] }
 0x25e   : > { %2306 = vmatpush.msra.mxu2 %v571_v31  ;;  %2284 = vmatpush.msra.mxu1 %v459_v61  ;;  %v387_v12 = vld [vmem:[%s3014_s27 + $0x4b0] sm:$0xff] }
 0x25f   : > { %2325 = vmatpush.msra.mxu3 %v707_v0  ;;  %2266 = vmatpush.msra.mxu0 %v315_v54  ;;  %v635_v30 = vld [vmem:[%s3014_s27 + $0xc70] sm:$0xff] }
 0x260   : > { %2307 = vmatpush.msra.mxu2 %v563_v1  ;;  %2285 = vmatpush.msra.mxu1 %v451_v7  ;;  %v1131_v33 = vld [vmem:[%s3014_s27 + $0x1bf0] sm:$0xff] }
 0x261   : > { %2326 = vmatpush.msra.mxu3 %v699_v8  ;;  %2267 = vmatpush.msra.mxu0 %v307_v22  ;;  %v243_v34 = vld [vmem:[%s3014_s27 + $0x30] sm:$0xff] }
 0x262   : > { %2308 = vmatpush.msra.mxu2 %v555_v52  ;;  %2286 = vmatpush.msra.mxu1 %v443_v36  ;;  %v379_v62 = vld [vmem:[%s3014_s27 + $0x470] sm:$0xff] }
 0x263   : > { %2327 = vmatpush.msra.mxu3 %v691_v9  ;;  %2268 = vmatpush.msra.mxu0 %v299_v13  ;;  %v627_v60 = vld [vmem:[%s3014_s27 + $0xc30] sm:$0xff] }
 0x264   : > { %2309 = vmatpush.msra.mxu2 %v547_v4  ;;  %2287 = vmatpush.msra.mxu1 %v435_v14  ;;  %v875_v32 = vld [vmem:[%s3014_s27 + $0x13f0] sm:$0xff] }
 0x265   : > { %2328 = vmatpush.msra.mxu3 %v683_v59  ;;  %2269 = vmatpush.msra.mxu0 %v291_v11  ;;  %v1123_v29 = vld [vmem:[%s3014_s27 + $0x1bb0] sm:$0xff] }
 0x266   : > { %2310 = vmatpush.msra.mxu2 %v539_v41  ;;  %2288 = vmatpush.msra.mxu1 %v427_v35  ;;  %v1259_v37 = vld [vmem:[%s3014_s27 + $0x1ff0] sm:$0xff] }
 0x267   : > { %2329 = vmatpush.msra.mxu3 %v675_v44  ;;  %2270 = vmatpush.msra.mxu0 %v283_v15  ;;  %v371_v2 = vld [vmem:[%s3014_s27 + $0x430] sm:$0xff] }
 0x268   : > { %2311 = vmatpush.msra.mxu2 %v531_v16  ;;  %2289 = vmatpush.msra.mxu1 %v419_v5  ;;  %v867_v38 = vld [vmem:[%s3014_s27 + $0x13b0] sm:$0xff] }
 0x269   : > { %2330 = vmatpush.msra.mxu3 %v667_v17  ;;  %2271 = vmatpush.msra.mxu0 %v275_v20  ;;  %v1003_v40 = vld [vmem:[%s3014_s27 + $0x17f0] sm:$0xff] }
 0x26a   : > { %2312 = vmatpush.msra.mxu2 %v523_v21  ;;  %2290 = vmatpush.msra.mxu1 %v411_v51  ;;  %v1115_v6 = vld [vmem:[%s3014_s27 + $0x1b70] sm:$0xff] }
 0x26b   : > { %2331 = vmatpush.msra.mxu3 %v659_v18  ;;  %2272 = vmatpush.msra.mxu0 %v267_v24  ;;  %v1251_v43 = vld [vmem:[%s3014_s27 + $0x1fb0] sm:$0xff] }
 0x26c   : > { %2313 = vmatpush.msra.mxu2 %v515_v63  ;;  %2291 = vmatpush.msra.mxu1 %v403_v26  ;;  %v859_v42 = vld [vmem:[%s3014_s27 + $0x1370] sm:$0xff] }
 0x26d   : > { %2332 = vmatpush.msra.mxu3 %v651_v19  ;;  %2273 = vmatpush.msra.mxu0 %v259_v58  ;;  %v995_v45 = vld [vmem:[%s3014_s27 + $0x17b0] sm:$0xff] }
 0x26e   : > { %2314 = vmatpush.msra.mxu2 %v507_v28  ;;  %2292 = vmatpush.msra.mxu1 %v395_v23  ;;  %v1107_v47 = vld [vmem:[%s3014_s27 + $0x1b30] sm:$0xff] }
 0x26f   : > { %2333 = vmatpush.msra.mxu3 %v643_v25  ;;  %2274 = vmatpush.msra.mxu0 %v251_v39  ;;  %v1243_v46 = vld [vmem:[%s3014_s27 + $0x1f70] sm:$0xff] }
 0x270   : > { %2315 = vmatpush.msra.mxu2 %v499_v27  ;;  %2293 = vmatpush.msra.mxu1 %v387_v12  ;;  %v851_v10 = vld [vmem:[%s3014_s27 + $0x1330] sm:$0xff] }
 0x271   : > { %2334 = vmatpush.msra.mxu3 %v635_v30  ;;  %2275 = vmatpush.msra.mxu0 %v243_v34  ;;  %v987_v50 = vld [vmem:[%s3014_s27 + $0x1770] sm:$0xff]  ;;  %v620_v34 = vld [vmem:[%s3014_s27 + $0xbf8] sm:$0xff] }
 0x272   : > { %2380 = vmatpush.msrb.mxu2 %v1131_v33  ;;  %2294 = vmatpush.msra.mxu1 %v379_v62  ;;  %v1099_v3 = vld [vmem:[%s3014_s27 + $0x1af0] sm:$0xff] }
 0x273   : > { %2335 = vmatpush.msra.mxu3 %v627_v60  ;;  %2340 = vmatpush.msrb.mxu0 %v875_v32  ;;  %v1235_v49 = vld [vmem:[%s3014_s27 + $0x1f30] sm:$0xff]  ;;  %v4108_v32 = vld.sshfl [vmem:[#allocation1 + $0x10] sm:$0xff pattern:$0x73625140] }
 0x274   : > { %2381 = vmatpush.msrb.mxu2 %v1123_v29  ;;  %2295 = vmatpush.msra.mxu1 %v371_v2  ;;  %v843_v53 = vld [vmem:[%s3014_s27 + $0x12f0] sm:$0xff]  ;;  %v364_v29 = vld [vmem:[%s3014_s27 + $0x3f8] sm:$0xff] }
 0x275   : > { %2400 = vmatpush.msrb.mxu3 %v1259_v37  ;;  %2341 = vmatpush.msrb.mxu0 %v867_v38  ;;  %v979_v55 = vld [vmem:[%s3014_s27 + $0x1730] sm:$0xff]  ;;  %v612_v37 = vld [vmem:[%s3014_s27 + $0xbb8] sm:$0xff] }
 0x276   : > { %2360 = vmatpush.msrb.mxu1 %v1003_v40  ;;  %2382 = vmatpush.msrb.mxu2 %v1115_v6  ;;  %v1091_v56 = vld [vmem:[%s3014_s27 + $0x1ab0] sm:$0xff]  ;;  %v748_v2 = vld [vmem:[%s3014_s27 + $0xff8] sm:$0xff] }
 0x277   : > { %2401 = vmatpush.msrb.mxu3 %v1251_v43  ;;  %2342 = vmatpush.msrb.mxu0 %v859_v42  ;;  %v1227_v48 = vld [vmem:[%s3014_s27 + $0x1ef0] sm:$0xff]  ;;  %v4114_v38 = vld.sshfl [vmem:[#allocation1] sm:$0xff pattern:$0x73625140] }
 0x278   : > { %2361 = vmatpush.msrb.mxu1 %v995_v45  ;;  %2383 = vmatpush.msrb.mxu2 %v1107_v47  ;;  %v835_v57 = vld [vmem:[%s3014_s27 + $0x12b0] sm:$0xff]  ;;  %v356_v6 = vld [vmem:[%s3014_s27 + $0x3b8] sm:$0xff] }
 0x279   : > { %2402 = vmatpush.msrb.mxu3 %v1243_v46  ;;  %2343 = vmatpush.msrb.mxu0 %v851_v10  ;;  %v971_v31 = vld [vmem:[%s3014_s27 + $0x16f0] sm:$0xff]  ;;  %v604_v42 = vld [vmem:[%s3014_s27 + $0xb78] sm:$0xff] }
 0x27a   : > { %2362 = vmatpush.msrb.mxu1 %v987_v50  ;;  %2384 = vmatpush.msrb.mxu2 %v1099_v3  ;;  %v1083_v61 = vld [vmem:[%s3014_s27 + $0x1a70] sm:$0xff]  ;;  %v492_v45 = vld [vmem:[%s3014_s27 + $0x7f8] sm:$0xff]  ;;  %v4127_v50 = vld.sshfl [vmem:[#allocation1 + $0x8] sm:$0xff pattern:$0x73625140] }
 0x27b   : > { %2403 = vmatpush.msrb.mxu3 %v1235_v49  ;;  %2344 = vmatpush.msrb.mxu0 %v843_v53  ;;  %v1219_v0 = vld [vmem:[%s3014_s27 + $0x1eb0] sm:$0xff]  ;;  %v740_v47 = vld [vmem:[%s3014_s27 + $0xfb8] sm:$0xff] }
 0x27c   : > { %2363 = vmatpush.msrb.mxu1 %v979_v55  ;;  %2385 = vmatpush.msrb.mxu2 %v1091_v56  ;;  %v827_v54 = vld [vmem:[%s3014_s27 + $0x1270] sm:$0xff]  ;;  %v348_v46 = vld [vmem:[%s3014_s27 + $0x378] sm:$0xff] }
 0x27d   : > { %2404 = vmatpush.msrb.mxu3 %v1227_v48  ;;  %v963_v1 = vld [vmem:[%s3014_s27 + $0x16b0] sm:$0xff]  ;;  %2345 = vmatpush.msrb.mxu0 %v835_v57  ;;  %v596_v10 = vld [vmem:[%s3014_s27 + $0xb38] sm:$0xff]  ;;  %v4136_v57 = vld.sshfl [vmem:[#allocation1 + $0x30] sm:$0xff pattern:$0x73625140] }
 0x27e   : > { %2364 = vmatpush.msrb.mxu1 %v971_v31  ;;  %v1075_v7 = vld [vmem:[%s3014_s27 + $0x1a30] sm:$0xff]  ;;  %2386 = vmatpush.msrb.mxu2 %v1083_v61  ;;  %v484_v3 = vld [vmem:[%s3014_s27 + $0x7b8] sm:$0xff] }
 0x27f   : > { %v1211_v8 = vld [vmem:[%s3014_s27 + $0x1e70] sm:$0xff]  ;;  %2405 = vmatpush.msrb.mxu3 %v1219_v0  ;;  %2346 = vmatpush.msrb.mxu0 %v827_v54  ;;  %v732_v49 = vld [vmem:[%s3014_s27 + $0xf78] sm:$0xff] }
 0x280   : > { %v819_v22 = vld [vmem:[%s3014_s27 + $0x1230] sm:$0xff]  ;;  %2365 = vmatpush.msrb.mxu1 %v963_v1  ;;  %2387 = vmatpush.msrb.mxu2 %v1075_v7  ;;  %v340_v53 = vld [vmem:[%s3014_s27 + $0x338] sm:$0xff] }
 0x281   : > { %v955_v52 = vld [vmem:[%s3014_s27 + $0x1670] sm:$0xff]  ;;  %2406 = vmatpush.msrb.mxu3 %v1211_v8  ;;  %2347 = vmatpush.msrb.mxu0 %v819_v22  ;;  %v476_v55 = vld [vmem:[%s3014_s27 + $0x778] sm:$0xff] }
 0x282   : > { %v1067_v36 = vld [vmem:[%s3014_s27 + $0x19f0] sm:$0xff]  ;;  %2366 = vmatpush.msrb.mxu1 %v955_v52  ;;  %2316 = vmatmul.f32.vlgmr.msra.gmra.mxu2 %v4108_v32  ;;  %v588_v56 = vld [vmem:[%s3014_s27 + $0xaf8] sm:$0xff] }
 0x283   : > { %v1203_v9 = vld [vmem:[%s3014_s27 + $0x1e30] sm:$0xff]  ;;  %2388 = vmatpush.msrb.mxu2 %v1067_v36  ;;  %2276 = vmatmul.f32.vlgmr.msra.gmra.mxu0 %v4114_v38  ;;  %v724_v48 = vld [vmem:[%s3014_s27 + $0xf38] sm:$0xff] }
 0x284   : > { %v811_v13 = vld [vmem:[%s3014_s27 + $0x11f0] sm:$0xff]  ;;  %2407 = vmatpush.msrb.mxu3 %v1203_v9  ;;  %2296 = vmatmul.f32.vlgmr.msra.gmra.mxu1 %v4127_v50  ;;  %v332_v31 = vld [vmem:[%s3014_s27 + $0x2f8] sm:$0xff]  ;;  %v4153_v9 = vld.sshfl [vmem:[#allocation1 + $0x28] sm:$0xff pattern:$0x73625140] }
 0x285   : > { %v947_v4 = vld [vmem:[%s3014_s27 + $0x1630] sm:$0xff]  ;;  %2348 = vmatpush.msrb.mxu0 %v811_v13  ;;  %v468_v61 = vld [vmem:[%s3014_s27 + $0x738] sm:$0xff] }
 0x286   : > { %v1059_v14 = vld [vmem:[%s3014_s27 + $0x19b0] sm:$0xff]  ;;  %2367 = vmatpush.msrb.mxu1 %v947_v4  ;;  %v580_v0 = vld [vmem:[%s3014_s27 + $0xab8] sm:$0xff] }
 0x287   : > { %v1195_v59 = vld [vmem:[%s3014_s27 + $0x1df0] sm:$0xff]  ;;  %2389 = vmatpush.msrb.mxu2 %v1059_v14  ;;  %v4142_v54 = vld.sshfl [vmem:[#allocation1 + $0x20] sm:$0xff pattern:$0x73625140] }
 0x288   : > { %v803_v11 = vld [vmem:[%s3014_s27 + $0x11b0] sm:$0xff]  ;;  %2408 = vmatpush.msrb.mxu3 %v1195_v59  ;;  %v716_v1 = vld [vmem:[%s3014_s27 + $0xef8] sm:$0xff] }
 0x289   : > { %v939_v41 = vld [vmem:[%s3014_s27 + $0x15f0] sm:$0xff]  ;;  %2349 = vmatpush.msrb.mxu0 %v803_v11  ;;  %v324_v8 = vld [vmem:[%s3014_s27 + $0x2b8] sm:$0xff] }
 0x28a   : > { %v1051_v35 = vld [vmem:[%s3014_s27 + $0x1970] sm:$0xff]  ;;  %2368 = vmatpush.msrb.mxu1 %v939_v41  ;;  %v460_v22 = vld [vmem:[%s3014_s27 + $0x6f8] sm:$0xff] }
 0x28b   : > { %v1187_v44 = vld [vmem:[%s3014_s27 + $0x1db0] sm:$0xff]  ;;  %2390 = vmatpush.msrb.mxu2 %v1051_v35  ;;  %v572_v52 = vld [vmem:[%s3014_s27 + $0xa78] sm:$0xff] }
 0x28c   : > { %v795_v15 = vld [vmem:[%s3014_s27 + $0x1170] sm:$0xff]  ;;  %2409 = vmatpush.msrb.mxu3 %v1187_v44  ;;  %v708_v36 = vld [vmem:[%s3014_s27 + $0xeb8] sm:$0xff] }
 0x28d   : > { %v931_v16 = vld [vmem:[%s3014_s27 + $0x15b0] sm:$0xff]  ;;  %2350 = vmatpush.msrb.mxu0 %v795_v15  ;;  %v316_v13 = vld [vmem:[%s3014_s27 + $0x278] sm:$0xff] }
 0x28e   : > { %v1043_v5 = vld [vmem:[%s3014_s27 + $0x1930] sm:$0xff]  ;;  %2369 = vmatpush.msrb.mxu1 %v931_v16  ;;  %v452_v4 = vld [vmem:[%s3014_s27 + $0x6b8] sm:$0xff] }
 0x28f   : > { %v1179_v17 = vld [vmem:[%s3014_s27 + $0x1d70] sm:$0xff]  ;;  %2391 = vmatpush.msrb.mxu2 %v1043_v5  ;;  %v564_v14 = vld [vmem:[%s3014_s27 + $0xa38] sm:$0xff] }
 0x290   : > { %v787_v20 = vld [vmem:[%s3014_s27 + $0x1130] sm:$0xff]  ;;  %2410 = vmatpush.msrb.mxu3 %v1179_v17  ;;  %v700_v59 = vld [vmem:[%s3014_s27 + $0xe78] sm:$0xff] }
 0x291   : > { %v923_v21 = vld [vmem:[%s3014_s27 + $0x1570] sm:$0xff]  ;;  %2351 = vmatpush.msrb.mxu0 %v787_v20  ;;  %v308_v11 = vld [vmem:[%s3014_s27 + $0x238] sm:$0xff] }
 0x292   : > { %v1035_v51 = vld [vmem:[%s3014_s27 + $0x18f0] sm:$0xff]  ;;  %2370 = vmatpush.msrb.mxu1 %v923_v21  ;;  %v444_v41 = vld [vmem:[%s3014_s27 + $0x678] sm:$0xff] }
 0x293   : > { %v1171_v18 = vld [vmem:[%s3014_s27 + $0x1d30] sm:$0xff]  ;;  %2392 = vmatpush.msrb.mxu2 %v1035_v51  ;;  %v556_v35 = vld [vmem:[%s3014_s27 + $0x9f8] sm:$0xff] }
 0x294   : > { %v779_v24 = vld [vmem:[%s3014_s27 + $0x10f0] sm:$0xff]  ;;  %2411 = vmatpush.msrb.mxu3 %v1171_v18  ;;  %v692_v44 = vld [vmem:[%s3014_s27 + $0xe38] sm:$0xff] }
 0x295   : > { %v915_v63 = vld [vmem:[%s3014_s27 + $0x1530] sm:$0xff]  ;;  %2352 = vmatpush.msrb.mxu0 %v779_v24  ;;  %v300_v15 = vld [vmem:[%s3014_s27 + $0x1f8] sm:$0xff] }
 0x296   : > { %v1027_v26 = vld [vmem:[%s3014_s27 + $0x18b0] sm:$0xff]  ;;  %2371 = vmatpush.msrb.mxu1 %v915_v63  ;;  %v436_v16 = vld [vmem:[%s3014_s27 + $0x638] sm:$0xff] }
 0x297   : > { %v1163_v19 = vld [vmem:[%s3014_s27 + $0x1cf0] sm:$0xff]  ;;  %2393 = vmatpush.msrb.mxu2 %v1027_v26  ;;  %v548_v5 = vld [vmem:[%s3014_s27 + $0x9b8] sm:$0xff] }
 0x298   : > { %v771_v58 = vld [vmem:[%s3014_s27 + $0x10b0] sm:$0xff]  ;;  %2412 = vmatpush.msrb.mxu3 %v1163_v19  ;;  %v684_v17 = vld [vmem:[%s3014_s27 + $0xdf8] sm:$0xff] }
 0x299   : > { %v907_v28 = vld [vmem:[%s3014_s27 + $0x14f0] sm:$0xff]  ;;  %2353 = vmatpush.msrb.mxu0 %v771_v58  ;;  %v292_v20 = vld [vmem:[%s3014_s27 + $0x1b8] sm:$0xff] }
 0x29a   : > { %v1019_v23 = vld [vmem:[%s3014_s27 + $0x1870] sm:$0xff]  ;;  %2372 = vmatpush.msrb.mxu1 %v907_v28  ;;  %v428_v21 = vld [vmem:[%s3014_s27 + $0x5f8] sm:$0xff] }
 0x29b   : > { %v1155_v25 = vld [vmem:[%s3014_s27 + $0x1cb0] sm:$0xff]  ;;  %2394 = vmatpush.msrb.mxu2 %v1019_v23  ;;  %v540_v51 = vld [vmem:[%s3014_s27 + $0x978] sm:$0xff] }
 0x29c   : > { %v763_v39 = vld [vmem:[%s3014_s27 + $0x1070] sm:$0xff]  ;;  %2413 = vmatpush.msrb.mxu3 %v1155_v25  ;;  %v676_v18 = vld [vmem:[%s3014_s27 + $0xdb8] sm:$0xff] }
 0x29d   : > { %v899_v27 = vld [vmem:[%s3014_s27 + $0x14b0] sm:$0xff]  ;;  %2354 = vmatpush.msrb.mxu0 %v763_v39  ;;  %v284_v24 = vld [vmem:[%s3014_s27 + $0x178] sm:$0xff] }
 0x29e   : > { %v1011_v12 = vld [vmem:[%s3014_s27 + $0x1830] sm:$0xff]  ;;  %2373 = vmatpush.msrb.mxu1 %v899_v27  ;;  %v420_v63 = vld [vmem:[%s3014_s27 + $0x5b8] sm:$0xff] }
 0x29f   : > { %v1147_v30 = vld [vmem:[%s3014_s27 + $0x1c70] sm:$0xff]  ;;  %2395 = vmatpush.msrb.mxu2 %v1011_v12  ;;  %v532_v26 = vld [vmem:[%s3014_s27 + $0x938] sm:$0xff] }
 0x2a0   : > { %v755_v33 = vld [vmem:[%s3014_s27 + $0x1030] sm:$0xff]  ;;  %2414 = vmatpush.msrb.mxu3 %v1147_v30  ;;  %2396 = vmatmul.f32.vlgmr.msrb.gmra.mxu2 %v4136_v57  ;;  %v668_v19 = vld [vmem:[%s3014_s27 + $0xd78] sm:$0xff] }
 0x2a1   : > { %v891_v62 = vld [vmem:[%s3014_s27 + $0x1470] sm:$0xff]  ;;  %2355 = vmatpush.msrb.mxu0 %v755_v33  ;;  %2460 = vmatpush.msra.mxu2 %v620_v34  ;;  %v276_v58 = vld [vmem:[%s3014_s27 + $0x138] sm:$0xff] }
 0x2a2   : > { %v1139_v60 = vld [vmem:[%s3014_s27 + $0x1c30] sm:$0xff]  ;;  %2374 = vmatpush.msrb.mxu1 %v891_v62  ;;  %2356 = vmatmul.f32.vlgmr.msrb.gmra.mxu0 %v4142_v54  ;;  %v412_v28 = vld [vmem:[%s3014_s27 + $0x578] sm:$0xff] }
 0x2a3   : > { %2415 = vmatpush.msrb.mxu3 %v1139_v60  ;;  %v883_v40 = vld [vmem:[%s3014_s27 + $0x1430] sm:$0xff]  ;;  %2420 = vmatpush.msra.mxu0 %v364_v29  ;;  %v524_v23 = vld [vmem:[%s3014_s27 + $0x8f8] sm:$0xff] }
 0x2a4   : > { %v4119_v43 = vld.sshfl [vmem:[#allocation1 + $0x18] sm:$0xff pattern:$0x73625140]  ;;  %2461 = vmatpush.msra.mxu2 %v612_v37  ;;  %2375 = vmatpush.msrb.mxu1 %v883_v40  ;;  %v660_v25 = vld [vmem:[%s3014_s27 + $0xd38] sm:$0xff] }
 0x2a5   : > { %2336 = vmatmul.f32.vlgmr.msra.gmra.mxu3 %v4119_v43  ;;  %2421 = vmatpush.msra.mxu0 %v356_v6  ;;  %v4146_v7 = vld.sshfl [vmem:[#allocation1 + $0x38] sm:$0xff pattern:$0x73625140]  ;;  %v268_v39 = vld [vmem:[%s3014_s27 + $0xf8] sm:$0xff] }
 0x2a6   : > { %2480 = vmatpush.msra.mxu3 %v748_v2  ;;  %2462 = vmatpush.msra.mxu2 %v604_v42  ;;  %v404_v27 = vld [vmem:[%s3014_s27 + $0x538] sm:$0xff] }
 0x2a7   : > { %2440 = vmatpush.msra.mxu1 %v492_v45  ;;  %2422 = vmatpush.msra.mxu0 %v348_v46  ;;  %v516_v12 = vld [vmem:[%s3014_s27 + $0x8b8] sm:$0xff] }
 0x2a8   : > { %2481 = vmatpush.msra.mxu3 %v740_v47  ;;  %2463 = vmatpush.msra.mxu2 %v596_v10  ;;  %v652_v30 = vld [vmem:[%s3014_s27 + $0xcf8] sm:$0xff] }
 0x2a9   : > { %2441 = vmatpush.msra.mxu1 %v484_v3  ;;  %2423 = vmatpush.msra.mxu0 %v340_v53  ;;  %v260_v33 = vld [vmem:[%s3014_s27 + $0xb8] sm:$0xff] }
 0x2aa   : > { %2482 = vmatpush.msra.mxu3 %v732_v49  ;;  %2464 = vmatpush.msra.mxu2 %v588_v56  ;;  %v396_v34 = vld [vmem:[%s3014_s27 + $0x4f8] sm:$0xff] }
 0x2ab   : > { %2442 = vmatpush.msra.mxu1 %v476_v55  ;;  %2424 = vmatpush.msra.mxu0 %v332_v31  ;;  %v508_v62 = vld [vmem:[%s3014_s27 + $0x878] sm:$0xff] }
 0x2ac   : > { %2483 = vmatpush.msra.mxu3 %v724_v48  ;;  %2465 = vmatpush.msra.mxu2 %v580_v0  ;;  %v644_v60 = vld [vmem:[%s3014_s27 + $0xcb8] sm:$0xff] }
 0x2ad   : > { %2416 = vmatmul.f32.vlgmr.msrb.gmra.mxu3 %v4146_v7  ;;  %2443 = vmatpush.msra.mxu1 %v468_v61  ;;  %v252_v29 = vld [vmem:[%s3014_s27 + $0x78] sm:$0xff] }
 0x2ae   : > { %2484 = vmatpush.msra.mxu3 %v716_v1  ;;  %2376 = vmatmul.f32.vlgmr.msrb.gmra.mxu1 %v4153_v9  ;;  %v388_v37 = vld [vmem:[%s3014_s27 + $0x4b8] sm:$0xff] }
 0x2af   : > { %2425 = vmatpush.msra.mxu0 %v324_v8  ;;  %2444 = vmatpush.msra.mxu1 %v460_v22  ;;  %v500_v2 = vld [vmem:[%s3014_s27 + $0x838] sm:$0xff] }
 0x2b0   : > { %2466 = vmatpush.msra.mxu2 %v572_v52  ;;  %2485 = vmatpush.msra.mxu3 %v708_v36  ;;  %v636_v40 = vld [vmem:[%s3014_s27 + $0xc78] sm:$0xff] }
 0x2b1   : > { %2426 = vmatpush.msra.mxu0 %v316_v13  ;;  %2445 = vmatpush.msra.mxu1 %v452_v4  ;;  %v1132_v6 = vld [vmem:[%s3014_s27 + $0x1bf8] sm:$0xff] }
 0x2b2   : > { %2467 = vmatpush.msra.mxu2 %v564_v14  ;;  %2486 = vmatpush.msra.mxu3 %v700_v59  ;;  %v244_v42 = vld [vmem:[%s3014_s27 + $0x38] sm:$0xff] }
 0x2b3   : > { %2427 = vmatpush.msra.mxu0 %v308_v11  ;;  %2446 = vmatpush.msra.mxu1 %v444_v41  ;;  %v380_v45 = vld [vmem:[%s3014_s27 + $0x478] sm:$0xff] }
 0x2b4   : > { %2468 = vmatpush.msra.mxu2 %v556_v35  ;;  %2487 = vmatpush.msra.mxu3 %v692_v44  ;;  %v628_v47 = vld [vmem:[%s3014_s27 + $0xc38] sm:$0xff] }
 0x2b5   : > { %2428 = vmatpush.msra.mxu0 %v300_v15  ;;  %2447 = vmatpush.msra.mxu1 %v436_v16  ;;  %v876_v46 = vld [vmem:[%s3014_s27 + $0x13f8] sm:$0xff] }
 0x2b6   : > { %2469 = vmatpush.msra.mxu2 %v548_v5  ;;  %2488 = vmatpush.msra.mxu3 %v684_v17  ;;  %v1124_v10 = vld [vmem:[%s3014_s27 + $0x1bb8] sm:$0xff] }
 0x2b7   : > { %2429 = vmatpush.msra.mxu0 %v292_v20  ;;  %2448 = vmatpush.msra.mxu1 %v428_v21  ;;  %v1260_v3 = vld [vmem:[%s3014_s27 + $0x1ff8] sm:$0xff] }
 0x2b8   : > { %2470 = vmatpush.msra.mxu2 %v540_v51  ;;  %2489 = vmatpush.msra.mxu3 %v676_v18  ;;  %v372_v49 = vld [vmem:[%s3014_s27 + $0x438] sm:$0xff] }
 0x2b9   : > { %2430 = vmatpush.msra.mxu0 %v284_v24  ;;  %2449 = vmatpush.msra.mxu1 %v420_v63  ;;  %v868_v53 = vld [vmem:[%s3014_s27 + $0x13b8] sm:$0xff] }
 0x2ba   : > { %2471 = vmatpush.msra.mxu2 %v532_v26  ;;  %2490 = vmatpush.msra.mxu3 %v668_v19  ;;  %v1004_v55 = vld [vmem:[%s3014_s27 + $0x17f8] sm:$0xff] }
 0x2bb   : > { %2431 = vmatpush.msra.mxu0 %v276_v58  ;;  %2450 = vmatpush.msra.mxu1 %v412_v28  ;;  %v1116_v56 = vld [vmem:[%s3014_s27 + $0x1b78] sm:$0xff] }
 0x2bc   : > { %2472 = vmatpush.msra.mxu2 %v524_v23  ;;  %2491 = vmatpush.msra.mxu3 %v660_v25  ;;  %v1252_v48 = vld [vmem:[%s3014_s27 + $0x1fb8] sm:$0xff] }
 0x2bd   : > { %2432 = vmatpush.msra.mxu0 %v268_v39  ;;  %2451 = vmatpush.msra.mxu1 %v404_v27  ;;  %v860_v31 = vld [vmem:[%s3014_s27 + $0x1378] sm:$0xff] }
 0x2be   : > { %2473 = vmatpush.msra.mxu2 %v516_v12  ;;  %2492 = vmatpush.msra.mxu3 %v652_v30  ;;  %v996_v61 = vld [vmem:[%s3014_s27 + $0x17b8] sm:$0xff] }
 0x2bf   : > { %2433 = vmatpush.msra.mxu0 %v260_v33  ;;  %2452 = vmatpush.msra.mxu1 %v396_v34  ;;  %v1108_v0 = vld [vmem:[%s3014_s27 + $0x1b38] sm:$0xff] }
 0x2c0   : > { %2474 = vmatpush.msra.mxu2 %v508_v62  ;;  %2493 = vmatpush.msra.mxu3 %v644_v60  ;;  %v1244_v1 = vld [vmem:[%s3014_s27 + $0x1f78] sm:$0xff] }
 0x2c1   : > { %2434 = vmatpush.msra.mxu0 %v252_v29  ;;  %2453 = vmatpush.msra.mxu1 %v388_v37  ;;  %v852_v8 = vld [vmem:[%s3014_s27 + $0x1338] sm:$0xff] }
 0x2c2   : > { %2475 = vmatpush.msra.mxu2 %v500_v2  ;;  %2494 = vmatpush.msra.mxu3 %v636_v40  ;;  %v988_v22 = vld [vmem:[%s3014_s27 + $0x1778] sm:$0xff] }
 0x2c3   : > { %2435 = vmatpush.msra.mxu0 %v244_v42  ;;  %2454 = vmatpush.msra.mxu1 %v380_v45  ;;  %v1100_v52 = vld [vmem:[%s3014_s27 + $0x1af8] sm:$0xff] }
 0x2c4   : > { %2540 = vmatpush.msrb.mxu2 %v1132_v6  ;;  %2495 = vmatpush.msra.mxu3 %v628_v47  ;;  %v1236_v36 = vld [vmem:[%s3014_s27 + $0x1f38] sm:$0xff] }
 0x2c5   : > { %2500 = vmatpush.msrb.mxu0 %v876_v46  ;;  %2455 = vmatpush.msra.mxu1 %v372_v49  ;;  %v844_v13 = vld [vmem:[%s3014_s27 + $0x12f8] sm:$0xff] }
 0x2c6   : > { %2541 = vmatpush.msrb.mxu2 %v1124_v10  ;;  %2560 = vmatpush.msrb.mxu3 %v1260_v3  ;;  %v980_v4 = vld [vmem:[%s3014_s27 + $0x1738] sm:$0xff] }
 0x2c7   : > { %2501 = vmatpush.msrb.mxu0 %v868_v53  ;;  %2520 = vmatpush.msrb.mxu1 %v1004_v55  ;;  %v1092_v14 = vld [vmem:[%s3014_s27 + $0x1ab8] sm:$0xff]  ;;  %v1957_v53 = vpop.f32.mrf.mxu0  ;;  %v1977_v55 = vpop.f32.mrf.mxu1 }
 0x2c8   : > { %2542 = vmatpush.msrb.mxu2 %v1116_v56  ;;  %2561 = vmatpush.msrb.mxu3 %v1252_v48  ;;  %v1228_v59 = vld [vmem:[%s3014_s27 + $0x1ef8] sm:$0xff]  ;;  %v1997_v56 = vpop.f32.mrf.mxu2  ;;  %v2017_v48 = vpop.f32.mrf.mxu3 }
 0x2c9   : > { %2502 = vmatpush.msrb.mxu0 %v860_v31  ;;  %2521 = vmatpush.msrb.mxu1 %v996_v61  ;;  %v836_v11 = vld [vmem:[%s3014_s27 + $0x12b8] sm:$0xff] }
 0x2ca   : > { %2543 = vmatpush.msrb.mxu2 %v1108_v0  ;;  %2562 = vmatpush.msrb.mxu3 %v1244_v1  ;;  %v972_v41 = vld [vmem:[%s3014_s27 + $0x16f8] sm:$0xff] }
 0x2cb   : > { %2503 = vmatpush.msrb.mxu0 %v852_v8  ;;  %2522 = vmatpush.msrb.mxu1 %v988_v22  ;;  %v1084_v35 = vld [vmem:[%s3014_s27 + $0x1a78] sm:$0xff] }
 0x2cc   : > { %2544 = vmatpush.msrb.mxu2 %v1100_v52  ;;  %2563 = vmatpush.msrb.mxu3 %v1236_v36  ;;  %v1220_v44 = vld [vmem:[%s3014_s27 + $0x1eb8] sm:$0xff] }
 0x2cd   : > { %2504 = vmatpush.msrb.mxu0 %v844_v13  ;;  %2523 = vmatpush.msrb.mxu1 %v980_v4  ;;  %v828_v15 = vld [vmem:[%s3014_s27 + $0x1278] sm:$0xff] }
 0x2ce   : > { %2545 = vmatpush.msrb.mxu2 %v1092_v14  ;;  %2564 = vmatpush.msrb.mxu3 %v1228_v59  ;;  %v964_v16 = vld [vmem:[%s3014_s27 + $0x16b8] sm:$0xff] }
 0x2cf   : > { %2505 = vmatpush.msrb.mxu0 %v836_v11  ;;  %2524 = vmatpush.msrb.mxu1 %v972_v41  ;;  %v1076_v5 = vld [vmem:[%s3014_s27 + $0x1a38] sm:$0xff]  ;;  %v2037_v31 = vpop.f32.mrf.mxu0  ;;  %v2057_v61 = vpop.f32.mrf.mxu1 }
 0x2d0   : > { %v1212_v17 = vld [vmem:[%s3014_s27 + $0x1e78] sm:$0xff]  ;;  %2546 = vmatpush.msrb.mxu2 %v1084_v35  ;;  %2565 = vmatpush.msrb.mxu3 %v1220_v44  ;;  %v2077_v0 = vpop.f32.mrf.mxu2 }
 0x2d1   : > { %v820_v20 = vld [vmem:[%s3014_s27 + $0x1238] sm:$0xff]  ;;  %2506 = vmatpush.msrb.mxu0 %v828_v15  ;;  %2525 = vmatpush.msrb.mxu1 %v964_v16 }
 0x2d2   : > { %v956_v21 = vld [vmem:[%s3014_s27 + $0x1678] sm:$0xff]  ;;  %2547 = vmatpush.msrb.mxu2 %v1076_v5  ;;  %2566 = vmatpush.msrb.mxu3 %v1212_v17 }
 0x2d3   : > { %v1068_v51 = vld [vmem:[%s3014_s27 + $0x19f8] sm:$0xff]  ;;  %2507 = vmatpush.msrb.mxu0 %v820_v20  ;;  %2526 = vmatpush.msrb.mxu1 %v956_v21 }
 0x2d4   : > { %v1204_v18 = vld [vmem:[%s3014_s27 + $0x1e38] sm:$0xff]  ;;  %2548 = vmatpush.msrb.mxu2 %v1068_v51  ;;  %2436 = vmatmul.f32.vlgmr.msra.gmra.mxu0 %v4114_v38 }
 0x2d5   : > { %v812_v24 = vld [vmem:[%s3014_s27 + $0x11f8] sm:$0xff]  ;;  %2567 = vmatpush.msrb.mxu3 %v1204_v18  ;;  %2476 = vmatmul.f32.vlgmr.msra.gmra.mxu2 %v4108_v32 }
 0x2d6   : > { %v948_v63 = vld [vmem:[%s3014_s27 + $0x1638] sm:$0xff]  ;;  %2508 = vmatpush.msrb.mxu0 %v812_v24  ;;  %2496 = vmatmul.f32.vlgmr.msra.gmra.mxu3 %v4119_v43 }
 0x2d7   : > { %v1060_v26 = vld [vmem:[%s3014_s27 + $0x19b8] sm:$0xff]  ;;  %2527 = vmatpush.msrb.mxu1 %v948_v63  ;;  %v2117_v1 = vpop.f32.mrf.mxu0  ;;  %v2137_v8 = vpop.f32.mrf.mxu1 }
 0x2d8   : > { %v1196_v19 = vld [vmem:[%s3014_s27 + $0x1df8] sm:$0xff]  ;;  %2549 = vmatpush.msrb.mxu2 %v1060_v26  ;;  %2456 = vmatmul.f32.vlgmr.msra.gmra.mxu1 %v4127_v50  ;;  %v2157_v22 = vpop.f32.mrf.mxu2 }
 0x2d9   : > { %v804_v58 = vld [vmem:[%s3014_s27 + $0x11b8] sm:$0xff]  ;;  %2568 = vmatpush.msrb.mxu3 %v1196_v19 }
 0x2da   : > { %v940_v28 = vld [vmem:[%s3014_s27 + $0x15f8] sm:$0xff]  ;;  %2509 = vmatpush.msrb.mxu0 %v804_v58 }
 0x2db   : > { %v1052_v23 = vld [vmem:[%s3014_s27 + $0x1978] sm:$0xff]  ;;  %2528 = vmatpush.msrb.mxu1 %v940_v28 }
 0x2dc   : > { %v1188_v25 = vld [vmem:[%s3014_s27 + $0x1db8] sm:$0xff]  ;;  %2550 = vmatpush.msrb.mxu2 %v1052_v23 }
 0x2dd   : > { %v796_v39 = vld [vmem:[%s3014_s27 + $0x1178] sm:$0xff]  ;;  %2569 = vmatpush.msrb.mxu3 %v1188_v25 }
 0x2de   : > { %v932_v27 = vld [vmem:[%s3014_s27 + $0x15b8] sm:$0xff]  ;;  %2510 = vmatpush.msrb.mxu0 %v796_v39 }
 0x2df   : > { %v1044_v12 = vld [vmem:[%s3014_s27 + $0x1938] sm:$0xff]  ;;  %2529 = vmatpush.msrb.mxu1 %v932_v27  ;;  %v2197_v36 = vpop.f32.mrf.mxu0 }
 0x2e0   : > { %v1180_v30 = vld [vmem:[%s3014_s27 + $0x1d78] sm:$0xff]  ;;  %2551 = vmatpush.msrb.mxu2 %v1044_v12  ;;  %v2237_v13 = vpop.f32.mrf.mxu2 }
 0x2e1   : > { %v788_v33 = vld [vmem:[%s3014_s27 + $0x1138] sm:$0xff]  ;;  %2570 = vmatpush.msrb.mxu3 %v1180_v30 }
 0x2e2   : > { %v924_v34 = vld [vmem:[%s3014_s27 + $0x1578] sm:$0xff]  ;;  %2511 = vmatpush.msrb.mxu0 %v788_v33 }
 0x2e3   : > { %v1036_v62 = vld [vmem:[%s3014_s27 + $0x18f8] sm:$0xff]  ;;  %2530 = vmatpush.msrb.mxu1 %v924_v34 }
 0x2e4   : > { %v1172_v60 = vld [vmem:[%s3014_s27 + $0x1d38] sm:$0xff]  ;;  %2552 = vmatpush.msrb.mxu2 %v1036_v62 }
 0x2e5   : > { %v780_v29 = vld [vmem:[%s3014_s27 + $0x10f8] sm:$0xff]  ;;  %2571 = vmatpush.msrb.mxu3 %v1172_v60 }
 0x2e6   : > { %v916_v37 = vld [vmem:[%s3014_s27 + $0x1538] sm:$0xff]  ;;  %2512 = vmatpush.msrb.mxu0 %v780_v29 }
 0x2e7   : > { %v1028_v2 = vld [vmem:[%s3014_s27 + $0x18b8] sm:$0xff]  ;;  %2531 = vmatpush.msrb.mxu1 %v916_v37 }
 0x2e8   : > { %v1164_v40 = vld [vmem:[%s3014_s27 + $0x1cf8] sm:$0xff]  ;;  %2553 = vmatpush.msrb.mxu2 %v1028_v2 }
 0x2e9   : > { %v772_v32 = vld [vmem:[%s3014_s27 + $0x10b8] sm:$0xff]  ;;  %2572 = vmatpush.msrb.mxu3 %v1164_v40 }
 0x2ea   : > { %v908_v6 = vld [vmem:[%s3014_s27 + $0x14f8] sm:$0xff]  ;;  %2513 = vmatpush.msrb.mxu0 %v772_v32 }
 0x2eb   : > { %v1020_v42 = vld [vmem:[%s3014_s27 + $0x1878] sm:$0xff]  ;;  %2532 = vmatpush.msrb.mxu1 %v908_v6 }
 0x2ec   : > { %v1156_v45 = vld [vmem:[%s3014_s27 + $0x1cb8] sm:$0xff]  ;;  %2554 = vmatpush.msrb.mxu2 %v1020_v42 }
 0x2ed   : > { %v764_v47 = vld [vmem:[%s3014_s27 + $0x1078] sm:$0xff]  ;;  %2573 = vmatpush.msrb.mxu3 %v1156_v45 }
 0x2ee   : > { %v900_v38 = vld [vmem:[%s3014_s27 + $0x14b8] sm:$0xff]  ;;  %2514 = vmatpush.msrb.mxu0 %v764_v47 }
 0x2ef   : > { %v1012_v46 = vld [vmem:[%s3014_s27 + $0x1838] sm:$0xff]  ;;  %2533 = vmatpush.msrb.mxu1 %v900_v38 }
 0x2f0   : > { %v1148_v43 = vld [vmem:[%s3014_s27 + $0x1c78] sm:$0xff]  ;;  %2555 = vmatpush.msrb.mxu2 %v1012_v46 }
 0x2f1   : > { %v756_v10 = vld [vmem:[%s3014_s27 + $0x1038] sm:$0xff]  ;;  %2574 = vmatpush.msrb.mxu3 %v1148_v43  ;;  %2556 = vmatmul.f32.vlgmr.msrb.gmra.mxu2 %v4136_v57  ;;  %v2097_v57 = vpop.f32.mrf.mxu3 }
 0x2f2   : > { %v892_v3 = vld [vmem:[%s3014_s27 + $0x1478] sm:$0xff]  ;;  %2515 = vmatpush.msrb.mxu0 %v756_v10 }
 0x2f3   : > { %v1140_v49 = vld [vmem:[%s3014_s27 + $0x1c38] sm:$0xff]  ;;  %2534 = vmatpush.msrb.mxu1 %v892_v3  ;;  %2516 = vmatmul.f32.vlgmr.msrb.gmra.mxu0 %v4142_v54  ;;  %v2217_v54 = vpop.f32.mrf.mxu1 }
 0x2f4   : > { %v884_v50 = vld [vmem:[%s3014_s27 + $0x1438] sm:$0xff]  ;;  %2575 = vmatpush.msrb.mxu3 %v1140_v49 }
 0x2f5   : > { %2576 = vmatmul.f32.vlgmr.msrb.gmra.mxu3 %v4146_v7  ;;  %2535 = vmatpush.msrb.mxu1 %v884_v50  ;;  %v2793_v7 = vld [vmem:[%s3020_s5] sm:$0xff] }
 0x2f6   : > { %2536 = vmatmul.f32.vlgmr.msrb.gmra.mxu1 %v4153_v9  ;;  %v1268_v4 = vperm.slane %v2793_v7, 5  ;;  %v1269_v9 = vperm.slane %v2793_v7, 6  ;;  %v1267_v41 = vperm.slane %v2793_v7, 4  ;;  %v1270_v23 = vperm.slane %v2793_v7, 7 }
 0x2f8   : > { %v2118_v11 = vadd.f32 %v2117_v1, %v1268_v4  ;;  %v1958_v5 = vadd.f32 %v1957_v53, %v1267_v41 }
 0x2f9   : > { %v2177_v52 = vpop.f32.mrf.mxu3 }
 0x2fa   : > { %v2138_v16 = vadd.f32 %v2137_v8, %v2118_v11  ;;  %v1978_v18 = vadd.f32 %v1977_v55, %v1958_v5 }
 0x2fc   : > { %v2158_v21 = vadd.f32 %v2157_v22, %v2138_v16  ;;  %v1998_v58 = vadd.f32 %v1997_v56, %v1978_v18 }
 0x2fe   : > { %v2178_v63 = vadd.f32 %v2177_v52, %v2158_v21  ;;  %v2018_v12 = vadd.f32 %v2017_v48, %v1998_v58 }
 0x300   : > { %v2277_v59 = vpop.f32.mrf.mxu0  ;;  %v2198_v25 = vadd.f32 %v2197_v36, %v2178_v63  ;;  %v2038_v37 = vadd.f32 %v2037_v31, %v2018_v12 }
 0x301   : > { %v2257_v14 = vpop.f32.mrf.mxu3  ;;  %v2278_v35 = vadd.f32 %v2277_v59, %v1269_v9  ;;  %v2297_v44 = vpop.f32.mrf.mxu1 }
 0x302   : > { %v2218_v34 = vadd.f32 %v2217_v54, %v2198_v25  ;;  %v2058_v45 = vadd.f32 %v2057_v61, %v2038_v37 }
 0x303   : > { %v2298_v17 = vadd.f32 %v2297_v44, %v2278_v35 }
 0x304   : > { %v2238_v32 = vadd.f32 %v2237_v13, %v2218_v34  ;;  %v2078_v3 = vadd.f32 %v2077_v0, %v2058_v45 }
 0x305   : > { %v2317_v15 = vpop.f32.mrf.mxu2 }
 0x306   : > { %v2318_v24 = vadd.f32 %v2317_v15, %v2298_v17  ;;  %v2258_v46 = vadd.f32 %v2257_v14, %v2238_v32  ;;  %v2098_v31 = vadd.f32 %v2097_v57, %v2078_v3 }
 0x308   : > { %v2585_v55 = vmax.f32 %v2258_v46, 0.0  ;;  %v2584_v36 = vmax.f32 %v2098_v31, 0.0 }
 0x30a   : > { %v2599_v22 = vrot.slane %v2585_v55, 6 }
 0x30c   : > { %v2608_v13 = vsel %vm2602_vm0, %v2584_v36, %v2599_v22 }
 0x31f   : > { %v2357_v51 = vpop.f32.mrf.mxu0 }
 0x323   : > { %v2397_v19 = vpop.f32.mrf.mxu2 }
 0x328   : > { %v2337_v20 = vpop.f32.mrf.mxu3 }
 0x329   : > { %v2338_v28 = vadd.f32 %v2337_v20, %v2318_v24 }
 0x32b   : > { %v2377_v26 = vpop.f32.mrf.mxu1  ;;  %v2358_v30 = vadd.f32 %v2357_v51, %v2338_v28 }
 0x32d   : > { %v2378_v2 = vadd.f32 %v2377_v26, %v2358_v30 }
 0x32f   : > { %v2398_v47 = vadd.f32 %v2397_v19, %v2378_v2 }
 0x330   : > { %v2417_v39 = vpop.f32.mrf.mxu3 }
 0x331   : > { %v2418_v49 = vadd.f32 %v2417_v39, %v2398_v47 }
 0x333   : > { %v2586_v1 = vmax.f32 %v2418_v49, 0.0 }
 0x335   : > { %v2600_v61 = vrot.slane %v2586_v1, 4 }
 0x351   : > { %v2437_v27 = vpop.f32.mrf.mxu0 }
 0x352   : > { %v2438_v33 = vadd.f32 %v2437_v27, %v1270_v23 }
 0x355   : > { %v2457_v62 = vpop.f32.mrf.mxu1 }
 0x356   : > { %v2458_v60 = vadd.f32 %v2457_v62, %v2438_v33 }
 0x358   : > { %v2477_v29 = vpop.f32.mrf.mxu2 }
 0x359   : > { %v2478_v40 = vadd.f32 %v2477_v29, %v2458_v60  ;;  %v2497_v6 = vpop.f32.mrf.mxu3 }
 0x35b   : > { %v2498_v42 = vadd.f32 %v2497_v6, %v2478_v40 }
 0x370   : > { %v2517_v38 = vpop.f32.mrf.mxu0 }
 0x371   : > { %v2518_v43 = vadd.f32 %v2517_v38, %v2498_v42 }
 0x373   : > { %v2537_v10 = vpop.f32.mrf.mxu1 }
 0x374   : > { %v2538_v50 = vadd.f32 %v2537_v10, %v2518_v43  ;;  %v2557_v53 = vpop.f32.mrf.mxu2 }
 0x376   : > { %v2558_v56 = vadd.f32 %v2557_v53, %v2538_v50 }
 0x378   : > { %v2577_v48 = vpop.f32.mrf.mxu3 }
 0x379   : > { %v2578_v8 = vadd.f32 %v2577_v48, %v2558_v56 }
 0x37b   : > { %v2587_v52 = vmax.f32 %v2578_v8, 0.0 }
 0x37d   : > { %v2601_v54 = vrot.slane %v2587_v52, 2 }
 0x37f   : > { %v2609_v7 = vsel %vm2604_vm1, %v2600_v61, %v2601_v54 }
 0x380   : > { %v2610_v0 = vsel %vm2606_vm2, %v2608_v13, %v2609_v7 }
 0x381   : > { %2614 = vst [vmem:[%s3983_s11 + $0x8] sm:$0xff] %v2610_v0 }
 0x382 PF: > { %p16_p8 = scmp.ge.s32.totalorder %s2937_s17, 6   ;;  %s4294_s12 = smov %s2884_s13 }
 0x383   : > { %s4295_s13 = smov %s2888_s14  ;;  %s4296_s14 = smov %s2947_s20 }
 0x384   : > { %s4297_s15 = smov %s2937_s17  ;;  %18 = sbr.rel (!%p16_p8) target bundleno = 5 (0x5), region = 86 }
 0x389   :  { %2637 = vsyncpa [#allocation3], 1 }
 0x38a   :  { %2639 = vsyncpa [#allocation3 + $0x1], 1 }
 0x38b   :  { %2640 = vsyncpa [#allocation5], 1 }
 0x38c   :  { %2642 = vsyncpa [#allocation5 + $0x1], 1 }

// kernel: vgg_classifier_forward.3
= control target key start
LH: loop header
LB: loop body
LE: loop exit
PB: predicated region body
PF: predicated region fallthrough
CT: control target
= control target key end

     0   :  { %9 = vsyncpa [#allocation3], 0  ;;  %s8006_s0 = inlined_call_operand.vmem [shape: f32[2,4096], index: 0, kind: input, shape index: {}]   ;;  %s8007_s1 = inlined_call_operand.hbm [shape: f32[4096,4096], index: 1, kind: input, shape index: {}]   ;;  %s8008_s2 = inlined_call_operand.hbm [shape: f32[1,4096], index: 2, kind: input, shape index: {}]   ;;  %s8009_s3 = inlined_call_operand.vmem [shape: f32[4096,10], index: 3, kind: input, shape index: {}]   ;;  %s8010_s4 = inlined_call_operand.vmem [shape: f32[8,2,10], index: 4, kind: output, shape index: {}]  }
   0x1   :  { %11 = vsyncpa [#allocation3 + $0x1], 0 }
   0x2   :  { %12 = vsyncpa [#allocation5], 0 }
   0x3   :  { %14 = vsyncpa [#allocation5 + $0x1], 0  ;;  %s5455_s15 = smov 0   ;;  %s5457_s16 = smov 0  }
   0x4   :  { %s5459_s17 = smov 0   ;;  %s5461_s18 = smov 0  }
   0x5 LB: > { %s5474_s19 = sadd.s32 4294967295, %s5425_s18   ;;  %s5477_s20 = sadd.s32 1, %s5425_s18   ;;  %s5425_s18 = sphi %s5461_s18, %s8037_s18   ;;  %s5421_s17 = sphi %s5459_s17, %s8036_s17   ;;  %s5417_s16 = sphi %s5457_s16, %s8035_s16   ;;  %s5413_s15 = sphi %s5455_s15, %s8034_s15  }
   0x6   : > { %s45_s21 = ssub.s32 %s5425_s18, %s5477_s20  ;;  %s48_s22 = sadd.s32 1, %s5421_s17 }
   0x7   : > { %p46_p0 = scmp.eq.s32.totalorder %s45_s21, 0  ;;  %p55_p1 = scmp.ne.s32.totalorder %s5421_s17, %s5417_s16 }
   0x8   : > { %p56_p2 = scmp.eq.s32.totalorder %s5425_s18, 0  ;;  %p61_p3 = scmp.ne.s32.totalorder %s5417_s16, %s5413_s15 }
   0x9   : > { %s5487_s23 = scalar_select %p46_p0, %s5421_s17, %s48_s22  }
   0xa   : > { %p5489_p4 = por %p56_p2, %p55_p1  ;;  %p62_p5 = scmp.eq.s32.totalorder %s5474_s19, 0 }
   0xb   : > { %p5266_p6 = scmp.lt.s32.totalorder %s5425_s18, 8  ;;  %s5500_s26 = sand.u32 1, %s5421_s17  }
   0xc   : > { %p5495_p7 = por %p62_p5, %p61_p3  ;;  %s5241_s27 = sshll.u32 %s5500_s26, 14 }
   0xd   : > { %s5254_s28 = sshll.u32 %s5425_s18, 5  ;;  %s170_s6 = scalar_lea.vmem [#allocation2], %s5241_s27 }
   0xe   : > { %s175_s5 = scalar_lea.hbm %s8007_s1, %s5254_s28  ;;  %s178_s7 = sshll.u32 %s170_s6, 4  ;;  %s179_s7 = int_to_ptr.vmem [resolvable:$true] %s178_s7 }
   0xf   : > { %s176_s8 = sshll.u32 %s175_s5, 4  ;;  %p5509_p8 = pnand %p5266_p6, %p5489_p4  ;;  %s177_s8 = int_to_ptr.hbm [resolvable:$true] %s176_s8 }
  0x10   : > { %s167_s10 = scalar_lea.sflag [#allocation3], %s5500_s26  ;;  %s5327_s11 = sshra.s32 %s177_s8, 4  ;;  %s5328_s11 = int_to_ptr.hbm [resolvable:$true] %s5327_s11 }
  0x11   : > { %s5329_s12 = scalar_lea.hbm %s5328_s11, 16384  ;;  %p5331_p10 = pneg %p5509_p8 }
  0x12   : > { %p5330_p9 = scmp.ne.s32.totalorder %s5328_s11, %s5329_s12  ;;  %s5334_s15 = scalar_lea.hbm %s8007_s1, 131072 }
  0x13   : > { %p5335_p13 = scmp.lt.s32.totalorder %s5328_s11, %s8007_s1  ;;  %p5336_p0 = scmp.lt.s32.totalorder %s5334_s15, %s5329_s12 }
  0x14   : > { %p5332_p11 = pnand %p5331_p10, %p5330_p9 }
  0x15   : > { %p5337_p1 = por %p5336_p0, %p5335_p13 }
  0x16   : > { %p5333_p12 = pneg %p5332_p11 }
  0x18   : > { %p5338_p2 = pnand %p5337_p1, %p5333_p12 }
  0x1a   : > { %5341 = shalt.err (!%p5338_p2)
}
  0x1b   : > { %s5427_s24 = smov 4096   ;;  %s5428_s27 = smov 512  }
  0x1c   : > { %s5429_s28 = smov 32   ;;  %p5246_p3 = scmp.ge.s32.totalorder %s5425_s18, 1 }
  0x1d   : > { %5262 = dma.hbm_to_vmem [thread:$0]  (!%p5509_p8), %s177_s8, 262144, %s179_s7, %s167_s10, %s5427_s24, %s5428_s27, %s5429_s28  }
  0x1e   : > { %p214_p4 = scmp.lt.s32.totalorder %s5425_s18, 9  ;;  %s5244_s29 = sshll.u32 %s5500_s26, 2 }
  0x1f   : > { %s5245_s5 = sshll.u32 %s5425_s18, 2  ;;  %s192_s6 = scalar_lea.vmem [#allocation4], %s5244_s29 }
  0x20   : > { %p5530_p5 = pnand %p5246_p3, %p214_p4  ;;  %s200_s11 = sshll.u32 %s192_s6, 4  ;;  %s201_s11 = int_to_ptr.vmem [resolvable:$true] %s200_s11 }
  0x21   : > { %s196_s14 = scalar_lea.hbm %s8008_s2, %s5245_s5  ;;  %s189_s21 = scalar_lea.sflag [#allocation5], %s5500_s26 }
  0x22   : > { %s198_s15 = sshll.u32 %s196_s14, 4  ;;  %s5364_s22 = scalar_lea.hbm %s8008_s2, 32  ;;  %s199_s15 = int_to_ptr.hbm [resolvable:$true] %s198_s15 }
  0x23   : > { %s5357_s7 = sshra.s32 %s199_s15, 4  ;;  %s5358_s7 = int_to_ptr.hbm [resolvable:$true] %s5357_s7 }
  0x24   : > { %s5359_s8 = scalar_lea.hbm %s5358_s7, 4  ;;  %p5365_p12 = scmp.lt.s32.totalorder %s5358_s7, %s8008_s2 }
  0x25   : > { %p5360_p6 = scmp.ne.s32.totalorder %s5358_s7, %s5359_s8  ;;  %p5366_p13 = scmp.lt.s32.totalorder %s5364_s22, %s5359_s8 }
  0x27   : > { %p5362_p9 = pnand %p5360_p6, %p5331_p10  ;;  %p5367_p0 = por %p5366_p13, %p5365_p12 }
  0x29   : > { %p5363_p11 = pneg %p5362_p9 }
  0x2b   : > { %p5368_p1 = pnand %p5367_p0, %p5363_p11 }
  0x2d   : > { %5371 = shalt.err (!%p5368_p1)
}
  0x2e   : > { %5265 = dma.hbm_to_vmem [thread:$0]  (!%p5509_p8), %s199_s15, 64, %s201_s11, %s189_s21  }
  0x2f   : > { %218 = sbr.rel (%p5530_p5) target bundleno = 2334 (0x91e), region = 36 }
  0x34   : > { %s220_s26 = sand.u32 1, %s5417_s16  }
  0x35   : > { %s5247_s28 = sshll.u32 %s220_s26, 14  ;;  %s221_s29 = scalar_lea.sflag [#allocation3], %s220_s26 }
  0x36   : > { %s5553_s5 = scalar_lea.vmem [#allocation2], %s5247_s28 }
  0x37   : > { %5404 = dma.done.wait (%p5495_p7), %s221_s29, 262144  }
  0x38   : > { %5406 = vsyncadd (%p5495_p7), %s221_s29, 4294705152  ;;  %s5248_s6 = sshll.u32 %s220_s26, 2  ;;  %s231_s12 = scalar_lea.sflag [#allocation5], %s220_s26 }
  0x39   : > { %s5559_s9 = scalar_lea.vmem [#allocation4], %s5248_s6 }
  0x3a   : > { %5408 = dma.done.wait (%p5495_p7), %s231_s12, 64  }
  0x3b   : > { %5410 = vsyncadd (%p5495_p7), %s231_s12, 4294967232  ;;  %v349_v0 = vld [vmem:[%s5553_s5 + $0x1e0] sm:$0xff]  ;;  %s5249_s29 = sshll.u32 %s5474_s19, 6  ;;  %p277_p8 = scmp.lt.s32.totalorder %s5474_s19, 7  ;;  %vm5136_vm0 = vcmask 74752  }
  0x3c   : > { %v413_v1 = vld [vmem:[%s5553_s5 + $0x3e0] sm:$0xff]  ;;  %2428 = vmatpush.msra.mxu0 %v349_v0  ;;  %p7866_p7 = scmp.lt.s32.totalorder %s5249_s29, 511 }
  0x3d   : > { %v477_v2 = vld [vmem:[%s5553_s5 + $0x5e0] sm:$0xff]  ;;  %2448 = vmatpush.msra.mxu1 %v413_v1  ;;  %s8041_s19 = smov (!%p277_p8, %s5474_s19), 7 }
  0x3e   : > { %v345_v3 = vld [vmem:[%s5553_s5 + $0x1c0] sm:$0xff]  ;;  %2468 = vmatpush.msra.mxu2 %v477_v2  ;;  %s8039_s29 = smov (!%p7866_p7, %s5249_s29), 511 }
  0x3f   : > { %v409_v4 = vld [vmem:[%s5553_s5 + $0x3c0] sm:$0xff]  ;;  %2429 = vmatpush.msra.mxu0 %v345_v3  ;;  %s5250_s12 = sshll.u32 %s8039_s29, 3 }
  0x40   : > { %v473_v5 = vld [vmem:[%s5553_s5 + $0x5c0] sm:$0xff]  ;;  %2449 = vmatpush.msra.mxu1 %v409_v4  ;;  %s7906_s30 = scalar_lea.vmem %s8009_s3, %s5250_s12 }
  0x41   : > { %v541_v6 = vld [vmem:[%s5553_s5 + $0x7e0] sm:$0xff]  ;;  %2469 = vmatpush.msra.mxu2 %v473_v5 }
  0x42   : > { %v341_v7 = vld [vmem:[%s5553_s5 + $0x1a0] sm:$0xff]  ;;  %2488 = vmatpush.msra.mxu3 %v541_v6 }
  0x43   : > { %v405_v8 = vld [vmem:[%s5553_s5 + $0x3a0] sm:$0xff]  ;;  %2430 = vmatpush.msra.mxu0 %v341_v7 }
  0x44   : > { %v469_v9 = vld [vmem:[%s5553_s5 + $0x5a0] sm:$0xff]  ;;  %2450 = vmatpush.msra.mxu1 %v405_v8 }
  0x45   : > { %v537_v10 = vld [vmem:[%s5553_s5 + $0x7c0] sm:$0xff]  ;;  %2470 = vmatpush.msra.mxu2 %v469_v9 }
  0x46   : > { %v337_v11 = vld [vmem:[%s5553_s5 + $0x180] sm:$0xff]  ;;  %2489 = vmatpush.msra.mxu3 %v537_v10 }
  0x47   : > { %v401_v12 = vld [vmem:[%s5553_s5 + $0x380] sm:$0xff]  ;;  %2431 = vmatpush.msra.mxu0 %v337_v11 }
  0x48   : > { %v465_v13 = vld [vmem:[%s5553_s5 + $0x580] sm:$0xff]  ;;  %2451 = vmatpush.msra.mxu1 %v401_v12 }
  0x49   : > { %v533_v14 = vld [vmem:[%s5553_s5 + $0x7a0] sm:$0xff]  ;;  %2471 = vmatpush.msra.mxu2 %v465_v13 }
  0x4a   : > { %v333_v15 = vld [vmem:[%s5553_s5 + $0x160] sm:$0xff]  ;;  %2490 = vmatpush.msra.mxu3 %v533_v14 }
  0x4b   : > { %v397_v16 = vld [vmem:[%s5553_s5 + $0x360] sm:$0xff]  ;;  %2432 = vmatpush.msra.mxu0 %v333_v15 }
  0x4c   : > { %v461_v17 = vld [vmem:[%s5553_s5 + $0x560] sm:$0xff]  ;;  %2452 = vmatpush.msra.mxu1 %v397_v16 }
  0x4d   : > { %v529_v18 = vld [vmem:[%s5553_s5 + $0x780] sm:$0xff]  ;;  %2472 = vmatpush.msra.mxu2 %v461_v17 }
  0x4e   : > { %v329_v19 = vld [vmem:[%s5553_s5 + $0x140] sm:$0xff]  ;;  %2491 = vmatpush.msra.mxu3 %v529_v18 }
  0x4f   : > { %v393_v20 = vld [vmem:[%s5553_s5 + $0x340] sm:$0xff]  ;;  %2433 = vmatpush.msra.mxu0 %v329_v19 }
  0x50   : > { %v457_v21 = vld [vmem:[%s5553_s5 + $0x540] sm:$0xff]  ;;  %2453 = vmatpush.msra.mxu1 %v393_v20 }
  0x51   : > { %v525_v22 = vld [vmem:[%s5553_s5 + $0x760] sm:$0xff]  ;;  %2473 = vmatpush.msra.mxu2 %v457_v21 }
  0x52   : > { %v325_v23 = vld [vmem:[%s5553_s5 + $0x120] sm:$0xff]  ;;  %2492 = vmatpush.msra.mxu3 %v525_v22 }
  0x53   : > { %v389_v24 = vld [vmem:[%s5553_s5 + $0x320] sm:$0xff]  ;;  %2434 = vmatpush.msra.mxu0 %v325_v23 }
  0x54   : > { %v453_v25 = vld [vmem:[%s5553_s5 + $0x520] sm:$0xff]  ;;  %2454 = vmatpush.msra.mxu1 %v389_v24 }
  0x55   : > { %v521_v26 = vld [vmem:[%s5553_s5 + $0x740] sm:$0xff]  ;;  %2474 = vmatpush.msra.mxu2 %v453_v25  ;;  %v281_v25 = vld [vmem:[%s8006_s0] sm:$0xff] }
  0x56   : > { %v321_v27 = vld [vmem:[%s5553_s5 + $0x100] sm:$0xff]  ;;  %2493 = vmatpush.msra.mxu3 %v521_v26  ;;  %2355 = vst [vmem:[#allocation1] ss:$4 sm:$0xff] %v281_v25 }
  0x57   : > { %v385_v28 = vld [vmem:[%s5553_s5 + $0x300] sm:$0xff]  ;;  %2435 = vmatpush.msra.mxu0 %v321_v27 }
  0x58   : > { %v449_v29 = vld [vmem:[%s5553_s5 + $0x500] sm:$0xff]  ;;  %2455 = vmatpush.msra.mxu1 %v385_v28 }
  0x59   : > { %v517_v30 = vld [vmem:[%s5553_s5 + $0x720] sm:$0xff]  ;;  %2475 = vmatpush.msra.mxu2 %v449_v29 }
  0x5a   : > { %v317_v31 = vld [vmem:[%s5553_s5 + $0xe0] sm:$0xff]  ;;  %2494 = vmatpush.msra.mxu3 %v517_v30 }
  0x5b   : > { %v381_v32 = vld [vmem:[%s5553_s5 + $0x2e0] sm:$0xff]  ;;  %2436 = vmatpush.msra.mxu0 %v317_v31 }
  0x5c   : > { %v445_v33 = vld [vmem:[%s5553_s5 + $0x4e0] sm:$0xff]  ;;  %2456 = vmatpush.msra.mxu1 %v381_v32 }
  0x5d   : > { %v513_v34 = vld [vmem:[%s5553_s5 + $0x700] sm:$0xff]  ;;  %2476 = vmatpush.msra.mxu2 %v445_v33 }
  0x5e   : > { %v313_v35 = vld [vmem:[%s5553_s5 + $0xc0] sm:$0xff]  ;;  %2495 = vmatpush.msra.mxu3 %v513_v34 }
  0x5f   : > { %v377_v36 = vld [vmem:[%s5553_s5 + $0x2c0] sm:$0xff]  ;;  %2437 = vmatpush.msra.mxu0 %v313_v35 }
  0x60   : > { %v441_v37 = vld [vmem:[%s5553_s5 + $0x4c0] sm:$0xff]  ;;  %2457 = vmatpush.msra.mxu1 %v377_v36 }
  0x61   : > { %v509_v38 = vld [vmem:[%s5553_s5 + $0x6e0] sm:$0xff]  ;;  %2477 = vmatpush.msra.mxu2 %v441_v37 }
  0x62   : > { %v309_v39 = vld [vmem:[%s5553_s5 + $0xa0] sm:$0xff]  ;;  %2496 = vmatpush.msra.mxu3 %v509_v38 }
  0x63   : > { %v373_v40 = vld [vmem:[%s5553_s5 + $0x2a0] sm:$0xff]  ;;  %2438 = vmatpush.msra.mxu0 %v309_v39 }
  0x64   : > { %v437_v41 = vld [vmem:[%s5553_s5 + $0x4a0] sm:$0xff]  ;;  %2458 = vmatpush.msra.mxu1 %v373_v40 }
  0x65   : > { %v505_v42 = vld [vmem:[%s5553_s5 + $0x6c0] sm:$0xff]  ;;  %2478 = vmatpush.msra.mxu2 %v437_v41 }
  0x66   : > { %v305_v43 = vld [vmem:[%s5553_s5 + $0x80] sm:$0xff]  ;;  %2497 = vmatpush.msra.mxu3 %v505_v42 }
  0x67   : > { %v369_v44 = vld [vmem:[%s5553_s5 + $0x280] sm:$0xff]  ;;  %2439 = vmatpush.msra.mxu0 %v305_v43 }
  0x68   : > { %v433_v45 = vld [vmem:[%s5553_s5 + $0x480] sm:$0xff]  ;;  %2459 = vmatpush.msra.mxu1 %v369_v44 }
  0x69   : > { %v501_v46 = vld [vmem:[%s5553_s5 + $0x6a0] sm:$0xff]  ;;  %2479 = vmatpush.msra.mxu2 %v433_v45  ;;  %v283_v45 = vld [vmem:[%s8006_s0 + $0x10] sm:$0xff] }
  0x6a   : > { %v301_v47 = vld [vmem:[%s5553_s5 + $0x60] sm:$0xff]  ;;  %2498 = vmatpush.msra.mxu3 %v501_v46 }
  0x6b   : > { %v365_v48 = vld [vmem:[%s5553_s5 + $0x260] sm:$0xff]  ;;  %2440 = vmatpush.msra.mxu0 %v301_v47  ;;  %v5682_v47 = vld.sshfl [vmem:[#allocation1] sm:$0xff pattern:$0x73625140] }
  0x6c   : > { %v429_v49 = vld [vmem:[%s5553_s5 + $0x460] sm:$0xff]  ;;  %2460 = vmatpush.msra.mxu1 %v365_v48 }
  0x6d   : > { %v497_v50 = vld [vmem:[%s5553_s5 + $0x680] sm:$0xff]  ;;  %2480 = vmatpush.msra.mxu2 %v429_v49  ;;  %v5686_v49 = vld.sshfl [vmem:[#allocation1 + $0x10] sm:$0xff pattern:$0x73625140] }
  0x6e   : > { %v297_v51 = vld [vmem:[%s5553_s5 + $0x40] sm:$0xff]  ;;  %2499 = vmatpush.msra.mxu3 %v497_v50  ;;  %v5688_v50 = vld.sshfl [vmem:[#allocation1 + $0x18] sm:$0xff pattern:$0x73625140] }
  0x6f   : > { %v361_v52 = vld [vmem:[%s5553_s5 + $0x240] sm:$0xff]  ;;  %2441 = vmatpush.msra.mxu0 %v297_v51 }
  0x70   : > { %v425_v53 = vld [vmem:[%s5553_s5 + $0x440] sm:$0xff]  ;;  %2461 = vmatpush.msra.mxu1 %v361_v52 }
  0x71   : > { %v493_v54 = vld [vmem:[%s5553_s5 + $0x660] sm:$0xff]  ;;  %2481 = vmatpush.msra.mxu2 %v425_v53 }
  0x72   : > { %v293_v55 = vld [vmem:[%s5553_s5 + $0x20] sm:$0xff]  ;;  %2500 = vmatpush.msra.mxu3 %v493_v54 }
  0x73   : > { %v357_v56 = vld [vmem:[%s5553_s5 + $0x220] sm:$0xff]  ;;  %2442 = vmatpush.msra.mxu0 %v293_v55 }
  0x74   : > { %v421_v57 = vld [vmem:[%s5553_s5 + $0x420] sm:$0xff]  ;;  %2462 = vmatpush.msra.mxu1 %v357_v56 }
  0x75   : > { %v489_v58 = vld [vmem:[%s5553_s5 + $0x640] sm:$0xff]  ;;  %2482 = vmatpush.msra.mxu2 %v421_v57 }
  0x76   : > { %v289_v59 = vld [vmem:[%s5553_s5] sm:$0xff]  ;;  %2501 = vmatpush.msra.mxu3 %v489_v58 }
  0x77   : > { %v353_v60 = vld [vmem:[%s5553_s5 + $0x200] sm:$0xff]  ;;  %2443 = vmatpush.msra.mxu0 %v289_v59 }
  0x78   : > { %v417_v61 = vld [vmem:[%s5553_s5 + $0x400] sm:$0xff]  ;;  %2463 = vmatpush.msra.mxu1 %v353_v60  ;;  %2444 = vmatmul.f32.vlgmr.msra.gmra.mxu0 %v5682_v47 }
  0x79   : > { %v485_v62 = vld [vmem:[%s5553_s5 + $0x620] sm:$0xff]  ;;  %2483 = vmatpush.msra.mxu2 %v417_v61 }
  0x7a   : > { %v605_v63 = vld [vmem:[%s5553_s5 + $0x9e0] sm:$0xff]  ;;  %2502 = vmatpush.msra.mxu3 %v485_v62  ;;  %v284_v62 = vld [vmem:[%s8006_s0 + $0x18] sm:$0xff]  ;;  %2484 = vmatmul.f32.vlgmr.msra.gmra.mxu2 %v5686_v49 }
  0x7b   : > { %v669_v0 = vld [vmem:[%s5553_s5 + $0xbe0] sm:$0xff]  ;;  %2508 = vmatpush.msrb.mxu0 %v605_v63 }
  0x7c   : > { %v733_v1 = vld [vmem:[%s5553_s5 + $0xde0] sm:$0xff]  ;;  %2528 = vmatpush.msrb.mxu1 %v669_v0 }
  0x7d   : > { %v481_v2 = vld [vmem:[%s5553_s5 + $0x600] sm:$0xff]  ;;  %2548 = vmatpush.msrb.mxu2 %v733_v1 }
  0x7e   : > { %v601_v3 = vld [vmem:[%s5553_s5 + $0x9c0] sm:$0xff]  ;;  %2503 = vmatpush.msra.mxu3 %v481_v2 }
  0x7f   : > { %v665_v4 = vld [vmem:[%s5553_s5 + $0xbc0] sm:$0xff]  ;;  %2509 = vmatpush.msrb.mxu0 %v601_v3  ;;  %2504 = vmatmul.f32.vlgmr.msra.gmra.mxu3 %v5688_v50 }
  0x80   : > { %v729_v5 = vld [vmem:[%s5553_s5 + $0xdc0] sm:$0xff]  ;;  %2529 = vmatpush.msrb.mxu1 %v665_v4 }
  0x81   : > { %v797_v6 = vld [vmem:[%s5553_s5 + $0xfe0] sm:$0xff]  ;;  %2549 = vmatpush.msrb.mxu2 %v729_v5 }
  0x82   : > { %v597_v7 = vld [vmem:[%s5553_s5 + $0x9a0] sm:$0xff]  ;;  %2568 = vmatpush.msrb.mxu3 %v797_v6 }
  0x83   : > { %v661_v8 = vld [vmem:[%s5553_s5 + $0xba0] sm:$0xff]  ;;  %2510 = vmatpush.msrb.mxu0 %v597_v7 }
  0x84   : > { %v725_v9 = vld [vmem:[%s5553_s5 + $0xda0] sm:$0xff]  ;;  %2530 = vmatpush.msrb.mxu1 %v661_v8 }
  0x85   : > { %v793_v10 = vld [vmem:[%s5553_s5 + $0xfc0] sm:$0xff]  ;;  %2550 = vmatpush.msrb.mxu2 %v725_v9 }
  0x86   : > { %v593_v11 = vld [vmem:[%s5553_s5 + $0x980] sm:$0xff]  ;;  %2569 = vmatpush.msrb.mxu3 %v793_v10 }
  0x87   : > { %v657_v12 = vld [vmem:[%s5553_s5 + $0xb80] sm:$0xff]  ;;  %2511 = vmatpush.msrb.mxu0 %v593_v11 }
  0x88   : > { %v721_v13 = vld [vmem:[%s5553_s5 + $0xd80] sm:$0xff]  ;;  %2531 = vmatpush.msrb.mxu1 %v657_v12 }
  0x89   : > { %v789_v14 = vld [vmem:[%s5553_s5 + $0xfa0] sm:$0xff]  ;;  %2551 = vmatpush.msrb.mxu2 %v721_v13 }
  0x8a   : > { %v589_v15 = vld [vmem:[%s5553_s5 + $0x960] sm:$0xff]  ;;  %2570 = vmatpush.msrb.mxu3 %v789_v14 }
  0x8b   : > { %v653_v16 = vld [vmem:[%s5553_s5 + $0xb60] sm:$0xff]  ;;  %2512 = vmatpush.msrb.mxu0 %v589_v15 }
  0x8c   : > { %v717_v17 = vld [vmem:[%s5553_s5 + $0xd60] sm:$0xff]  ;;  %2532 = vmatpush.msrb.mxu1 %v653_v16 }
  0x8d   : > { %v785_v18 = vld [vmem:[%s5553_s5 + $0xf80] sm:$0xff]  ;;  %2552 = vmatpush.msrb.mxu2 %v717_v17 }
  0x8e   : > { %v585_v19 = vld [vmem:[%s5553_s5 + $0x940] sm:$0xff]  ;;  %2571 = vmatpush.msrb.mxu3 %v785_v18 }
  0x8f   : > { %v649_v20 = vld [vmem:[%s5553_s5 + $0xb40] sm:$0xff]  ;;  %2513 = vmatpush.msrb.mxu0 %v585_v19 }
  0x90   : > { %v713_v21 = vld [vmem:[%s5553_s5 + $0xd40] sm:$0xff]  ;;  %2533 = vmatpush.msrb.mxu1 %v649_v20 }
  0x91   : > { %v781_v22 = vld [vmem:[%s5553_s5 + $0xf60] sm:$0xff]  ;;  %2553 = vmatpush.msrb.mxu2 %v713_v21 }
  0x92   : > { %v581_v23 = vld [vmem:[%s5553_s5 + $0x920] sm:$0xff]  ;;  %2572 = vmatpush.msrb.mxu3 %v781_v22 }
  0x93   : > { %v645_v24 = vld [vmem:[%s5553_s5 + $0xb20] sm:$0xff]  ;;  %2514 = vmatpush.msrb.mxu0 %v581_v23 }
  0x94   : > { %v709_v26 = vld [vmem:[%s5553_s5 + $0xd20] sm:$0xff]  ;;  %2534 = vmatpush.msrb.mxu1 %v645_v24 }
  0x95   : > { %v777_v27 = vld [vmem:[%s5553_s5 + $0xf40] sm:$0xff]  ;;  %2554 = vmatpush.msrb.mxu2 %v709_v26 }
  0x96   : > { %v577_v28 = vld [vmem:[%s5553_s5 + $0x900] sm:$0xff]  ;;  %2573 = vmatpush.msrb.mxu3 %v777_v27 }
  0x97   : > { %v641_v29 = vld [vmem:[%s5553_s5 + $0xb00] sm:$0xff]  ;;  %2515 = vmatpush.msrb.mxu0 %v577_v28 }
  0x98   : > { %v705_v30 = vld [vmem:[%s5553_s5 + $0xd00] sm:$0xff]  ;;  %2535 = vmatpush.msrb.mxu1 %v641_v29 }
  0x99   : > { %v773_v31 = vld [vmem:[%s5553_s5 + $0xf20] sm:$0xff]  ;;  %2555 = vmatpush.msrb.mxu2 %v705_v30 }
  0x9a   : > { %v573_v32 = vld [vmem:[%s5553_s5 + $0x8e0] sm:$0xff]  ;;  %2574 = vmatpush.msrb.mxu3 %v773_v31 }
  0x9b   : > { %v637_v33 = vld [vmem:[%s5553_s5 + $0xae0] sm:$0xff]  ;;  %2516 = vmatpush.msrb.mxu0 %v573_v32 }
  0x9c   : > { %v701_v34 = vld [vmem:[%s5553_s5 + $0xce0] sm:$0xff]  ;;  %2536 = vmatpush.msrb.mxu1 %v637_v33 }
  0x9d   : > { %v769_v35 = vld [vmem:[%s5553_s5 + $0xf00] sm:$0xff]  ;;  %2556 = vmatpush.msrb.mxu2 %v701_v34 }
  0x9e   : > { %v569_v36 = vld [vmem:[%s5553_s5 + $0x8c0] sm:$0xff]  ;;  %2575 = vmatpush.msrb.mxu3 %v769_v35 }
  0x9f   : > { %v633_v37 = vld [vmem:[%s5553_s5 + $0xac0] sm:$0xff]  ;;  %2517 = vmatpush.msrb.mxu0 %v569_v36 }
  0xa0   : > { %v697_v38 = vld [vmem:[%s5553_s5 + $0xcc0] sm:$0xff]  ;;  %2537 = vmatpush.msrb.mxu1 %v633_v37 }
  0xa1   : > { %v765_v39 = vld [vmem:[%s5553_s5 + $0xee0] sm:$0xff]  ;;  %2557 = vmatpush.msrb.mxu2 %v697_v38 }
  0xa2   : > { %v565_v40 = vld [vmem:[%s5553_s5 + $0x8a0] sm:$0xff]  ;;  %2576 = vmatpush.msrb.mxu3 %v765_v39 }
  0xa3   : > { %v629_v41 = vld [vmem:[%s5553_s5 + $0xaa0] sm:$0xff]  ;;  %2518 = vmatpush.msrb.mxu0 %v565_v40 }
  0xa4   : > { %v282_v42 = vld [vmem:[%s8006_s0 + $0x8] sm:$0xff]  ;;  %2538 = vmatpush.msrb.mxu1 %v629_v41 }
  0xa5   : > { %v693_v43 = vld [vmem:[%s5553_s5 + $0xca0] sm:$0xff]  ;;  %2357 = vst [vmem:[#allocation1 + $0x20] ss:$4 sm:$0xff] %v282_v42 }
  0xa6   : > { %v761_v44 = vld [vmem:[%s5553_s5 + $0xec0] sm:$0xff]  ;;  %2558 = vmatpush.msrb.mxu2 %v693_v43 }
  0xa7   : > { %v561_v46 = vld [vmem:[%s5553_s5 + $0x880] sm:$0xff]  ;;  %2577 = vmatpush.msrb.mxu3 %v761_v44 }
  0xa8   : > { %v5684_v48 = vld.sshfl [vmem:[#allocation1 + $0x8] sm:$0xff pattern:$0x73625140]  ;;  %2519 = vmatpush.msrb.mxu0 %v561_v46 }
  0xa9   : > { %v625_v51 = vld [vmem:[%s5553_s5 + $0xa80] sm:$0xff]  ;;  %2366 = vst [vmem:[#allocation1] ss:$4 sm:$0xff] %v283_v45  ;;  %2464 = vmatmul.f32.vlgmr.msra.gmra.mxu1 %v5684_v48 }
  0xaa   : > { %v689_v52 = vld [vmem:[%s5553_s5 + $0xc80] sm:$0xff]  ;;  %2539 = vmatpush.msrb.mxu1 %v625_v51 }
  0xab   : > { %v757_v53 = vld [vmem:[%s5553_s5 + $0xea0] sm:$0xff]  ;;  %2559 = vmatpush.msrb.mxu2 %v689_v52 }
  0xac   : > { %v557_v54 = vld [vmem:[%s5553_s5 + $0x860] sm:$0xff]  ;;  %2578 = vmatpush.msrb.mxu3 %v757_v53  ;;  %v5704_v63 = vld.sshfl [vmem:[#allocation1 + $0x30] sm:$0xff pattern:$0x73625140] }
  0xad   : > { %v621_v55 = vld [vmem:[%s5553_s5 + $0xa60] sm:$0xff]  ;;  %v5706_v0 = vld.sshfl [vmem:[#allocation1 + $0x20] sm:$0xff pattern:$0x73625140]  ;;  %2520 = vmatpush.msrb.mxu0 %v557_v54 }
  0xae   : > { %v685_v56 = vld [vmem:[%s5553_s5 + $0xc60] sm:$0xff]  ;;  %2540 = vmatpush.msrb.mxu1 %v621_v55  ;;  %v5708_v1 = vld.sshfl [vmem:[#allocation1 + $0x38] sm:$0xff pattern:$0x73625140] }
  0xaf   : > { %v753_v57 = vld [vmem:[%s5553_s5 + $0xe80] sm:$0xff]  ;;  %2560 = vmatpush.msrb.mxu2 %v685_v56 }
  0xb0   : > { %v553_v58 = vld [vmem:[%s5553_s5 + $0x840] sm:$0xff]  ;;  %2579 = vmatpush.msrb.mxu3 %v753_v57 }
  0xb1   : > { %v617_v59 = vld [vmem:[%s5553_s5 + $0xa40] sm:$0xff]  ;;  %2521 = vmatpush.msrb.mxu0 %v553_v58 }
  0xb2   : > { %v681_v60 = vld [vmem:[%s5553_s5 + $0xc40] sm:$0xff]  ;;  %2541 = vmatpush.msrb.mxu1 %v617_v59 }
  0xb3   : > { %v749_v61 = vld [vmem:[%s5553_s5 + $0xe60] sm:$0xff]  ;;  %2561 = vmatpush.msrb.mxu2 %v681_v60 }
  0xb4   : > { %v5710_v2 = vld.sshfl [vmem:[#allocation1 + $0x28] sm:$0xff pattern:$0x73625140]  ;;  %2580 = vmatpush.msrb.mxu3 %v749_v61 }
  0xb5   : > { %v549_v3 = vld [vmem:[%s5553_s5 + $0x820] sm:$0xff]  ;;  %2367 = vst [vmem:[#allocation1 + $0x20] ss:$4 sm:$0xff] %v284_v62 }
  0xb6   : > { %v613_v4 = vld [vmem:[%s5553_s5 + $0xa20] sm:$0xff]  ;;  %2522 = vmatpush.msrb.mxu0 %v549_v3 }
  0xb7   : > { %v677_v5 = vld [vmem:[%s5553_s5 + $0xc20] sm:$0xff]  ;;  %2542 = vmatpush.msrb.mxu1 %v613_v4 }
  0xb8   : > { %v745_v6 = vld [vmem:[%s5553_s5 + $0xe40] sm:$0xff]  ;;  %2562 = vmatpush.msrb.mxu2 %v677_v5 }
  0xb9   : > { %v545_v7 = vld [vmem:[%s5553_s5 + $0x800] sm:$0xff]  ;;  %2581 = vmatpush.msrb.mxu3 %v745_v6 }
  0xba   : > { %v609_v8 = vld [vmem:[%s5553_s5 + $0xa00] sm:$0xff]  ;;  %2523 = vmatpush.msrb.mxu0 %v545_v7 }
  0xbb   : > { %v673_v9 = vld [vmem:[%s5553_s5 + $0xc00] sm:$0xff]  ;;  %2543 = vmatpush.msrb.mxu1 %v609_v8  ;;  %2524 = vmatmul.f32.vlgmr.msrb.gmra.mxu0 %v5706_v0 }
  0xbc   : > { %v741_v10 = vld [vmem:[%s5553_s5 + $0xe20] sm:$0xff]  ;;  %2563 = vmatpush.msrb.mxu2 %v673_v9  ;;  %2544 = vmatmul.f32.vlgmr.msrb.gmra.mxu1 %v5710_v2 }
  0xbd   : > { %v861_v11 = vld [vmem:[%s5553_s5 + $0x11e0] sm:$0xff]  ;;  %2582 = vmatpush.msrb.mxu3 %v741_v10  ;;  %2564 = vmatmul.f32.vlgmr.msrb.gmra.mxu2 %v5704_v63 }
  0xbe   : > { %v925_v12 = vld [vmem:[%s5553_s5 + $0x13e0] sm:$0xff]  ;;  %2588 = vmatpush.msra.mxu0 %v861_v11 }
  0xbf   : > { %v989_v13 = vld [vmem:[%s5553_s5 + $0x15e0] sm:$0xff]  ;;  %2608 = vmatpush.msra.mxu1 %v925_v12 }
  0xc0   : > { %v737_v14 = vld [vmem:[%s5553_s5 + $0xe00] sm:$0xff]  ;;  %2628 = vmatpush.msra.mxu2 %v989_v13 }
  0xc1   : > { %v857_v15 = vld [vmem:[%s5553_s5 + $0x11c0] sm:$0xff]  ;;  %2583 = vmatpush.msrb.mxu3 %v737_v14 }
  0xc2   : > { %v921_v16 = vld [vmem:[%s5553_s5 + $0x13c0] sm:$0xff]  ;;  %2589 = vmatpush.msra.mxu0 %v857_v15  ;;  %2584 = vmatmul.f32.vlgmr.msrb.gmra.mxu3 %v5708_v1 }
  0xc3   : > { %v985_v17 = vld [vmem:[%s5553_s5 + $0x15c0] sm:$0xff]  ;;  %2609 = vmatpush.msra.mxu1 %v921_v16 }
  0xc4   : > { %v1053_v18 = vld [vmem:[%s5553_s5 + $0x17e0] sm:$0xff]  ;;  %2629 = vmatpush.msra.mxu2 %v985_v17 }
  0xc5   : > { %v853_v19 = vld [vmem:[%s5553_s5 + $0x11a0] sm:$0xff]  ;;  %2648 = vmatpush.msra.mxu3 %v1053_v18 }
  0xc6   : > { %v917_v20 = vld [vmem:[%s5553_s5 + $0x13a0] sm:$0xff]  ;;  %2590 = vmatpush.msra.mxu0 %v853_v19  ;;  %v5792_v19 = vld.sshfl [vmem:[#allocation1] sm:$0xff pattern:$0x73625140] }
  0xc7   : > { %v981_v21 = vld [vmem:[%s5553_s5 + $0x15a0] sm:$0xff]  ;;  %2610 = vmatpush.msra.mxu1 %v917_v20  ;;  %v5794_v20 = vld.sshfl [vmem:[#allocation1 + $0x10] sm:$0xff pattern:$0x73625140] }
  0xc8   : > { %v1049_v22 = vld [vmem:[%s5553_s5 + $0x17c0] sm:$0xff]  ;;  %2630 = vmatpush.msra.mxu2 %v981_v21 }
  0xc9   : > { %v849_v23 = vld [vmem:[%s5553_s5 + $0x1180] sm:$0xff]  ;;  %2649 = vmatpush.msra.mxu3 %v1049_v22 }
  0xca   : > { %v913_v24 = vld [vmem:[%s5553_s5 + $0x1380] sm:$0xff]  ;;  %2591 = vmatpush.msra.mxu0 %v849_v23 }
  0xcb   : > { %v977_v25 = vld [vmem:[%s5553_s5 + $0x1580] sm:$0xff]  ;;  %2611 = vmatpush.msra.mxu1 %v913_v24 }
  0xcc   : > { %v1045_v26 = vld [vmem:[%s5553_s5 + $0x17a0] sm:$0xff]  ;;  %2631 = vmatpush.msra.mxu2 %v977_v25 }
  0xcd   : > { %v845_v27 = vld [vmem:[%s5553_s5 + $0x1160] sm:$0xff]  ;;  %2650 = vmatpush.msra.mxu3 %v1045_v26  ;;  %v5804_v26 = vld.sshfl [vmem:[#allocation1 + $0x18] sm:$0xff pattern:$0x73625140] }
  0xce   : > { %v909_v28 = vld [vmem:[%s5553_s5 + $0x1360] sm:$0xff]  ;;  %2592 = vmatpush.msra.mxu0 %v845_v27 }
  0xcf   : > { %v973_v29 = vld [vmem:[%s5553_s5 + $0x1560] sm:$0xff]  ;;  %2612 = vmatpush.msra.mxu1 %v909_v28 }
  0xd0   : > { %v1041_v30 = vld [vmem:[%s5553_s5 + $0x1780] sm:$0xff]  ;;  %2632 = vmatpush.msra.mxu2 %v973_v29 }
  0xd1   : > { %v841_v31 = vld [vmem:[%s5553_s5 + $0x1140] sm:$0xff]  ;;  %2651 = vmatpush.msra.mxu3 %v1041_v30 }
  0xd2   : > { %v905_v32 = vld [vmem:[%s5553_s5 + $0x1340] sm:$0xff]  ;;  %2593 = vmatpush.msra.mxu0 %v841_v31 }
  0xd3   : > { %v969_v33 = vld [vmem:[%s5553_s5 + $0x1540] sm:$0xff]  ;;  %2613 = vmatpush.msra.mxu1 %v905_v32 }
  0xd4   : > { %v1037_v34 = vld [vmem:[%s5553_s5 + $0x1760] sm:$0xff]  ;;  %2633 = vmatpush.msra.mxu2 %v969_v33 }
  0xd5   : > { %v837_v35 = vld [vmem:[%s5553_s5 + $0x1120] sm:$0xff]  ;;  %2652 = vmatpush.msra.mxu3 %v1037_v34 }
  0xd6   : > { %v901_v36 = vld [vmem:[%s5553_s5 + $0x1320] sm:$0xff]  ;;  %2594 = vmatpush.msra.mxu0 %v837_v35 }
  0xd7   : > { %v965_v37 = vld [vmem:[%s5553_s5 + $0x1520] sm:$0xff]  ;;  %2614 = vmatpush.msra.mxu1 %v901_v36 }
  0xd8   : > { %v1033_v38 = vld [vmem:[%s5553_s5 + $0x1740] sm:$0xff]  ;;  %2634 = vmatpush.msra.mxu2 %v965_v37 }
  0xd9   : > { %v833_v39 = vld [vmem:[%s5553_s5 + $0x1100] sm:$0xff]  ;;  %2653 = vmatpush.msra.mxu3 %v1033_v38 }
  0xda   : > { %v897_v40 = vld [vmem:[%s5553_s5 + $0x1300] sm:$0xff]  ;;  %2595 = vmatpush.msra.mxu0 %v833_v39 }
  0xdb   : > { %v961_v41 = vld [vmem:[%s5553_s5 + $0x1500] sm:$0xff]  ;;  %2615 = vmatpush.msra.mxu1 %v897_v40 }
  0xdc   : > { %v1029_v42 = vld [vmem:[%s5553_s5 + $0x1720] sm:$0xff]  ;;  %2635 = vmatpush.msra.mxu2 %v961_v41 }
  0xdd   : > { %v829_v43 = vld [vmem:[%s5553_s5 + $0x10e0] sm:$0xff]  ;;  %2654 = vmatpush.msra.mxu3 %v1029_v42 }
  0xde   : > { %v893_v44 = vld [vmem:[%s5553_s5 + $0x12e0] sm:$0xff]  ;;  %2596 = vmatpush.msra.mxu0 %v829_v43 }
  0xdf   : > { %v957_v45 = vld [vmem:[%s5553_s5 + $0x14e0] sm:$0xff]  ;;  %2616 = vmatpush.msra.mxu1 %v893_v44 }
  0xe0   : > { %v1025_v46 = vld [vmem:[%s5553_s5 + $0x1700] sm:$0xff]  ;;  %2636 = vmatpush.msra.mxu2 %v957_v45 }
  0xe1   : > { %v825_v51 = vld [vmem:[%s5553_s5 + $0x10c0] sm:$0xff]  ;;  %2655 = vmatpush.msra.mxu3 %v1025_v46 }
  0xe2   : > { %v889_v52 = vld [vmem:[%s5553_s5 + $0x12c0] sm:$0xff]  ;;  %2597 = vmatpush.msra.mxu0 %v825_v51 }
  0xe3   : > { %v953_v53 = vld [vmem:[%s5553_s5 + $0x14c0] sm:$0xff]  ;;  %2617 = vmatpush.msra.mxu1 %v889_v52 }
  0xe4   : > { %v1021_v54 = vld [vmem:[%s5553_s5 + $0x16e0] sm:$0xff]  ;;  %2637 = vmatpush.msra.mxu2 %v953_v53 }
  0xe5   : > { %v821_v55 = vld [vmem:[%s5553_s5 + $0x10a0] sm:$0xff]  ;;  %2656 = vmatpush.msra.mxu3 %v1021_v54 }
  0xe6   : > { %v885_v56 = vld [vmem:[%s5553_s5 + $0x12a0] sm:$0xff]  ;;  %2598 = vmatpush.msra.mxu0 %v821_v55 }
  0xe7   : > { %v949_v57 = vld [vmem:[%s5553_s5 + $0x14a0] sm:$0xff]  ;;  %2618 = vmatpush.msra.mxu1 %v885_v56 }
  0xe8   : > { %v1017_v58 = vld [vmem:[%s5553_s5 + $0x16c0] sm:$0xff]  ;;  %2638 = vmatpush.msra.mxu2 %v949_v57 }
  0xe9   : > { %v817_v59 = vld [vmem:[%s5553_s5 + $0x1080] sm:$0xff]  ;;  %2657 = vmatpush.msra.mxu3 %v1017_v58 }
  0xea   : > { %v881_v60 = vld [vmem:[%s5553_s5 + $0x1280] sm:$0xff]  ;;  %2599 = vmatpush.msra.mxu0 %v817_v59 }
  0xeb   : > { %v945_v61 = vld [vmem:[%s5553_s5 + $0x1480] sm:$0xff]  ;;  %2619 = vmatpush.msra.mxu1 %v881_v60 }
  0xec   : > { %v1013_v62 = vld [vmem:[%s5553_s5 + $0x16a0] sm:$0xff]  ;;  %2639 = vmatpush.msra.mxu2 %v945_v61 }
  0xed   : > { %v813_v3 = vld [vmem:[%s5553_s5 + $0x1060] sm:$0xff]  ;;  %2658 = vmatpush.msra.mxu3 %v1013_v62 }
  0xee   : > { %v877_v4 = vld [vmem:[%s5553_s5 + $0x1260] sm:$0xff]  ;;  %2600 = vmatpush.msra.mxu0 %v813_v3 }
  0xef   : > { %v941_v5 = vld [vmem:[%s5553_s5 + $0x1460] sm:$0xff]  ;;  %2620 = vmatpush.msra.mxu1 %v877_v4 }
  0xf0   : > { %v1009_v6 = vld [vmem:[%s5553_s5 + $0x1680] sm:$0xff]  ;;  %2640 = vmatpush.msra.mxu2 %v941_v5 }
  0xf1   : > { %v809_v7 = vld [vmem:[%s5553_s5 + $0x1040] sm:$0xff]  ;;  %2659 = vmatpush.msra.mxu3 %v1009_v6 }
  0xf2   : > { %v873_v8 = vld [vmem:[%s5553_s5 + $0x1240] sm:$0xff]  ;;  %2601 = vmatpush.msra.mxu0 %v809_v7 }
  0xf3   : > { %v937_v9 = vld [vmem:[%s5553_s5 + $0x1440] sm:$0xff]  ;;  %2621 = vmatpush.msra.mxu1 %v873_v8 }
  0xf4   : > { %v1005_v10 = vld [vmem:[%s5553_s5 + $0x1660] sm:$0xff]  ;;  %2641 = vmatpush.msra.mxu2 %v937_v9 }
  0xf5   : > { %v805_v11 = vld [vmem:[%s5553_s5 + $0x1020] sm:$0xff]  ;;  %2660 = vmatpush.msra.mxu3 %v1005_v10 }
  0xf6   : > { %v869_v12 = vld [vmem:[%s5553_s5 + $0x1220] sm:$0xff]  ;;  %2602 = vmatpush.msra.mxu0 %v805_v11 }
  0xf7   : > { %v933_v13 = vld [vmem:[%s5553_s5 + $0x1420] sm:$0xff]  ;;  %2622 = vmatpush.msra.mxu1 %v869_v12 }
  0xf8   : > { %v1001_v14 = vld [vmem:[%s5553_s5 + $0x1640] sm:$0xff]  ;;  %2642 = vmatpush.msra.mxu2 %v933_v13 }
  0xf9   : > { %v801_v15 = vld [vmem:[%s5553_s5 + $0x1000] sm:$0xff]  ;;  %2661 = vmatpush.msra.mxu3 %v1001_v14 }
  0xfa   : > { %v865_v16 = vld [vmem:[%s5553_s5 + $0x1200] sm:$0xff]  ;;  %2603 = vmatpush.msra.mxu0 %v801_v15 }
  0xfb   : > { %v929_v17 = vld [vmem:[%s5553_s5 + $0x1400] sm:$0xff]  ;;  %2623 = vmatpush.msra.mxu1 %v865_v16  ;;  %2604 = vmatmul.f32.vlgmr.msra.gmra.mxu0 %v5792_v19 }
  0xfc   : > { %v997_v18 = vld [vmem:[%s5553_s5 + $0x1620] sm:$0xff]  ;;  %2643 = vmatpush.msra.mxu2 %v929_v17 }
  0xfd   : > { %v1117_v21 = vld [vmem:[%s5553_s5 + $0x19e0] sm:$0xff]  ;;  %2662 = vmatpush.msra.mxu3 %v997_v18  ;;  %2644 = vmatmul.f32.vlgmr.msra.gmra.mxu2 %v5794_v20 }
  0xfe   : > { %v1181_v22 = vld [vmem:[%s5553_s5 + $0x1be0] sm:$0xff]  ;;  %2668 = vmatpush.msrb.mxu0 %v1117_v21 }
  0xff   : > { %v1245_v23 = vld [vmem:[%s5553_s5 + $0x1de0] sm:$0xff]  ;;  %2688 = vmatpush.msrb.mxu1 %v1181_v22 }
 0x100   : > { %v993_v24 = vld [vmem:[%s5553_s5 + $0x1600] sm:$0xff]  ;;  %2708 = vmatpush.msrb.mxu2 %v1245_v23 }
 0x101   : > { %v5802_v25 = vld.sshfl [vmem:[#allocation1 + $0x8] sm:$0xff pattern:$0x73625140]  ;;  %2663 = vmatpush.msra.mxu3 %v993_v24 }
 0x102   : > { %v1113_v27 = vld [vmem:[%s5553_s5 + $0x19c0] sm:$0xff]  ;;  %2624 = vmatmul.f32.vlgmr.msra.gmra.mxu1 %v5802_v25  ;;  %2664 = vmatmul.f32.vlgmr.msra.gmra.mxu3 %v5804_v26 }
 0x103   : > { %v1177_v28 = vld [vmem:[%s5553_s5 + $0x1bc0] sm:$0xff]  ;;  %2669 = vmatpush.msrb.mxu0 %v1113_v27 }
 0x104   : > { %v1241_v29 = vld [vmem:[%s5553_s5 + $0x1dc0] sm:$0xff]  ;;  %2689 = vmatpush.msrb.mxu1 %v1177_v28 }
 0x105   : > { %v1309_v30 = vld [vmem:[%s5553_s5 + $0x1fe0] sm:$0xff]  ;;  %2709 = vmatpush.msrb.mxu2 %v1241_v29  ;;  %v285_v29 = vld [vmem:[%s8006_s0 + $0x20] sm:$0xff] }
 0x106   : > { %v1109_v31 = vld [vmem:[%s5553_s5 + $0x19a0] sm:$0xff]  ;;  %2728 = vmatpush.msrb.mxu3 %v1309_v30  ;;  %2376 = vst [vmem:[#allocation1] ss:$4 sm:$0xff] %v285_v29 }
 0x107   : > { %v1173_v32 = vld [vmem:[%s5553_s5 + $0x1ba0] sm:$0xff]  ;;  %2670 = vmatpush.msrb.mxu0 %v1109_v31 }
 0x108   : > { %v1237_v33 = vld [vmem:[%s5553_s5 + $0x1da0] sm:$0xff]  ;;  %2690 = vmatpush.msrb.mxu1 %v1173_v32 }
 0x109   : > { %v1305_v34 = vld [vmem:[%s5553_s5 + $0x1fc0] sm:$0xff]  ;;  %2710 = vmatpush.msrb.mxu2 %v1237_v33 }
 0x10a   : > { %v1105_v35 = vld [vmem:[%s5553_s5 + $0x1980] sm:$0xff]  ;;  %2729 = vmatpush.msrb.mxu3 %v1305_v34 }
 0x10b   : > { %v1169_v36 = vld [vmem:[%s5553_s5 + $0x1b80] sm:$0xff]  ;;  %2671 = vmatpush.msrb.mxu0 %v1105_v35 }
 0x10c   : > { %v1233_v37 = vld [vmem:[%s5553_s5 + $0x1d80] sm:$0xff]  ;;  %2691 = vmatpush.msrb.mxu1 %v1169_v36  ;;  %v5871_v36 = vld.sshfl [vmem:[#allocation1 + $0x20] sm:$0xff pattern:$0x73625140] }
 0x10d   : > { %v1301_v38 = vld [vmem:[%s5553_s5 + $0x1fa0] sm:$0xff]  ;;  %2711 = vmatpush.msrb.mxu2 %v1233_v37  ;;  %v5873_v37 = vld.sshfl [vmem:[#allocation1 + $0x30] sm:$0xff pattern:$0x73625140] }
 0x10e   : > { %v1101_v39 = vld [vmem:[%s5553_s5 + $0x1960] sm:$0xff]  ;;  %2730 = vmatpush.msrb.mxu3 %v1301_v38 }
 0x10f   : > { %v1165_v40 = vld [vmem:[%s5553_s5 + $0x1b60] sm:$0xff]  ;;  %2672 = vmatpush.msrb.mxu0 %v1101_v39 }
 0x110   : > { %v1229_v41 = vld [vmem:[%s5553_s5 + $0x1d60] sm:$0xff]  ;;  %2692 = vmatpush.msrb.mxu1 %v1165_v40 }
 0x111   : > { %v1297_v42 = vld [vmem:[%s5553_s5 + $0x1f80] sm:$0xff]  ;;  %2712 = vmatpush.msrb.mxu2 %v1229_v41 }
 0x112   : > { %v1097_v43 = vld [vmem:[%s5553_s5 + $0x1940] sm:$0xff]  ;;  %2731 = vmatpush.msrb.mxu3 %v1297_v42 }
 0x113   : > { %v1161_v44 = vld [vmem:[%s5553_s5 + $0x1b40] sm:$0xff]  ;;  %2673 = vmatpush.msrb.mxu0 %v1097_v43  ;;  %v5883_v43 = vld.sshfl [vmem:[#allocation1 + $0x38] sm:$0xff pattern:$0x73625140] }
 0x114   : > { %v1225_v45 = vld [vmem:[%s5553_s5 + $0x1d40] sm:$0xff]  ;;  %2693 = vmatpush.msrb.mxu1 %v1161_v44 }
 0x115   : > { %v1293_v46 = vld [vmem:[%s5553_s5 + $0x1f60] sm:$0xff]  ;;  %2713 = vmatpush.msrb.mxu2 %v1225_v45 }
 0x116   : > { %v1093_v51 = vld [vmem:[%s5553_s5 + $0x1920] sm:$0xff]  ;;  %2732 = vmatpush.msrb.mxu3 %v1293_v46 }
 0x117   : > { %v1157_v52 = vld [vmem:[%s5553_s5 + $0x1b20] sm:$0xff]  ;;  %2674 = vmatpush.msrb.mxu0 %v1093_v51 }
 0x118   : > { %v1221_v53 = vld [vmem:[%s5553_s5 + $0x1d20] sm:$0xff]  ;;  %2694 = vmatpush.msrb.mxu1 %v1157_v52 }
 0x119   : > { %v1289_v54 = vld [vmem:[%s5553_s5 + $0x1f40] sm:$0xff]  ;;  %2714 = vmatpush.msrb.mxu2 %v1221_v53 }
 0x11a   : > { %v1089_v55 = vld [vmem:[%s5553_s5 + $0x1900] sm:$0xff]  ;;  %2733 = vmatpush.msrb.mxu3 %v1289_v54 }
 0x11b   : > { %v1153_v56 = vld [vmem:[%s5553_s5 + $0x1b00] sm:$0xff]  ;;  %2675 = vmatpush.msrb.mxu0 %v1089_v55 }
 0x11c   : > { %v1217_v57 = vld [vmem:[%s5553_s5 + $0x1d00] sm:$0xff]  ;;  %2695 = vmatpush.msrb.mxu1 %v1153_v56 }
 0x11d   : > { %v1285_v58 = vld [vmem:[%s5553_s5 + $0x1f20] sm:$0xff]  ;;  %2715 = vmatpush.msrb.mxu2 %v1217_v57 }
 0x11e   : > { %v1085_v59 = vld [vmem:[%s5553_s5 + $0x18e0] sm:$0xff]  ;;  %2734 = vmatpush.msrb.mxu3 %v1285_v58 }
 0x11f   : > { %v1149_v60 = vld [vmem:[%s5553_s5 + $0x1ae0] sm:$0xff]  ;;  %2676 = vmatpush.msrb.mxu0 %v1085_v59 }
 0x120   : > { %v1213_v61 = vld [vmem:[%s5553_s5 + $0x1ce0] sm:$0xff]  ;;  %2696 = vmatpush.msrb.mxu1 %v1149_v60 }
 0x121   : > { %v1281_v62 = vld [vmem:[%s5553_s5 + $0x1f00] sm:$0xff]  ;;  %2716 = vmatpush.msrb.mxu2 %v1213_v61 }
 0x122   : > { %v1081_v3 = vld [vmem:[%s5553_s5 + $0x18c0] sm:$0xff]  ;;  %2735 = vmatpush.msrb.mxu3 %v1281_v62 }
 0x123   : > { %v1145_v4 = vld [vmem:[%s5553_s5 + $0x1ac0] sm:$0xff]  ;;  %2677 = vmatpush.msrb.mxu0 %v1081_v3 }
 0x124   : > { %v1209_v5 = vld [vmem:[%s5553_s5 + $0x1cc0] sm:$0xff]  ;;  %2697 = vmatpush.msrb.mxu1 %v1145_v4 }
 0x125   : > { %v1277_v6 = vld [vmem:[%s5553_s5 + $0x1ee0] sm:$0xff]  ;;  %2717 = vmatpush.msrb.mxu2 %v1209_v5 }
 0x126   : > { %v1077_v7 = vld [vmem:[%s5553_s5 + $0x18a0] sm:$0xff]  ;;  %2736 = vmatpush.msrb.mxu3 %v1277_v6 }
 0x127   : > { %v1141_v8 = vld [vmem:[%s5553_s5 + $0x1aa0] sm:$0xff]  ;;  %2678 = vmatpush.msrb.mxu0 %v1077_v7 }
 0x128   : > { %v1205_v9 = vld [vmem:[%s5553_s5 + $0x1ca0] sm:$0xff]  ;;  %2698 = vmatpush.msrb.mxu1 %v1141_v8 }
 0x129   : > { %v1273_v10 = vld [vmem:[%s5553_s5 + $0x1ec0] sm:$0xff]  ;;  %2718 = vmatpush.msrb.mxu2 %v1205_v9 }
 0x12a   : > { %v1073_v11 = vld [vmem:[%s5553_s5 + $0x1880] sm:$0xff]  ;;  %2737 = vmatpush.msrb.mxu3 %v1273_v10 }
 0x12b   : > { %v1137_v12 = vld [vmem:[%s5553_s5 + $0x1a80] sm:$0xff]  ;;  %2679 = vmatpush.msrb.mxu0 %v1073_v11 }
 0x12c   : > { %v1201_v13 = vld [vmem:[%s5553_s5 + $0x1c80] sm:$0xff]  ;;  %2699 = vmatpush.msrb.mxu1 %v1137_v12 }
 0x12d   : > { %v1269_v14 = vld [vmem:[%s5553_s5 + $0x1ea0] sm:$0xff]  ;;  %2719 = vmatpush.msrb.mxu2 %v1201_v13 }
 0x12e   : > { %v1069_v15 = vld [vmem:[%s5553_s5 + $0x1860] sm:$0xff]  ;;  %2738 = vmatpush.msrb.mxu3 %v1269_v14 }
 0x12f   : > { %v1133_v16 = vld [vmem:[%s5553_s5 + $0x1a60] sm:$0xff]  ;;  %2680 = vmatpush.msrb.mxu0 %v1069_v15 }
 0x130   : > { %v1197_v17 = vld [vmem:[%s5553_s5 + $0x1c60] sm:$0xff]  ;;  %2700 = vmatpush.msrb.mxu1 %v1133_v16 }
 0x131   : > { %v1265_v18 = vld [vmem:[%s5553_s5 + $0x1e80] sm:$0xff]  ;;  %2720 = vmatpush.msrb.mxu2 %v1197_v17 }
 0x132   : > { %v1065_v21 = vld [vmem:[%s5553_s5 + $0x1840] sm:$0xff]  ;;  %2739 = vmatpush.msrb.mxu3 %v1265_v18 }
 0x133   : > { %v1129_v22 = vld [vmem:[%s5553_s5 + $0x1a40] sm:$0xff]  ;;  %2681 = vmatpush.msrb.mxu0 %v1065_v21 }
 0x134   : > { %v1193_v23 = vld [vmem:[%s5553_s5 + $0x1c40] sm:$0xff]  ;;  %2701 = vmatpush.msrb.mxu1 %v1129_v22 }
 0x135   : > { %v1261_v24 = vld [vmem:[%s5553_s5 + $0x1e60] sm:$0xff]  ;;  %2721 = vmatpush.msrb.mxu2 %v1193_v23 }
 0x136   : > { %v1061_v27 = vld [vmem:[%s5553_s5 + $0x1820] sm:$0xff]  ;;  %2740 = vmatpush.msrb.mxu3 %v1261_v24 }
 0x137   : > { %v1125_v28 = vld [vmem:[%s5553_s5 + $0x1a20] sm:$0xff]  ;;  %2682 = vmatpush.msrb.mxu0 %v1061_v27 }
 0x138   : > { %v1189_v30 = vld [vmem:[%s5553_s5 + $0x1c20] sm:$0xff]  ;;  %2702 = vmatpush.msrb.mxu1 %v1125_v28 }
 0x139   : > { %v1257_v31 = vld [vmem:[%s5553_s5 + $0x1e40] sm:$0xff]  ;;  %2722 = vmatpush.msrb.mxu2 %v1189_v30 }
 0x13a   : > { %v1057_v32 = vld [vmem:[%s5553_s5 + $0x1800] sm:$0xff]  ;;  %2741 = vmatpush.msrb.mxu3 %v1257_v31 }
 0x13b   : > { %v1121_v33 = vld [vmem:[%s5553_s5 + $0x1a00] sm:$0xff]  ;;  %2683 = vmatpush.msrb.mxu0 %v1057_v32 }
 0x13c   : > { %v1185_v34 = vld [vmem:[%s5553_s5 + $0x1c00] sm:$0xff]  ;;  %2703 = vmatpush.msrb.mxu1 %v1121_v33  ;;  %2684 = vmatmul.f32.vlgmr.msrb.gmra.mxu0 %v5871_v36 }
 0x13d   : > { %v1253_v35 = vld [vmem:[%s5553_s5 + $0x1e20] sm:$0xff]  ;;  %2723 = vmatpush.msrb.mxu2 %v1185_v34 }
 0x13e   : > { %v1373_v38 = vld [vmem:[%s5553_s5 + $0x21e0] sm:$0xff]  ;;  %2742 = vmatpush.msrb.mxu3 %v1253_v35  ;;  %2724 = vmatmul.f32.vlgmr.msrb.gmra.mxu2 %v5873_v37 }
 0x13f   : > { %v1437_v39 = vld [vmem:[%s5553_s5 + $0x23e0] sm:$0xff]  ;;  %2748 = vmatpush.msra.mxu0 %v1373_v38 }
 0x140   : > { %v1501_v40 = vld [vmem:[%s5553_s5 + $0x25e0] sm:$0xff]  ;;  %2768 = vmatpush.msra.mxu1 %v1437_v39 }
 0x141   : > { %v1249_v41 = vld [vmem:[%s5553_s5 + $0x1e00] sm:$0xff]  ;;  %2788 = vmatpush.msra.mxu2 %v1501_v40 }
 0x142   : > { %v5881_v42 = vld.sshfl [vmem:[#allocation1 + $0x28] sm:$0xff pattern:$0x73625140]  ;;  %2743 = vmatpush.msrb.mxu3 %v1249_v41 }
 0x143   : > { %v1369_v44 = vld [vmem:[%s5553_s5 + $0x21c0] sm:$0xff]  ;;  %2704 = vmatmul.f32.vlgmr.msrb.gmra.mxu1 %v5881_v42  ;;  %2744 = vmatmul.f32.vlgmr.msrb.gmra.mxu3 %v5883_v43 }
 0x144   : > { %v1433_v45 = vld [vmem:[%s5553_s5 + $0x23c0] sm:$0xff]  ;;  %2749 = vmatpush.msra.mxu0 %v1369_v44 }
 0x145   : > { %v1497_v46 = vld [vmem:[%s5553_s5 + $0x25c0] sm:$0xff]  ;;  %2769 = vmatpush.msra.mxu1 %v1433_v45 }
 0x146   : > { %v1565_v51 = vld [vmem:[%s5553_s5 + $0x27e0] sm:$0xff]  ;;  %2789 = vmatpush.msra.mxu2 %v1497_v46 }
 0x147   : > { %v1365_v52 = vld [vmem:[%s5553_s5 + $0x21a0] sm:$0xff]  ;;  %2808 = vmatpush.msra.mxu3 %v1565_v51 }
 0x148   : > { %v1429_v53 = vld [vmem:[%s5553_s5 + $0x23a0] sm:$0xff]  ;;  %2750 = vmatpush.msra.mxu0 %v1365_v52 }
 0x149   : > { %v1493_v54 = vld [vmem:[%s5553_s5 + $0x25a0] sm:$0xff]  ;;  %2770 = vmatpush.msra.mxu1 %v1429_v53 }
 0x14a   : > { %v1561_v55 = vld [vmem:[%s5553_s5 + $0x27c0] sm:$0xff]  ;;  %2790 = vmatpush.msra.mxu2 %v1493_v54 }
 0x14b   : > { %v1361_v56 = vld [vmem:[%s5553_s5 + $0x2180] sm:$0xff]  ;;  %2809 = vmatpush.msra.mxu3 %v1561_v55 }
 0x14c   : > { %v1425_v57 = vld [vmem:[%s5553_s5 + $0x2380] sm:$0xff]  ;;  %2751 = vmatpush.msra.mxu0 %v1361_v56 }
 0x14d   : > { %v1489_v58 = vld [vmem:[%s5553_s5 + $0x2580] sm:$0xff]  ;;  %2771 = vmatpush.msra.mxu1 %v1425_v57 }
 0x14e   : > { %v1557_v59 = vld [vmem:[%s5553_s5 + $0x27a0] sm:$0xff]  ;;  %2791 = vmatpush.msra.mxu2 %v1489_v58 }
 0x14f   : > { %v1357_v60 = vld [vmem:[%s5553_s5 + $0x2160] sm:$0xff]  ;;  %2810 = vmatpush.msra.mxu3 %v1557_v59 }
 0x150   : > { %v1421_v61 = vld [vmem:[%s5553_s5 + $0x2360] sm:$0xff]  ;;  %2752 = vmatpush.msra.mxu0 %v1357_v60 }
 0x151   : > { %v1485_v62 = vld [vmem:[%s5553_s5 + $0x2560] sm:$0xff]  ;;  %2772 = vmatpush.msra.mxu1 %v1421_v61  ;;  %v5950_v61 = vld.sshfl [vmem:[#allocation1] sm:$0xff pattern:$0x73625140] }
 0x152   : > { %v1553_v3 = vld [vmem:[%s5553_s5 + $0x2780] sm:$0xff]  ;;  %2792 = vmatpush.msra.mxu2 %v1485_v62  ;;  %v5952_v62 = vld.sshfl [vmem:[#allocation1 + $0x10] sm:$0xff pattern:$0x73625140] }
 0x153   : > { %v1353_v4 = vld [vmem:[%s5553_s5 + $0x2140] sm:$0xff]  ;;  %2811 = vmatpush.msra.mxu3 %v1553_v3 }
 0x154   : > { %v1417_v5 = vld [vmem:[%s5553_s5 + $0x2340] sm:$0xff]  ;;  %2753 = vmatpush.msra.mxu0 %v1353_v4 }
 0x155   : > { %v1481_v6 = vld [vmem:[%s5553_s5 + $0x2540] sm:$0xff]  ;;  %2773 = vmatpush.msra.mxu1 %v1417_v5 }
 0x156   : > { %v1549_v7 = vld [vmem:[%s5553_s5 + $0x2760] sm:$0xff]  ;;  %2793 = vmatpush.msra.mxu2 %v1481_v6 }
 0x157   : > { %v1349_v8 = vld [vmem:[%s5553_s5 + $0x2120] sm:$0xff]  ;;  %2812 = vmatpush.msra.mxu3 %v1549_v7 }
 0x158   : > { %v1413_v9 = vld [vmem:[%s5553_s5 + $0x2320] sm:$0xff]  ;;  %2754 = vmatpush.msra.mxu0 %v1349_v8  ;;  %v5962_v8 = vld.sshfl [vmem:[#allocation1 + $0x18] sm:$0xff pattern:$0x73625140] }
 0x159   : > { %v1477_v10 = vld [vmem:[%s5553_s5 + $0x2520] sm:$0xff]  ;;  %2774 = vmatpush.msra.mxu1 %v1413_v9 }
 0x15a   : > { %v1545_v11 = vld [vmem:[%s5553_s5 + $0x2740] sm:$0xff]  ;;  %2794 = vmatpush.msra.mxu2 %v1477_v10 }
 0x15b   : > { %v1345_v12 = vld [vmem:[%s5553_s5 + $0x2100] sm:$0xff]  ;;  %2813 = vmatpush.msra.mxu3 %v1545_v11 }
 0x15c   : > { %v1409_v13 = vld [vmem:[%s5553_s5 + $0x2300] sm:$0xff]  ;;  %2755 = vmatpush.msra.mxu0 %v1345_v12 }
 0x15d   : > { %v1473_v14 = vld [vmem:[%s5553_s5 + $0x2500] sm:$0xff]  ;;  %2775 = vmatpush.msra.mxu1 %v1409_v13 }
 0x15e   : > { %v1541_v15 = vld [vmem:[%s5553_s5 + $0x2720] sm:$0xff]  ;;  %2795 = vmatpush.msra.mxu2 %v1473_v14 }
 0x15f   : > { %v1341_v16 = vld [vmem:[%s5553_s5 + $0x20e0] sm:$0xff]  ;;  %2814 = vmatpush.msra.mxu3 %v1541_v15 }
 0x160   : > { %v1405_v17 = vld [vmem:[%s5553_s5 + $0x22e0] sm:$0xff]  ;;  %2756 = vmatpush.msra.mxu0 %v1341_v16 }
 0x161   : > { %v1469_v18 = vld [vmem:[%s5553_s5 + $0x24e0] sm:$0xff]  ;;  %2776 = vmatpush.msra.mxu1 %v1405_v17 }
 0x162   : > { %v1537_v21 = vld [vmem:[%s5553_s5 + $0x2700] sm:$0xff]  ;;  %2796 = vmatpush.msra.mxu2 %v1469_v18 }
 0x163   : > { %v1337_v22 = vld [vmem:[%s5553_s5 + $0x20c0] sm:$0xff]  ;;  %2815 = vmatpush.msra.mxu3 %v1537_v21 }
 0x164   : > { %v1401_v23 = vld [vmem:[%s5553_s5 + $0x22c0] sm:$0xff]  ;;  %2757 = vmatpush.msra.mxu0 %v1337_v22 }
 0x165   : > { %v1465_v24 = vld [vmem:[%s5553_s5 + $0x24c0] sm:$0xff]  ;;  %2777 = vmatpush.msra.mxu1 %v1401_v23 }
 0x166   : > { %v1533_v27 = vld [vmem:[%s5553_s5 + $0x26e0] sm:$0xff]  ;;  %2797 = vmatpush.msra.mxu2 %v1465_v24 }
 0x167   : > { %v1333_v28 = vld [vmem:[%s5553_s5 + $0x20a0] sm:$0xff]  ;;  %2816 = vmatpush.msra.mxu3 %v1533_v27 }
 0x168   : > { %v1397_v29 = vld [vmem:[%s5553_s5 + $0x22a0] sm:$0xff]  ;;  %2758 = vmatpush.msra.mxu0 %v1333_v28 }
 0x169   : > { %v1461_v30 = vld [vmem:[%s5553_s5 + $0x24a0] sm:$0xff]  ;;  %2778 = vmatpush.msra.mxu1 %v1397_v29 }
 0x16a   : > { %v1529_v31 = vld [vmem:[%s5553_s5 + $0x26c0] sm:$0xff]  ;;  %2798 = vmatpush.msra.mxu2 %v1461_v30 }
 0x16b   : > { %v1329_v32 = vld [vmem:[%s5553_s5 + $0x2080] sm:$0xff]  ;;  %2817 = vmatpush.msra.mxu3 %v1529_v31 }
 0x16c   : > { %v1393_v33 = vld [vmem:[%s5553_s5 + $0x2280] sm:$0xff]  ;;  %2759 = vmatpush.msra.mxu0 %v1329_v32 }
 0x16d   : > { %v1457_v34 = vld [vmem:[%s5553_s5 + $0x2480] sm:$0xff]  ;;  %2779 = vmatpush.msra.mxu1 %v1393_v33 }
 0x16e   : > { %v1525_v35 = vld [vmem:[%s5553_s5 + $0x26a0] sm:$0xff]  ;;  %2799 = vmatpush.msra.mxu2 %v1457_v34 }
 0x16f   : > { %v1325_v38 = vld [vmem:[%s5553_s5 + $0x2060] sm:$0xff]  ;;  %2818 = vmatpush.msra.mxu3 %v1525_v35 }
 0x170   : > { %v1389_v39 = vld [vmem:[%s5553_s5 + $0x2260] sm:$0xff]  ;;  %2760 = vmatpush.msra.mxu0 %v1325_v38 }
 0x171   : > { %v1453_v40 = vld [vmem:[%s5553_s5 + $0x2460] sm:$0xff]  ;;  %2780 = vmatpush.msra.mxu1 %v1389_v39 }
 0x172   : > { %v1521_v41 = vld [vmem:[%s5553_s5 + $0x2680] sm:$0xff]  ;;  %2800 = vmatpush.msra.mxu2 %v1453_v40 }
 0x173   : > { %v1321_v44 = vld [vmem:[%s5553_s5 + $0x2040] sm:$0xff]  ;;  %2819 = vmatpush.msra.mxu3 %v1521_v41 }
 0x174   : > { %v1385_v45 = vld [vmem:[%s5553_s5 + $0x2240] sm:$0xff]  ;;  %2761 = vmatpush.msra.mxu0 %v1321_v44 }
 0x175   : > { %v1449_v46 = vld [vmem:[%s5553_s5 + $0x2440] sm:$0xff]  ;;  %2781 = vmatpush.msra.mxu1 %v1385_v45 }
 0x176   : > { %v1517_v51 = vld [vmem:[%s5553_s5 + $0x2660] sm:$0xff]  ;;  %2801 = vmatpush.msra.mxu2 %v1449_v46 }
 0x177   : > { %v1317_v52 = vld [vmem:[%s5553_s5 + $0x2020] sm:$0xff]  ;;  %2820 = vmatpush.msra.mxu3 %v1517_v51 }
 0x178   : > { %v1381_v53 = vld [vmem:[%s5553_s5 + $0x2220] sm:$0xff]  ;;  %2762 = vmatpush.msra.mxu0 %v1317_v52 }
 0x179   : > { %v286_v54 = vld [vmem:[%s8006_s0 + $0x28] sm:$0xff]  ;;  %2782 = vmatpush.msra.mxu1 %v1381_v53 }
 0x17a   : > { %v1445_v55 = vld [vmem:[%s5553_s5 + $0x2420] sm:$0xff]  ;;  %2377 = vst [vmem:[#allocation1 + $0x20] ss:$4 sm:$0xff] %v286_v54 }
 0x17b   : > { %v1513_v56 = vld [vmem:[%s5553_s5 + $0x2640] sm:$0xff]  ;;  %2802 = vmatpush.msra.mxu2 %v1445_v55 }
 0x17c   : > { %v1313_v57 = vld [vmem:[%s5553_s5 + $0x2000] sm:$0xff]  ;;  %2821 = vmatpush.msra.mxu3 %v1513_v56 }
 0x17d   : > { %v1377_v58 = vld [vmem:[%s5553_s5 + $0x2200] sm:$0xff]  ;;  %2763 = vmatpush.msra.mxu0 %v1313_v57 }
 0x17e   : > { %v1441_v59 = vld [vmem:[%s5553_s5 + $0x2400] sm:$0xff]  ;;  %2783 = vmatpush.msra.mxu1 %v1377_v58  ;;  %2764 = vmatmul.f32.vlgmr.msra.gmra.mxu0 %v5950_v61 }
 0x17f   : > { %v1509_v60 = vld [vmem:[%s5553_s5 + $0x2620] sm:$0xff]  ;;  %2803 = vmatpush.msra.mxu2 %v1441_v59 }
 0x180   : > { %v1629_v3 = vld [vmem:[%s5553_s5 + $0x29e0] sm:$0xff]  ;;  %2822 = vmatpush.msra.mxu3 %v1509_v60  ;;  %2804 = vmatmul.f32.vlgmr.msra.gmra.mxu2 %v5952_v62 }
 0x181   : > { %v1693_v4 = vld [vmem:[%s5553_s5 + $0x2be0] sm:$0xff]  ;;  %2828 = vmatpush.msrb.mxu0 %v1629_v3 }
 0x182   : > { %v1757_v5 = vld [vmem:[%s5553_s5 + $0x2de0] sm:$0xff]  ;;  %2848 = vmatpush.msrb.mxu1 %v1693_v4 }
 0x183   : > { %v1505_v6 = vld [vmem:[%s5553_s5 + $0x2600] sm:$0xff]  ;;  %2868 = vmatpush.msrb.mxu2 %v1757_v5 }
 0x184   : > { %v5960_v7 = vld.sshfl [vmem:[#allocation1 + $0x8] sm:$0xff pattern:$0x73625140]  ;;  %2823 = vmatpush.msra.mxu3 %v1505_v6 }
 0x185   : > { %v1625_v9 = vld [vmem:[%s5553_s5 + $0x29c0] sm:$0xff]  ;;  %2784 = vmatmul.f32.vlgmr.msra.gmra.mxu1 %v5960_v7  ;;  %2824 = vmatmul.f32.vlgmr.msra.gmra.mxu3 %v5962_v8 }
 0x186   : > { %v1689_v10 = vld [vmem:[%s5553_s5 + $0x2bc0] sm:$0xff]  ;;  %2829 = vmatpush.msrb.mxu0 %v1625_v9 }
 0x187   : > { %v1753_v11 = vld [vmem:[%s5553_s5 + $0x2dc0] sm:$0xff]  ;;  %2849 = vmatpush.msrb.mxu1 %v1689_v10 }
 0x188   : > { %v1821_v12 = vld [vmem:[%s5553_s5 + $0x2fe0] sm:$0xff]  ;;  %2869 = vmatpush.msrb.mxu2 %v1753_v11 }
 0x189   : > { %v1621_v13 = vld [vmem:[%s5553_s5 + $0x29a0] sm:$0xff]  ;;  %2888 = vmatpush.msrb.mxu3 %v1821_v12 }
 0x18a   : > { %v1685_v14 = vld [vmem:[%s5553_s5 + $0x2ba0] sm:$0xff]  ;;  %2830 = vmatpush.msrb.mxu0 %v1621_v13 }
 0x18b   : > { %v1749_v15 = vld [vmem:[%s5553_s5 + $0x2da0] sm:$0xff]  ;;  %2850 = vmatpush.msrb.mxu1 %v1685_v14 }
 0x18c   : > { %v1817_v16 = vld [vmem:[%s5553_s5 + $0x2fc0] sm:$0xff]  ;;  %2870 = vmatpush.msrb.mxu2 %v1749_v15 }
 0x18d   : > { %v1617_v17 = vld [vmem:[%s5553_s5 + $0x2980] sm:$0xff]  ;;  %2889 = vmatpush.msrb.mxu3 %v1817_v16 }
 0x18e   : > { %v1681_v18 = vld [vmem:[%s5553_s5 + $0x2b80] sm:$0xff]  ;;  %2831 = vmatpush.msrb.mxu0 %v1617_v17 }
 0x18f   : > { %v1745_v21 = vld [vmem:[%s5553_s5 + $0x2d80] sm:$0xff]  ;;  %2851 = vmatpush.msrb.mxu1 %v1681_v18 }
 0x190   : > { %v1813_v22 = vld [vmem:[%s5553_s5 + $0x2fa0] sm:$0xff]  ;;  %2871 = vmatpush.msrb.mxu2 %v1745_v21  ;;  %v287_v21 = vld [vmem:[%s8006_s0 + $0x30] sm:$0xff] }
 0x191   : > { %v1613_v23 = vld [vmem:[%s5553_s5 + $0x2960] sm:$0xff]  ;;  %2890 = vmatpush.msrb.mxu3 %v1813_v22  ;;  %2386 = vst [vmem:[#allocation1] ss:$4 sm:$0xff] %v287_v21 }
 0x192   : > { %v1677_v24 = vld [vmem:[%s5553_s5 + $0x2b60] sm:$0xff]  ;;  %2832 = vmatpush.msrb.mxu0 %v1613_v23 }
 0x193   : > { %v1741_v27 = vld [vmem:[%s5553_s5 + $0x2d60] sm:$0xff]  ;;  %2852 = vmatpush.msrb.mxu1 %v1677_v24 }
 0x194   : > { %v1809_v28 = vld [vmem:[%s5553_s5 + $0x2f80] sm:$0xff]  ;;  %2872 = vmatpush.msrb.mxu2 %v1741_v27 }
 0x195   : > { %v1609_v29 = vld [vmem:[%s5553_s5 + $0x2940] sm:$0xff]  ;;  %2891 = vmatpush.msrb.mxu3 %v1809_v28 }
 0x196   : > { %v1673_v30 = vld [vmem:[%s5553_s5 + $0x2b40] sm:$0xff]  ;;  %2833 = vmatpush.msrb.mxu0 %v1609_v29 }
 0x197   : > { %v1737_v31 = vld [vmem:[%s5553_s5 + $0x2d40] sm:$0xff]  ;;  %2853 = vmatpush.msrb.mxu1 %v1673_v30  ;;  %v6029_v30 = vld.sshfl [vmem:[#allocation1 + $0x20] sm:$0xff pattern:$0x73625140] }
 0x198   : > { %v1805_v32 = vld [vmem:[%s5553_s5 + $0x2f60] sm:$0xff]  ;;  %2873 = vmatpush.msrb.mxu2 %v1737_v31  ;;  %v6031_v31 = vld.sshfl [vmem:[#allocation1 + $0x30] sm:$0xff pattern:$0x73625140] }
 0x199   : > { %v1605_v33 = vld [vmem:[%s5553_s5 + $0x2920] sm:$0xff]  ;;  %2892 = vmatpush.msrb.mxu3 %v1805_v32 }
 0x19a   : > { %v1669_v34 = vld [vmem:[%s5553_s5 + $0x2b20] sm:$0xff]  ;;  %2834 = vmatpush.msrb.mxu0 %v1605_v33 }
 0x19b   : > { %v1733_v35 = vld [vmem:[%s5553_s5 + $0x2d20] sm:$0xff]  ;;  %2854 = vmatpush.msrb.mxu1 %v1669_v34 }
 0x19c   : > { %v1801_v38 = vld [vmem:[%s5553_s5 + $0x2f40] sm:$0xff]  ;;  %2874 = vmatpush.msrb.mxu2 %v1733_v35 }
 0x19d   : > { %v1601_v39 = vld [vmem:[%s5553_s5 + $0x2900] sm:$0xff]  ;;  %2893 = vmatpush.msrb.mxu3 %v1801_v38 }
 0x19e   : > { %v1665_v40 = vld [vmem:[%s5553_s5 + $0x2b00] sm:$0xff]  ;;  %2835 = vmatpush.msrb.mxu0 %v1601_v39  ;;  %v6041_v39 = vld.sshfl [vmem:[#allocation1 + $0x38] sm:$0xff pattern:$0x73625140] }
 0x19f   : > { %v1729_v41 = vld [vmem:[%s5553_s5 + $0x2d00] sm:$0xff]  ;;  %2855 = vmatpush.msrb.mxu1 %v1665_v40 }
 0x1a0   : > { %v1797_v44 = vld [vmem:[%s5553_s5 + $0x2f20] sm:$0xff]  ;;  %2875 = vmatpush.msrb.mxu2 %v1729_v41 }
 0x1a1   : > { %v1597_v45 = vld [vmem:[%s5553_s5 + $0x28e0] sm:$0xff]  ;;  %2894 = vmatpush.msrb.mxu3 %v1797_v44 }
 0x1a2   : > { %v1661_v46 = vld [vmem:[%s5553_s5 + $0x2ae0] sm:$0xff]  ;;  %2836 = vmatpush.msrb.mxu0 %v1597_v45 }
 0x1a3   : > { %v1725_v51 = vld [vmem:[%s5553_s5 + $0x2ce0] sm:$0xff]  ;;  %2856 = vmatpush.msrb.mxu1 %v1661_v46 }
 0x1a4   : > { %v1793_v52 = vld [vmem:[%s5553_s5 + $0x2f00] sm:$0xff]  ;;  %2876 = vmatpush.msrb.mxu2 %v1725_v51 }
 0x1a5   : > { %v1593_v53 = vld [vmem:[%s5553_s5 + $0x28c0] sm:$0xff]  ;;  %2895 = vmatpush.msrb.mxu3 %v1793_v52 }
 0x1a6   : > { %v1657_v54 = vld [vmem:[%s5553_s5 + $0x2ac0] sm:$0xff]  ;;  %2837 = vmatpush.msrb.mxu0 %v1593_v53 }
 0x1a7   : > { %v1721_v55 = vld [vmem:[%s5553_s5 + $0x2cc0] sm:$0xff]  ;;  %2857 = vmatpush.msrb.mxu1 %v1657_v54 }
 0x1a8   : > { %v1789_v56 = vld [vmem:[%s5553_s5 + $0x2ee0] sm:$0xff]  ;;  %2877 = vmatpush.msrb.mxu2 %v1721_v55 }
 0x1a9   : > { %v1589_v57 = vld [vmem:[%s5553_s5 + $0x28a0] sm:$0xff]  ;;  %2896 = vmatpush.msrb.mxu3 %v1789_v56 }
 0x1aa   : > { %v1653_v58 = vld [vmem:[%s5553_s5 + $0x2aa0] sm:$0xff]  ;;  %2838 = vmatpush.msrb.mxu0 %v1589_v57 }
 0x1ab   : > { %v1717_v59 = vld [vmem:[%s5553_s5 + $0x2ca0] sm:$0xff]  ;;  %2858 = vmatpush.msrb.mxu1 %v1653_v58 }
 0x1ac   : > { %v1785_v60 = vld [vmem:[%s5553_s5 + $0x2ec0] sm:$0xff]  ;;  %2878 = vmatpush.msrb.mxu2 %v1717_v59 }
 0x1ad   : > { %v1585_v3 = vld [vmem:[%s5553_s5 + $0x2880] sm:$0xff]  ;;  %2897 = vmatpush.msrb.mxu3 %v1785_v60 }
 0x1ae   : > { %v1649_v4 = vld [vmem:[%s5553_s5 + $0x2a80] sm:$0xff]  ;;  %2839 = vmatpush.msrb.mxu0 %v1585_v3 }
 0x1af   : > { %v1713_v5 = vld [vmem:[%s5553_s5 + $0x2c80] sm:$0xff]  ;;  %2859 = vmatpush.msrb.mxu1 %v1649_v4 }
 0x1b0   : > { %v1781_v6 = vld [vmem:[%s5553_s5 + $0x2ea0] sm:$0xff]  ;;  %2879 = vmatpush.msrb.mxu2 %v1713_v5 }
 0x1b1   : > { %v1581_v9 = vld [vmem:[%s5553_s5 + $0x2860] sm:$0xff]  ;;  %2898 = vmatpush.msrb.mxu3 %v1781_v6 }
 0x1b2   : > { %v1645_v10 = vld [vmem:[%s5553_s5 + $0x2a60] sm:$0xff]  ;;  %2840 = vmatpush.msrb.mxu0 %v1581_v9 }
 0x1b3   : > { %v1709_v11 = vld [vmem:[%s5553_s5 + $0x2c60] sm:$0xff]  ;;  %2860 = vmatpush.msrb.mxu1 %v1645_v10 }
 0x1b4   : > { %v1777_v12 = vld [vmem:[%s5553_s5 + $0x2e80] sm:$0xff]  ;;  %2880 = vmatpush.msrb.mxu2 %v1709_v11 }
 0x1b5   : > { %v1577_v13 = vld [vmem:[%s5553_s5 + $0x2840] sm:$0xff]  ;;  %2899 = vmatpush.msrb.mxu3 %v1777_v12 }
 0x1b6   : > { %v1641_v14 = vld [vmem:[%s5553_s5 + $0x2a40] sm:$0xff]  ;;  %2841 = vmatpush.msrb.mxu0 %v1577_v13 }
 0x1b7   : > { %v1705_v15 = vld [vmem:[%s5553_s5 + $0x2c40] sm:$0xff]  ;;  %2861 = vmatpush.msrb.mxu1 %v1641_v14 }
 0x1b8   : > { %v1773_v16 = vld [vmem:[%s5553_s5 + $0x2e60] sm:$0xff]  ;;  %2881 = vmatpush.msrb.mxu2 %v1705_v15 }
 0x1b9   : > { %v1573_v17 = vld [vmem:[%s5553_s5 + $0x2820] sm:$0xff]  ;;  %2900 = vmatpush.msrb.mxu3 %v1773_v16 }
 0x1ba   : > { %v1637_v18 = vld [vmem:[%s5553_s5 + $0x2a20] sm:$0xff]  ;;  %2842 = vmatpush.msrb.mxu0 %v1573_v17 }
 0x1bb   : > { %v1701_v22 = vld [vmem:[%s5553_s5 + $0x2c20] sm:$0xff]  ;;  %2862 = vmatpush.msrb.mxu1 %v1637_v18 }
 0x1bc   : > { %v1769_v23 = vld [vmem:[%s5553_s5 + $0x2e40] sm:$0xff]  ;;  %2882 = vmatpush.msrb.mxu2 %v1701_v22 }
 0x1bd   : > { %v1569_v24 = vld [vmem:[%s5553_s5 + $0x2800] sm:$0xff]  ;;  %2901 = vmatpush.msrb.mxu3 %v1769_v23 }
 0x1be   : > { %v1633_v27 = vld [vmem:[%s5553_s5 + $0x2a00] sm:$0xff]  ;;  %2843 = vmatpush.msrb.mxu0 %v1569_v24 }
 0x1bf   : > { %v1697_v28 = vld [vmem:[%s5553_s5 + $0x2c00] sm:$0xff]  ;;  %2863 = vmatpush.msrb.mxu1 %v1633_v27  ;;  %2844 = vmatmul.f32.vlgmr.msrb.gmra.mxu0 %v6029_v30 }
 0x1c0   : > { %v1765_v29 = vld [vmem:[%s5553_s5 + $0x2e20] sm:$0xff]  ;;  %2883 = vmatpush.msrb.mxu2 %v1697_v28 }
 0x1c1   : > { %v1885_v32 = vld [vmem:[%s5553_s5 + $0x31e0] sm:$0xff]  ;;  %2902 = vmatpush.msrb.mxu3 %v1765_v29  ;;  %2884 = vmatmul.f32.vlgmr.msrb.gmra.mxu2 %v6031_v31 }
 0x1c2   : > { %v1949_v33 = vld [vmem:[%s5553_s5 + $0x33e0] sm:$0xff]  ;;  %2908 = vmatpush.msra.mxu0 %v1885_v32 }
 0x1c3   : > { %v2013_v34 = vld [vmem:[%s5553_s5 + $0x35e0] sm:$0xff]  ;;  %2928 = vmatpush.msra.mxu1 %v1949_v33 }
 0x1c4   : > { %v1761_v35 = vld [vmem:[%s5553_s5 + $0x2e00] sm:$0xff]  ;;  %2948 = vmatpush.msra.mxu2 %v2013_v34 }
 0x1c5   : > { %v6039_v38 = vld.sshfl [vmem:[#allocation1 + $0x28] sm:$0xff pattern:$0x73625140]  ;;  %2903 = vmatpush.msrb.mxu3 %v1761_v35 }
 0x1c6   : > { %v1881_v40 = vld [vmem:[%s5553_s5 + $0x31c0] sm:$0xff]  ;;  %2864 = vmatmul.f32.vlgmr.msrb.gmra.mxu1 %v6039_v38  ;;  %2904 = vmatmul.f32.vlgmr.msrb.gmra.mxu3 %v6041_v39 }
 0x1c7   : > { %v1945_v41 = vld [vmem:[%s5553_s5 + $0x33c0] sm:$0xff]  ;;  %2909 = vmatpush.msra.mxu0 %v1881_v40 }
 0x1c8   : > { %v2009_v44 = vld [vmem:[%s5553_s5 + $0x35c0] sm:$0xff]  ;;  %2929 = vmatpush.msra.mxu1 %v1945_v41 }
 0x1c9   : > { %v2077_v45 = vld [vmem:[%s5553_s5 + $0x37e0] sm:$0xff]  ;;  %2949 = vmatpush.msra.mxu2 %v2009_v44 }
 0x1ca   : > { %v1877_v46 = vld [vmem:[%s5553_s5 + $0x31a0] sm:$0xff]  ;;  %2968 = vmatpush.msra.mxu3 %v2077_v45 }
 0x1cb   : > { %v1941_v51 = vld [vmem:[%s5553_s5 + $0x33a0] sm:$0xff]  ;;  %2910 = vmatpush.msra.mxu0 %v1877_v46 }
 0x1cc   : > { %v2005_v52 = vld [vmem:[%s5553_s5 + $0x35a0] sm:$0xff]  ;;  %2930 = vmatpush.msra.mxu1 %v1941_v51 }
 0x1cd   : > { %v2073_v53 = vld [vmem:[%s5553_s5 + $0x37c0] sm:$0xff]  ;;  %2950 = vmatpush.msra.mxu2 %v2005_v52 }
 0x1ce   : > { %v1873_v54 = vld [vmem:[%s5553_s5 + $0x3180] sm:$0xff]  ;;  %2969 = vmatpush.msra.mxu3 %v2073_v53 }
 0x1cf   : > { %v1937_v55 = vld [vmem:[%s5553_s5 + $0x3380] sm:$0xff]  ;;  %2911 = vmatpush.msra.mxu0 %v1873_v54 }
 0x1d0   : > { %v2001_v56 = vld [vmem:[%s5553_s5 + $0x3580] sm:$0xff]  ;;  %2931 = vmatpush.msra.mxu1 %v1937_v55 }
 0x1d1   : > { %v2069_v57 = vld [vmem:[%s5553_s5 + $0x37a0] sm:$0xff]  ;;  %2951 = vmatpush.msra.mxu2 %v2001_v56 }
 0x1d2   : > { %v1869_v58 = vld [vmem:[%s5553_s5 + $0x3160] sm:$0xff]  ;;  %2970 = vmatpush.msra.mxu3 %v2069_v57 }
 0x1d3   : > { %v1933_v59 = vld [vmem:[%s5553_s5 + $0x3360] sm:$0xff]  ;;  %2912 = vmatpush.msra.mxu0 %v1869_v58 }
 0x1d4   : > { %v1997_v60 = vld [vmem:[%s5553_s5 + $0x3560] sm:$0xff]  ;;  %2932 = vmatpush.msra.mxu1 %v1933_v59 }
 0x1d5   : > { %v2065_v3 = vld [vmem:[%s5553_s5 + $0x3780] sm:$0xff]  ;;  %2952 = vmatpush.msra.mxu2 %v1997_v60  ;;  %v288_v60 = vld [vmem:[%s8006_s0 + $0x38] sm:$0xff] }
 0x1d6   : > { %v1865_v4 = vld [vmem:[%s5553_s5 + $0x3140] sm:$0xff]  ;;  %2971 = vmatpush.msra.mxu3 %v2065_v3  ;;  %2387 = vst [vmem:[#allocation1 + $0x20] ss:$4 sm:$0xff] %v288_v60 }
 0x1d7   : > { %v1929_v5 = vld [vmem:[%s5553_s5 + $0x3340] sm:$0xff]  ;;  %2913 = vmatpush.msra.mxu0 %v1865_v4 }
 0x1d8   : > { %v1993_v6 = vld [vmem:[%s5553_s5 + $0x3540] sm:$0xff]  ;;  %2933 = vmatpush.msra.mxu1 %v1929_v5 }
 0x1d9   : > { %v2061_v9 = vld [vmem:[%s5553_s5 + $0x3760] sm:$0xff]  ;;  %2953 = vmatpush.msra.mxu2 %v1993_v6 }
 0x1da   : > { %v1861_v10 = vld [vmem:[%s5553_s5 + $0x3120] sm:$0xff]  ;;  %2972 = vmatpush.msra.mxu3 %v2061_v9 }
 0x1db   : > { %v1925_v11 = vld [vmem:[%s5553_s5 + $0x3320] sm:$0xff]  ;;  %2914 = vmatpush.msra.mxu0 %v1861_v10 }
 0x1dc   : > { %v1989_v12 = vld [vmem:[%s5553_s5 + $0x3520] sm:$0xff]  ;;  %2934 = vmatpush.msra.mxu1 %v1925_v11  ;;  %v2388_v11 = vld.sshfl [vmem:[#allocation1] sm:$0xff pattern:$0x73625140] }
 0x1dd   : > { %v2057_v13 = vld [vmem:[%s5553_s5 + $0x3740] sm:$0xff]  ;;  %2954 = vmatpush.msra.mxu2 %v1989_v12  ;;  %v2390_v12 = vld.sshfl [vmem:[#allocation1 + $0x10] sm:$0xff pattern:$0x73625140] }
 0x1de   : > { %v1857_v14 = vld [vmem:[%s5553_s5 + $0x3100] sm:$0xff]  ;;  %2973 = vmatpush.msra.mxu3 %v2057_v13 }
 0x1df   : > { %v1921_v15 = vld [vmem:[%s5553_s5 + $0x3300] sm:$0xff]  ;;  %2915 = vmatpush.msra.mxu0 %v1857_v14 }
 0x1e0   : > { %v1985_v16 = vld [vmem:[%s5553_s5 + $0x3500] sm:$0xff]  ;;  %2935 = vmatpush.msra.mxu1 %v1921_v15 }
 0x1e1   : > { %v2053_v17 = vld [vmem:[%s5553_s5 + $0x3720] sm:$0xff]  ;;  %2955 = vmatpush.msra.mxu2 %v1985_v16 }
 0x1e2   : > { %v1853_v18 = vld [vmem:[%s5553_s5 + $0x30e0] sm:$0xff]  ;;  %2974 = vmatpush.msra.mxu3 %v2053_v17 }
 0x1e3   : > { %v1917_v21 = vld [vmem:[%s5553_s5 + $0x32e0] sm:$0xff]  ;;  %2916 = vmatpush.msra.mxu0 %v1853_v18  ;;  %v2391_v18 = vld.sshfl [vmem:[#allocation1 + $0x18] sm:$0xff pattern:$0x73625140] }
 0x1e4   : > { %v1981_v22 = vld [vmem:[%s5553_s5 + $0x34e0] sm:$0xff]  ;;  %2936 = vmatpush.msra.mxu1 %v1917_v21 }
 0x1e5   : > { %v2049_v23 = vld [vmem:[%s5553_s5 + $0x3700] sm:$0xff]  ;;  %2956 = vmatpush.msra.mxu2 %v1981_v22 }
 0x1e6   : > { %v1849_v24 = vld [vmem:[%s5553_s5 + $0x30c0] sm:$0xff]  ;;  %2975 = vmatpush.msra.mxu3 %v2049_v23 }
 0x1e7   : > { %v1913_v27 = vld [vmem:[%s5553_s5 + $0x32c0] sm:$0xff]  ;;  %2917 = vmatpush.msra.mxu0 %v1849_v24 }
 0x1e8   : > { %v1977_v28 = vld [vmem:[%s5553_s5 + $0x34c0] sm:$0xff]  ;;  %2937 = vmatpush.msra.mxu1 %v1913_v27 }
 0x1e9   : > { %v2045_v29 = vld [vmem:[%s5553_s5 + $0x36e0] sm:$0xff]  ;;  %2957 = vmatpush.msra.mxu2 %v1977_v28 }
 0x1ea   : > { %v1845_v32 = vld [vmem:[%s5553_s5 + $0x30a0] sm:$0xff]  ;;  %2976 = vmatpush.msra.mxu3 %v2045_v29 }
 0x1eb   : > { %v1909_v33 = vld [vmem:[%s5553_s5 + $0x32a0] sm:$0xff]  ;;  %2918 = vmatpush.msra.mxu0 %v1845_v32 }
 0x1ec   : > { %v1973_v34 = vld [vmem:[%s5553_s5 + $0x34a0] sm:$0xff]  ;;  %2938 = vmatpush.msra.mxu1 %v1909_v33 }
 0x1ed   : > { %v2041_v35 = vld [vmem:[%s5553_s5 + $0x36c0] sm:$0xff]  ;;  %2958 = vmatpush.msra.mxu2 %v1973_v34 }
 0x1ee   : > { %v1841_v40 = vld [vmem:[%s5553_s5 + $0x3080] sm:$0xff]  ;;  %2977 = vmatpush.msra.mxu3 %v2041_v35 }
 0x1ef   : > { %v1905_v41 = vld [vmem:[%s5553_s5 + $0x3280] sm:$0xff]  ;;  %2919 = vmatpush.msra.mxu0 %v1841_v40 }
 0x1f0   : > { %v1969_v44 = vld [vmem:[%s5553_s5 + $0x3480] sm:$0xff]  ;;  %2939 = vmatpush.msra.mxu1 %v1905_v41 }
 0x1f1   : > { %v2037_v45 = vld [vmem:[%s5553_s5 + $0x36a0] sm:$0xff]  ;;  %2959 = vmatpush.msra.mxu2 %v1969_v44 }
 0x1f2   : > { %v1837_v46 = vld [vmem:[%s5553_s5 + $0x3060] sm:$0xff]  ;;  %2978 = vmatpush.msra.mxu3 %v2037_v45 }
 0x1f3   : > { %v1901_v51 = vld [vmem:[%s5553_s5 + $0x3260] sm:$0xff]  ;;  %2920 = vmatpush.msra.mxu0 %v1837_v46 }
 0x1f4   : > { %v1965_v52 = vld [vmem:[%s5553_s5 + $0x3460] sm:$0xff]  ;;  %2940 = vmatpush.msra.mxu1 %v1901_v51 }
 0x1f5   : > { %v2033_v53 = vld [vmem:[%s5553_s5 + $0x3680] sm:$0xff]  ;;  %2960 = vmatpush.msra.mxu2 %v1965_v52 }
 0x1f6   : > { %v1833_v54 = vld [vmem:[%s5553_s5 + $0x3040] sm:$0xff]  ;;  %2979 = vmatpush.msra.mxu3 %v2033_v53 }
 0x1f7   : > { %v1897_v55 = vld [vmem:[%s5553_s5 + $0x3240] sm:$0xff]  ;;  %2921 = vmatpush.msra.mxu0 %v1833_v54 }
 0x1f8   : > { %v1961_v56 = vld [vmem:[%s5553_s5 + $0x3440] sm:$0xff]  ;;  %2941 = vmatpush.msra.mxu1 %v1897_v55 }
 0x1f9   : > { %v2029_v57 = vld [vmem:[%s5553_s5 + $0x3660] sm:$0xff]  ;;  %2961 = vmatpush.msra.mxu2 %v1961_v56 }
 0x1fa   : > { %v1829_v58 = vld [vmem:[%s5553_s5 + $0x3020] sm:$0xff]  ;;  %2980 = vmatpush.msra.mxu3 %v2029_v57 }
 0x1fb   : > { %v1893_v59 = vld [vmem:[%s5553_s5 + $0x3220] sm:$0xff]  ;;  %2922 = vmatpush.msra.mxu0 %v1829_v58 }
 0x1fc   : > { %v1957_v3 = vld [vmem:[%s5553_s5 + $0x3420] sm:$0xff]  ;;  %2942 = vmatpush.msra.mxu1 %v1893_v59 }
 0x1fd   : > { %v2025_v4 = vld [vmem:[%s5553_s5 + $0x3640] sm:$0xff]  ;;  %2962 = vmatpush.msra.mxu2 %v1957_v3 }
 0x1fe   : > { %v1825_v5 = vld [vmem:[%s5553_s5 + $0x3000] sm:$0xff]  ;;  %2981 = vmatpush.msra.mxu3 %v2025_v4 }
 0x1ff   : > { %v1889_v6 = vld [vmem:[%s5553_s5 + $0x3200] sm:$0xff]  ;;  %2923 = vmatpush.msra.mxu0 %v1825_v5 }
 0x200   : > { %v1953_v9 = vld [vmem:[%s5553_s5 + $0x3400] sm:$0xff]  ;;  %2943 = vmatpush.msra.mxu1 %v1889_v6  ;;  %2924 = vmatmul.f32.vlgmr.msra.gmra.mxu0 %v2388_v11 }
 0x201   : > { %v2021_v10 = vld [vmem:[%s5553_s5 + $0x3620] sm:$0xff]  ;;  %2963 = vmatpush.msra.mxu2 %v1953_v9 }
 0x202   : > { %v2141_v13 = vld [vmem:[%s5553_s5 + $0x39e0] sm:$0xff]  ;;  %2982 = vmatpush.msra.mxu3 %v2021_v10  ;;  %2964 = vmatmul.f32.vlgmr.msra.gmra.mxu2 %v2390_v12 }
 0x203   : > { %v2205_v14 = vld [vmem:[%s5553_s5 + $0x3be0] sm:$0xff]  ;;  %2988 = vmatpush.msrb.mxu0 %v2141_v13 }
 0x204   : > { %v2269_v15 = vld [vmem:[%s5553_s5 + $0x3de0] sm:$0xff]  ;;  %3008 = vmatpush.msrb.mxu1 %v2205_v14 }
 0x205   : > { %v2017_v16 = vld [vmem:[%s5553_s5 + $0x3600] sm:$0xff]  ;;  %3028 = vmatpush.msrb.mxu2 %v2269_v15 }
 0x206   : > { %v2389_v17 = vld.sshfl [vmem:[#allocation1 + $0x8] sm:$0xff pattern:$0x73625140]  ;;  %2983 = vmatpush.msra.mxu3 %v2017_v16 }
 0x207   : > { %v2137_v21 = vld [vmem:[%s5553_s5 + $0x39c0] sm:$0xff]  ;;  %2944 = vmatmul.f32.vlgmr.msra.gmra.mxu1 %v2389_v17  ;;  %2984 = vmatmul.f32.vlgmr.msra.gmra.mxu3 %v2391_v18 }
 0x208   : > { %v2201_v22 = vld [vmem:[%s5553_s5 + $0x3bc0] sm:$0xff]  ;;  %2989 = vmatpush.msrb.mxu0 %v2137_v21 }
 0x209   : > { %v2265_v23 = vld [vmem:[%s5553_s5 + $0x3dc0] sm:$0xff]  ;;  %3009 = vmatpush.msrb.mxu1 %v2201_v22 }
 0x20a   : > { %v2333_v24 = vld [vmem:[%s5553_s5 + $0x3fe0] sm:$0xff]  ;;  %3029 = vmatpush.msrb.mxu2 %v2265_v23 }
 0x20b   : > { %v2133_v27 = vld [vmem:[%s5553_s5 + $0x39a0] sm:$0xff]  ;;  %3048 = vmatpush.msrb.mxu3 %v2333_v24 }
 0x20c   : > { %v2197_v28 = vld [vmem:[%s5553_s5 + $0x3ba0] sm:$0xff]  ;;  %2990 = vmatpush.msrb.mxu0 %v2133_v27 }
 0x20d   : > { %v2261_v29 = vld [vmem:[%s5553_s5 + $0x3da0] sm:$0xff]  ;;  %3010 = vmatpush.msrb.mxu1 %v2197_v28 }
 0x20e   : > { %v2329_v32 = vld [vmem:[%s5553_s5 + $0x3fc0] sm:$0xff]  ;;  %3030 = vmatpush.msrb.mxu2 %v2261_v29 }
 0x20f   : > { %v2129_v33 = vld [vmem:[%s5553_s5 + $0x3980] sm:$0xff]  ;;  %3049 = vmatpush.msrb.mxu3 %v2329_v32 }
 0x210   : > { %v2193_v34 = vld [vmem:[%s5553_s5 + $0x3b80] sm:$0xff]  ;;  %2991 = vmatpush.msrb.mxu0 %v2129_v33 }
 0x211   : > { %v2257_v35 = vld [vmem:[%s5553_s5 + $0x3d80] sm:$0xff]  ;;  %3011 = vmatpush.msrb.mxu1 %v2193_v34 }
 0x212   : > { %v2325_v40 = vld [vmem:[%s5553_s5 + $0x3fa0] sm:$0xff]  ;;  %3031 = vmatpush.msrb.mxu2 %v2257_v35 }
 0x213   : > { %v2125_v41 = vld [vmem:[%s5553_s5 + $0x3960] sm:$0xff]  ;;  %3050 = vmatpush.msrb.mxu3 %v2325_v40 }
 0x214   : > { %v2189_v44 = vld [vmem:[%s5553_s5 + $0x3b60] sm:$0xff]  ;;  %2992 = vmatpush.msrb.mxu0 %v2125_v41 }
 0x215   : > { %v2253_v45 = vld [vmem:[%s5553_s5 + $0x3d60] sm:$0xff]  ;;  %3012 = vmatpush.msrb.mxu1 %v2189_v44 }
 0x216   : > { %v2321_v46 = vld [vmem:[%s5553_s5 + $0x3f80] sm:$0xff]  ;;  %3032 = vmatpush.msrb.mxu2 %v2253_v45 }
 0x217   : > { %v2121_v51 = vld [vmem:[%s5553_s5 + $0x3940] sm:$0xff]  ;;  %3051 = vmatpush.msrb.mxu3 %v2321_v46 }
 0x218   : > { %v2185_v52 = vld [vmem:[%s5553_s5 + $0x3b40] sm:$0xff]  ;;  %2993 = vmatpush.msrb.mxu0 %v2121_v51 }
 0x219   : > { %v2249_v53 = vld [vmem:[%s5553_s5 + $0x3d40] sm:$0xff]  ;;  %3013 = vmatpush.msrb.mxu1 %v2185_v52 }
 0x21a   : > { %v2317_v54 = vld [vmem:[%s5553_s5 + $0x3f60] sm:$0xff]  ;;  %3033 = vmatpush.msrb.mxu2 %v2249_v53 }
 0x21b   : > { %v2117_v55 = vld [vmem:[%s5553_s5 + $0x3920] sm:$0xff]  ;;  %3052 = vmatpush.msrb.mxu3 %v2317_v54 }
 0x21c   : > { %v2181_v56 = vld [vmem:[%s5553_s5 + $0x3b20] sm:$0xff]  ;;  %2994 = vmatpush.msrb.mxu0 %v2117_v55  ;;  %v2392_v55 = vld.sshfl [vmem:[#allocation1 + $0x20] sm:$0xff pattern:$0x73625140] }
 0x21d   : > { %v2245_v57 = vld [vmem:[%s5553_s5 + $0x3d20] sm:$0xff]  ;;  %3014 = vmatpush.msrb.mxu1 %v2181_v56  ;;  %v2394_v56 = vld.sshfl [vmem:[#allocation1 + $0x30] sm:$0xff pattern:$0x73625140] }
 0x21e   : > { %v2313_v58 = vld [vmem:[%s5553_s5 + $0x3f40] sm:$0xff]  ;;  %3034 = vmatpush.msrb.mxu2 %v2245_v57  ;;  %v350_v57 = vld [vmem:[%s5553_s5 + $0x1e8] sm:$0xff] }
 0x21f   : > { %v2113_v59 = vld [vmem:[%s5553_s5 + $0x3900] sm:$0xff]  ;;  %3053 = vmatpush.msrb.mxu3 %v2313_v58  ;;  %v414_v58 = vld [vmem:[%s5553_s5 + $0x3e8] sm:$0xff] }
 0x220   : > { %v2177_v60 = vld [vmem:[%s5553_s5 + $0x3b00] sm:$0xff]  ;;  %2995 = vmatpush.msrb.mxu0 %v2113_v59  ;;  %v478_v59 = vld [vmem:[%s5553_s5 + $0x5e8] sm:$0xff] }
 0x221   : > { %v2241_v3 = vld [vmem:[%s5553_s5 + $0x3d00] sm:$0xff]  ;;  %3015 = vmatpush.msrb.mxu1 %v2177_v60 }
 0x222   : > { %v2309_v4 = vld [vmem:[%s5553_s5 + $0x3f20] sm:$0xff]  ;;  %3035 = vmatpush.msrb.mxu2 %v2241_v3 }
 0x223   : > { %v2109_v5 = vld [vmem:[%s5553_s5 + $0x38e0] sm:$0xff]  ;;  %3054 = vmatpush.msrb.mxu3 %v2309_v4  ;;  %v2395_v4 = vld.sshfl [vmem:[#allocation1 + $0x38] sm:$0xff pattern:$0x73625140] }
 0x224   : > { %v2173_v6 = vld [vmem:[%s5553_s5 + $0x3ae0] sm:$0xff]  ;;  %2996 = vmatpush.msrb.mxu0 %v2109_v5  ;;  %v346_v5 = vld [vmem:[%s5553_s5 + $0x1c8] sm:$0xff] }
 0x225   : > { %v2237_v9 = vld [vmem:[%s5553_s5 + $0x3ce0] sm:$0xff]  ;;  %3016 = vmatpush.msrb.mxu1 %v2173_v6  ;;  %v410_v6 = vld [vmem:[%s5553_s5 + $0x3c8] sm:$0xff] }
 0x226   : > { %v2305_v10 = vld [vmem:[%s5553_s5 + $0x3f00] sm:$0xff]  ;;  %3036 = vmatpush.msrb.mxu2 %v2237_v9  ;;  %v474_v9 = vld [vmem:[%s5553_s5 + $0x5c8] sm:$0xff] }
 0x227   : > { %v2105_v11 = vld [vmem:[%s5553_s5 + $0x38c0] sm:$0xff]  ;;  %3055 = vmatpush.msrb.mxu3 %v2305_v10  ;;  %v542_v10 = vld [vmem:[%s5553_s5 + $0x7e8] sm:$0xff] }
 0x228   : > { %v2169_v12 = vld [vmem:[%s5553_s5 + $0x3ac0] sm:$0xff]  ;;  %2997 = vmatpush.msrb.mxu0 %v2105_v11  ;;  %v342_v11 = vld [vmem:[%s5553_s5 + $0x1a8] sm:$0xff] }
 0x229   : > { %v2233_v13 = vld [vmem:[%s5553_s5 + $0x3cc0] sm:$0xff]  ;;  %3017 = vmatpush.msrb.mxu1 %v2169_v12  ;;  %v406_v12 = vld [vmem:[%s5553_s5 + $0x3a8] sm:$0xff] }
 0x22a   : > { %v2301_v14 = vld [vmem:[%s5553_s5 + $0x3ee0] sm:$0xff]  ;;  %3037 = vmatpush.msrb.mxu2 %v2233_v13  ;;  %v470_v13 = vld [vmem:[%s5553_s5 + $0x5a8] sm:$0xff] }
 0x22b   : > { %v2101_v15 = vld [vmem:[%s5553_s5 + $0x38a0] sm:$0xff]  ;;  %3056 = vmatpush.msrb.mxu3 %v2301_v14  ;;  %v538_v14 = vld [vmem:[%s5553_s5 + $0x7c8] sm:$0xff] }
 0x22c   : > { %v2165_v16 = vld [vmem:[%s5553_s5 + $0x3aa0] sm:$0xff]  ;;  %2998 = vmatpush.msrb.mxu0 %v2101_v15  ;;  %v338_v15 = vld [vmem:[%s5553_s5 + $0x188] sm:$0xff] }
 0x22d   : > { %v2229_v17 = vld [vmem:[%s5553_s5 + $0x3ca0] sm:$0xff]  ;;  %3018 = vmatpush.msrb.mxu1 %v2165_v16  ;;  %v402_v16 = vld [vmem:[%s5553_s5 + $0x388] sm:$0xff] }
 0x22e   : > { %v2297_v18 = vld [vmem:[%s5553_s5 + $0x3ec0] sm:$0xff]  ;;  %3038 = vmatpush.msrb.mxu2 %v2229_v17  ;;  %v466_v17 = vld [vmem:[%s5553_s5 + $0x588] sm:$0xff] }
 0x22f   : > { %v2097_v21 = vld [vmem:[%s5553_s5 + $0x3880] sm:$0xff]  ;;  %3057 = vmatpush.msrb.mxu3 %v2297_v18  ;;  %v534_v18 = vld [vmem:[%s5553_s5 + $0x7a8] sm:$0xff] }
 0x230   : > { %v2161_v22 = vld [vmem:[%s5553_s5 + $0x3a80] sm:$0xff]  ;;  %2999 = vmatpush.msrb.mxu0 %v2097_v21  ;;  %v334_v21 = vld [vmem:[%s5553_s5 + $0x168] sm:$0xff] }
 0x231   : > { %v2225_v23 = vld [vmem:[%s5553_s5 + $0x3c80] sm:$0xff]  ;;  %3019 = vmatpush.msrb.mxu1 %v2161_v22  ;;  %v398_v22 = vld [vmem:[%s5553_s5 + $0x368] sm:$0xff] }
 0x232   : > { %v2293_v24 = vld [vmem:[%s5553_s5 + $0x3ea0] sm:$0xff]  ;;  %3039 = vmatpush.msrb.mxu2 %v2225_v23  ;;  %v462_v23 = vld [vmem:[%s5553_s5 + $0x568] sm:$0xff] }
 0x233   : > { %v2093_v27 = vld [vmem:[%s5553_s5 + $0x3860] sm:$0xff]  ;;  %3058 = vmatpush.msrb.mxu3 %v2293_v24  ;;  %v530_v24 = vld [vmem:[%s5553_s5 + $0x788] sm:$0xff] }
 0x234   : > { %v2157_v28 = vld [vmem:[%s5553_s5 + $0x3a60] sm:$0xff]  ;;  %3000 = vmatpush.msrb.mxu0 %v2093_v27  ;;  %v330_v27 = vld [vmem:[%s5553_s5 + $0x148] sm:$0xff] }
 0x235   : > { %v2221_v29 = vld [vmem:[%s5553_s5 + $0x3c60] sm:$0xff]  ;;  %3020 = vmatpush.msrb.mxu1 %v2157_v28  ;;  %v394_v28 = vld [vmem:[%s5553_s5 + $0x348] sm:$0xff] }
 0x236   : > { %v2289_v32 = vld [vmem:[%s5553_s5 + $0x3e80] sm:$0xff]  ;;  %3040 = vmatpush.msrb.mxu2 %v2221_v29  ;;  %v458_v29 = vld [vmem:[%s5553_s5 + $0x548] sm:$0xff] }
 0x237   : > { %v2089_v33 = vld [vmem:[%s5553_s5 + $0x3840] sm:$0xff]  ;;  %3059 = vmatpush.msrb.mxu3 %v2289_v32  ;;  %v526_v32 = vld [vmem:[%s5553_s5 + $0x768] sm:$0xff] }
 0x238   : > { %v2153_v34 = vld [vmem:[%s5553_s5 + $0x3a40] sm:$0xff]  ;;  %3001 = vmatpush.msrb.mxu0 %v2089_v33  ;;  %v326_v33 = vld [vmem:[%s5553_s5 + $0x128] sm:$0xff] }
 0x239   : > { %v2217_v35 = vld [vmem:[%s5553_s5 + $0x3c40] sm:$0xff]  ;;  %3021 = vmatpush.msrb.mxu1 %v2153_v34  ;;  %v390_v34 = vld [vmem:[%s5553_s5 + $0x328] sm:$0xff] }
 0x23a   : > { %v2285_v40 = vld [vmem:[%s5553_s5 + $0x3e60] sm:$0xff]  ;;  %3041 = vmatpush.msrb.mxu2 %v2217_v35  ;;  %v454_v35 = vld [vmem:[%s5553_s5 + $0x528] sm:$0xff] }
 0x23b   : > { %v2085_v41 = vld [vmem:[%s5553_s5 + $0x3820] sm:$0xff]  ;;  %3060 = vmatpush.msrb.mxu3 %v2285_v40  ;;  %v522_v40 = vld [vmem:[%s5553_s5 + $0x748] sm:$0xff] }
 0x23c   : > { %v2149_v44 = vld [vmem:[%s5553_s5 + $0x3a20] sm:$0xff]  ;;  %3002 = vmatpush.msrb.mxu0 %v2085_v41  ;;  %v322_v41 = vld [vmem:[%s5553_s5 + $0x108] sm:$0xff] }
 0x23d   : > { %v2213_v45 = vld [vmem:[%s5553_s5 + $0x3c20] sm:$0xff]  ;;  %3022 = vmatpush.msrb.mxu1 %v2149_v44  ;;  %v386_v44 = vld [vmem:[%s5553_s5 + $0x308] sm:$0xff] }
 0x23e   : > { %v2281_v46 = vld [vmem:[%s5553_s5 + $0x3e40] sm:$0xff]  ;;  %3042 = vmatpush.msrb.mxu2 %v2213_v45  ;;  %v450_v45 = vld [vmem:[%s5553_s5 + $0x508] sm:$0xff] }
 0x23f   : > { %v2081_v51 = vld [vmem:[%s5553_s5 + $0x3800] sm:$0xff]  ;;  %3061 = vmatpush.msrb.mxu3 %v2281_v46  ;;  %v518_v46 = vld [vmem:[%s5553_s5 + $0x728] sm:$0xff] }
 0x240   : > { %v2145_v52 = vld [vmem:[%s5553_s5 + $0x3a00] sm:$0xff]  ;;  %3003 = vmatpush.msrb.mxu0 %v2081_v51  ;;  %v318_v51 = vld [vmem:[%s5553_s5 + $0xe8] sm:$0xff] }
 0x241   : > { %v2209_v53 = vld [vmem:[%s5553_s5 + $0x3c00] sm:$0xff]  ;;  %3023 = vmatpush.msrb.mxu1 %v2145_v52  ;;  %3004 = vmatmul.f32.vlgmr.msrb.gmra.mxu0 %v2392_v55  ;;  %v382_v52 = vld [vmem:[%s5553_s5 + $0x2e8] sm:$0xff] }
 0x242   : > { %v2277_v54 = vld [vmem:[%s5553_s5 + $0x3e20] sm:$0xff]  ;;  %3043 = vmatpush.msrb.mxu2 %v2209_v53  ;;  %3068 = vmatpush.msra.mxu0 %v350_v57  ;;  %v446_v53 = vld [vmem:[%s5553_s5 + $0x4e8] sm:$0xff] }
 0x243   : > { %3062 = vmatpush.msrb.mxu3 %v2277_v54  ;;  %v2273_v60 = vld [vmem:[%s5553_s5 + $0x3e00] sm:$0xff]  ;;  %3044 = vmatmul.f32.vlgmr.msrb.gmra.mxu2 %v2394_v56  ;;  %v514_v54 = vld [vmem:[%s5553_s5 + $0x708] sm:$0xff] }
 0x244   : > { %v2393_v3 = vld.sshfl [vmem:[#allocation1 + $0x28] sm:$0xff pattern:$0x73625140]  ;;  %3088 = vmatpush.msra.mxu1 %v414_v58  ;;  %3108 = vmatpush.msra.mxu2 %v478_v59  ;;  %v314_v55 = vld [vmem:[%s5553_s5 + $0xc8] sm:$0xff] }
 0x245   : > { %3063 = vmatpush.msrb.mxu3 %v2273_v60  ;;  %3024 = vmatmul.f32.vlgmr.msrb.gmra.mxu1 %v2393_v3  ;;  %v378_v56 = vld [vmem:[%s5553_s5 + $0x2c8] sm:$0xff] }
 0x246   : > { %3064 = vmatmul.f32.vlgmr.msrb.gmra.mxu3 %v2395_v4  ;;  %3069 = vmatpush.msra.mxu0 %v346_v5  ;;  %v442_v57 = vld [vmem:[%s5553_s5 + $0x4c8] sm:$0xff] }
 0x247   : > { %3089 = vmatpush.msra.mxu1 %v410_v6  ;;  %3109 = vmatpush.msra.mxu2 %v474_v9  ;;  %v510_v58 = vld [vmem:[%s5553_s5 + $0x6e8] sm:$0xff] }
 0x248   : > { %3128 = vmatpush.msra.mxu3 %v542_v10  ;;  %3070 = vmatpush.msra.mxu0 %v342_v11  ;;  %v310_v59 = vld [vmem:[%s5553_s5 + $0xa8] sm:$0xff] }
 0x249   : > { %3090 = vmatpush.msra.mxu1 %v406_v12  ;;  %3110 = vmatpush.msra.mxu2 %v470_v13  ;;  %v374_v60 = vld [vmem:[%s5553_s5 + $0x2a8] sm:$0xff] }
 0x24a   : > { %3129 = vmatpush.msra.mxu3 %v538_v14  ;;  %3071 = vmatpush.msra.mxu0 %v338_v15  ;;  %v438_v3 = vld [vmem:[%s5553_s5 + $0x4a8] sm:$0xff] }
 0x24b   : > { %3091 = vmatpush.msra.mxu1 %v402_v16  ;;  %3111 = vmatpush.msra.mxu2 %v466_v17  ;;  %v506_v4 = vld [vmem:[%s5553_s5 + $0x6c8] sm:$0xff] }
 0x24c   : > { %3130 = vmatpush.msra.mxu3 %v534_v18  ;;  %3072 = vmatpush.msra.mxu0 %v334_v21  ;;  %v306_v5 = vld [vmem:[%s5553_s5 + $0x88] sm:$0xff] }
 0x24d   : > { %3092 = vmatpush.msra.mxu1 %v398_v22  ;;  %3112 = vmatpush.msra.mxu2 %v462_v23  ;;  %v370_v6 = vld [vmem:[%s5553_s5 + $0x288] sm:$0xff] }
 0x24e   : > { %3131 = vmatpush.msra.mxu3 %v530_v24  ;;  %3073 = vmatpush.msra.mxu0 %v330_v27  ;;  %v434_v9 = vld [vmem:[%s5553_s5 + $0x488] sm:$0xff] }
 0x24f   : > { %3093 = vmatpush.msra.mxu1 %v394_v28  ;;  %3113 = vmatpush.msra.mxu2 %v458_v29  ;;  %v502_v10 = vld [vmem:[%s5553_s5 + $0x6a8] sm:$0xff] }
 0x250   : > { %3132 = vmatpush.msra.mxu3 %v526_v32  ;;  %3074 = vmatpush.msra.mxu0 %v326_v33  ;;  %v302_v11 = vld [vmem:[%s5553_s5 + $0x68] sm:$0xff] }
 0x251   : > { %3094 = vmatpush.msra.mxu1 %v390_v34  ;;  %3114 = vmatpush.msra.mxu2 %v454_v35  ;;  %v366_v12 = vld [vmem:[%s5553_s5 + $0x268] sm:$0xff] }
 0x252   : > { %3133 = vmatpush.msra.mxu3 %v522_v40  ;;  %3075 = vmatpush.msra.mxu0 %v322_v41  ;;  %v430_v13 = vld [vmem:[%s5553_s5 + $0x468] sm:$0xff] }
 0x253   : > { %3095 = vmatpush.msra.mxu1 %v386_v44  ;;  %3115 = vmatpush.msra.mxu2 %v450_v45  ;;  %v498_v14 = vld [vmem:[%s5553_s5 + $0x688] sm:$0xff] }
 0x254   : > { %3134 = vmatpush.msra.mxu3 %v518_v46  ;;  %3076 = vmatpush.msra.mxu0 %v318_v51  ;;  %v298_v15 = vld [vmem:[%s5553_s5 + $0x48] sm:$0xff] }
 0x255   : > { %3096 = vmatpush.msra.mxu1 %v382_v52  ;;  %3116 = vmatpush.msra.mxu2 %v446_v53  ;;  %v362_v16 = vld [vmem:[%s5553_s5 + $0x248] sm:$0xff] }
 0x256   : > { %3135 = vmatpush.msra.mxu3 %v514_v54  ;;  %3077 = vmatpush.msra.mxu0 %v314_v55  ;;  %v426_v17 = vld [vmem:[%s5553_s5 + $0x448] sm:$0xff] }
 0x257   : > { %3097 = vmatpush.msra.mxu1 %v378_v56  ;;  %3117 = vmatpush.msra.mxu2 %v442_v57  ;;  %v494_v18 = vld [vmem:[%s5553_s5 + $0x668] sm:$0xff] }
 0x258   : > { %3136 = vmatpush.msra.mxu3 %v510_v58  ;;  %3078 = vmatpush.msra.mxu0 %v310_v59  ;;  %v294_v21 = vld [vmem:[%s5553_s5 + $0x28] sm:$0xff] }
 0x259   : > { %3098 = vmatpush.msra.mxu1 %v374_v60  ;;  %3118 = vmatpush.msra.mxu2 %v438_v3  ;;  %v358_v22 = vld [vmem:[%s5553_s5 + $0x228] sm:$0xff] }
 0x25a   : > { %3137 = vmatpush.msra.mxu3 %v506_v4  ;;  %3079 = vmatpush.msra.mxu0 %v306_v5  ;;  %v422_v23 = vld [vmem:[%s5553_s5 + $0x428] sm:$0xff] }
 0x25b   : > { %3099 = vmatpush.msra.mxu1 %v370_v6  ;;  %3119 = vmatpush.msra.mxu2 %v434_v9  ;;  %v490_v24 = vld [vmem:[%s5553_s5 + $0x648] sm:$0xff] }
 0x25c   : > { %3138 = vmatpush.msra.mxu3 %v502_v10  ;;  %3080 = vmatpush.msra.mxu0 %v302_v11  ;;  %v290_v27 = vld [vmem:[%s5553_s5 + $0x8] sm:$0xff] }
 0x25d   : > { %3100 = vmatpush.msra.mxu1 %v366_v12  ;;  %3120 = vmatpush.msra.mxu2 %v430_v13  ;;  %v354_v28 = vld [vmem:[%s5553_s5 + $0x208] sm:$0xff] }
 0x25e   : > { %3139 = vmatpush.msra.mxu3 %v498_v14  ;;  %3081 = vmatpush.msra.mxu0 %v298_v15  ;;  %v418_v29 = vld [vmem:[%s5553_s5 + $0x408] sm:$0xff] }
 0x25f   : > { %3101 = vmatpush.msra.mxu1 %v362_v16  ;;  %3121 = vmatpush.msra.mxu2 %v426_v17  ;;  %v486_v32 = vld [vmem:[%s5553_s5 + $0x628] sm:$0xff] }
 0x260   : > { %3140 = vmatpush.msra.mxu3 %v494_v18  ;;  %3082 = vmatpush.msra.mxu0 %v294_v21  ;;  %v606_v33 = vld [vmem:[%s5553_s5 + $0x9e8] sm:$0xff] }
 0x261   : > { %3102 = vmatpush.msra.mxu1 %v358_v22  ;;  %3122 = vmatpush.msra.mxu2 %v422_v23  ;;  %v670_v34 = vld [vmem:[%s5553_s5 + $0xbe8] sm:$0xff] }
 0x262   : > { %3141 = vmatpush.msra.mxu3 %v490_v24  ;;  %3083 = vmatpush.msra.mxu0 %v290_v27  ;;  %v734_v35 = vld [vmem:[%s5553_s5 + $0xde8] sm:$0xff] }
 0x263   : > { %3103 = vmatpush.msra.mxu1 %v354_v28  ;;  %v482_v40 = vld [vmem:[%s5553_s5 + $0x608] sm:$0xff]  ;;  %3123 = vmatpush.msra.mxu2 %v418_v29 }
 0x264   : > { %3142 = vmatpush.msra.mxu3 %v486_v32  ;;  %v602_v41 = vld [vmem:[%s5553_s5 + $0x9c8] sm:$0xff]  ;;  %3148 = vmatpush.msrb.mxu0 %v606_v33 }
 0x265   : > { %v666_v44 = vld [vmem:[%s5553_s5 + $0xbc8] sm:$0xff]  ;;  %3168 = vmatpush.msrb.mxu1 %v670_v34  ;;  %3188 = vmatpush.msrb.mxu2 %v734_v35 }
 0x266   : > { %v730_v45 = vld [vmem:[%s5553_s5 + $0xdc8] sm:$0xff]  ;;  %3143 = vmatpush.msra.mxu3 %v482_v40  ;;  %3149 = vmatpush.msrb.mxu0 %v602_v41 }
 0x267   : > { %v798_v46 = vld [vmem:[%s5553_s5 + $0xfe8] sm:$0xff]  ;;  %3169 = vmatpush.msrb.mxu1 %v666_v44  ;;  %3189 = vmatpush.msrb.mxu2 %v730_v45 }
 0x268   : > { %v598_v51 = vld [vmem:[%s5553_s5 + $0x9a8] sm:$0xff]  ;;  %3208 = vmatpush.msrb.mxu3 %v798_v46  ;;  %3084 = vmatmul.f32.vlgmr.msra.gmra.mxu0 %v5682_v47 }
 0x269   : > { %v662_v52 = vld [vmem:[%s5553_s5 + $0xba8] sm:$0xff]  ;;  %3150 = vmatpush.msrb.mxu0 %v598_v51  ;;  %3104 = vmatmul.f32.vlgmr.msra.gmra.mxu1 %v5684_v48 }
 0x26a   : > { %v726_v53 = vld [vmem:[%s5553_s5 + $0xda8] sm:$0xff]  ;;  %3170 = vmatpush.msrb.mxu1 %v662_v52  ;;  %3124 = vmatmul.f32.vlgmr.msra.gmra.mxu2 %v5686_v49 }
 0x26b   : > { %v794_v54 = vld [vmem:[%s5553_s5 + $0xfc8] sm:$0xff]  ;;  %3190 = vmatpush.msrb.mxu2 %v726_v53  ;;  %3144 = vmatmul.f32.vlgmr.msra.gmra.mxu3 %v5688_v50 }
 0x26c   : > { %v594_v55 = vld [vmem:[%s5553_s5 + $0x988] sm:$0xff]  ;;  %3209 = vmatpush.msrb.mxu3 %v794_v54 }
 0x26d   : > { %v658_v56 = vld [vmem:[%s5553_s5 + $0xb88] sm:$0xff]  ;;  %3151 = vmatpush.msrb.mxu0 %v594_v55 }
 0x26e   : > { %v722_v57 = vld [vmem:[%s5553_s5 + $0xd88] sm:$0xff]  ;;  %3171 = vmatpush.msrb.mxu1 %v658_v56 }
 0x26f   : > { %v790_v58 = vld [vmem:[%s5553_s5 + $0xfa8] sm:$0xff]  ;;  %3191 = vmatpush.msrb.mxu2 %v722_v57 }
 0x270   : > { %v590_v59 = vld [vmem:[%s5553_s5 + $0x968] sm:$0xff]  ;;  %3210 = vmatpush.msrb.mxu3 %v790_v58 }
 0x271   : > { %v654_v60 = vld [vmem:[%s5553_s5 + $0xb68] sm:$0xff]  ;;  %3152 = vmatpush.msrb.mxu0 %v590_v59 }
 0x272   : > { %v718_v3 = vld [vmem:[%s5553_s5 + $0xd68] sm:$0xff]  ;;  %3172 = vmatpush.msrb.mxu1 %v654_v60 }
 0x273   : > { %v786_v4 = vld [vmem:[%s5553_s5 + $0xf88] sm:$0xff]  ;;  %3192 = vmatpush.msrb.mxu2 %v718_v3 }
 0x274   : > { %v586_v5 = vld [vmem:[%s5553_s5 + $0x948] sm:$0xff]  ;;  %3211 = vmatpush.msrb.mxu3 %v786_v4 }
 0x275   : > { %v650_v6 = vld [vmem:[%s5553_s5 + $0xb48] sm:$0xff]  ;;  %3153 = vmatpush.msrb.mxu0 %v586_v5 }
 0x276   : > { %v714_v9 = vld [vmem:[%s5553_s5 + $0xd48] sm:$0xff]  ;;  %3173 = vmatpush.msrb.mxu1 %v650_v6 }
 0x277   : > { %v782_v10 = vld [vmem:[%s5553_s5 + $0xf68] sm:$0xff]  ;;  %3193 = vmatpush.msrb.mxu2 %v714_v9 }
 0x278   : > { %v582_v11 = vld [vmem:[%s5553_s5 + $0x928] sm:$0xff]  ;;  %3212 = vmatpush.msrb.mxu3 %v782_v10 }
 0x279   : > { %v646_v12 = vld [vmem:[%s5553_s5 + $0xb28] sm:$0xff]  ;;  %3154 = vmatpush.msrb.mxu0 %v582_v11 }
 0x27a   : > { %v710_v13 = vld [vmem:[%s5553_s5 + $0xd28] sm:$0xff]  ;;  %3174 = vmatpush.msrb.mxu1 %v646_v12 }
 0x27b   : > { %v778_v14 = vld [vmem:[%s5553_s5 + $0xf48] sm:$0xff]  ;;  %3194 = vmatpush.msrb.mxu2 %v710_v13 }
 0x27c   : > { %v578_v15 = vld [vmem:[%s5553_s5 + $0x908] sm:$0xff]  ;;  %3213 = vmatpush.msrb.mxu3 %v778_v14 }
 0x27d   : > { %v642_v16 = vld [vmem:[%s5553_s5 + $0xb08] sm:$0xff]  ;;  %3155 = vmatpush.msrb.mxu0 %v578_v15 }
 0x27e   : > { %v706_v17 = vld [vmem:[%s5553_s5 + $0xd08] sm:$0xff]  ;;  %3175 = vmatpush.msrb.mxu1 %v642_v16 }
 0x27f   : > { %v774_v18 = vld [vmem:[%s5553_s5 + $0xf28] sm:$0xff]  ;;  %3195 = vmatpush.msrb.mxu2 %v706_v17 }
 0x280   : > { %v574_v21 = vld [vmem:[%s5553_s5 + $0x8e8] sm:$0xff]  ;;  %3214 = vmatpush.msrb.mxu3 %v774_v18 }
 0x281   : > { %v638_v22 = vld [vmem:[%s5553_s5 + $0xae8] sm:$0xff]  ;;  %3156 = vmatpush.msrb.mxu0 %v574_v21 }
 0x282   : > { %v702_v23 = vld [vmem:[%s5553_s5 + $0xce8] sm:$0xff]  ;;  %3176 = vmatpush.msrb.mxu1 %v638_v22 }
 0x283   : > { %v770_v24 = vld [vmem:[%s5553_s5 + $0xf08] sm:$0xff]  ;;  %3196 = vmatpush.msrb.mxu2 %v702_v23 }
 0x284   : > { %v570_v27 = vld [vmem:[%s5553_s5 + $0x8c8] sm:$0xff]  ;;  %3215 = vmatpush.msrb.mxu3 %v770_v24 }
 0x285   : > { %v634_v28 = vld [vmem:[%s5553_s5 + $0xac8] sm:$0xff]  ;;  %3157 = vmatpush.msrb.mxu0 %v570_v27 }
 0x286   : > { %v698_v29 = vld [vmem:[%s5553_s5 + $0xcc8] sm:$0xff]  ;;  %3177 = vmatpush.msrb.mxu1 %v634_v28 }
 0x287   : > { %v766_v32 = vld [vmem:[%s5553_s5 + $0xee8] sm:$0xff]  ;;  %3197 = vmatpush.msrb.mxu2 %v698_v29 }
 0x288   : > { %v566_v33 = vld [vmem:[%s5553_s5 + $0x8a8] sm:$0xff]  ;;  %3216 = vmatpush.msrb.mxu3 %v766_v32 }
 0x289   : > { %v630_v34 = vld [vmem:[%s5553_s5 + $0xaa8] sm:$0xff]  ;;  %3158 = vmatpush.msrb.mxu0 %v566_v33 }
 0x28a   : > { %v694_v35 = vld [vmem:[%s5553_s5 + $0xca8] sm:$0xff]  ;;  %3178 = vmatpush.msrb.mxu1 %v630_v34 }
 0x28b   : > { %v762_v40 = vld [vmem:[%s5553_s5 + $0xec8] sm:$0xff]  ;;  %3198 = vmatpush.msrb.mxu2 %v694_v35 }
 0x28c   : > { %v562_v41 = vld [vmem:[%s5553_s5 + $0x888] sm:$0xff]  ;;  %3217 = vmatpush.msrb.mxu3 %v762_v40 }
 0x28d   : > { %v626_v44 = vld [vmem:[%s5553_s5 + $0xa88] sm:$0xff]  ;;  %3159 = vmatpush.msrb.mxu0 %v562_v41 }
 0x28e   : > { %v690_v45 = vld [vmem:[%s5553_s5 + $0xc88] sm:$0xff]  ;;  %3179 = vmatpush.msrb.mxu1 %v626_v44 }
 0x28f   : > { %v758_v46 = vld [vmem:[%s5553_s5 + $0xea8] sm:$0xff]  ;;  %3199 = vmatpush.msrb.mxu2 %v690_v45 }
 0x290   : > { %v558_v51 = vld [vmem:[%s5553_s5 + $0x868] sm:$0xff]  ;;  %3218 = vmatpush.msrb.mxu3 %v758_v46 }
 0x291   : > { %v622_v52 = vld [vmem:[%s5553_s5 + $0xa68] sm:$0xff]  ;;  %3160 = vmatpush.msrb.mxu0 %v558_v51 }
 0x292   : > { %v686_v53 = vld [vmem:[%s5553_s5 + $0xc68] sm:$0xff]  ;;  %3180 = vmatpush.msrb.mxu1 %v622_v52 }
 0x293   : > { %v754_v54 = vld [vmem:[%s5553_s5 + $0xe88] sm:$0xff]  ;;  %3200 = vmatpush.msrb.mxu2 %v686_v53 }
 0x294   : > { %v554_v55 = vld [vmem:[%s5553_s5 + $0x848] sm:$0xff]  ;;  %3219 = vmatpush.msrb.mxu3 %v754_v54 }
 0x295   : > { %v618_v56 = vld [vmem:[%s5553_s5 + $0xa48] sm:$0xff]  ;;  %3161 = vmatpush.msrb.mxu0 %v554_v55 }
 0x296   : > { %v682_v57 = vld [vmem:[%s5553_s5 + $0xc48] sm:$0xff]  ;;  %3181 = vmatpush.msrb.mxu1 %v618_v56 }
 0x297   : > { %v750_v58 = vld [vmem:[%s5553_s5 + $0xe68] sm:$0xff]  ;;  %3201 = vmatpush.msrb.mxu2 %v682_v57 }
 0x298   : > { %v550_v59 = vld [vmem:[%s5553_s5 + $0x828] sm:$0xff]  ;;  %3220 = vmatpush.msrb.mxu3 %v750_v58 }
 0x299   : > { %v614_v60 = vld [vmem:[%s5553_s5 + $0xa28] sm:$0xff]  ;;  %3162 = vmatpush.msrb.mxu0 %v550_v59 }
 0x29a   : > { %v678_v3 = vld [vmem:[%s5553_s5 + $0xc28] sm:$0xff]  ;;  %3182 = vmatpush.msrb.mxu1 %v614_v60 }
 0x29b   : > { %v746_v4 = vld [vmem:[%s5553_s5 + $0xe48] sm:$0xff]  ;;  %3202 = vmatpush.msrb.mxu2 %v678_v3 }
 0x29c   : > { %v546_v5 = vld [vmem:[%s5553_s5 + $0x808] sm:$0xff]  ;;  %3221 = vmatpush.msrb.mxu3 %v746_v4 }
 0x29d   : > { %v610_v6 = vld [vmem:[%s5553_s5 + $0xa08] sm:$0xff]  ;;  %3163 = vmatpush.msrb.mxu0 %v546_v5 }
 0x29e   : > { %v674_v9 = vld [vmem:[%s5553_s5 + $0xc08] sm:$0xff]  ;;  %3183 = vmatpush.msrb.mxu1 %v610_v6  ;;  %3164 = vmatmul.f32.vlgmr.msrb.gmra.mxu0 %v5706_v0 }
 0x29f   : > { %v742_v10 = vld [vmem:[%s5553_s5 + $0xe28] sm:$0xff]  ;;  %3203 = vmatpush.msrb.mxu2 %v674_v9  ;;  %3184 = vmatmul.f32.vlgmr.msrb.gmra.mxu1 %v5710_v2 }
 0x2a0   : > { %v862_v11 = vld [vmem:[%s5553_s5 + $0x11e8] sm:$0xff]  ;;  %3222 = vmatpush.msrb.mxu3 %v742_v10  ;;  %3204 = vmatmul.f32.vlgmr.msrb.gmra.mxu2 %v5704_v63 }
 0x2a1   : > { %v926_v12 = vld [vmem:[%s5553_s5 + $0x13e8] sm:$0xff]  ;;  %3228 = vmatpush.msra.mxu0 %v862_v11 }
 0x2a2   : > { %v990_v13 = vld [vmem:[%s5553_s5 + $0x15e8] sm:$0xff]  ;;  %3248 = vmatpush.msra.mxu1 %v926_v12 }
 0x2a3   : > { %v738_v14 = vld [vmem:[%s5553_s5 + $0xe08] sm:$0xff]  ;;  %3268 = vmatpush.msra.mxu2 %v990_v13 }
 0x2a4   : > { %v858_v15 = vld [vmem:[%s5553_s5 + $0x11c8] sm:$0xff]  ;;  %3223 = vmatpush.msrb.mxu3 %v738_v14 }
 0x2a5   : > { %v922_v16 = vld [vmem:[%s5553_s5 + $0x13c8] sm:$0xff]  ;;  %3229 = vmatpush.msra.mxu0 %v858_v15  ;;  %3224 = vmatmul.f32.vlgmr.msrb.gmra.mxu3 %v5708_v1 }
 0x2a6   : > { %v986_v17 = vld [vmem:[%s5553_s5 + $0x15c8] sm:$0xff]  ;;  %3249 = vmatpush.msra.mxu1 %v922_v16 }
 0x2a7   : > { %v1054_v18 = vld [vmem:[%s5553_s5 + $0x17e8] sm:$0xff]  ;;  %3269 = vmatpush.msra.mxu2 %v986_v17 }
 0x2a8   : > { %v854_v21 = vld [vmem:[%s5553_s5 + $0x11a8] sm:$0xff]  ;;  %3288 = vmatpush.msra.mxu3 %v1054_v18 }
 0x2a9   : > { %v918_v22 = vld [vmem:[%s5553_s5 + $0x13a8] sm:$0xff]  ;;  %3230 = vmatpush.msra.mxu0 %v854_v21 }
 0x2aa   : > { %v982_v23 = vld [vmem:[%s5553_s5 + $0x15a8] sm:$0xff]  ;;  %3250 = vmatpush.msra.mxu1 %v918_v22 }
 0x2ab   : > { %v1050_v24 = vld [vmem:[%s5553_s5 + $0x17c8] sm:$0xff]  ;;  %3270 = vmatpush.msra.mxu2 %v982_v23 }
 0x2ac   : > { %v850_v27 = vld [vmem:[%s5553_s5 + $0x1188] sm:$0xff]  ;;  %3289 = vmatpush.msra.mxu3 %v1050_v24 }
 0x2ad   : > { %v914_v28 = vld [vmem:[%s5553_s5 + $0x1388] sm:$0xff]  ;;  %3231 = vmatpush.msra.mxu0 %v850_v27 }
 0x2ae   : > { %v978_v29 = vld [vmem:[%s5553_s5 + $0x1588] sm:$0xff]  ;;  %3251 = vmatpush.msra.mxu1 %v914_v28 }
 0x2af   : > { %v1046_v32 = vld [vmem:[%s5553_s5 + $0x17a8] sm:$0xff]  ;;  %3271 = vmatpush.msra.mxu2 %v978_v29 }
 0x2b0   : > { %v846_v33 = vld [vmem:[%s5553_s5 + $0x1168] sm:$0xff]  ;;  %3290 = vmatpush.msra.mxu3 %v1046_v32 }
 0x2b1   : > { %v910_v34 = vld [vmem:[%s5553_s5 + $0x1368] sm:$0xff]  ;;  %3232 = vmatpush.msra.mxu0 %v846_v33 }
 0x2b2   : > { %v974_v35 = vld [vmem:[%s5553_s5 + $0x1568] sm:$0xff]  ;;  %3252 = vmatpush.msra.mxu1 %v910_v34 }
 0x2b3   : > { %v1042_v40 = vld [vmem:[%s5553_s5 + $0x1788] sm:$0xff]  ;;  %3272 = vmatpush.msra.mxu2 %v974_v35 }
 0x2b4   : > { %v842_v41 = vld [vmem:[%s5553_s5 + $0x1148] sm:$0xff]  ;;  %3291 = vmatpush.msra.mxu3 %v1042_v40 }
 0x2b5   : > { %v906_v44 = vld [vmem:[%s5553_s5 + $0x1348] sm:$0xff]  ;;  %3233 = vmatpush.msra.mxu0 %v842_v41 }
 0x2b6   : > { %v970_v45 = vld [vmem:[%s5553_s5 + $0x1548] sm:$0xff]  ;;  %3253 = vmatpush.msra.mxu1 %v906_v44 }
 0x2b7   : > { %v1038_v46 = vld [vmem:[%s5553_s5 + $0x1768] sm:$0xff]  ;;  %3273 = vmatpush.msra.mxu2 %v970_v45 }
 0x2b8   : > { %v838_v51 = vld [vmem:[%s5553_s5 + $0x1128] sm:$0xff]  ;;  %3292 = vmatpush.msra.mxu3 %v1038_v46 }
 0x2b9   : > { %v902_v52 = vld [vmem:[%s5553_s5 + $0x1328] sm:$0xff]  ;;  %3234 = vmatpush.msra.mxu0 %v838_v51 }
 0x2ba   : > { %v966_v53 = vld [vmem:[%s5553_s5 + $0x1528] sm:$0xff]  ;;  %3254 = vmatpush.msra.mxu1 %v902_v52 }
 0x2bb   : > { %v1034_v54 = vld [vmem:[%s5553_s5 + $0x1748] sm:$0xff]  ;;  %3274 = vmatpush.msra.mxu2 %v966_v53 }
 0x2bc   : > { %v834_v55 = vld [vmem:[%s5553_s5 + $0x1108] sm:$0xff]  ;;  %3293 = vmatpush.msra.mxu3 %v1034_v54 }
 0x2bd   : > { %v898_v56 = vld [vmem:[%s5553_s5 + $0x1308] sm:$0xff]  ;;  %3235 = vmatpush.msra.mxu0 %v834_v55 }
 0x2be   : > { %v962_v57 = vld [vmem:[%s5553_s5 + $0x1508] sm:$0xff]  ;;  %3255 = vmatpush.msra.mxu1 %v898_v56 }
 0x2bf   : > { %v1030_v58 = vld [vmem:[%s5553_s5 + $0x1728] sm:$0xff]  ;;  %3275 = vmatpush.msra.mxu2 %v962_v57 }
 0x2c0   : > { %v830_v59 = vld [vmem:[%s5553_s5 + $0x10e8] sm:$0xff]  ;;  %3294 = vmatpush.msra.mxu3 %v1030_v58 }
 0x2c1   : > { %v894_v60 = vld [vmem:[%s5553_s5 + $0x12e8] sm:$0xff]  ;;  %3236 = vmatpush.msra.mxu0 %v830_v59 }
 0x2c2   : > { %v958_v3 = vld [vmem:[%s5553_s5 + $0x14e8] sm:$0xff]  ;;  %3256 = vmatpush.msra.mxu1 %v894_v60 }
 0x2c3   : > { %v1026_v4 = vld [vmem:[%s5553_s5 + $0x1708] sm:$0xff]  ;;  %3276 = vmatpush.msra.mxu2 %v958_v3 }
 0x2c4   : > { %v826_v5 = vld [vmem:[%s5553_s5 + $0x10c8] sm:$0xff]  ;;  %3295 = vmatpush.msra.mxu3 %v1026_v4 }
 0x2c5   : > { %v890_v6 = vld [vmem:[%s5553_s5 + $0x12c8] sm:$0xff]  ;;  %3237 = vmatpush.msra.mxu0 %v826_v5 }
 0x2c6   : > { %v954_v9 = vld [vmem:[%s5553_s5 + $0x14c8] sm:$0xff]  ;;  %3257 = vmatpush.msra.mxu1 %v890_v6 }
 0x2c7   : > { %v1022_v10 = vld [vmem:[%s5553_s5 + $0x16e8] sm:$0xff]  ;;  %3277 = vmatpush.msra.mxu2 %v954_v9 }
 0x2c8   : > { %v822_v11 = vld [vmem:[%s5553_s5 + $0x10a8] sm:$0xff]  ;;  %3296 = vmatpush.msra.mxu3 %v1022_v10 }
 0x2c9   : > { %v886_v12 = vld [vmem:[%s5553_s5 + $0x12a8] sm:$0xff]  ;;  %3238 = vmatpush.msra.mxu0 %v822_v11 }
 0x2ca   : > { %v950_v13 = vld [vmem:[%s5553_s5 + $0x14a8] sm:$0xff]  ;;  %3258 = vmatpush.msra.mxu1 %v886_v12 }
 0x2cb   : > { %v1018_v14 = vld [vmem:[%s5553_s5 + $0x16c8] sm:$0xff]  ;;  %3278 = vmatpush.msra.mxu2 %v950_v13 }
 0x2cc   : > { %v818_v15 = vld [vmem:[%s5553_s5 + $0x1088] sm:$0xff]  ;;  %3297 = vmatpush.msra.mxu3 %v1018_v14 }
 0x2cd   : > { %v882_v16 = vld [vmem:[%s5553_s5 + $0x1288] sm:$0xff]  ;;  %3239 = vmatpush.msra.mxu0 %v818_v15 }
 0x2ce   : > { %v946_v17 = vld [vmem:[%s5553_s5 + $0x1488] sm:$0xff]  ;;  %3259 = vmatpush.msra.mxu1 %v882_v16 }
 0x2cf   : > { %v1014_v18 = vld [vmem:[%s5553_s5 + $0x16a8] sm:$0xff]  ;;  %3279 = vmatpush.msra.mxu2 %v946_v17 }
 0x2d0   : > { %v814_v21 = vld [vmem:[%s5553_s5 + $0x1068] sm:$0xff]  ;;  %3298 = vmatpush.msra.mxu3 %v1014_v18 }
 0x2d1   : > { %v878_v22 = vld [vmem:[%s5553_s5 + $0x1268] sm:$0xff]  ;;  %3240 = vmatpush.msra.mxu0 %v814_v21 }
 0x2d2   : > { %v942_v23 = vld [vmem:[%s5553_s5 + $0x1468] sm:$0xff]  ;;  %3260 = vmatpush.msra.mxu1 %v878_v22 }
 0x2d3   : > { %v1010_v24 = vld [vmem:[%s5553_s5 + $0x1688] sm:$0xff]  ;;  %3280 = vmatpush.msra.mxu2 %v942_v23 }
 0x2d4   : > { %v810_v27 = vld [vmem:[%s5553_s5 + $0x1048] sm:$0xff]  ;;  %3299 = vmatpush.msra.mxu3 %v1010_v24 }
 0x2d5   : > { %v874_v28 = vld [vmem:[%s5553_s5 + $0x1248] sm:$0xff]  ;;  %3241 = vmatpush.msra.mxu0 %v810_v27 }
 0x2d6   : > { %v938_v29 = vld [vmem:[%s5553_s5 + $0x1448] sm:$0xff]  ;;  %3261 = vmatpush.msra.mxu1 %v874_v28 }
 0x2d7   : > { %v1006_v32 = vld [vmem:[%s5553_s5 + $0x1668] sm:$0xff]  ;;  %3281 = vmatpush.msra.mxu2 %v938_v29 }
 0x2d8   : > { %v806_v33 = vld [vmem:[%s5553_s5 + $0x1028] sm:$0xff]  ;;  %3300 = vmatpush.msra.mxu3 %v1006_v32 }
 0x2d9   : > { %v870_v34 = vld [vmem:[%s5553_s5 + $0x1228] sm:$0xff]  ;;  %3242 = vmatpush.msra.mxu0 %v806_v33 }
 0x2da   : > { %v934_v35 = vld [vmem:[%s5553_s5 + $0x1428] sm:$0xff]  ;;  %3262 = vmatpush.msra.mxu1 %v870_v34 }
 0x2db   : > { %v1002_v40 = vld [vmem:[%s5553_s5 + $0x1648] sm:$0xff]  ;;  %3282 = vmatpush.msra.mxu2 %v934_v35 }
 0x2dc   : > { %v802_v41 = vld [vmem:[%s5553_s5 + $0x1008] sm:$0xff]  ;;  %3301 = vmatpush.msra.mxu3 %v1002_v40 }
 0x2dd   : > { %v866_v44 = vld [vmem:[%s5553_s5 + $0x1208] sm:$0xff]  ;;  %3243 = vmatpush.msra.mxu0 %v802_v41 }
 0x2de   : > { %v930_v45 = vld [vmem:[%s5553_s5 + $0x1408] sm:$0xff]  ;;  %3263 = vmatpush.msra.mxu1 %v866_v44  ;;  %3244 = vmatmul.f32.vlgmr.msra.gmra.mxu0 %v5792_v19 }
 0x2df   : > { %v998_v46 = vld [vmem:[%s5553_s5 + $0x1628] sm:$0xff]  ;;  %3283 = vmatpush.msra.mxu2 %v930_v45  ;;  %3264 = vmatmul.f32.vlgmr.msra.gmra.mxu1 %v5802_v25 }
 0x2e0   : > { %v1118_v51 = vld [vmem:[%s5553_s5 + $0x19e8] sm:$0xff]  ;;  %3302 = vmatpush.msra.mxu3 %v998_v46  ;;  %3284 = vmatmul.f32.vlgmr.msra.gmra.mxu2 %v5794_v20 }
 0x2e1   : > { %v1182_v52 = vld [vmem:[%s5553_s5 + $0x1be8] sm:$0xff]  ;;  %3308 = vmatpush.msrb.mxu0 %v1118_v51 }
 0x2e2   : > { %v1246_v53 = vld [vmem:[%s5553_s5 + $0x1de8] sm:$0xff]  ;;  %3328 = vmatpush.msrb.mxu1 %v1182_v52 }
 0x2e3   : > { %v994_v54 = vld [vmem:[%s5553_s5 + $0x1608] sm:$0xff]  ;;  %3348 = vmatpush.msrb.mxu2 %v1246_v53 }
 0x2e4   : > { %v1114_v55 = vld [vmem:[%s5553_s5 + $0x19c8] sm:$0xff]  ;;  %3303 = vmatpush.msra.mxu3 %v994_v54 }
 0x2e5   : > { %v1178_v56 = vld [vmem:[%s5553_s5 + $0x1bc8] sm:$0xff]  ;;  %3304 = vmatmul.f32.vlgmr.msra.gmra.mxu3 %v5804_v26  ;;  %3309 = vmatpush.msrb.mxu0 %v1114_v55 }
 0x2e6   : > { %v1242_v57 = vld [vmem:[%s5553_s5 + $0x1dc8] sm:$0xff]  ;;  %3329 = vmatpush.msrb.mxu1 %v1178_v56 }
 0x2e7   : > { %v1310_v58 = vld [vmem:[%s5553_s5 + $0x1fe8] sm:$0xff]  ;;  %3349 = vmatpush.msrb.mxu2 %v1242_v57 }
 0x2e8   : > { %v1110_v59 = vld [vmem:[%s5553_s5 + $0x19a8] sm:$0xff]  ;;  %3368 = vmatpush.msrb.mxu3 %v1310_v58 }
 0x2e9   : > { %v1174_v60 = vld [vmem:[%s5553_s5 + $0x1ba8] sm:$0xff]  ;;  %3310 = vmatpush.msrb.mxu0 %v1110_v59  ;;  %v6424_v59 = vpop.f32.mrf.mxu0 }
 0x2ea   : > { %v1238_v3 = vld [vmem:[%s5553_s5 + $0x1da8] sm:$0xff]  ;;  %3330 = vmatpush.msrb.mxu1 %v1174_v60 }
 0x2eb   : > { %v1306_v4 = vld [vmem:[%s5553_s5 + $0x1fc8] sm:$0xff]  ;;  %3350 = vmatpush.msrb.mxu2 %v1238_v3 }
 0x2ec   : > { %v1106_v5 = vld [vmem:[%s5553_s5 + $0x1988] sm:$0xff]  ;;  %3369 = vmatpush.msrb.mxu3 %v1306_v4  ;;  %v6428_v4 = vpop.f32.mrf.mxu1 }
 0x2ed   : > { %v1170_v6 = vld [vmem:[%s5553_s5 + $0x1b88] sm:$0xff]  ;;  %3311 = vmatpush.msrb.mxu0 %v1106_v5 }
 0x2ee   : > { %v1234_v9 = vld [vmem:[%s5553_s5 + $0x1d88] sm:$0xff]  ;;  %3331 = vmatpush.msrb.mxu1 %v1170_v6 }
 0x2ef   : > { %v1302_v10 = vld [vmem:[%s5553_s5 + $0x1fa8] sm:$0xff]  ;;  %3351 = vmatpush.msrb.mxu2 %v1234_v9 }
 0x2f0   : > { %v1102_v11 = vld [vmem:[%s5553_s5 + $0x1968] sm:$0xff]  ;;  %3370 = vmatpush.msrb.mxu3 %v1302_v10 }
 0x2f1   : > { %v1166_v12 = vld [vmem:[%s5553_s5 + $0x1b68] sm:$0xff]  ;;  %3312 = vmatpush.msrb.mxu0 %v1102_v11 }
 0x2f2   : > { %v1230_v13 = vld [vmem:[%s5553_s5 + $0x1d68] sm:$0xff]  ;;  %3332 = vmatpush.msrb.mxu1 %v1166_v12 }
 0x2f3   : > { %v1298_v14 = vld [vmem:[%s5553_s5 + $0x1f88] sm:$0xff]  ;;  %3352 = vmatpush.msrb.mxu2 %v1230_v13 }
 0x2f4   : > { %v1098_v15 = vld [vmem:[%s5553_s5 + $0x1948] sm:$0xff]  ;;  %3371 = vmatpush.msrb.mxu3 %v1298_v14 }
 0x2f5   : > { %v1162_v16 = vld [vmem:[%s5553_s5 + $0x1b48] sm:$0xff]  ;;  %3313 = vmatpush.msrb.mxu0 %v1098_v15 }
 0x2f6   : > { %v1226_v17 = vld [vmem:[%s5553_s5 + $0x1d48] sm:$0xff]  ;;  %3333 = vmatpush.msrb.mxu1 %v1162_v16 }
 0x2f7   : > { %v1294_v18 = vld [vmem:[%s5553_s5 + $0x1f68] sm:$0xff]  ;;  %3353 = vmatpush.msrb.mxu2 %v1226_v17 }
 0x2f8   : > { %v1094_v21 = vld [vmem:[%s5553_s5 + $0x1928] sm:$0xff]  ;;  %3372 = vmatpush.msrb.mxu3 %v1294_v18 }
 0x2f9   : > { %v1158_v22 = vld [vmem:[%s5553_s5 + $0x1b28] sm:$0xff]  ;;  %3314 = vmatpush.msrb.mxu0 %v1094_v21  ;;  %v6442_v21 = vpop.f32.mrf.mxu2 }
 0x2fa   : > { %v1222_v23 = vld [vmem:[%s5553_s5 + $0x1d28] sm:$0xff]  ;;  %3334 = vmatpush.msrb.mxu1 %v1158_v22 }
 0x2fb   : > { %v1290_v24 = vld [vmem:[%s5553_s5 + $0x1f48] sm:$0xff]  ;;  %3354 = vmatpush.msrb.mxu2 %v1222_v23 }
 0x2fc   : > { %v1090_v27 = vld [vmem:[%s5553_s5 + $0x1908] sm:$0xff]  ;;  %3373 = vmatpush.msrb.mxu3 %v1290_v24 }
 0x2fd   : > { %v1154_v28 = vld [vmem:[%s5553_s5 + $0x1b08] sm:$0xff]  ;;  %3315 = vmatpush.msrb.mxu0 %v1090_v27 }
 0x2fe   : > { %v1218_v29 = vld [vmem:[%s5553_s5 + $0x1d08] sm:$0xff]  ;;  %3335 = vmatpush.msrb.mxu1 %v1154_v28  ;;  %v6448_v28 = vpop.f32.mrf.mxu3 }
 0x2ff   : > { %v1286_v32 = vld [vmem:[%s5553_s5 + $0x1f28] sm:$0xff]  ;;  %3355 = vmatpush.msrb.mxu2 %v1218_v29  ;;  %v6450_v29 = vpop.f32.mrf.mxu0 }
 0x300   : > { %v1086_v33 = vld [vmem:[%s5553_s5 + $0x18e8] sm:$0xff]  ;;  %3374 = vmatpush.msrb.mxu3 %v1286_v32 }
 0x301   : > { %v1150_v34 = vld [vmem:[%s5553_s5 + $0x1ae8] sm:$0xff]  ;;  %3316 = vmatpush.msrb.mxu0 %v1086_v33 }
 0x302   : > { %v1214_v35 = vld [vmem:[%s5553_s5 + $0x1ce8] sm:$0xff]  ;;  %3336 = vmatpush.msrb.mxu1 %v1150_v34  ;;  %v6454_v34 = vpop.f32.mrf.mxu1 }
 0x303   : > { %v1282_v40 = vld [vmem:[%s5553_s5 + $0x1f08] sm:$0xff]  ;;  %3356 = vmatpush.msrb.mxu2 %v1214_v35 }
 0x304   : > { %v1082_v41 = vld [vmem:[%s5553_s5 + $0x18c8] sm:$0xff]  ;;  %3375 = vmatpush.msrb.mxu3 %v1282_v40 }
 0x305   : > { %v1146_v44 = vld [vmem:[%s5553_s5 + $0x1ac8] sm:$0xff]  ;;  %3317 = vmatpush.msrb.mxu0 %v1082_v41 }
 0x306   : > { %v1210_v45 = vld [vmem:[%s5553_s5 + $0x1cc8] sm:$0xff]  ;;  %3337 = vmatpush.msrb.mxu1 %v1146_v44 }
 0x307   : > { %v1278_v46 = vld [vmem:[%s5553_s5 + $0x1ee8] sm:$0xff]  ;;  %3357 = vmatpush.msrb.mxu2 %v1210_v45 }
 0x308   : > { %v1078_v51 = vld [vmem:[%s5553_s5 + $0x18a8] sm:$0xff]  ;;  %3376 = vmatpush.msrb.mxu3 %v1278_v46 }
 0x309   : > { %v1142_v52 = vld [vmem:[%s5553_s5 + $0x1aa8] sm:$0xff]  ;;  %3318 = vmatpush.msrb.mxu0 %v1078_v51 }
 0x30a   : > { %v1206_v53 = vld [vmem:[%s5553_s5 + $0x1ca8] sm:$0xff]  ;;  %3338 = vmatpush.msrb.mxu1 %v1142_v52 }
 0x30b   : > { %v1274_v54 = vld [vmem:[%s5553_s5 + $0x1ec8] sm:$0xff]  ;;  %3358 = vmatpush.msrb.mxu2 %v1206_v53 }
 0x30c   : > { %v1074_v55 = vld [vmem:[%s5553_s5 + $0x1888] sm:$0xff]  ;;  %3377 = vmatpush.msrb.mxu3 %v1274_v54 }
 0x30d   : > { %v1138_v56 = vld [vmem:[%s5553_s5 + $0x1a88] sm:$0xff]  ;;  %3319 = vmatpush.msrb.mxu0 %v1074_v55  ;;  %v6470_v55 = vpop.f32.mrf.mxu2 }
 0x30e   : > { %v1202_v57 = vld [vmem:[%s5553_s5 + $0x1c88] sm:$0xff]  ;;  %3339 = vmatpush.msrb.mxu1 %v1138_v56 }
 0x30f   : > { %v1270_v58 = vld [vmem:[%s5553_s5 + $0x1ea8] sm:$0xff]  ;;  %3359 = vmatpush.msrb.mxu2 %v1202_v57 }
 0x310   : > { %v1070_v60 = vld [vmem:[%s5553_s5 + $0x1868] sm:$0xff]  ;;  %3378 = vmatpush.msrb.mxu3 %v1270_v58  ;;  %v6474_v58 = vpop.f32.mrf.mxu0 }
 0x311   : > { %v1134_v3 = vld [vmem:[%s5553_s5 + $0x1a68] sm:$0xff]  ;;  %3320 = vmatpush.msrb.mxu0 %v1070_v60 }
 0x312   : > { %v1198_v5 = vld [vmem:[%s5553_s5 + $0x1c68] sm:$0xff]  ;;  %3340 = vmatpush.msrb.mxu1 %v1134_v3 }
 0x313   : > { %v1266_v6 = vld [vmem:[%s5553_s5 + $0x1e88] sm:$0xff]  ;;  %3360 = vmatpush.msrb.mxu2 %v1198_v5  ;;  %v6478_v5 = vpop.f32.mrf.mxu1 }
 0x314   : > { %v1066_v9 = vld [vmem:[%s5553_s5 + $0x1848] sm:$0xff]  ;;  %3379 = vmatpush.msrb.mxu3 %v1266_v6 }
 0x315   : > { %v1130_v10 = vld [vmem:[%s5553_s5 + $0x1a48] sm:$0xff]  ;;  %3321 = vmatpush.msrb.mxu0 %v1066_v9 }
 0x316   : > { %v1194_v11 = vld [vmem:[%s5553_s5 + $0x1c48] sm:$0xff]  ;;  %3341 = vmatpush.msrb.mxu1 %v1130_v10  ;;  %v6482_v10 = vpop.f32.mrf.mxu3 }
 0x317   : > { %v1262_v12 = vld [vmem:[%s5553_s5 + $0x1e68] sm:$0xff]  ;;  %3361 = vmatpush.msrb.mxu2 %v1194_v11 }
 0x318   : > { %v1062_v13 = vld [vmem:[%s5553_s5 + $0x1828] sm:$0xff]  ;;  %3380 = vmatpush.msrb.mxu3 %v1262_v12 }
 0x319   : > { %v1126_v14 = vld [vmem:[%s5553_s5 + $0x1a28] sm:$0xff]  ;;  %3322 = vmatpush.msrb.mxu0 %v1062_v13 }
 0x31a   : > { %v1190_v15 = vld [vmem:[%s5553_s5 + $0x1c28] sm:$0xff]  ;;  %3342 = vmatpush.msrb.mxu1 %v1126_v14 }
 0x31b   : > { %v1258_v16 = vld [vmem:[%s5553_s5 + $0x1e48] sm:$0xff]  ;;  %3362 = vmatpush.msrb.mxu2 %v1190_v15 }
 0x31c   : > { %v1058_v17 = vld [vmem:[%s5553_s5 + $0x1808] sm:$0xff]  ;;  %3381 = vmatpush.msrb.mxu3 %v1258_v16 }
 0x31d   : > { %v1122_v18 = vld [vmem:[%s5553_s5 + $0x1a08] sm:$0xff]  ;;  %3323 = vmatpush.msrb.mxu0 %v1058_v17 }
 0x31e   : > { %v1186_v22 = vld [vmem:[%s5553_s5 + $0x1c08] sm:$0xff]  ;;  %3343 = vmatpush.msrb.mxu1 %v1122_v18  ;;  %3324 = vmatmul.f32.vlgmr.msrb.gmra.mxu0 %v5871_v36 }
 0x31f   : > { %v1254_v23 = vld [vmem:[%s5553_s5 + $0x1e28] sm:$0xff]  ;;  %3363 = vmatpush.msrb.mxu2 %v1186_v22  ;;  %3344 = vmatmul.f32.vlgmr.msrb.gmra.mxu1 %v5881_v42 }
 0x320   : > { %v1374_v24 = vld [vmem:[%s5553_s5 + $0x21e8] sm:$0xff]  ;;  %3382 = vmatpush.msrb.mxu3 %v1254_v23  ;;  %3364 = vmatmul.f32.vlgmr.msrb.gmra.mxu2 %v5873_v37 }
 0x321   : > { %v1438_v27 = vld [vmem:[%s5553_s5 + $0x23e8] sm:$0xff]  ;;  %3388 = vmatpush.msra.mxu0 %v1374_v24  ;;  %v6494_v24 = vpop.f32.mrf.mxu2 }
 0x322   : > { %v1502_v32 = vld [vmem:[%s5553_s5 + $0x25e8] sm:$0xff]  ;;  %3408 = vmatpush.msra.mxu1 %v1438_v27 }
 0x323   : > { %v1250_v33 = vld [vmem:[%s5553_s5 + $0x1e08] sm:$0xff]  ;;  %3428 = vmatpush.msra.mxu2 %v1502_v32 }
 0x324   : > { %v1370_v35 = vld [vmem:[%s5553_s5 + $0x21c8] sm:$0xff]  ;;  %3383 = vmatpush.msrb.mxu3 %v1250_v33  ;;  %v6498_v33 = vpop.f32.mrf.mxu0 }
 0x325   : > { %v1434_v40 = vld [vmem:[%s5553_s5 + $0x23c8] sm:$0xff]  ;;  %3384 = vmatmul.f32.vlgmr.msrb.gmra.mxu3 %v5883_v43  ;;  %3389 = vmatpush.msra.mxu0 %v1370_v35 }
 0x326   : > { %v1498_v41 = vld [vmem:[%s5553_s5 + $0x25c8] sm:$0xff]  ;;  %3409 = vmatpush.msra.mxu1 %v1434_v40 }
 0x327   : > { %v1566_v44 = vld [vmem:[%s5553_s5 + $0x27e8] sm:$0xff]  ;;  %3429 = vmatpush.msra.mxu2 %v1498_v41  ;;  %v6502_v41 = vpop.f32.mrf.mxu1 }
 0x328   : > { %v1366_v45 = vld [vmem:[%s5553_s5 + $0x21a8] sm:$0xff]  ;;  %3448 = vmatpush.msra.mxu3 %v1566_v44 }
 0x329   : > { %v1430_v46 = vld [vmem:[%s5553_s5 + $0x23a8] sm:$0xff]  ;;  %3390 = vmatpush.msra.mxu0 %v1366_v45 }
 0x32a   : > { %v1494_v51 = vld [vmem:[%s5553_s5 + $0x25a8] sm:$0xff]  ;;  %3410 = vmatpush.msra.mxu1 %v1430_v46  ;;  %v6506_v46 = vpop.f32.mrf.mxu3 }
 0x32b   : > { %v1562_v52 = vld [vmem:[%s5553_s5 + $0x27c8] sm:$0xff]  ;;  %3430 = vmatpush.msra.mxu2 %v1494_v51 }
 0x32c   : > { %v1362_v53 = vld [vmem:[%s5553_s5 + $0x2188] sm:$0xff]  ;;  %3449 = vmatpush.msra.mxu3 %v1562_v52 }
 0x32d   : > { %v1426_v54 = vld [vmem:[%s5553_s5 + $0x2388] sm:$0xff]  ;;  %3391 = vmatpush.msra.mxu0 %v1362_v53 }
 0x32e   : > { %v1490_v56 = vld [vmem:[%s5553_s5 + $0x2588] sm:$0xff]  ;;  %3411 = vmatpush.msra.mxu1 %v1426_v54 }
 0x32f   : > { %v1558_v57 = vld [vmem:[%s5553_s5 + $0x27a8] sm:$0xff]  ;;  %3431 = vmatpush.msra.mxu2 %v1490_v56 }
 0x330   : > { %v1358_v60 = vld [vmem:[%s5553_s5 + $0x2168] sm:$0xff]  ;;  %3450 = vmatpush.msra.mxu3 %v1558_v57 }
 0x331   : > { %v1422_v3 = vld [vmem:[%s5553_s5 + $0x2368] sm:$0xff]  ;;  %3392 = vmatpush.msra.mxu0 %v1358_v60 }
 0x332   : > { %v1486_v6 = vld [vmem:[%s5553_s5 + $0x2568] sm:$0xff]  ;;  %3412 = vmatpush.msra.mxu1 %v1422_v3 }
 0x333   : > { %v1554_v9 = vld [vmem:[%s5553_s5 + $0x2788] sm:$0xff]  ;;  %3432 = vmatpush.msra.mxu2 %v1486_v6 }
 0x334   : > { %v1354_v11 = vld [vmem:[%s5553_s5 + $0x2148] sm:$0xff]  ;;  %3451 = vmatpush.msra.mxu3 %v1554_v9 }
 0x335   : > { %v1418_v12 = vld [vmem:[%s5553_s5 + $0x2348] sm:$0xff]  ;;  %3393 = vmatpush.msra.mxu0 %v1354_v11  ;;  %v6518_v11 = vpop.f32.mrf.mxu2 }
 0x336   : > { %v1482_v13 = vld [vmem:[%s5553_s5 + $0x2548] sm:$0xff]  ;;  %3413 = vmatpush.msra.mxu1 %v1418_v12 }
 0x337   : > { %v1550_v14 = vld [vmem:[%s5553_s5 + $0x2768] sm:$0xff]  ;;  %3433 = vmatpush.msra.mxu2 %v1482_v13 }
 0x338   : > { %v1350_v15 = vld [vmem:[%s5553_s5 + $0x2128] sm:$0xff]  ;;  %3452 = vmatpush.msra.mxu3 %v1550_v14  ;;  %v6522_v14 = vpop.f32.mrf.mxu0 }
 0x339   : > { %v1414_v16 = vld [vmem:[%s5553_s5 + $0x2328] sm:$0xff]  ;;  %3394 = vmatpush.msra.mxu0 %v1350_v15 }
 0x33a   : > { %v1478_v17 = vld [vmem:[%s5553_s5 + $0x2528] sm:$0xff]  ;;  %3414 = vmatpush.msra.mxu1 %v1414_v16 }
 0x33b   : > { %v1546_v18 = vld [vmem:[%s5553_s5 + $0x2748] sm:$0xff]  ;;  %3434 = vmatpush.msra.mxu2 %v1478_v17  ;;  %v6526_v17 = vpop.f32.mrf.mxu1 }
 0x33c   : > { %v1346_v22 = vld [vmem:[%s5553_s5 + $0x2108] sm:$0xff]  ;;  %3453 = vmatpush.msra.mxu3 %v1546_v18 }
 0x33d   : > { %v1410_v23 = vld [vmem:[%s5553_s5 + $0x2308] sm:$0xff]  ;;  %3395 = vmatpush.msra.mxu0 %v1346_v22 }
 0x33e   : > { %v1474_v27 = vld [vmem:[%s5553_s5 + $0x2508] sm:$0xff]  ;;  %3415 = vmatpush.msra.mxu1 %v1410_v23  ;;  %v6530_v23 = vpop.f32.mrf.mxu3 }
 0x33f   : > { %v1542_v32 = vld [vmem:[%s5553_s5 + $0x2728] sm:$0xff]  ;;  %3435 = vmatpush.msra.mxu2 %v1474_v27 }
 0x340   : > { %v1342_v35 = vld [vmem:[%s5553_s5 + $0x20e8] sm:$0xff]  ;;  %3454 = vmatpush.msra.mxu3 %v1542_v32 }
 0x341   : > { %v1406_v40 = vld [vmem:[%s5553_s5 + $0x22e8] sm:$0xff]  ;;  %3396 = vmatpush.msra.mxu0 %v1342_v35 }
 0x342   : > { %v1470_v44 = vld [vmem:[%s5553_s5 + $0x24e8] sm:$0xff]  ;;  %3416 = vmatpush.msra.mxu1 %v1406_v40 }
 0x343   : > { %v1538_v45 = vld [vmem:[%s5553_s5 + $0x2708] sm:$0xff]  ;;  %3436 = vmatpush.msra.mxu2 %v1470_v44 }
 0x344   : > { %v1338_v51 = vld [vmem:[%s5553_s5 + $0x20c8] sm:$0xff]  ;;  %3455 = vmatpush.msra.mxu3 %v1538_v45 }
 0x345   : > { %v1402_v52 = vld [vmem:[%s5553_s5 + $0x22c8] sm:$0xff]  ;;  %3397 = vmatpush.msra.mxu0 %v1338_v51 }
 0x346   : > { %v1466_v53 = vld [vmem:[%s5553_s5 + $0x24c8] sm:$0xff]  ;;  %3417 = vmatpush.msra.mxu1 %v1402_v52 }
 0x347   : > { %v1534_v54 = vld [vmem:[%s5553_s5 + $0x26e8] sm:$0xff]  ;;  %3437 = vmatpush.msra.mxu2 %v1466_v53 }
 0x348   : > { %v1334_v56 = vld [vmem:[%s5553_s5 + $0x20a8] sm:$0xff]  ;;  %3456 = vmatpush.msra.mxu3 %v1534_v54 }
 0x349   : > { %v1398_v57 = vld [vmem:[%s5553_s5 + $0x22a8] sm:$0xff]  ;;  %3398 = vmatpush.msra.mxu0 %v1334_v56  ;;  %v6542_v56 = vpop.f32.mrf.mxu2 }
 0x34a   : > { %v1462_v60 = vld [vmem:[%s5553_s5 + $0x24a8] sm:$0xff]  ;;  %3418 = vmatpush.msra.mxu1 %v1398_v57 }
 0x34b   : > { %v1530_v3 = vld [vmem:[%s5553_s5 + $0x26c8] sm:$0xff]  ;;  %3438 = vmatpush.msra.mxu2 %v1462_v60 }
 0x34c   : > { %v1330_v6 = vld [vmem:[%s5553_s5 + $0x2088] sm:$0xff]  ;;  %3457 = vmatpush.msra.mxu3 %v1530_v3  ;;  %v6546_v3 = vpop.f32.mrf.mxu0 }
 0x34d   : > { %v1394_v9 = vld [vmem:[%s5553_s5 + $0x2288] sm:$0xff]  ;;  %3399 = vmatpush.msra.mxu0 %v1330_v6  ;;  %v6548_v6 = vpop.f32.mrf.mxu1 }
 0x34e   : > { %v1458_v12 = vld [vmem:[%s5553_s5 + $0x2488] sm:$0xff]  ;;  %3419 = vmatpush.msra.mxu1 %v1394_v9 }
 0x34f   : > { %v1526_v13 = vld [vmem:[%s5553_s5 + $0x26a8] sm:$0xff]  ;;  %3439 = vmatpush.msra.mxu2 %v1458_v12 }
 0x350   : > { %v1326_v15 = vld [vmem:[%s5553_s5 + $0x2068] sm:$0xff]  ;;  %3458 = vmatpush.msra.mxu3 %v1526_v13  ;;  %v6552_v13 = vpop.f32.mrf.mxu3 }
 0x351   : > { %v1390_v16 = vld [vmem:[%s5553_s5 + $0x2268] sm:$0xff]  ;;  %3400 = vmatpush.msra.mxu0 %v1326_v15 }
 0x352   : > { %v1454_v18 = vld [vmem:[%s5553_s5 + $0x2468] sm:$0xff]  ;;  %3420 = vmatpush.msra.mxu1 %v1390_v16 }
 0x353   : > { %v1522_v22 = vld [vmem:[%s5553_s5 + $0x2688] sm:$0xff]  ;;  %3440 = vmatpush.msra.mxu2 %v1454_v18 }
 0x354   : > { %v1322_v27 = vld [vmem:[%s5553_s5 + $0x2048] sm:$0xff]  ;;  %3459 = vmatpush.msra.mxu3 %v1522_v22 }
 0x355   : > { %v1386_v32 = vld [vmem:[%s5553_s5 + $0x2248] sm:$0xff]  ;;  %3401 = vmatpush.msra.mxu0 %v1322_v27 }
 0x356   : > { %v1450_v35 = vld [vmem:[%s5553_s5 + $0x2448] sm:$0xff]  ;;  %3421 = vmatpush.msra.mxu1 %v1386_v32 }
 0x357   : > { %v1518_v40 = vld [vmem:[%s5553_s5 + $0x2668] sm:$0xff]  ;;  %3441 = vmatpush.msra.mxu2 %v1450_v35 }
 0x358   : > { %v1318_v44 = vld [vmem:[%s5553_s5 + $0x2028] sm:$0xff]  ;;  %3460 = vmatpush.msra.mxu3 %v1518_v40 }
 0x359   : > { %v1382_v45 = vld [vmem:[%s5553_s5 + $0x2228] sm:$0xff]  ;;  %3402 = vmatpush.msra.mxu0 %v1318_v44  ;;  %v6566_v44 = vpop.f32.mrf.mxu2 }
 0x35a   : > { %v1446_v51 = vld [vmem:[%s5553_s5 + $0x2428] sm:$0xff]  ;;  %3422 = vmatpush.msra.mxu1 %v1382_v45 }
 0x35b   : > { %v1514_v52 = vld [vmem:[%s5553_s5 + $0x2648] sm:$0xff]  ;;  %3442 = vmatpush.msra.mxu2 %v1446_v51 }
 0x35c   : > { %v1314_v53 = vld [vmem:[%s5553_s5 + $0x2008] sm:$0xff]  ;;  %3461 = vmatpush.msra.mxu3 %v1514_v52  ;;  %v6570_v52 = vpop.f32.mrf.mxu0 }
 0x35d   : > { %v1378_v54 = vld [vmem:[%s5553_s5 + $0x2208] sm:$0xff]  ;;  %3403 = vmatpush.msra.mxu0 %v1314_v53  ;;  %8015 = vst [vmem:[#allocation8_spill] sm:$0xff] %v6570_v52 }
 0x35e   : > { %v1442_v57 = vld [vmem:[%s5553_s5 + $0x2408] sm:$0xff]  ;;  %3423 = vmatpush.msra.mxu1 %v1378_v54  ;;  %3404 = vmatmul.f32.vlgmr.msra.gmra.mxu0 %v5950_v61 }
 0x35f   : > { %v1510_v60 = vld [vmem:[%s5553_s5 + $0x2628] sm:$0xff]  ;;  %3443 = vmatpush.msra.mxu2 %v1442_v57  ;;  %3424 = vmatmul.f32.vlgmr.msra.gmra.mxu1 %v5960_v7  ;;  %v6574_v57 = vpop.f32.mrf.mxu1 }
 0x360   : > { %v1630_v9 = vld [vmem:[%s5553_s5 + $0x29e8] sm:$0xff]  ;;  %3462 = vmatpush.msra.mxu3 %v1510_v60  ;;  %3444 = vmatmul.f32.vlgmr.msra.gmra.mxu2 %v5952_v62  ;;  %8016 = vst [vmem:[#allocation9_spill] sm:$0xff] %v6574_v57 }
 0x361   : > { %v1694_v12 = vld [vmem:[%s5553_s5 + $0x2be8] sm:$0xff]  ;;  %3468 = vmatpush.msrb.mxu0 %v1630_v9 }
 0x362   : > { %v1758_v15 = vld [vmem:[%s5553_s5 + $0x2de8] sm:$0xff]  ;;  %3488 = vmatpush.msrb.mxu1 %v1694_v12  ;;  %v6578_v12 = vpop.f32.mrf.mxu3 }
 0x363   : > { %v1506_v16 = vld [vmem:[%s5553_s5 + $0x2608] sm:$0xff]  ;;  %3508 = vmatpush.msrb.mxu2 %v1758_v15  ;;  %8017 = vst [vmem:[#allocation10_spill] sm:$0xff] %v6578_v12 }
 0x364   : > { %v1626_v18 = vld [vmem:[%s5553_s5 + $0x29c8] sm:$0xff]  ;;  %3463 = vmatpush.msra.mxu3 %v1506_v16 }
 0x365   : > { %v1690_v22 = vld [vmem:[%s5553_s5 + $0x2bc8] sm:$0xff]  ;;  %3464 = vmatmul.f32.vlgmr.msra.gmra.mxu3 %v5962_v8  ;;  %3469 = vmatpush.msrb.mxu0 %v1626_v18 }
 0x366   : > { %v1754_v27 = vld [vmem:[%s5553_s5 + $0x2dc8] sm:$0xff]  ;;  %3489 = vmatpush.msrb.mxu1 %v1690_v22 }
 0x367   : > { %v1822_v32 = vld [vmem:[%s5553_s5 + $0x2fe8] sm:$0xff]  ;;  %3509 = vmatpush.msrb.mxu2 %v1754_v27 }
 0x368   : > { %v1622_v35 = vld [vmem:[%s5553_s5 + $0x29a8] sm:$0xff]  ;;  %3528 = vmatpush.msrb.mxu3 %v1822_v32 }
 0x369   : > { %v1686_v40 = vld [vmem:[%s5553_s5 + $0x2ba8] sm:$0xff]  ;;  %3470 = vmatpush.msrb.mxu0 %v1622_v35 }
 0x36a   : > { %v1750_v45 = vld [vmem:[%s5553_s5 + $0x2da8] sm:$0xff]  ;;  %3490 = vmatpush.msrb.mxu1 %v1686_v40 }
 0x36b   : > { %v1818_v51 = vld [vmem:[%s5553_s5 + $0x2fc8] sm:$0xff]  ;;  %3510 = vmatpush.msrb.mxu2 %v1750_v45 }
 0x36c   : > { %v1618_v53 = vld [vmem:[%s5553_s5 + $0x2988] sm:$0xff]  ;;  %3529 = vmatpush.msrb.mxu3 %v1818_v51 }
 0x36d   : > { %v1682_v54 = vld [vmem:[%s5553_s5 + $0x2b88] sm:$0xff]  ;;  %3471 = vmatpush.msrb.mxu0 %v1618_v53  ;;  %v6590_v53 = vpop.f32.mrf.mxu2 }
 0x36e   : > { %v1746_v60 = vld [vmem:[%s5553_s5 + $0x2d88] sm:$0xff]  ;;  %3491 = vmatpush.msrb.mxu1 %v1682_v54  ;;  %8018 = vst [vmem:[#allocation11_spill] sm:$0xff] %v6590_v53 }
 0x36f   : > { %v1814_v9 = vld [vmem:[%s5553_s5 + $0x2fa8] sm:$0xff]  ;;  %3511 = vmatpush.msrb.mxu2 %v1746_v60 }
 0x370   : > { %v1614_v15 = vld [vmem:[%s5553_s5 + $0x2968] sm:$0xff]  ;;  %3530 = vmatpush.msrb.mxu3 %v1814_v9  ;;  %v6594_v9 = vpop.f32.mrf.mxu0 }
 0x371   : > { %v1678_v16 = vld [vmem:[%s5553_s5 + $0x2b68] sm:$0xff]  ;;  %3472 = vmatpush.msrb.mxu0 %v1614_v15  ;;  %8019 = vst [vmem:[#allocation12_spill] sm:$0xff] %v6594_v9 }
 0x372   : > { %v1742_v18 = vld [vmem:[%s5553_s5 + $0x2d68] sm:$0xff]  ;;  %3492 = vmatpush.msrb.mxu1 %v1678_v16 }
 0x373   : > { %v1810_v22 = vld [vmem:[%s5553_s5 + $0x2f88] sm:$0xff]  ;;  %3512 = vmatpush.msrb.mxu2 %v1742_v18  ;;  %v6598_v18 = vpop.f32.mrf.mxu1 }
 0x374   : > { %v1610_v27 = vld [vmem:[%s5553_s5 + $0x2948] sm:$0xff]  ;;  %3531 = vmatpush.msrb.mxu3 %v1810_v22  ;;  %8020 = vst [vmem:[#allocation13_spill] sm:$0xff] %v6598_v18 }
 0x375   : > { %v1674_v32 = vld [vmem:[%s5553_s5 + $0x2b48] sm:$0xff]  ;;  %3473 = vmatpush.msrb.mxu0 %v1610_v27  ;;  %v6615_v57 = vpop.f32.mrf.mxu2 }
 0x376   : > { %v1738_v35 = vld [vmem:[%s5553_s5 + $0x2d48] sm:$0xff]  ;;  %3493 = vmatpush.msrb.mxu1 %v1674_v32  ;;  %v6602_v32 = vpop.f32.mrf.mxu3  ;;  %8022 = vst [vmem:[#allocation15_spill] sm:$0xff] %v6615_v57 }
 0x377   : > { %v1806_v40 = vld [vmem:[%s5553_s5 + $0x2f68] sm:$0xff]  ;;  %3513 = vmatpush.msrb.mxu2 %v1738_v35  ;;  %8021 = vst [vmem:[#allocation14_spill] sm:$0xff] %v6602_v32 }
 0x378   : > { %v1606_v45 = vld [vmem:[%s5553_s5 + $0x2928] sm:$0xff]  ;;  %3532 = vmatpush.msrb.mxu3 %v1806_v40 }
 0x379   : > { %v1670_v51 = vld [vmem:[%s5553_s5 + $0x2b28] sm:$0xff]  ;;  %3474 = vmatpush.msrb.mxu0 %v1606_v45  ;;  %v2337_v45 = vld [vmem:[%s5559_s9] sm:$0xf] }
 0x37a   : > { %v1734_v54 = vld [vmem:[%s5553_s5 + $0x2d28] sm:$0xff]  ;;  %3494 = vmatpush.msrb.mxu1 %v1670_v51  ;;  %v2340_v32 = vperm.slane %v2337_v45, 1 }
 0x37b   : > { %v1802_v60 = vld [vmem:[%s5553_s5 + $0x2f48] sm:$0xff]  ;;  %3514 = vmatpush.msrb.mxu2 %v1734_v54 }
 0x37c   : > { %v1602_v15 = vld [vmem:[%s5553_s5 + $0x2908] sm:$0xff]  ;;  %3533 = vmatpush.msrb.mxu3 %v1802_v60 }
 0x37d   : > { %v1666_v16 = vld [vmem:[%s5553_s5 + $0x2b08] sm:$0xff]  ;;  %3475 = vmatpush.msrb.mxu0 %v1602_v15 }
 0x37e   : > { %v1730_v22 = vld [vmem:[%s5553_s5 + $0x2d08] sm:$0xff]  ;;  %3495 = vmatpush.msrb.mxu1 %v1666_v16 }
 0x37f   : > { %v1798_v27 = vld [vmem:[%s5553_s5 + $0x2f28] sm:$0xff]  ;;  %3515 = vmatpush.msrb.mxu2 %v1730_v22 }
 0x380   : > { %v1598_v35 = vld [vmem:[%s5553_s5 + $0x28e8] sm:$0xff]  ;;  %3534 = vmatpush.msrb.mxu3 %v1798_v27 }
 0x381   : > { %v1662_v40 = vld [vmem:[%s5553_s5 + $0x2ae8] sm:$0xff]  ;;  %3476 = vmatpush.msrb.mxu0 %v1598_v35 }
 0x382   : > { %v1726_v9 = vld [vmem:[%s5553_s5 + $0x2ce8] sm:$0xff]  ;;  %3496 = vmatpush.msrb.mxu1 %v1662_v40 }
 0x383   : > { %v1794_v18 = vld [vmem:[%s5553_s5 + $0x2f08] sm:$0xff]  ;;  %3516 = vmatpush.msrb.mxu2 %v1726_v9  ;;  %v3085_v9 = vpop.f32.mrf.mxu0 }
 0x384   : > { %v1594_v51 = vld [vmem:[%s5553_s5 + $0x28c8] sm:$0xff]  ;;  %3535 = vmatpush.msrb.mxu3 %v1794_v18  ;;  %v3086_v57 = vadd.f32 %v3085_v9, %v2340_v32 }
 0x385   : > { %v1658_v53 = vld [vmem:[%s5553_s5 + $0x2ac8] sm:$0xff]  ;;  %3477 = vmatpush.msrb.mxu0 %v1594_v51  ;;  %v3105_v51 = vpop.f32.mrf.mxu1 }
 0x386   : > { %v1722_v54 = vld [vmem:[%s5553_s5 + $0x2cc8] sm:$0xff]  ;;  %3497 = vmatpush.msrb.mxu1 %v1658_v53  ;;  %v6623_v53 = vpop.f32.mrf.mxu3  ;;  %v3106_v52 = vadd.f32 %v3105_v51, %v3086_v57 }
 0x387   : > { %v1790_v60 = vld [vmem:[%s5553_s5 + $0x2ee8] sm:$0xff]  ;;  %3517 = vmatpush.msrb.mxu2 %v1722_v54  ;;  %8023 = vst [vmem:[#allocation16_spill] sm:$0xff] %v6623_v53 }
 0x388   : > { %v1590_v15 = vld [vmem:[%s5553_s5 + $0x28a8] sm:$0xff]  ;;  %3536 = vmatpush.msrb.mxu3 %v1790_v60 }
 0x389   : > { %v1654_v16 = vld [vmem:[%s5553_s5 + $0x2aa8] sm:$0xff]  ;;  %3478 = vmatpush.msrb.mxu0 %v1590_v15 }
 0x38a   : > { %v1718_v22 = vld [vmem:[%s5553_s5 + $0x2ca8] sm:$0xff]  ;;  %3498 = vmatpush.msrb.mxu1 %v1654_v16 }
 0x38b   : > { %v1786_v27 = vld [vmem:[%s5553_s5 + $0x2ec8] sm:$0xff]  ;;  %3518 = vmatpush.msrb.mxu2 %v1718_v22 }
 0x38c   : > { %v1586_v35 = vld [vmem:[%s5553_s5 + $0x2888] sm:$0xff]  ;;  %3537 = vmatpush.msrb.mxu3 %v1786_v27 }
 0x38d   : > { %v1650_v40 = vld [vmem:[%s5553_s5 + $0x2a88] sm:$0xff]  ;;  %3479 = vmatpush.msrb.mxu0 %v1586_v35 }
 0x38e   : > { %v1714_v18 = vld [vmem:[%s5553_s5 + $0x2c88] sm:$0xff]  ;;  %3499 = vmatpush.msrb.mxu1 %v1650_v40 }
 0x38f   : > { %v1782_v45 = vld [vmem:[%s5553_s5 + $0x2ea8] sm:$0xff]  ;;  %3519 = vmatpush.msrb.mxu2 %v1714_v18 }
 0x390   : > { %v1582_v54 = vld [vmem:[%s5553_s5 + $0x2868] sm:$0xff]  ;;  %3538 = vmatpush.msrb.mxu3 %v1782_v45  ;;  %v3125_v45 = vpop.f32.mrf.mxu2 }
 0x391   : > { %v1646_v60 = vld [vmem:[%s5553_s5 + $0x2a68] sm:$0xff]  ;;  %3480 = vmatpush.msrb.mxu0 %v1582_v54  ;;  %v3126_v54 = vadd.f32 %v3125_v45, %v3106_v52 }
 0x392   : > { %v1710_v15 = vld [vmem:[%s5553_s5 + $0x2c68] sm:$0xff]  ;;  %3500 = vmatpush.msrb.mxu1 %v1646_v60 }
 0x393   : > { %v1778_v16 = vld [vmem:[%s5553_s5 + $0x2e88] sm:$0xff]  ;;  %3520 = vmatpush.msrb.mxu2 %v1710_v15 }
 0x394   : > { %v1578_v32 = vld [vmem:[%s5553_s5 + $0x2848] sm:$0xff]  ;;  %3539 = vmatpush.msrb.mxu3 %v1778_v16  ;;  %v3145_v16 = vpop.f32.mrf.mxu3 }
 0x395   : > { %v1642_v9 = vld [vmem:[%s5553_s5 + $0x2a48] sm:$0xff]  ;;  %3481 = vmatpush.msrb.mxu0 %v1578_v32 }
 0x396   : > { %v1706_v22 = vld [vmem:[%s5553_s5 + $0x2c48] sm:$0xff]  ;;  %3501 = vmatpush.msrb.mxu1 %v1642_v9 }
 0x397   : > { %v1774_v27 = vld [vmem:[%s5553_s5 + $0x2e68] sm:$0xff]  ;;  %3521 = vmatpush.msrb.mxu2 %v1706_v22  ;;  %v3146_v22 = vadd.f32 %v3145_v16, %v3126_v54 }
 0x398   : > { %v1574_v35 = vld [vmem:[%s5553_s5 + $0x2828] sm:$0xff]  ;;  %3540 = vmatpush.msrb.mxu3 %v1774_v27  ;;  %v3205_v16 = vpop.f32.mrf.mxu2 }
 0x399   : > { %v1638_v40 = vld [vmem:[%s5553_s5 + $0x2a28] sm:$0xff]  ;;  %3482 = vmatpush.msrb.mxu0 %v1574_v35  ;;  %v3165_v35 = vpop.f32.mrf.mxu0 }
 0x39a   : > { %v1702_v18 = vld [vmem:[%s5553_s5 + $0x2c28] sm:$0xff]  ;;  %3502 = vmatpush.msrb.mxu1 %v1638_v40 }
 0x39b   : > { %v1770_v53 = vld [vmem:[%s5553_s5 + $0x2e48] sm:$0xff]  ;;  %3522 = vmatpush.msrb.mxu2 %v1702_v18 }
 0x39c   : > { %v1570_v57 = vld [vmem:[%s5553_s5 + $0x2808] sm:$0xff]  ;;  %3541 = vmatpush.msrb.mxu3 %v1770_v53  ;;  %v3166_v53 = vadd.f32 %v3165_v35, %v3146_v22 }
 0x39d   : > { %v1634_v51 = vld [vmem:[%s5553_s5 + $0x2a08] sm:$0xff]  ;;  %3483 = vmatpush.msrb.mxu0 %v1570_v57 }
 0x39e   : > { %v1698_v60 = vld [vmem:[%s5553_s5 + $0x2c08] sm:$0xff]  ;;  %3503 = vmatpush.msrb.mxu1 %v1634_v51  ;;  %3484 = vmatmul.f32.vlgmr.msrb.gmra.mxu0 %v6029_v30  ;;  %v3185_v51 = vpop.f32.mrf.mxu1 }
 0x39f   : > { %v1766_v15 = vld [vmem:[%s5553_s5 + $0x2e28] sm:$0xff]  ;;  %3523 = vmatpush.msrb.mxu2 %v1698_v60  ;;  %3504 = vmatmul.f32.vlgmr.msrb.gmra.mxu1 %v6039_v38 }
 0x3a0   : > { %v1886_v32 = vld [vmem:[%s5553_s5 + $0x31e8] sm:$0xff]  ;;  %3542 = vmatpush.msrb.mxu3 %v1766_v15  ;;  %3524 = vmatmul.f32.vlgmr.msrb.gmra.mxu2 %v6031_v31  ;;  %v3186_v15 = vadd.f32 %v3185_v51, %v3166_v53  ;;  %v3225_v51 = vpop.f32.mrf.mxu3 }
 0x3a1   : > { %v1950_v9 = vld [vmem:[%s5553_s5 + $0x33e8] sm:$0xff]  ;;  %3548 = vmatpush.msra.mxu0 %v1886_v32 }
 0x3a2   : > { %v2014_v52 = vld [vmem:[%s5553_s5 + $0x35e8] sm:$0xff]  ;;  %3568 = vmatpush.msra.mxu1 %v1950_v9 }
 0x3a3   : > { %v1762_v27 = vld [vmem:[%s5553_s5 + $0x2e08] sm:$0xff]  ;;  %3588 = vmatpush.msra.mxu2 %v2014_v52 }
 0x3a4   : > { %v1882_v40 = vld [vmem:[%s5553_s5 + $0x31c8] sm:$0xff]  ;;  %3543 = vmatpush.msrb.mxu3 %v1762_v27  ;;  %v3206_v27 = vadd.f32 %v3205_v16, %v3186_v15 }
 0x3a5   : > { %v1946_v18 = vld [vmem:[%s5553_s5 + $0x33c8] sm:$0xff]  ;;  %3544 = vmatmul.f32.vlgmr.msrb.gmra.mxu3 %v6041_v39  ;;  %3549 = vmatpush.msra.mxu0 %v1882_v40 }
 0x3a6   : > { %v2010_v45 = vld [vmem:[%s5553_s5 + $0x35c8] sm:$0xff]  ;;  %3569 = vmatpush.msra.mxu1 %v1946_v18 }
 0x3a7   : > { %v2078_v57 = vld [vmem:[%s5553_s5 + $0x37e8] sm:$0xff]  ;;  %3589 = vmatpush.msra.mxu2 %v2010_v45  ;;  %v6663_v45 = vadd.f32 %v3225_v51, %v3206_v27 }
 0x3a8   : > { %v1878_v54 = vld [vmem:[%s5553_s5 + $0x31a8] sm:$0xff]  ;;  %3608 = vmatpush.msra.mxu3 %v2078_v57 }
 0x3a9   : > { %v1942_v60 = vld [vmem:[%s5553_s5 + $0x33a8] sm:$0xff]  ;;  %3550 = vmatpush.msra.mxu0 %v1878_v54 }
 0x3aa   : > { %v2006_v32 = vld [vmem:[%s5553_s5 + $0x35a8] sm:$0xff]  ;;  %3570 = vmatpush.msra.mxu1 %v1942_v60 }
 0x3ab   : > { %v2074_v9 = vld [vmem:[%s5553_s5 + $0x37c8] sm:$0xff]  ;;  %3590 = vmatpush.msra.mxu2 %v2006_v32 }
 0x3ac   : > { %v1874_v22 = vld [vmem:[%s5553_s5 + $0x3188] sm:$0xff]  ;;  %3609 = vmatpush.msra.mxu3 %v2074_v9 }
 0x3ad   : > { %v1938_v52 = vld [vmem:[%s5553_s5 + $0x3388] sm:$0xff]  ;;  %3551 = vmatpush.msra.mxu0 %v1874_v22 }
 0x3ae   : > { %v2002_v35 = vld [vmem:[%s5553_s5 + $0x3588] sm:$0xff]  ;;  %3571 = vmatpush.msra.mxu1 %v1938_v52 }
 0x3af   : > { %v2070_v53 = vld [vmem:[%s5553_s5 + $0x37a8] sm:$0xff]  ;;  %3591 = vmatpush.msra.mxu2 %v2002_v35 }
 0x3b0   : > { %v1870_v40 = vld [vmem:[%s5553_s5 + $0x3168] sm:$0xff]  ;;  %3610 = vmatpush.msra.mxu3 %v2070_v53 }
 0x3b1   : > { %v1934_v18 = vld [vmem:[%s5553_s5 + $0x3368] sm:$0xff]  ;;  %3552 = vmatpush.msra.mxu0 %v1870_v40 }
 0x3b2   : > { %v1998_v57 = vld [vmem:[%s5553_s5 + $0x3568] sm:$0xff]  ;;  %3572 = vmatpush.msra.mxu1 %v1934_v18 }
 0x3b3   : > { %v2066_v54 = vld [vmem:[%s5553_s5 + $0x3788] sm:$0xff]  ;;  %3592 = vmatpush.msra.mxu2 %v1998_v57 }
 0x3b4   : > { %v1866_v60 = vld [vmem:[%s5553_s5 + $0x3148] sm:$0xff]  ;;  %3611 = vmatpush.msra.mxu3 %v2066_v54 }
 0x3b5   : > { %v1930_v15 = vld [vmem:[%s5553_s5 + $0x3348] sm:$0xff]  ;;  %3553 = vmatpush.msra.mxu0 %v1866_v60 }
 0x3b6   : > { %v1994_v16 = vld [vmem:[%s5553_s5 + $0x3548] sm:$0xff]  ;;  %3573 = vmatpush.msra.mxu1 %v1930_v15 }
 0x3b7   : > { %v2062_v32 = vld [vmem:[%s5553_s5 + $0x3768] sm:$0xff]  ;;  %3593 = vmatpush.msra.mxu2 %v1994_v16 }
 0x3b8   : > { %v1862_v9 = vld [vmem:[%s5553_s5 + $0x3128] sm:$0xff]  ;;  %3612 = vmatpush.msra.mxu3 %v2062_v32 }
 0x3b9   : > { %v1926_v22 = vld [vmem:[%s5553_s5 + $0x3328] sm:$0xff]  ;;  %3554 = vmatpush.msra.mxu0 %v1862_v9 }
 0x3ba   : > { %v1990_v52 = vld [vmem:[%s5553_s5 + $0x3528] sm:$0xff]  ;;  %3574 = vmatpush.msra.mxu1 %v1926_v22 }
 0x3bb   : > { %v2058_v27 = vld [vmem:[%s5553_s5 + $0x3748] sm:$0xff]  ;;  %3594 = vmatpush.msra.mxu2 %v1990_v52 }
 0x3bc   : > { %v1858_v35 = vld [vmem:[%s5553_s5 + $0x3108] sm:$0xff]  ;;  %3613 = vmatpush.msra.mxu3 %v2058_v27 }
 0x3bd   : > { %v1922_v53 = vld [vmem:[%s5553_s5 + $0x3308] sm:$0xff]  ;;  %3555 = vmatpush.msra.mxu0 %v1858_v35 }
 0x3be   : > { %v1986_v51 = vld [vmem:[%s5553_s5 + $0x3508] sm:$0xff]  ;;  %3575 = vmatpush.msra.mxu1 %v1922_v53 }
 0x3bf   : > { %v2054_v40 = vld [vmem:[%s5553_s5 + $0x3728] sm:$0xff]  ;;  %3595 = vmatpush.msra.mxu2 %v1986_v51 }
 0x3c0   : > { %v1854_v18 = vld [vmem:[%s5553_s5 + $0x30e8] sm:$0xff]  ;;  %3614 = vmatpush.msra.mxu3 %v2054_v40 }
 0x3c1   : > { %v1918_v57 = vld [vmem:[%s5553_s5 + $0x32e8] sm:$0xff]  ;;  %3556 = vmatpush.msra.mxu0 %v1854_v18 }
 0x3c2   : > { %v1982_v54 = vld [vmem:[%s5553_s5 + $0x34e8] sm:$0xff]  ;;  %3576 = vmatpush.msra.mxu1 %v1918_v57 }
 0x3c3   : > { %v2050_v60 = vld [vmem:[%s5553_s5 + $0x3708] sm:$0xff]  ;;  %3596 = vmatpush.msra.mxu2 %v1982_v54 }
 0x3c4   : > { %v1850_v15 = vld [vmem:[%s5553_s5 + $0x30c8] sm:$0xff]  ;;  %3615 = vmatpush.msra.mxu3 %v2050_v60  ;;  %v3245_v60 = vpop.f32.mrf.mxu0 }
 0x3c5   : > { %v1914_v16 = vld [vmem:[%s5553_s5 + $0x32c8] sm:$0xff]  ;;  %3557 = vmatpush.msra.mxu0 %v1850_v15 }
 0x3c6   : > { %v1978_v32 = vld [vmem:[%s5553_s5 + $0x34c8] sm:$0xff]  ;;  %3577 = vmatpush.msra.mxu1 %v1914_v16 }
 0x3c7   : > { %v2046_v9 = vld [vmem:[%s5553_s5 + $0x36e8] sm:$0xff]  ;;  %3597 = vmatpush.msra.mxu2 %v1978_v32  ;;  %v3246_v32 = vadd.f32 %v3245_v60, %v6663_v45  ;;  %v3285_v60 = vpop.f32.mrf.mxu2 }
 0x3c8   : > { %v1846_v22 = vld [vmem:[%s5553_s5 + $0x30a8] sm:$0xff]  ;;  %3616 = vmatpush.msra.mxu3 %v2046_v9 }
 0x3c9   : > { %v1910_v52 = vld [vmem:[%s5553_s5 + $0x32a8] sm:$0xff]  ;;  %3558 = vmatpush.msra.mxu0 %v1846_v22 }
 0x3ca   : > { %v1974_v27 = vld [vmem:[%s5553_s5 + $0x34a8] sm:$0xff]  ;;  %3578 = vmatpush.msra.mxu1 %v1910_v52 }
 0x3cb   : > { %v2042_v35 = vld [vmem:[%s5553_s5 + $0x36c8] sm:$0xff]  ;;  %3598 = vmatpush.msra.mxu2 %v1974_v27 }
 0x3cc   : > { %v1842_v53 = vld [vmem:[%s5553_s5 + $0x3088] sm:$0xff]  ;;  %3617 = vmatpush.msra.mxu3 %v2042_v35  ;;  %v3265_v35 = vpop.f32.mrf.mxu1 }
 0x3cd   : > { %v1906_v51 = vld [vmem:[%s5553_s5 + $0x3288] sm:$0xff]  ;;  %3559 = vmatpush.msra.mxu0 %v1842_v53  ;;  %v3266_v45 = vadd.f32 %v3265_v35, %v3246_v32 }
 0x3ce   : > { %v1970_v40 = vld [vmem:[%s5553_s5 + $0x3488] sm:$0xff]  ;;  %3579 = vmatpush.msra.mxu1 %v1906_v51 }
 0x3cf   : > { %v2038_v18 = vld [vmem:[%s5553_s5 + $0x36a8] sm:$0xff]  ;;  %3599 = vmatpush.msra.mxu2 %v1970_v40  ;;  %v3286_v12 = vadd.f32 %v3285_v60, %v3266_v45 }
 0x3d0   : > { %v1838_v57 = vld [vmem:[%s5553_s5 + $0x3068] sm:$0xff]  ;;  %3618 = vmatpush.msra.mxu3 %v2038_v18 }
 0x3d1   : > { %v1902_v54 = vld [vmem:[%s5553_s5 + $0x3268] sm:$0xff]  ;;  %3560 = vmatpush.msra.mxu0 %v1838_v57 }
 0x3d2   : > { %v1966_v15 = vld [vmem:[%s5553_s5 + $0x3468] sm:$0xff]  ;;  %3580 = vmatpush.msra.mxu1 %v1902_v54 }
 0x3d3   : > { %v2034_v16 = vld [vmem:[%s5553_s5 + $0x3688] sm:$0xff]  ;;  %3600 = vmatpush.msra.mxu2 %v1966_v15 }
 0x3d4   : > { %v1834_v9 = vld [vmem:[%s5553_s5 + $0x3048] sm:$0xff]  ;;  %3619 = vmatpush.msra.mxu3 %v2034_v16 }
 0x3d5   : > { %v1898_v22 = vld [vmem:[%s5553_s5 + $0x3248] sm:$0xff]  ;;  %3561 = vmatpush.msra.mxu0 %v1834_v9 }
 0x3d6   : > { %v1962_v52 = vld [vmem:[%s5553_s5 + $0x3448] sm:$0xff]  ;;  %3581 = vmatpush.msra.mxu1 %v1898_v22  ;;  %v3305_v22 = vpop.f32.mrf.mxu3 }
 0x3d7   : > { %v2030_v27 = vld [vmem:[%s5553_s5 + $0x3668] sm:$0xff]  ;;  %3601 = vmatpush.msra.mxu2 %v1962_v52  ;;  %v6716_v35 = vadd.f32 %v3305_v22, %v3286_v12  ;;  %v5304_v12 = vld.sshfl [vmem:[#allocation1 + $0x8] sm:$0xff pattern:$0x73625140] }
 0x3d8   : > { %v1830_v53 = vld [vmem:[%s5553_s5 + $0x3028] sm:$0xff]  ;;  %3620 = vmatpush.msra.mxu3 %v2030_v27 }
 0x3d9   : > { %v1894_v51 = vld [vmem:[%s5553_s5 + $0x3228] sm:$0xff]  ;;  %3562 = vmatpush.msra.mxu0 %v1830_v53  ;;  %v5302_v53 = vld.sshfl [vmem:[#allocation1] sm:$0xff pattern:$0x73625140] }
 0x3da   : > { %v1958_v40 = vld [vmem:[%s5553_s5 + $0x3428] sm:$0xff]  ;;  %3582 = vmatpush.msra.mxu1 %v1894_v51 }
 0x3db   : > { %v2026_v18 = vld [vmem:[%s5553_s5 + $0x3648] sm:$0xff]  ;;  %3602 = vmatpush.msra.mxu2 %v1958_v40 }
 0x3dc   : > { %v1826_v57 = vld [vmem:[%s5553_s5 + $0x3008] sm:$0xff]  ;;  %3621 = vmatpush.msra.mxu3 %v2026_v18 }
 0x3dd   : > { %v1890_v54 = vld [vmem:[%s5553_s5 + $0x3208] sm:$0xff]  ;;  %3563 = vmatpush.msra.mxu0 %v1826_v57 }
 0x3de   : > { %v1954_v15 = vld [vmem:[%s5553_s5 + $0x3408] sm:$0xff]  ;;  %3583 = vmatpush.msra.mxu1 %v1890_v54  ;;  %3564 = vmatmul.f32.vlgmr.msra.gmra.mxu0 %v5302_v53  ;;  %v5305_v54 = vld.sshfl [vmem:[#allocation1 + $0x18] sm:$0xff pattern:$0x73625140] }
 0x3df   : > { %v2022_v16 = vld [vmem:[%s5553_s5 + $0x3628] sm:$0xff]  ;;  %3603 = vmatpush.msra.mxu2 %v1954_v15  ;;  %3584 = vmatmul.f32.vlgmr.msra.gmra.mxu1 %v5304_v12 }
 0x3e0   : > { %v2142_v32 = vld [vmem:[%s5553_s5 + $0x39e8] sm:$0xff]  ;;  %3622 = vmatpush.msra.mxu3 %v2022_v16 }
 0x3e1   : > { %v2206_v9 = vld [vmem:[%s5553_s5 + $0x3be8] sm:$0xff]  ;;  %3628 = vmatpush.msrb.mxu0 %v2142_v32 }
 0x3e2   : > { %v2270_v52 = vld [vmem:[%s5553_s5 + $0x3de8] sm:$0xff]  ;;  %3648 = vmatpush.msrb.mxu1 %v2206_v9 }
 0x3e3   : > { %v2018_v27 = vld [vmem:[%s5553_s5 + $0x3608] sm:$0xff]  ;;  %3668 = vmatpush.msrb.mxu2 %v2270_v52 }
 0x3e4   : > { %v5303_v51 = vld.sshfl [vmem:[#allocation1 + $0x10] sm:$0xff pattern:$0x73625140]  ;;  %3623 = vmatpush.msra.mxu3 %v2018_v27 }
 0x3e5   : > { %3604 = vmatmul.f32.vlgmr.msra.gmra.mxu2 %v5303_v51  ;;  %v2138_v45 = vld [vmem:[%s5553_s5 + $0x39c8] sm:$0xff]  ;;  %3624 = vmatmul.f32.vlgmr.msra.gmra.mxu3 %v5305_v54 }
 0x3e6   : > { %v2202_v40 = vld [vmem:[%s5553_s5 + $0x3bc8] sm:$0xff]  ;;  %3629 = vmatpush.msrb.mxu0 %v2138_v45 }
 0x3e7   : > { %v2266_v18 = vld [vmem:[%s5553_s5 + $0x3dc8] sm:$0xff]  ;;  %3649 = vmatpush.msrb.mxu1 %v2202_v40 }
 0x3e8   : > { %v2334_v57 = vld [vmem:[%s5553_s5 + $0x3fe8] sm:$0xff]  ;;  %3669 = vmatpush.msrb.mxu2 %v2266_v18 }
 0x3e9   : > { %v2134_v60 = vld [vmem:[%s5553_s5 + $0x39a8] sm:$0xff]  ;;  %3688 = vmatpush.msrb.mxu3 %v2334_v57 }
 0x3ea   : > { %v2198_v15 = vld [vmem:[%s5553_s5 + $0x3ba8] sm:$0xff]  ;;  %3630 = vmatpush.msrb.mxu0 %v2134_v60 }
 0x3eb   : > { %v2262_v16 = vld [vmem:[%s5553_s5 + $0x3da8] sm:$0xff]  ;;  %3650 = vmatpush.msrb.mxu1 %v2198_v15 }
 0x3ec   : > { %v2330_v32 = vld [vmem:[%s5553_s5 + $0x3fc8] sm:$0xff]  ;;  %3670 = vmatpush.msrb.mxu2 %v2262_v16 }
 0x3ed   : > { %v2130_v9 = vld [vmem:[%s5553_s5 + $0x3988] sm:$0xff]  ;;  %3689 = vmatpush.msrb.mxu3 %v2330_v32 }
 0x3ee   : > { %v2194_v22 = vld [vmem:[%s5553_s5 + $0x3b88] sm:$0xff]  ;;  %3631 = vmatpush.msrb.mxu0 %v2130_v9 }
 0x3ef   : > { %v2258_v52 = vld [vmem:[%s5553_s5 + $0x3d88] sm:$0xff]  ;;  %3651 = vmatpush.msrb.mxu1 %v2194_v22 }
 0x3f0   : > { %v2326_v27 = vld [vmem:[%s5553_s5 + $0x3fa8] sm:$0xff]  ;;  %3671 = vmatpush.msrb.mxu2 %v2258_v52 }
 0x3f1   : > { %v2126_v53 = vld [vmem:[%s5553_s5 + $0x3968] sm:$0xff]  ;;  %3690 = vmatpush.msrb.mxu3 %v2326_v27 }
 0x3f2   : > { %v2190_v51 = vld [vmem:[%s5553_s5 + $0x3b68] sm:$0xff]  ;;  %3632 = vmatpush.msrb.mxu0 %v2126_v53 }
 0x3f3   : > { %v2254_v45 = vld [vmem:[%s5553_s5 + $0x3d68] sm:$0xff]  ;;  %3652 = vmatpush.msrb.mxu1 %v2190_v51 }
 0x3f4   : > { %v2322_v40 = vld [vmem:[%s5553_s5 + $0x3f88] sm:$0xff]  ;;  %3672 = vmatpush.msrb.mxu2 %v2254_v45 }
 0x3f5   : > { %v2122_v18 = vld [vmem:[%s5553_s5 + $0x3948] sm:$0xff]  ;;  %3691 = vmatpush.msrb.mxu3 %v2322_v40 }
 0x3f6   : > { %v2186_v57 = vld [vmem:[%s5553_s5 + $0x3b48] sm:$0xff]  ;;  %3633 = vmatpush.msrb.mxu0 %v2122_v18 }
 0x3f7   : > { %v2250_v12 = vld [vmem:[%s5553_s5 + $0x3d48] sm:$0xff]  ;;  %3653 = vmatpush.msrb.mxu1 %v2186_v57 }
 0x3f8   : > { %v2318_v54 = vld [vmem:[%s5553_s5 + $0x3f68] sm:$0xff]  ;;  %3673 = vmatpush.msrb.mxu2 %v2250_v12 }
 0x3f9   : > { %v2118_v60 = vld [vmem:[%s5553_s5 + $0x3928] sm:$0xff]  ;;  %3692 = vmatpush.msrb.mxu3 %v2318_v54 }
 0x3fa   : > { %v2182_v15 = vld [vmem:[%s5553_s5 + $0x3b28] sm:$0xff]  ;;  %3634 = vmatpush.msrb.mxu0 %v2118_v60 }
 0x3fb   : > { %v2246_v16 = vld [vmem:[%s5553_s5 + $0x3d28] sm:$0xff]  ;;  %3654 = vmatpush.msrb.mxu1 %v2182_v15 }
 0x3fc   : > { %v2314_v32 = vld [vmem:[%s5553_s5 + $0x3f48] sm:$0xff]  ;;  %3674 = vmatpush.msrb.mxu2 %v2246_v16 }
 0x3fd   : > { %v2114_v9 = vld [vmem:[%s5553_s5 + $0x3908] sm:$0xff]  ;;  %3693 = vmatpush.msrb.mxu3 %v2314_v32 }
 0x3fe   : > { %v2178_v22 = vld [vmem:[%s5553_s5 + $0x3b08] sm:$0xff]  ;;  %3635 = vmatpush.msrb.mxu0 %v2114_v9 }
 0x3ff   : > { %v2242_v52 = vld [vmem:[%s5553_s5 + $0x3d08] sm:$0xff]  ;;  %3655 = vmatpush.msrb.mxu1 %v2178_v22 }
 0x400   : > { %v2310_v27 = vld [vmem:[%s5553_s5 + $0x3f28] sm:$0xff]  ;;  %3675 = vmatpush.msrb.mxu2 %v2242_v52 }
 0x401   : > { %v2110_v53 = vld [vmem:[%s5553_s5 + $0x38e8] sm:$0xff]  ;;  %3694 = vmatpush.msrb.mxu3 %v2310_v27 }
 0x402   : > { %v2174_v51 = vld [vmem:[%s5553_s5 + $0x3ae8] sm:$0xff]  ;;  %3636 = vmatpush.msrb.mxu0 %v2110_v53 }
 0x403   : > { %v2238_v45 = vld [vmem:[%s5553_s5 + $0x3ce8] sm:$0xff]  ;;  %3656 = vmatpush.msrb.mxu1 %v2174_v51 }
 0x404   : > { %v2306_v40 = vld [vmem:[%s5553_s5 + $0x3f08] sm:$0xff]  ;;  %3676 = vmatpush.msrb.mxu2 %v2238_v45  ;;  %v3325_v45 = vpop.f32.mrf.mxu0 }
 0x405   : > { %v2106_v18 = vld [vmem:[%s5553_s5 + $0x38c8] sm:$0xff]  ;;  %3695 = vmatpush.msrb.mxu3 %v2306_v40 }
 0x406   : > { %v2170_v57 = vld [vmem:[%s5553_s5 + $0x3ac8] sm:$0xff]  ;;  %3637 = vmatpush.msrb.mxu0 %v2106_v18 }
 0x407   : > { %v2234_v12 = vld [vmem:[%s5553_s5 + $0x3cc8] sm:$0xff]  ;;  %3657 = vmatpush.msrb.mxu1 %v2170_v57  ;;  %v3326_v57 = vadd.f32 %v3325_v45, %v6716_v35 }
 0x408   : > { %v2302_v54 = vld [vmem:[%s5553_s5 + $0x3ee8] sm:$0xff]  ;;  %3677 = vmatpush.msrb.mxu2 %v2234_v12 }
 0x409   : > { %v2102_v60 = vld [vmem:[%s5553_s5 + $0x38a8] sm:$0xff]  ;;  %3696 = vmatpush.msrb.mxu3 %v2302_v54 }
 0x40a   : > { %v2166_v15 = vld [vmem:[%s5553_s5 + $0x3aa8] sm:$0xff]  ;;  %3638 = vmatpush.msrb.mxu0 %v2102_v60 }
 0x40b   : > { %v2230_v16 = vld [vmem:[%s5553_s5 + $0x3ca8] sm:$0xff]  ;;  %3658 = vmatpush.msrb.mxu1 %v2166_v15 }
 0x40c   : > { %v2298_v32 = vld [vmem:[%s5553_s5 + $0x3ec8] sm:$0xff]  ;;  %3678 = vmatpush.msrb.mxu2 %v2230_v16  ;;  %v3345_v16 = vpop.f32.mrf.mxu1 }
 0x40d   : > { %v2098_v9 = vld [vmem:[%s5553_s5 + $0x3888] sm:$0xff]  ;;  %3697 = vmatpush.msrb.mxu3 %v2298_v32  ;;  %v3346_v35 = vadd.f32 %v3345_v16, %v3326_v57  ;;  %v351_v57 = vld [vmem:[%s5553_s5 + $0x1f0] sm:$0xff] }
 0x40e   : > { %v2162_v22 = vld [vmem:[%s5553_s5 + $0x3a88] sm:$0xff]  ;;  %3639 = vmatpush.msrb.mxu0 %v2098_v9 }
 0x40f   : > { %v2226_v52 = vld [vmem:[%s5553_s5 + $0x3c88] sm:$0xff]  ;;  %3659 = vmatpush.msrb.mxu1 %v2162_v22 }
 0x410   : > { %v2294_v27 = vld [vmem:[%s5553_s5 + $0x3ea8] sm:$0xff]  ;;  %3679 = vmatpush.msrb.mxu2 %v2226_v52 }
 0x411   : > { %v2094_v53 = vld [vmem:[%s5553_s5 + $0x3868] sm:$0xff]  ;;  %3698 = vmatpush.msrb.mxu3 %v2294_v27 }
 0x412   : > { %v2158_v51 = vld [vmem:[%s5553_s5 + $0x3a68] sm:$0xff]  ;;  %3640 = vmatpush.msrb.mxu0 %v2094_v53 }
 0x413   : > { %v2222_v40 = vld [vmem:[%s5553_s5 + $0x3c68] sm:$0xff]  ;;  %3660 = vmatpush.msrb.mxu1 %v2158_v51  ;;  %v3365_v51 = vpop.f32.mrf.mxu2 }
 0x414   : > { %v2290_v18 = vld [vmem:[%s5553_s5 + $0x3e88] sm:$0xff]  ;;  %3680 = vmatpush.msrb.mxu2 %v2222_v40 }
 0x415   : > { %v2090_v12 = vld [vmem:[%s5553_s5 + $0x3848] sm:$0xff]  ;;  %3699 = vmatpush.msrb.mxu3 %v2290_v18  ;;  %v3366_v18 = vadd.f32 %v3365_v51, %v3346_v35  ;;  %v347_v35 = vld [vmem:[%s5553_s5 + $0x1d0] sm:$0xff] }
 0x416   : > { %v2154_v54 = vld [vmem:[%s5553_s5 + $0x3a48] sm:$0xff]  ;;  %3641 = vmatpush.msrb.mxu0 %v2090_v12  ;;  %v415_v12 = vld [vmem:[%s5553_s5 + $0x3f0] sm:$0xff] }
 0x417   : > { %v2218_v60 = vld [vmem:[%s5553_s5 + $0x3c48] sm:$0xff]  ;;  %3661 = vmatpush.msrb.mxu1 %v2154_v54  ;;  %v3385_v54 = vpop.f32.mrf.mxu3  ;;  %v5309_v51 = vld.sshfl [vmem:[#allocation1 + $0x38] sm:$0xff pattern:$0x73625140] }
 0x418   : > { %v2286_v15 = vld [vmem:[%s5553_s5 + $0x3e68] sm:$0xff]  ;;  %3681 = vmatpush.msrb.mxu2 %v2218_v60  ;;  %v479_v60 = vld [vmem:[%s5553_s5 + $0x5f0] sm:$0xff]  ;;  %v6783_v16 = vadd.f32 %v3385_v54, %v3366_v18 }
 0x419   : > { %v2086_v32 = vld [vmem:[%s5553_s5 + $0x3828] sm:$0xff]  ;;  %3700 = vmatpush.msrb.mxu3 %v2286_v15  ;;  %v471_v18 = vld [vmem:[%s5553_s5 + $0x5b0] sm:$0xff] }
 0x41a   : > { %v2150_v9 = vld [vmem:[%s5553_s5 + $0x3a28] sm:$0xff]  ;;  %3642 = vmatpush.msrb.mxu0 %v2086_v32  ;;  %v5306_v32 = vld.sshfl [vmem:[#allocation1 + $0x20] sm:$0xff pattern:$0x73625140]  ;;  %v403_v54 = vld [vmem:[%s5553_s5 + $0x390] sm:$0xff] }
 0x41b   : > { %v2214_v22 = vld [vmem:[%s5553_s5 + $0x3c28] sm:$0xff]  ;;  %3662 = vmatpush.msrb.mxu1 %v2150_v9 }
 0x41c   : > { %v2282_v52 = vld [vmem:[%s5553_s5 + $0x3e48] sm:$0xff]  ;;  %3682 = vmatpush.msrb.mxu2 %v2214_v22  ;;  %v411_v22 = vld [vmem:[%s5553_s5 + $0x3d0] sm:$0xff] }
 0x41d   : > { %v2082_v27 = vld [vmem:[%s5553_s5 + $0x3808] sm:$0xff]  ;;  %3701 = vmatpush.msrb.mxu3 %v2282_v52  ;;  %v475_v52 = vld [vmem:[%s5553_s5 + $0x5d0] sm:$0xff] }
 0x41e   : > { %v2146_v53 = vld [vmem:[%s5553_s5 + $0x3a08] sm:$0xff]  ;;  %3643 = vmatpush.msrb.mxu0 %v2082_v27  ;;  %v543_v27 = vld [vmem:[%s5553_s5 + $0x7f0] sm:$0xff] }
 0x41f   : > { %v2210_v45 = vld [vmem:[%s5553_s5 + $0x3c08] sm:$0xff]  ;;  %3663 = vmatpush.msrb.mxu1 %v2146_v53  ;;  %3644 = vmatmul.f32.vlgmr.msrb.gmra.mxu0 %v5306_v32  ;;  %v5308_v53 = vld.sshfl [vmem:[#allocation1 + $0x28] sm:$0xff pattern:$0x73625140]  ;;  %v335_v32 = vld [vmem:[%s5553_s5 + $0x170] sm:$0xff] }
 0x420   : > { %v2278_v40 = vld [vmem:[%s5553_s5 + $0x3e28] sm:$0xff]  ;;  %3683 = vmatpush.msrb.mxu2 %v2210_v45  ;;  %3708 = vmatpush.msra.mxu0 %v351_v57  ;;  %v343_v45 = vld [vmem:[%s5553_s5 + $0x1b0] sm:$0xff] }
 0x421   : > { %3702 = vmatpush.msrb.mxu3 %v2278_v40  ;;  %v2274_v15 = vld [vmem:[%s5553_s5 + $0x3e08] sm:$0xff]  ;;  %3728 = vmatpush.msra.mxu1 %v415_v12  ;;  %v407_v40 = vld [vmem:[%s5553_s5 + $0x3b0] sm:$0xff] }
 0x422   : > { %v5307_v9 = vld.sshfl [vmem:[#allocation1 + $0x30] sm:$0xff pattern:$0x73625140]  ;;  %3748 = vmatpush.msra.mxu2 %v479_v60  ;;  %3664 = vmatmul.f32.vlgmr.msrb.gmra.mxu1 %v5308_v53  ;;  %v539_v57 = vld [vmem:[%s5553_s5 + $0x7d0] sm:$0xff] }
 0x423   : > { %3684 = vmatmul.f32.vlgmr.msrb.gmra.mxu2 %v5307_v9  ;;  %3703 = vmatpush.msrb.mxu3 %v2274_v15  ;;  %v339_v12 = vld [vmem:[%s5553_s5 + $0x190] sm:$0xff] }
 0x424   : > { %3704 = vmatmul.f32.vlgmr.msrb.gmra.mxu3 %v5309_v51  ;;  %3709 = vmatpush.msra.mxu0 %v347_v35  ;;  %v467_v60 = vld [vmem:[%s5553_s5 + $0x590] sm:$0xff] }
 0x425   : > { %3729 = vmatpush.msra.mxu1 %v411_v22  ;;  %3749 = vmatpush.msra.mxu2 %v475_v52  ;;  %v535_v15 = vld [vmem:[%s5553_s5 + $0x7b0] sm:$0xff] }
 0x426   : > { %3768 = vmatpush.msra.mxu3 %v543_v27  ;;  %3710 = vmatpush.msra.mxu0 %v343_v45  ;;  %v399_v9 = vld [vmem:[%s5553_s5 + $0x370] sm:$0xff] }
 0x427   : > { %3730 = vmatpush.msra.mxu1 %v407_v40  ;;  %3750 = vmatpush.msra.mxu2 %v471_v18  ;;  %v463_v35 = vld [vmem:[%s5553_s5 + $0x570] sm:$0xff] }
 0x428   : > { %3769 = vmatpush.msra.mxu3 %v539_v57  ;;  %3711 = vmatpush.msra.mxu0 %v339_v12  ;;  %v531_v22 = vld [vmem:[%s5553_s5 + $0x790] sm:$0xff] }
 0x429   : > { %3731 = vmatpush.msra.mxu1 %v403_v54  ;;  %3751 = vmatpush.msra.mxu2 %v467_v60  ;;  %v331_v52 = vld [vmem:[%s5553_s5 + $0x150] sm:$0xff] }
 0x42a   : > { %3770 = vmatpush.msra.mxu3 %v535_v15  ;;  %v395_v27 = vld [vmem:[%s5553_s5 + $0x350] sm:$0xff]  ;;  %3712 = vmatpush.msra.mxu0 %v335_v32 }
 0x42b   : > { %3732 = vmatpush.msra.mxu1 %v399_v9  ;;  %v459_v53 = vld [vmem:[%s5553_s5 + $0x550] sm:$0xff]  ;;  %3752 = vmatpush.msra.mxu2 %v463_v35 }
 0x42c   : > { %v527_v51 = vld [vmem:[%s5553_s5 + $0x770] sm:$0xff]  ;;  %3771 = vmatpush.msra.mxu3 %v531_v22  ;;  %3713 = vmatpush.msra.mxu0 %v331_v52 }
 0x42d   : > { %v327_v45 = vld [vmem:[%s5553_s5 + $0x130] sm:$0xff]  ;;  %3733 = vmatpush.msra.mxu1 %v395_v27  ;;  %3753 = vmatpush.msra.mxu2 %v459_v53 }
 0x42e   : > { %v391_v40 = vld [vmem:[%s5553_s5 + $0x330] sm:$0xff]  ;;  %3772 = vmatpush.msra.mxu3 %v527_v51  ;;  %3714 = vmatpush.msra.mxu0 %v327_v45 }
 0x42f   : > { %v455_v18 = vld [vmem:[%s5553_s5 + $0x530] sm:$0xff]  ;;  %3734 = vmatpush.msra.mxu1 %v391_v40 }
 0x430   : > { %v523_v57 = vld [vmem:[%s5553_s5 + $0x750] sm:$0xff]  ;;  %3754 = vmatpush.msra.mxu2 %v455_v18 }
 0x431   : > { %v323_v12 = vld [vmem:[%s5553_s5 + $0x110] sm:$0xff]  ;;  %3773 = vmatpush.msra.mxu3 %v523_v57 }
 0x432   : > { %v387_v54 = vld [vmem:[%s5553_s5 + $0x310] sm:$0xff]  ;;  %3715 = vmatpush.msra.mxu0 %v323_v12 }
 0x433   : > { %v451_v60 = vld [vmem:[%s5553_s5 + $0x510] sm:$0xff]  ;;  %3735 = vmatpush.msra.mxu1 %v387_v54 }
 0x434   : > { %v519_v15 = vld [vmem:[%s5553_s5 + $0x730] sm:$0xff]  ;;  %3755 = vmatpush.msra.mxu2 %v451_v60 }
 0x435   : > { %v319_v32 = vld [vmem:[%s5553_s5 + $0xf0] sm:$0xff]  ;;  %3774 = vmatpush.msra.mxu3 %v519_v15 }
 0x436   : > { %v383_v9 = vld [vmem:[%s5553_s5 + $0x2f0] sm:$0xff]  ;;  %3716 = vmatpush.msra.mxu0 %v319_v32 }
 0x437   : > { %v447_v35 = vld [vmem:[%s5553_s5 + $0x4f0] sm:$0xff]  ;;  %3736 = vmatpush.msra.mxu1 %v383_v9 }
 0x438   : > { %v515_v22 = vld [vmem:[%s5553_s5 + $0x710] sm:$0xff]  ;;  %3756 = vmatpush.msra.mxu2 %v447_v35  ;;  %v3405_v35 = vpop.f32.mrf.mxu0 }
 0x439   : > { %v315_v52 = vld [vmem:[%s5553_s5 + $0xd0] sm:$0xff]  ;;  %3775 = vmatpush.msra.mxu3 %v515_v22 }
 0x43a   : > { %v379_v27 = vld [vmem:[%s5553_s5 + $0x2d0] sm:$0xff]  ;;  %3717 = vmatpush.msra.mxu0 %v315_v52 }
 0x43b   : > { %v443_v53 = vld [vmem:[%s5553_s5 + $0x4d0] sm:$0xff]  ;;  %3737 = vmatpush.msra.mxu1 %v379_v27  ;;  %v3406_v27 = vadd.f32 %v3405_v35, %v6783_v16 }
 0x43c   : > { %v511_v51 = vld [vmem:[%s5553_s5 + $0x6f0] sm:$0xff]  ;;  %3757 = vmatpush.msra.mxu2 %v443_v53 }
 0x43d   : > { %v311_v45 = vld [vmem:[%s5553_s5 + $0xb0] sm:$0xff]  ;;  %3776 = vmatpush.msra.mxu3 %v511_v51 }
 0x43e   : > { %v375_v40 = vld [vmem:[%s5553_s5 + $0x2b0] sm:$0xff]  ;;  %3718 = vmatpush.msra.mxu0 %v311_v45 }
 0x43f   : > { %v439_v18 = vld [vmem:[%s5553_s5 + $0x4b0] sm:$0xff]  ;;  %3738 = vmatpush.msra.mxu1 %v375_v40 }
 0x440   : > { %v507_v57 = vld [vmem:[%s5553_s5 + $0x6d0] sm:$0xff]  ;;  %3758 = vmatpush.msra.mxu2 %v439_v18  ;;  %v3425_v18 = vpop.f32.mrf.mxu1 }
 0x441   : > { %v307_v12 = vld [vmem:[%s5553_s5 + $0x90] sm:$0xff]  ;;  %3777 = vmatpush.msra.mxu3 %v507_v57  ;;  %v3426_v16 = vadd.f32 %v3425_v18, %v3406_v27 }
 0x442   : > { %v371_v54 = vld [vmem:[%s5553_s5 + $0x290] sm:$0xff]  ;;  %3719 = vmatpush.msra.mxu0 %v307_v12 }
 0x443   : > { %v435_v60 = vld [vmem:[%s5553_s5 + $0x490] sm:$0xff]  ;;  %3739 = vmatpush.msra.mxu1 %v371_v54 }
 0x444   : > { %v503_v15 = vld [vmem:[%s5553_s5 + $0x6b0] sm:$0xff]  ;;  %3759 = vmatpush.msra.mxu2 %v435_v60 }
 0x445   : > { %v303_v32 = vld [vmem:[%s5553_s5 + $0x70] sm:$0xff]  ;;  %3778 = vmatpush.msra.mxu3 %v503_v15 }
 0x446   : > { %v367_v9 = vld [vmem:[%s5553_s5 + $0x270] sm:$0xff]  ;;  %3720 = vmatpush.msra.mxu0 %v303_v32 }
 0x447   : > { %v431_v22 = vld [vmem:[%s5553_s5 + $0x470] sm:$0xff]  ;;  %3740 = vmatpush.msra.mxu1 %v367_v9  ;;  %v3445_v9 = vpop.f32.mrf.mxu2 }
 0x448   : > { %v499_v52 = vld [vmem:[%s5553_s5 + $0x690] sm:$0xff]  ;;  %3760 = vmatpush.msra.mxu2 %v431_v22 }
 0x449   : > { %v299_v53 = vld [vmem:[%s5553_s5 + $0x50] sm:$0xff]  ;;  %3779 = vmatpush.msra.mxu3 %v499_v52  ;;  %v3446_v52 = vadd.f32 %v3445_v9, %v3426_v16 }
 0x44a   : > { %v363_v51 = vld [vmem:[%s5553_s5 + $0x250] sm:$0xff]  ;;  %3721 = vmatpush.msra.mxu0 %v299_v53 }
 0x44b   : > { %v427_v45 = vld [vmem:[%s5553_s5 + $0x450] sm:$0xff]  ;;  %3741 = vmatpush.msra.mxu1 %v363_v51 }
 0x44c   : > { %v495_v40 = vld [vmem:[%s5553_s5 + $0x670] sm:$0xff]  ;;  %3761 = vmatpush.msra.mxu2 %v427_v45 }
 0x44d   : > { %v295_v57 = vld [vmem:[%s5553_s5 + $0x30] sm:$0xff]  ;;  %3780 = vmatpush.msra.mxu3 %v495_v40  ;;  %v3465_v40 = vpop.f32.mrf.mxu3 }
 0x44e   : > { %v359_v12 = vld [vmem:[%s5553_s5 + $0x230] sm:$0xff]  ;;  %3722 = vmatpush.msra.mxu0 %v295_v57 }
 0x44f   : > { %v423_v54 = vld [vmem:[%s5553_s5 + $0x430] sm:$0xff]  ;;  %3742 = vmatpush.msra.mxu1 %v359_v12  ;;  %v6852_v12 = vadd.f32 %v3465_v40, %v3446_v52 }
 0x450   : > { %v491_v60 = vld [vmem:[%s5553_s5 + $0x650] sm:$0xff]  ;;  %3762 = vmatpush.msra.mxu2 %v423_v54 }
 0x451   : > { %v291_v15 = vld [vmem:[%s5553_s5 + $0x10] sm:$0xff]  ;;  %3781 = vmatpush.msra.mxu3 %v491_v60 }
 0x452   : > { %v355_v32 = vld [vmem:[%s5553_s5 + $0x210] sm:$0xff]  ;;  %3723 = vmatpush.msra.mxu0 %v291_v15 }
 0x453   : > { %v419_v35 = vld [vmem:[%s5553_s5 + $0x410] sm:$0xff]  ;;  %3743 = vmatpush.msra.mxu1 %v355_v32  ;;  %3724 = vmatmul.f32.vlgmr.msra.gmra.mxu0 %v5682_v47 }
 0x454   : > { %v487_v22 = vld [vmem:[%s5553_s5 + $0x630] sm:$0xff]  ;;  %3763 = vmatpush.msra.mxu2 %v419_v35  ;;  %3744 = vmatmul.f32.vlgmr.msra.gmra.mxu1 %v5684_v48 }
 0x455   : > { %v607_v27 = vld [vmem:[%s5553_s5 + $0x9f0] sm:$0xff]  ;;  %3782 = vmatpush.msra.mxu3 %v487_v22  ;;  %3764 = vmatmul.f32.vlgmr.msra.gmra.mxu2 %v5686_v49 }
 0x456   : > { %v671_v53 = vld [vmem:[%s5553_s5 + $0xbf0] sm:$0xff]  ;;  %3788 = vmatpush.msrb.mxu0 %v607_v27 }
 0x457   : > { %v735_v51 = vld [vmem:[%s5553_s5 + $0xdf0] sm:$0xff]  ;;  %3808 = vmatpush.msrb.mxu1 %v671_v53 }
 0x458   : > { %v483_v45 = vld [vmem:[%s5553_s5 + $0x610] sm:$0xff]  ;;  %3828 = vmatpush.msrb.mxu2 %v735_v51 }
 0x459   : > { %v603_v18 = vld [vmem:[%s5553_s5 + $0x9d0] sm:$0xff]  ;;  %3783 = vmatpush.msra.mxu3 %v483_v45 }
 0x45a   : > { %v667_v57 = vld [vmem:[%s5553_s5 + $0xbd0] sm:$0xff]  ;;  %3789 = vmatpush.msrb.mxu0 %v603_v18  ;;  %3784 = vmatmul.f32.vlgmr.msra.gmra.mxu3 %v5688_v50 }
 0x45b   : > { %v731_v16 = vld [vmem:[%s5553_s5 + $0xdd0] sm:$0xff]  ;;  %3809 = vmatpush.msrb.mxu1 %v667_v57 }
 0x45c   : > { %v799_v54 = vld [vmem:[%s5553_s5 + $0xff0] sm:$0xff]  ;;  %3829 = vmatpush.msrb.mxu2 %v731_v16 }
 0x45d   : > { %v599_v60 = vld [vmem:[%s5553_s5 + $0x9b0] sm:$0xff]  ;;  %3848 = vmatpush.msrb.mxu3 %v799_v54 }
 0x45e   : > { %v663_v15 = vld [vmem:[%s5553_s5 + $0xbb0] sm:$0xff]  ;;  %3790 = vmatpush.msrb.mxu0 %v599_v60 }
 0x45f   : > { %v727_v32 = vld [vmem:[%s5553_s5 + $0xdb0] sm:$0xff]  ;;  %3810 = vmatpush.msrb.mxu1 %v663_v15 }
 0x460   : > { %v795_v9 = vld [vmem:[%s5553_s5 + $0xfd0] sm:$0xff]  ;;  %3830 = vmatpush.msrb.mxu2 %v727_v32 }
 0x461   : > { %v595_v35 = vld [vmem:[%s5553_s5 + $0x990] sm:$0xff]  ;;  %3849 = vmatpush.msrb.mxu3 %v795_v9 }
 0x462   : > { %v659_v22 = vld [vmem:[%s5553_s5 + $0xb90] sm:$0xff]  ;;  %3791 = vmatpush.msrb.mxu0 %v595_v35 }
 0x463   : > { %v723_v52 = vld [vmem:[%s5553_s5 + $0xd90] sm:$0xff]  ;;  %3811 = vmatpush.msrb.mxu1 %v659_v22 }
 0x464   : > { %v791_v27 = vld [vmem:[%s5553_s5 + $0xfb0] sm:$0xff]  ;;  %3831 = vmatpush.msrb.mxu2 %v723_v52 }
 0x465   : > { %v591_v53 = vld [vmem:[%s5553_s5 + $0x970] sm:$0xff]  ;;  %3850 = vmatpush.msrb.mxu3 %v791_v27 }
 0x466   : > { %v655_v51 = vld [vmem:[%s5553_s5 + $0xb70] sm:$0xff]  ;;  %3792 = vmatpush.msrb.mxu0 %v591_v53 }
 0x467   : > { %v719_v45 = vld [vmem:[%s5553_s5 + $0xd70] sm:$0xff]  ;;  %3812 = vmatpush.msrb.mxu1 %v655_v51 }
 0x468   : > { %v787_v40 = vld [vmem:[%s5553_s5 + $0xf90] sm:$0xff]  ;;  %3832 = vmatpush.msrb.mxu2 %v719_v45 }
 0x469   : > { %v587_v18 = vld [vmem:[%s5553_s5 + $0x950] sm:$0xff]  ;;  %3851 = vmatpush.msrb.mxu3 %v787_v40 }
 0x46a   : > { %v651_v57 = vld [vmem:[%s5553_s5 + $0xb50] sm:$0xff]  ;;  %3793 = vmatpush.msrb.mxu0 %v587_v18 }
 0x46b   : > { %v715_v16 = vld [vmem:[%s5553_s5 + $0xd50] sm:$0xff]  ;;  %3813 = vmatpush.msrb.mxu1 %v651_v57 }
 0x46c   : > { %v783_v54 = vld [vmem:[%s5553_s5 + $0xf70] sm:$0xff]  ;;  %3833 = vmatpush.msrb.mxu2 %v715_v16 }
 0x46d   : > { %v583_v60 = vld [vmem:[%s5553_s5 + $0x930] sm:$0xff]  ;;  %3852 = vmatpush.msrb.mxu3 %v783_v54 }
 0x46e   : > { %v647_v15 = vld [vmem:[%s5553_s5 + $0xb30] sm:$0xff]  ;;  %3794 = vmatpush.msrb.mxu0 %v583_v60 }
 0x46f   : > { %v711_v32 = vld [vmem:[%s5553_s5 + $0xd30] sm:$0xff]  ;;  %3814 = vmatpush.msrb.mxu1 %v647_v15 }
 0x470   : > { %v779_v9 = vld [vmem:[%s5553_s5 + $0xf50] sm:$0xff]  ;;  %3834 = vmatpush.msrb.mxu2 %v711_v32 }
 0x471   : > { %v579_v35 = vld [vmem:[%s5553_s5 + $0x910] sm:$0xff]  ;;  %3853 = vmatpush.msrb.mxu3 %v779_v9 }
 0x472   : > { %v643_v22 = vld [vmem:[%s5553_s5 + $0xb10] sm:$0xff]  ;;  %3795 = vmatpush.msrb.mxu0 %v579_v35 }
 0x473   : > { %v707_v52 = vld [vmem:[%s5553_s5 + $0xd10] sm:$0xff]  ;;  %3815 = vmatpush.msrb.mxu1 %v643_v22 }
 0x474   : > { %v775_v27 = vld [vmem:[%s5553_s5 + $0xf30] sm:$0xff]  ;;  %3835 = vmatpush.msrb.mxu2 %v707_v52 }
 0x475   : > { %v575_v53 = vld [vmem:[%s5553_s5 + $0x8f0] sm:$0xff]  ;;  %3854 = vmatpush.msrb.mxu3 %v775_v27 }
 0x476   : > { %v639_v51 = vld [vmem:[%s5553_s5 + $0xaf0] sm:$0xff]  ;;  %3796 = vmatpush.msrb.mxu0 %v575_v53 }
 0x477   : > { %v703_v45 = vld [vmem:[%s5553_s5 + $0xcf0] sm:$0xff]  ;;  %3816 = vmatpush.msrb.mxu1 %v639_v51 }
 0x478   : > { %v771_v40 = vld [vmem:[%s5553_s5 + $0xf10] sm:$0xff]  ;;  %3836 = vmatpush.msrb.mxu2 %v703_v45 }
 0x479   : > { %v571_v18 = vld [vmem:[%s5553_s5 + $0x8d0] sm:$0xff]  ;;  %3855 = vmatpush.msrb.mxu3 %v771_v40 }
 0x47a   : > { %v635_v57 = vld [vmem:[%s5553_s5 + $0xad0] sm:$0xff]  ;;  %3797 = vmatpush.msrb.mxu0 %v571_v18 }
 0x47b   : > { %v699_v16 = vld [vmem:[%s5553_s5 + $0xcd0] sm:$0xff]  ;;  %3817 = vmatpush.msrb.mxu1 %v635_v57 }
 0x47c   : > { %v767_v54 = vld [vmem:[%s5553_s5 + $0xef0] sm:$0xff]  ;;  %3837 = vmatpush.msrb.mxu2 %v699_v16  ;;  %v3485_v16 = vpop.f32.mrf.mxu0 }
 0x47d   : > { %v567_v60 = vld [vmem:[%s5553_s5 + $0x8b0] sm:$0xff]  ;;  %3856 = vmatpush.msrb.mxu3 %v767_v54 }
 0x47e   : > { %v631_v15 = vld [vmem:[%s5553_s5 + $0xab0] sm:$0xff]  ;;  %3798 = vmatpush.msrb.mxu0 %v567_v60 }
 0x47f   : > { %v695_v32 = vld [vmem:[%s5553_s5 + $0xcb0] sm:$0xff]  ;;  %3818 = vmatpush.msrb.mxu1 %v631_v15  ;;  %v3486_v15 = vadd.f32 %v3485_v16, %v6852_v12 }
 0x480   : > { %v763_v9 = vld [vmem:[%s5553_s5 + $0xed0] sm:$0xff]  ;;  %3838 = vmatpush.msrb.mxu2 %v695_v32 }
 0x481   : > { %v563_v35 = vld [vmem:[%s5553_s5 + $0x890] sm:$0xff]  ;;  %3857 = vmatpush.msrb.mxu3 %v763_v9 }
 0x482   : > { %v627_v22 = vld [vmem:[%s5553_s5 + $0xa90] sm:$0xff]  ;;  %3799 = vmatpush.msrb.mxu0 %v563_v35 }
 0x483   : > { %v691_v52 = vld [vmem:[%s5553_s5 + $0xc90] sm:$0xff]  ;;  %3819 = vmatpush.msrb.mxu1 %v627_v22 }
 0x484   : > { %v759_v27 = vld [vmem:[%s5553_s5 + $0xeb0] sm:$0xff]  ;;  %3839 = vmatpush.msrb.mxu2 %v691_v52  ;;  %v3505_v52 = vpop.f32.mrf.mxu1 }
 0x485   : > { %v559_v53 = vld [vmem:[%s5553_s5 + $0x870] sm:$0xff]  ;;  %3858 = vmatpush.msrb.mxu3 %v759_v27 }
 0x486   : > { %v623_v51 = vld [vmem:[%s5553_s5 + $0xa70] sm:$0xff]  ;;  %3800 = vmatpush.msrb.mxu0 %v559_v53 }
 0x487   : > { %v687_v45 = vld [vmem:[%s5553_s5 + $0xc70] sm:$0xff]  ;;  %3820 = vmatpush.msrb.mxu1 %v623_v51  ;;  %v3506_v51 = vadd.f32 %v3505_v52, %v3486_v15 }
 0x488   : > { %v755_v40 = vld [vmem:[%s5553_s5 + $0xe90] sm:$0xff]  ;;  %3840 = vmatpush.msrb.mxu2 %v687_v45 }
 0x489   : > { %v555_v18 = vld [vmem:[%s5553_s5 + $0x850] sm:$0xff]  ;;  %3859 = vmatpush.msrb.mxu3 %v755_v40  ;;  %v3525_v40 = vpop.f32.mrf.mxu2 }
 0x48a   : > { %v619_v57 = vld [vmem:[%s5553_s5 + $0xa50] sm:$0xff]  ;;  %3801 = vmatpush.msrb.mxu0 %v555_v18 }
 0x48b   : > { %v683_v54 = vld [vmem:[%s5553_s5 + $0xc50] sm:$0xff]  ;;  %3821 = vmatpush.msrb.mxu1 %v619_v57  ;;  %v3526_v57 = vadd.f32 %v3525_v40, %v3506_v51 }
 0x48c   : > { %v751_v60 = vld [vmem:[%s5553_s5 + $0xe70] sm:$0xff]  ;;  %3841 = vmatpush.msrb.mxu2 %v683_v54 }
 0x48d   : > { %v551_v32 = vld [vmem:[%s5553_s5 + $0x830] sm:$0xff]  ;;  %3860 = vmatpush.msrb.mxu3 %v751_v60 }
 0x48e   : > { %v615_v9 = vld [vmem:[%s5553_s5 + $0xa30] sm:$0xff]  ;;  %3802 = vmatpush.msrb.mxu0 %v551_v32  ;;  %v3545_v32 = vpop.f32.mrf.mxu3 }
 0x48f   : > { %v679_v35 = vld [vmem:[%s5553_s5 + $0xc30] sm:$0xff]  ;;  %3822 = vmatpush.msrb.mxu1 %v615_v9 }
 0x490   : > { %v747_v22 = vld [vmem:[%s5553_s5 + $0xe50] sm:$0xff]  ;;  %3842 = vmatpush.msrb.mxu2 %v679_v35  ;;  %v6922_v35 = vadd.f32 %v3545_v32, %v3526_v57 }
 0x491   : > { %v547_v27 = vld [vmem:[%s5553_s5 + $0x810] sm:$0xff]  ;;  %3861 = vmatpush.msrb.mxu3 %v747_v22 }
 0x492   : > { %v611_v53 = vld [vmem:[%s5553_s5 + $0xa10] sm:$0xff]  ;;  %3803 = vmatpush.msrb.mxu0 %v547_v27 }
 0x493   : > { %v675_v12 = vld [vmem:[%s5553_s5 + $0xc10] sm:$0xff]  ;;  %3823 = vmatpush.msrb.mxu1 %v611_v53  ;;  %3804 = vmatmul.f32.vlgmr.msrb.gmra.mxu0 %v5706_v0 }
 0x494   : > { %v743_v45 = vld [vmem:[%s5553_s5 + $0xe30] sm:$0xff]  ;;  %3843 = vmatpush.msrb.mxu2 %v675_v12  ;;  %3824 = vmatmul.f32.vlgmr.msrb.gmra.mxu1 %v5710_v2 }
 0x495   : > { %v863_v18 = vld [vmem:[%s5553_s5 + $0x11f0] sm:$0xff]  ;;  %3862 = vmatpush.msrb.mxu3 %v743_v45  ;;  %3844 = vmatmul.f32.vlgmr.msrb.gmra.mxu2 %v5704_v63 }
 0x496   : > { %v927_v16 = vld [vmem:[%s5553_s5 + $0x13f0] sm:$0xff]  ;;  %3868 = vmatpush.msra.mxu0 %v863_v18 }
 0x497   : > { %v991_v54 = vld [vmem:[%s5553_s5 + $0x15f0] sm:$0xff]  ;;  %3888 = vmatpush.msra.mxu1 %v927_v16 }
 0x498   : > { %v739_v60 = vld [vmem:[%s5553_s5 + $0xe10] sm:$0xff]  ;;  %3908 = vmatpush.msra.mxu2 %v991_v54 }
 0x499   : > { %v859_v15 = vld [vmem:[%s5553_s5 + $0x11d0] sm:$0xff]  ;;  %3863 = vmatpush.msrb.mxu3 %v739_v60 }
 0x49a   : > { %v923_v9 = vld [vmem:[%s5553_s5 + $0x13d0] sm:$0xff]  ;;  %3869 = vmatpush.msra.mxu0 %v859_v15  ;;  %3864 = vmatmul.f32.vlgmr.msrb.gmra.mxu3 %v5708_v1 }
 0x49b   : > { %v987_v22 = vld [vmem:[%s5553_s5 + $0x15d0] sm:$0xff]  ;;  %3889 = vmatpush.msra.mxu1 %v923_v9 }
 0x49c   : > { %v1055_v52 = vld [vmem:[%s5553_s5 + $0x17f0] sm:$0xff]  ;;  %3909 = vmatpush.msra.mxu2 %v987_v22 }
 0x49d   : > { %v855_v27 = vld [vmem:[%s5553_s5 + $0x11b0] sm:$0xff]  ;;  %3928 = vmatpush.msra.mxu3 %v1055_v52 }
 0x49e   : > { %v919_v53 = vld [vmem:[%s5553_s5 + $0x13b0] sm:$0xff]  ;;  %3870 = vmatpush.msra.mxu0 %v855_v27 }
 0x49f   : > { %v983_v51 = vld [vmem:[%s5553_s5 + $0x15b0] sm:$0xff]  ;;  %3890 = vmatpush.msra.mxu1 %v919_v53 }
 0x4a0   : > { %v1051_v12 = vld [vmem:[%s5553_s5 + $0x17d0] sm:$0xff]  ;;  %3910 = vmatpush.msra.mxu2 %v983_v51 }
 0x4a1   : > { %v851_v45 = vld [vmem:[%s5553_s5 + $0x1190] sm:$0xff]  ;;  %3929 = vmatpush.msra.mxu3 %v1051_v12 }
 0x4a2   : > { %v915_v40 = vld [vmem:[%s5553_s5 + $0x1390] sm:$0xff]  ;;  %3871 = vmatpush.msra.mxu0 %v851_v45 }
 0x4a3   : > { %v979_v18 = vld [vmem:[%s5553_s5 + $0x1590] sm:$0xff]  ;;  %3891 = vmatpush.msra.mxu1 %v915_v40 }
 0x4a4   : > { %v1047_v57 = vld [vmem:[%s5553_s5 + $0x17b0] sm:$0xff]  ;;  %3911 = vmatpush.msra.mxu2 %v979_v18 }
 0x4a5   : > { %v847_v16 = vld [vmem:[%s5553_s5 + $0x1170] sm:$0xff]  ;;  %3930 = vmatpush.msra.mxu3 %v1047_v57 }
 0x4a6   : > { %v911_v54 = vld [vmem:[%s5553_s5 + $0x1370] sm:$0xff]  ;;  %3872 = vmatpush.msra.mxu0 %v847_v16 }
 0x4a7   : > { %v975_v60 = vld [vmem:[%s5553_s5 + $0x1570] sm:$0xff]  ;;  %3892 = vmatpush.msra.mxu1 %v911_v54 }
 0x4a8   : > { %v1043_v15 = vld [vmem:[%s5553_s5 + $0x1790] sm:$0xff]  ;;  %3912 = vmatpush.msra.mxu2 %v975_v60 }
 0x4a9   : > { %v843_v32 = vld [vmem:[%s5553_s5 + $0x1150] sm:$0xff]  ;;  %3931 = vmatpush.msra.mxu3 %v1043_v15 }
 0x4aa   : > { %v907_v9 = vld [vmem:[%s5553_s5 + $0x1350] sm:$0xff]  ;;  %3873 = vmatpush.msra.mxu0 %v843_v32 }
 0x4ab   : > { %v971_v22 = vld [vmem:[%s5553_s5 + $0x1550] sm:$0xff]  ;;  %3893 = vmatpush.msra.mxu1 %v907_v9 }
 0x4ac   : > { %v1039_v52 = vld [vmem:[%s5553_s5 + $0x1770] sm:$0xff]  ;;  %3913 = vmatpush.msra.mxu2 %v971_v22 }
 0x4ad   : > { %v839_v27 = vld [vmem:[%s5553_s5 + $0x1130] sm:$0xff]  ;;  %3932 = vmatpush.msra.mxu3 %v1039_v52 }
 0x4ae   : > { %v903_v53 = vld [vmem:[%s5553_s5 + $0x1330] sm:$0xff]  ;;  %3874 = vmatpush.msra.mxu0 %v839_v27 }
 0x4af   : > { %v967_v51 = vld [vmem:[%s5553_s5 + $0x1530] sm:$0xff]  ;;  %3894 = vmatpush.msra.mxu1 %v903_v53 }
 0x4b0   : > { %v1035_v12 = vld [vmem:[%s5553_s5 + $0x1750] sm:$0xff]  ;;  %3914 = vmatpush.msra.mxu2 %v967_v51 }
 0x4b1   : > { %v835_v45 = vld [vmem:[%s5553_s5 + $0x1110] sm:$0xff]  ;;  %3933 = vmatpush.msra.mxu3 %v1035_v12 }
 0x4b2   : > { %v899_v40 = vld [vmem:[%s5553_s5 + $0x1310] sm:$0xff]  ;;  %3875 = vmatpush.msra.mxu0 %v835_v45 }
 0x4b3   : > { %v963_v18 = vld [vmem:[%s5553_s5 + $0x1510] sm:$0xff]  ;;  %3895 = vmatpush.msra.mxu1 %v899_v40 }
 0x4b4   : > { %v1031_v57 = vld [vmem:[%s5553_s5 + $0x1730] sm:$0xff]  ;;  %3915 = vmatpush.msra.mxu2 %v963_v18 }
 0x4b5   : > { %v831_v16 = vld [vmem:[%s5553_s5 + $0x10f0] sm:$0xff]  ;;  %3934 = vmatpush.msra.mxu3 %v1031_v57 }
 0x4b6   : > { %v895_v54 = vld [vmem:[%s5553_s5 + $0x12f0] sm:$0xff]  ;;  %3876 = vmatpush.msra.mxu0 %v831_v16 }
 0x4b7   : > { %v959_v60 = vld [vmem:[%s5553_s5 + $0x14f0] sm:$0xff]  ;;  %3896 = vmatpush.msra.mxu1 %v895_v54 }
 0x4b8   : > { %v1027_v15 = vld [vmem:[%s5553_s5 + $0x1710] sm:$0xff]  ;;  %3916 = vmatpush.msra.mxu2 %v959_v60  ;;  %v3565_v60 = vpop.f32.mrf.mxu0 }
 0x4b9   : > { %v827_v32 = vld [vmem:[%s5553_s5 + $0x10d0] sm:$0xff]  ;;  %3935 = vmatpush.msra.mxu3 %v1027_v15 }
 0x4ba   : > { %v891_v9 = vld [vmem:[%s5553_s5 + $0x12d0] sm:$0xff]  ;;  %3877 = vmatpush.msra.mxu0 %v827_v32 }
 0x4bb   : > { %v955_v22 = vld [vmem:[%s5553_s5 + $0x14d0] sm:$0xff]  ;;  %3897 = vmatpush.msra.mxu1 %v891_v9  ;;  %v3566_v9 = vadd.f32 %v3565_v60, %v6922_v35 }
 0x4bc   : > { %v1023_v52 = vld [vmem:[%s5553_s5 + $0x16f0] sm:$0xff]  ;;  %3917 = vmatpush.msra.mxu2 %v955_v22 }
 0x4bd   : > { %v823_v27 = vld [vmem:[%s5553_s5 + $0x10b0] sm:$0xff]  ;;  %3936 = vmatpush.msra.mxu3 %v1023_v52 }
 0x4be   : > { %v887_v53 = vld [vmem:[%s5553_s5 + $0x12b0] sm:$0xff]  ;;  %3878 = vmatpush.msra.mxu0 %v823_v27 }
 0x4bf   : > { %v951_v51 = vld [vmem:[%s5553_s5 + $0x14b0] sm:$0xff]  ;;  %3898 = vmatpush.msra.mxu1 %v887_v53 }
 0x4c0   : > { %v1019_v12 = vld [vmem:[%s5553_s5 + $0x16d0] sm:$0xff]  ;;  %3918 = vmatpush.msra.mxu2 %v951_v51  ;;  %v3585_v51 = vpop.f32.mrf.mxu1 }
 0x4c1   : > { %v819_v45 = vld [vmem:[%s5553_s5 + $0x1090] sm:$0xff]  ;;  %3937 = vmatpush.msra.mxu3 %v1019_v12  ;;  %v3586_v35 = vadd.f32 %v3585_v51, %v3566_v9 }
 0x4c2   : > { %v883_v40 = vld [vmem:[%s5553_s5 + $0x1290] sm:$0xff]  ;;  %3879 = vmatpush.msra.mxu0 %v819_v45 }
 0x4c3   : > { %v947_v18 = vld [vmem:[%s5553_s5 + $0x1490] sm:$0xff]  ;;  %3899 = vmatpush.msra.mxu1 %v883_v40 }
 0x4c4   : > { %v1015_v57 = vld [vmem:[%s5553_s5 + $0x16b0] sm:$0xff]  ;;  %3919 = vmatpush.msra.mxu2 %v947_v18 }
 0x4c5   : > { %v815_v16 = vld [vmem:[%s5553_s5 + $0x1070] sm:$0xff]  ;;  %3938 = vmatpush.msra.mxu3 %v1015_v57 }
 0x4c6   : > { %v879_v54 = vld [vmem:[%s5553_s5 + $0x1270] sm:$0xff]  ;;  %3880 = vmatpush.msra.mxu0 %v815_v16 }
 0x4c7   : > { %v943_v15 = vld [vmem:[%s5553_s5 + $0x1470] sm:$0xff]  ;;  %3900 = vmatpush.msra.mxu1 %v879_v54  ;;  %v3605_v54 = vpop.f32.mrf.mxu2 }
 0x4c8   : > { %v1011_v32 = vld [vmem:[%s5553_s5 + $0x1690] sm:$0xff]  ;;  %3920 = vmatpush.msra.mxu2 %v943_v15 }
 0x4c9   : > { %v811_v22 = vld [vmem:[%s5553_s5 + $0x1050] sm:$0xff]  ;;  %3939 = vmatpush.msra.mxu3 %v1011_v32  ;;  %v3606_v32 = vadd.f32 %v3605_v54, %v3586_v35 }
 0x4ca   : > { %v875_v52 = vld [vmem:[%s5553_s5 + $0x1250] sm:$0xff]  ;;  %3881 = vmatpush.msra.mxu0 %v811_v22 }
 0x4cb   : > { %v939_v27 = vld [vmem:[%s5553_s5 + $0x1450] sm:$0xff]  ;;  %3901 = vmatpush.msra.mxu1 %v875_v52  ;;  %v3625_v52 = vpop.f32.mrf.mxu3 }
 0x4cc   : > { %v1007_v53 = vld [vmem:[%s5553_s5 + $0x1670] sm:$0xff]  ;;  %3921 = vmatpush.msra.mxu2 %v939_v27  ;;  %v6992_v51 = vadd.f32 %v3625_v52, %v3606_v32 }
 0x4cd   : > { %v807_v12 = vld [vmem:[%s5553_s5 + $0x1030] sm:$0xff]  ;;  %3940 = vmatpush.msra.mxu3 %v1007_v53 }
 0x4ce   : > { %v871_v45 = vld [vmem:[%s5553_s5 + $0x1230] sm:$0xff]  ;;  %3882 = vmatpush.msra.mxu0 %v807_v12 }
 0x4cf   : > { %v935_v40 = vld [vmem:[%s5553_s5 + $0x1430] sm:$0xff]  ;;  %3902 = vmatpush.msra.mxu1 %v871_v45 }
 0x4d0   : > { %v1003_v18 = vld [vmem:[%s5553_s5 + $0x1650] sm:$0xff]  ;;  %3922 = vmatpush.msra.mxu2 %v935_v40 }
 0x4d1   : > { %v803_v57 = vld [vmem:[%s5553_s5 + $0x1010] sm:$0xff]  ;;  %3941 = vmatpush.msra.mxu3 %v1003_v18 }
 0x4d2   : > { %v867_v16 = vld [vmem:[%s5553_s5 + $0x1210] sm:$0xff]  ;;  %3883 = vmatpush.msra.mxu0 %v803_v57 }
 0x4d3   : > { %v931_v60 = vld [vmem:[%s5553_s5 + $0x1410] sm:$0xff]  ;;  %3903 = vmatpush.msra.mxu1 %v867_v16  ;;  %3884 = vmatmul.f32.vlgmr.msra.gmra.mxu0 %v5792_v19 }
 0x4d4   : > { %v999_v15 = vld [vmem:[%s5553_s5 + $0x1630] sm:$0xff]  ;;  %3923 = vmatpush.msra.mxu2 %v931_v60  ;;  %3904 = vmatmul.f32.vlgmr.msra.gmra.mxu1 %v5802_v25 }
 0x4d5   : > { %v1119_v9 = vld [vmem:[%s5553_s5 + $0x19f0] sm:$0xff]  ;;  %3942 = vmatpush.msra.mxu3 %v999_v15  ;;  %3924 = vmatmul.f32.vlgmr.msra.gmra.mxu2 %v5794_v20 }
 0x4d6   : > { %v1183_v22 = vld [vmem:[%s5553_s5 + $0x1bf0] sm:$0xff]  ;;  %3948 = vmatpush.msrb.mxu0 %v1119_v9 }
 0x4d7   : > { %v1247_v27 = vld [vmem:[%s5553_s5 + $0x1df0] sm:$0xff]  ;;  %3968 = vmatpush.msrb.mxu1 %v1183_v22 }
 0x4d8   : > { %v995_v53 = vld [vmem:[%s5553_s5 + $0x1610] sm:$0xff]  ;;  %3988 = vmatpush.msrb.mxu2 %v1247_v27 }
 0x4d9   : > { %v1115_v12 = vld [vmem:[%s5553_s5 + $0x19d0] sm:$0xff]  ;;  %3943 = vmatpush.msra.mxu3 %v995_v53 }
 0x4da   : > { %v1179_v45 = vld [vmem:[%s5553_s5 + $0x1bd0] sm:$0xff]  ;;  %3944 = vmatmul.f32.vlgmr.msra.gmra.mxu3 %v5804_v26  ;;  %3949 = vmatpush.msrb.mxu0 %v1115_v12 }
 0x4db   : > { %v1243_v35 = vld [vmem:[%s5553_s5 + $0x1dd0] sm:$0xff]  ;;  %3969 = vmatpush.msrb.mxu1 %v1179_v45 }
 0x4dc   : > { %v1311_v40 = vld [vmem:[%s5553_s5 + $0x1ff0] sm:$0xff]  ;;  %3989 = vmatpush.msrb.mxu2 %v1243_v35 }
 0x4dd   : > { %v1111_v18 = vld [vmem:[%s5553_s5 + $0x19b0] sm:$0xff]  ;;  %4008 = vmatpush.msrb.mxu3 %v1311_v40 }
 0x4de   : > { %v1175_v57 = vld [vmem:[%s5553_s5 + $0x1bb0] sm:$0xff]  ;;  %3950 = vmatpush.msrb.mxu0 %v1111_v18 }
 0x4df   : > { %v1239_v16 = vld [vmem:[%s5553_s5 + $0x1db0] sm:$0xff]  ;;  %3970 = vmatpush.msrb.mxu1 %v1175_v57 }
 0x4e0   : > { %v1307_v54 = vld [vmem:[%s5553_s5 + $0x1fd0] sm:$0xff]  ;;  %3990 = vmatpush.msrb.mxu2 %v1239_v16 }
 0x4e1   : > { %v1107_v60 = vld [vmem:[%s5553_s5 + $0x1990] sm:$0xff]  ;;  %4009 = vmatpush.msrb.mxu3 %v1307_v54 }
 0x4e2   : > { %v1171_v15 = vld [vmem:[%s5553_s5 + $0x1b90] sm:$0xff]  ;;  %3951 = vmatpush.msrb.mxu0 %v1107_v60 }
 0x4e3   : > { %v1235_v32 = vld [vmem:[%s5553_s5 + $0x1d90] sm:$0xff]  ;;  %3971 = vmatpush.msrb.mxu1 %v1171_v15 }
 0x4e4   : > { %v1303_v9 = vld [vmem:[%s5553_s5 + $0x1fb0] sm:$0xff]  ;;  %3991 = vmatpush.msrb.mxu2 %v1235_v32 }
 0x4e5   : > { %v1103_v22 = vld [vmem:[%s5553_s5 + $0x1970] sm:$0xff]  ;;  %4010 = vmatpush.msrb.mxu3 %v1303_v9 }
 0x4e6   : > { %v1167_v52 = vld [vmem:[%s5553_s5 + $0x1b70] sm:$0xff]  ;;  %3952 = vmatpush.msrb.mxu0 %v1103_v22 }
 0x4e7   : > { %v1231_v27 = vld [vmem:[%s5553_s5 + $0x1d70] sm:$0xff]  ;;  %3972 = vmatpush.msrb.mxu1 %v1167_v52 }
 0x4e8   : > { %v1299_v53 = vld [vmem:[%s5553_s5 + $0x1f90] sm:$0xff]  ;;  %3992 = vmatpush.msrb.mxu2 %v1231_v27 }
 0x4e9   : > { %v1099_v12 = vld [vmem:[%s5553_s5 + $0x1950] sm:$0xff]  ;;  %4011 = vmatpush.msrb.mxu3 %v1299_v53 }
 0x4ea   : > { %v1163_v45 = vld [vmem:[%s5553_s5 + $0x1b50] sm:$0xff]  ;;  %3953 = vmatpush.msrb.mxu0 %v1099_v12 }
 0x4eb   : > { %v1227_v35 = vld [vmem:[%s5553_s5 + $0x1d50] sm:$0xff]  ;;  %3973 = vmatpush.msrb.mxu1 %v1163_v45 }
 0x4ec   : > { %v1295_v40 = vld [vmem:[%s5553_s5 + $0x1f70] sm:$0xff]  ;;  %3993 = vmatpush.msrb.mxu2 %v1227_v35 }
 0x4ed   : > { %v1095_v18 = vld [vmem:[%s5553_s5 + $0x1930] sm:$0xff]  ;;  %4012 = vmatpush.msrb.mxu3 %v1295_v40 }
 0x4ee   : > { %v1159_v57 = vld [vmem:[%s5553_s5 + $0x1b30] sm:$0xff]  ;;  %3954 = vmatpush.msrb.mxu0 %v1095_v18 }
 0x4ef   : > { %v1223_v16 = vld [vmem:[%s5553_s5 + $0x1d30] sm:$0xff]  ;;  %3974 = vmatpush.msrb.mxu1 %v1159_v57 }
 0x4f0   : > { %v1291_v54 = vld [vmem:[%s5553_s5 + $0x1f50] sm:$0xff]  ;;  %3994 = vmatpush.msrb.mxu2 %v1223_v16 }
 0x4f1   : > { %v1091_v60 = vld [vmem:[%s5553_s5 + $0x1910] sm:$0xff]  ;;  %4013 = vmatpush.msrb.mxu3 %v1291_v54 }
 0x4f2   : > { %v1155_v15 = vld [vmem:[%s5553_s5 + $0x1b10] sm:$0xff]  ;;  %3955 = vmatpush.msrb.mxu0 %v1091_v60 }
 0x4f3   : > { %v1219_v32 = vld [vmem:[%s5553_s5 + $0x1d10] sm:$0xff]  ;;  %3975 = vmatpush.msrb.mxu1 %v1155_v15 }
 0x4f4   : > { %v1287_v9 = vld [vmem:[%s5553_s5 + $0x1f30] sm:$0xff]  ;;  %3995 = vmatpush.msrb.mxu2 %v1219_v32 }
 0x4f5   : > { %v1087_v22 = vld [vmem:[%s5553_s5 + $0x18f0] sm:$0xff]  ;;  %4014 = vmatpush.msrb.mxu3 %v1287_v9 }
 0x4f6   : > { %v1151_v52 = vld [vmem:[%s5553_s5 + $0x1af0] sm:$0xff]  ;;  %3956 = vmatpush.msrb.mxu0 %v1087_v22 }
 0x4f7   : > { %v1215_v27 = vld [vmem:[%s5553_s5 + $0x1cf0] sm:$0xff]  ;;  %3976 = vmatpush.msrb.mxu1 %v1151_v52 }
 0x4f8   : > { %v1283_v53 = vld [vmem:[%s5553_s5 + $0x1f10] sm:$0xff]  ;;  %3996 = vmatpush.msrb.mxu2 %v1215_v27  ;;  %v3645_v27 = vpop.f32.mrf.mxu0 }
 0x4f9   : > { %v1083_v12 = vld [vmem:[%s5553_s5 + $0x18d0] sm:$0xff]  ;;  %4015 = vmatpush.msrb.mxu3 %v1283_v53 }
 0x4fa   : > { %v1147_v45 = vld [vmem:[%s5553_s5 + $0x1ad0] sm:$0xff]  ;;  %3957 = vmatpush.msrb.mxu0 %v1083_v12 }
 0x4fb   : > { %v1211_v35 = vld [vmem:[%s5553_s5 + $0x1cd0] sm:$0xff]  ;;  %3977 = vmatpush.msrb.mxu1 %v1147_v45  ;;  %v3646_v45 = vadd.f32 %v3645_v27, %v6992_v51 }
 0x4fc   : > { %v1279_v40 = vld [vmem:[%s5553_s5 + $0x1ef0] sm:$0xff]  ;;  %3997 = vmatpush.msrb.mxu2 %v1211_v35 }
 0x4fd   : > { %v1079_v18 = vld [vmem:[%s5553_s5 + $0x18b0] sm:$0xff]  ;;  %4016 = vmatpush.msrb.mxu3 %v1279_v40 }
 0x4fe   : > { %v1143_v57 = vld [vmem:[%s5553_s5 + $0x1ab0] sm:$0xff]  ;;  %3958 = vmatpush.msrb.mxu0 %v1079_v18 }
 0x4ff   : > { %v1207_v16 = vld [vmem:[%s5553_s5 + $0x1cb0] sm:$0xff]  ;;  %3978 = vmatpush.msrb.mxu1 %v1143_v57 }
 0x500   : > { %v1275_v54 = vld [vmem:[%s5553_s5 + $0x1ed0] sm:$0xff]  ;;  %3998 = vmatpush.msrb.mxu2 %v1207_v16  ;;  %v3665_v16 = vpop.f32.mrf.mxu1 }
 0x501   : > { %v1075_v60 = vld [vmem:[%s5553_s5 + $0x1890] sm:$0xff]  ;;  %4017 = vmatpush.msrb.mxu3 %v1275_v54  ;;  %v3666_v51 = vadd.f32 %v3665_v16, %v3646_v45 }
 0x502   : > { %v1139_v15 = vld [vmem:[%s5553_s5 + $0x1a90] sm:$0xff]  ;;  %3959 = vmatpush.msrb.mxu0 %v1075_v60 }
 0x503   : > { %v1203_v32 = vld [vmem:[%s5553_s5 + $0x1c90] sm:$0xff]  ;;  %3979 = vmatpush.msrb.mxu1 %v1139_v15 }
 0x504   : > { %v1271_v9 = vld [vmem:[%s5553_s5 + $0x1eb0] sm:$0xff]  ;;  %3999 = vmatpush.msrb.mxu2 %v1203_v32 }
 0x505   : > { %v1071_v22 = vld [vmem:[%s5553_s5 + $0x1870] sm:$0xff]  ;;  %4018 = vmatpush.msrb.mxu3 %v1271_v9 }
 0x506   : > { %v1135_v52 = vld [vmem:[%s5553_s5 + $0x1a70] sm:$0xff]  ;;  %3960 = vmatpush.msrb.mxu0 %v1071_v22 }
 0x507   : > { %v1199_v53 = vld [vmem:[%s5553_s5 + $0x1c70] sm:$0xff]  ;;  %3980 = vmatpush.msrb.mxu1 %v1135_v52  ;;  %v3685_v52 = vpop.f32.mrf.mxu2 }
 0x508   : > { %v1267_v12 = vld [vmem:[%s5553_s5 + $0x1e90] sm:$0xff]  ;;  %4000 = vmatpush.msrb.mxu2 %v1199_v53 }
 0x509   : > { %v1067_v35 = vld [vmem:[%s5553_s5 + $0x1850] sm:$0xff]  ;;  %4019 = vmatpush.msrb.mxu3 %v1267_v12  ;;  %v3686_v12 = vadd.f32 %v3685_v52, %v3666_v51 }
 0x50a   : > { %v1131_v40 = vld [vmem:[%s5553_s5 + $0x1a50] sm:$0xff]  ;;  %3961 = vmatpush.msrb.mxu0 %v1067_v35 }
 0x50b   : > { %v1195_v18 = vld [vmem:[%s5553_s5 + $0x1c50] sm:$0xff]  ;;  %3981 = vmatpush.msrb.mxu1 %v1131_v40  ;;  %v3705_v40 = vpop.f32.mrf.mxu3 }
 0x50c   : > { %v1263_v57 = vld [vmem:[%s5553_s5 + $0x1e70] sm:$0xff]  ;;  %4001 = vmatpush.msrb.mxu2 %v1195_v18  ;;  %v7063_v16 = vadd.f32 %v3705_v40, %v3686_v12 }
 0x50d   : > { %v1063_v54 = vld [vmem:[%s5553_s5 + $0x1830] sm:$0xff]  ;;  %4020 = vmatpush.msrb.mxu3 %v1263_v57 }
 0x50e   : > { %v1127_v60 = vld [vmem:[%s5553_s5 + $0x1a30] sm:$0xff]  ;;  %3962 = vmatpush.msrb.mxu0 %v1063_v54 }
 0x50f   : > { %v1191_v15 = vld [vmem:[%s5553_s5 + $0x1c30] sm:$0xff]  ;;  %3982 = vmatpush.msrb.mxu1 %v1127_v60 }
 0x510   : > { %v1259_v32 = vld [vmem:[%s5553_s5 + $0x1e50] sm:$0xff]  ;;  %4002 = vmatpush.msrb.mxu2 %v1191_v15 }
 0x511   : > { %v1059_v9 = vld [vmem:[%s5553_s5 + $0x1810] sm:$0xff]  ;;  %4021 = vmatpush.msrb.mxu3 %v1259_v32 }
 0x512   : > { %v1123_v22 = vld [vmem:[%s5553_s5 + $0x1a10] sm:$0xff]  ;;  %3963 = vmatpush.msrb.mxu0 %v1059_v9 }
 0x513   : > { %v1187_v27 = vld [vmem:[%s5553_s5 + $0x1c10] sm:$0xff]  ;;  %3983 = vmatpush.msrb.mxu1 %v1123_v22  ;;  %3964 = vmatmul.f32.vlgmr.msrb.gmra.mxu0 %v5871_v36 }
 0x514   : > { %v1255_v53 = vld [vmem:[%s5553_s5 + $0x1e30] sm:$0xff]  ;;  %4003 = vmatpush.msrb.mxu2 %v1187_v27  ;;  %3984 = vmatmul.f32.vlgmr.msrb.gmra.mxu1 %v5881_v42 }
 0x515   : > { %v1375_v45 = vld [vmem:[%s5553_s5 + $0x21f0] sm:$0xff]  ;;  %4022 = vmatpush.msrb.mxu3 %v1255_v53  ;;  %4004 = vmatmul.f32.vlgmr.msrb.gmra.mxu2 %v5873_v37 }
 0x516   : > { %v1439_v35 = vld [vmem:[%s5553_s5 + $0x23f0] sm:$0xff]  ;;  %4028 = vmatpush.msra.mxu0 %v1375_v45 }
 0x517   : > { %v1503_v18 = vld [vmem:[%s5553_s5 + $0x25f0] sm:$0xff]  ;;  %4048 = vmatpush.msra.mxu1 %v1439_v35 }
 0x518   : > { %v1251_v57 = vld [vmem:[%s5553_s5 + $0x1e10] sm:$0xff]  ;;  %4068 = vmatpush.msra.mxu2 %v1503_v18 }
 0x519   : > { %v1371_v54 = vld [vmem:[%s5553_s5 + $0x21d0] sm:$0xff]  ;;  %4023 = vmatpush.msrb.mxu3 %v1251_v57 }
 0x51a   : > { %v1435_v60 = vld [vmem:[%s5553_s5 + $0x23d0] sm:$0xff]  ;;  %4024 = vmatmul.f32.vlgmr.msrb.gmra.mxu3 %v5883_v43  ;;  %4029 = vmatpush.msra.mxu0 %v1371_v54 }
 0x51b   : > { %v1499_v51 = vld [vmem:[%s5553_s5 + $0x25d0] sm:$0xff]  ;;  %4049 = vmatpush.msra.mxu1 %v1435_v60 }
 0x51c   : > { %v1567_v15 = vld [vmem:[%s5553_s5 + $0x27f0] sm:$0xff]  ;;  %4069 = vmatpush.msra.mxu2 %v1499_v51 }
 0x51d   : > { %v1367_v32 = vld [vmem:[%s5553_s5 + $0x21b0] sm:$0xff]  ;;  %4088 = vmatpush.msra.mxu3 %v1567_v15 }
 0x51e   : > { %v1431_v9 = vld [vmem:[%s5553_s5 + $0x23b0] sm:$0xff]  ;;  %4030 = vmatpush.msra.mxu0 %v1367_v32 }
 0x51f   : > { %v1495_v22 = vld [vmem:[%s5553_s5 + $0x25b0] sm:$0xff]  ;;  %4050 = vmatpush.msra.mxu1 %v1431_v9 }
 0x520   : > { %v1563_v52 = vld [vmem:[%s5553_s5 + $0x27d0] sm:$0xff]  ;;  %4070 = vmatpush.msra.mxu2 %v1495_v22 }
 0x521   : > { %v1363_v27 = vld [vmem:[%s5553_s5 + $0x2190] sm:$0xff]  ;;  %4089 = vmatpush.msra.mxu3 %v1563_v52 }
 0x522   : > { %v1427_v53 = vld [vmem:[%s5553_s5 + $0x2390] sm:$0xff]  ;;  %4031 = vmatpush.msra.mxu0 %v1363_v27 }
 0x523   : > { %v1491_v12 = vld [vmem:[%s5553_s5 + $0x2590] sm:$0xff]  ;;  %4051 = vmatpush.msra.mxu1 %v1427_v53 }
 0x524   : > { %v1559_v45 = vld [vmem:[%s5553_s5 + $0x27b0] sm:$0xff]  ;;  %4071 = vmatpush.msra.mxu2 %v1491_v12 }
 0x525   : > { %v1359_v35 = vld [vmem:[%s5553_s5 + $0x2170] sm:$0xff]  ;;  %4090 = vmatpush.msra.mxu3 %v1559_v45 }
 0x526   : > { %v1423_v40 = vld [vmem:[%s5553_s5 + $0x2370] sm:$0xff]  ;;  %4032 = vmatpush.msra.mxu0 %v1359_v35 }
 0x527   : > { %v1487_v18 = vld [vmem:[%s5553_s5 + $0x2570] sm:$0xff]  ;;  %4052 = vmatpush.msra.mxu1 %v1423_v40 }
 0x528   : > { %v1555_v57 = vld [vmem:[%s5553_s5 + $0x2790] sm:$0xff]  ;;  %4072 = vmatpush.msra.mxu2 %v1487_v18 }
 0x529   : > { %v1355_v54 = vld [vmem:[%s5553_s5 + $0x2150] sm:$0xff]  ;;  %4091 = vmatpush.msra.mxu3 %v1555_v57 }
 0x52a   : > { %v1419_v60 = vld [vmem:[%s5553_s5 + $0x2350] sm:$0xff]  ;;  %4033 = vmatpush.msra.mxu0 %v1355_v54 }
 0x52b   : > { %v1483_v51 = vld [vmem:[%s5553_s5 + $0x2550] sm:$0xff]  ;;  %4053 = vmatpush.msra.mxu1 %v1419_v60 }
 0x52c   : > { %v1551_v15 = vld [vmem:[%s5553_s5 + $0x2770] sm:$0xff]  ;;  %4073 = vmatpush.msra.mxu2 %v1483_v51 }
 0x52d   : > { %v1351_v32 = vld [vmem:[%s5553_s5 + $0x2130] sm:$0xff]  ;;  %4092 = vmatpush.msra.mxu3 %v1551_v15 }
 0x52e   : > { %v1415_v9 = vld [vmem:[%s5553_s5 + $0x2330] sm:$0xff]  ;;  %4034 = vmatpush.msra.mxu0 %v1351_v32 }
 0x52f   : > { %v1479_v22 = vld [vmem:[%s5553_s5 + $0x2530] sm:$0xff]  ;;  %4054 = vmatpush.msra.mxu1 %v1415_v9 }
 0x530   : > { %v1547_v52 = vld [vmem:[%s5553_s5 + $0x2750] sm:$0xff]  ;;  %4074 = vmatpush.msra.mxu2 %v1479_v22 }
 0x531   : > { %v1347_v27 = vld [vmem:[%s5553_s5 + $0x2110] sm:$0xff]  ;;  %4093 = vmatpush.msra.mxu3 %v1547_v52 }
 0x532   : > { %v1411_v53 = vld [vmem:[%s5553_s5 + $0x2310] sm:$0xff]  ;;  %4035 = vmatpush.msra.mxu0 %v1347_v27 }
 0x533   : > { %v1475_v12 = vld [vmem:[%s5553_s5 + $0x2510] sm:$0xff]  ;;  %4055 = vmatpush.msra.mxu1 %v1411_v53 }
 0x534   : > { %v1543_v45 = vld [vmem:[%s5553_s5 + $0x2730] sm:$0xff]  ;;  %4075 = vmatpush.msra.mxu2 %v1475_v12 }
 0x535   : > { %v1343_v35 = vld [vmem:[%s5553_s5 + $0x20f0] sm:$0xff]  ;;  %4094 = vmatpush.msra.mxu3 %v1543_v45 }
 0x536   : > { %v1407_v40 = vld [vmem:[%s5553_s5 + $0x22f0] sm:$0xff]  ;;  %4036 = vmatpush.msra.mxu0 %v1343_v35 }
 0x537   : > { %v1471_v18 = vld [vmem:[%s5553_s5 + $0x24f0] sm:$0xff]  ;;  %4056 = vmatpush.msra.mxu1 %v1407_v40 }
 0x538   : > { %v1539_v57 = vld [vmem:[%s5553_s5 + $0x2710] sm:$0xff]  ;;  %4076 = vmatpush.msra.mxu2 %v1471_v18 }
 0x539   : > { %v1339_v54 = vld [vmem:[%s5553_s5 + $0x20d0] sm:$0xff]  ;;  %4095 = vmatpush.msra.mxu3 %v1539_v57 }
 0x53a   : > { %v1403_v60 = vld [vmem:[%s5553_s5 + $0x22d0] sm:$0xff]  ;;  %4037 = vmatpush.msra.mxu0 %v1339_v54 }
 0x53b   : > { %v1467_v51 = vld [vmem:[%s5553_s5 + $0x24d0] sm:$0xff]  ;;  %4057 = vmatpush.msra.mxu1 %v1403_v60 }
 0x53c   : > { %v1535_v15 = vld [vmem:[%s5553_s5 + $0x26f0] sm:$0xff]  ;;  %4077 = vmatpush.msra.mxu2 %v1467_v51 }
 0x53d   : > { %v1335_v32 = vld [vmem:[%s5553_s5 + $0x20b0] sm:$0xff]  ;;  %4096 = vmatpush.msra.mxu3 %v1535_v15 }
 0x53e   : > { %v1399_v9 = vld [vmem:[%s5553_s5 + $0x22b0] sm:$0xff]  ;;  %4038 = vmatpush.msra.mxu0 %v1335_v32 }
 0x53f   : > { %v1463_v22 = vld [vmem:[%s5553_s5 + $0x24b0] sm:$0xff]  ;;  %4058 = vmatpush.msra.mxu1 %v1399_v9 }
 0x540   : > { %v1531_v52 = vld [vmem:[%s5553_s5 + $0x26d0] sm:$0xff]  ;;  %4078 = vmatpush.msra.mxu2 %v1463_v22 }
 0x541   : > { %v1331_v27 = vld [vmem:[%s5553_s5 + $0x2090] sm:$0xff]  ;;  %4097 = vmatpush.msra.mxu3 %v1531_v52 }
 0x542   : > { %v1395_v53 = vld [vmem:[%s5553_s5 + $0x2290] sm:$0xff]  ;;  %4039 = vmatpush.msra.mxu0 %v1331_v27 }
 0x543   : > { %v1459_v12 = vld [vmem:[%s5553_s5 + $0x2490] sm:$0xff]  ;;  %4059 = vmatpush.msra.mxu1 %v1395_v53 }
 0x544   : > { %v1527_v45 = vld [vmem:[%s5553_s5 + $0x26b0] sm:$0xff]  ;;  %4079 = vmatpush.msra.mxu2 %v1459_v12 }
 0x545   : > { %v1327_v35 = vld [vmem:[%s5553_s5 + $0x2070] sm:$0xff]  ;;  %4098 = vmatpush.msra.mxu3 %v1527_v45 }
 0x546   : > { %v1391_v40 = vld [vmem:[%s5553_s5 + $0x2270] sm:$0xff]  ;;  %4040 = vmatpush.msra.mxu0 %v1327_v35 }
 0x547   : > { %v1455_v18 = vld [vmem:[%s5553_s5 + $0x2470] sm:$0xff]  ;;  %4060 = vmatpush.msra.mxu1 %v1391_v40 }
 0x548   : > { %v1523_v57 = vld [vmem:[%s5553_s5 + $0x2690] sm:$0xff]  ;;  %4080 = vmatpush.msra.mxu2 %v1455_v18 }
 0x549   : > { %v1323_v54 = vld [vmem:[%s5553_s5 + $0x2050] sm:$0xff]  ;;  %4099 = vmatpush.msra.mxu3 %v1523_v57 }
 0x54a   : > { %v1387_v60 = vld [vmem:[%s5553_s5 + $0x2250] sm:$0xff]  ;;  %4041 = vmatpush.msra.mxu0 %v1323_v54 }
 0x54b   : > { %v1451_v51 = vld [vmem:[%s5553_s5 + $0x2450] sm:$0xff]  ;;  %4061 = vmatpush.msra.mxu1 %v1387_v60 }
 0x54c   : > { %v1519_v15 = vld [vmem:[%s5553_s5 + $0x2670] sm:$0xff]  ;;  %4081 = vmatpush.msra.mxu2 %v1451_v51 }
 0x54d   : > { %v1319_v32 = vld [vmem:[%s5553_s5 + $0x2030] sm:$0xff]  ;;  %4100 = vmatpush.msra.mxu3 %v1519_v15 }
 0x54e   : > { %v1383_v9 = vld [vmem:[%s5553_s5 + $0x2230] sm:$0xff]  ;;  %4042 = vmatpush.msra.mxu0 %v1319_v32 }
 0x54f   : > { %v1447_v22 = vld [vmem:[%s5553_s5 + $0x2430] sm:$0xff]  ;;  %4062 = vmatpush.msra.mxu1 %v1383_v9 }
 0x550   : > { %v1515_v52 = vld [vmem:[%s5553_s5 + $0x2650] sm:$0xff]  ;;  %4082 = vmatpush.msra.mxu2 %v1447_v22 }
 0x551   : > { %v1315_v27 = vld [vmem:[%s5553_s5 + $0x2010] sm:$0xff]  ;;  %4101 = vmatpush.msra.mxu3 %v1515_v52 }
 0x552   : > { %v1379_v53 = vld [vmem:[%s5553_s5 + $0x2210] sm:$0xff]  ;;  %4043 = vmatpush.msra.mxu0 %v1315_v27 }
 0x553   : > { %v1443_v12 = vld [vmem:[%s5553_s5 + $0x2410] sm:$0xff]  ;;  %4063 = vmatpush.msra.mxu1 %v1379_v53  ;;  %4044 = vmatmul.f32.vlgmr.msra.gmra.mxu0 %v5950_v61 }
 0x554   : > { %v1511_v45 = vld [vmem:[%s5553_s5 + $0x2630] sm:$0xff]  ;;  %4083 = vmatpush.msra.mxu2 %v1443_v12  ;;  %4064 = vmatmul.f32.vlgmr.msra.gmra.mxu1 %v5960_v7 }
 0x555   : > { %v1631_v35 = vld [vmem:[%s5553_s5 + $0x29f0] sm:$0xff]  ;;  %4102 = vmatpush.msra.mxu3 %v1511_v45  ;;  %4084 = vmatmul.f32.vlgmr.msra.gmra.mxu2 %v5952_v62 }
 0x556   : > { %v1695_v40 = vld [vmem:[%s5553_s5 + $0x2bf0] sm:$0xff]  ;;  %4108 = vmatpush.msrb.mxu0 %v1631_v35 }
 0x557   : > { %v1759_v18 = vld [vmem:[%s5553_s5 + $0x2df0] sm:$0xff]  ;;  %4128 = vmatpush.msrb.mxu1 %v1695_v40 }
 0x558   : > { %v1507_v57 = vld [vmem:[%s5553_s5 + $0x2610] sm:$0xff]  ;;  %4148 = vmatpush.msrb.mxu2 %v1759_v18 }
 0x559   : > { %v1627_v54 = vld [vmem:[%s5553_s5 + $0x29d0] sm:$0xff]  ;;  %4103 = vmatpush.msra.mxu3 %v1507_v57 }
 0x55a   : > { %v1691_v60 = vld [vmem:[%s5553_s5 + $0x2bd0] sm:$0xff]  ;;  %4104 = vmatmul.f32.vlgmr.msra.gmra.mxu3 %v5962_v8  ;;  %4109 = vmatpush.msrb.mxu0 %v1627_v54 }
 0x55b   : > { %v1755_v51 = vld [vmem:[%s5553_s5 + $0x2dd0] sm:$0xff]  ;;  %4129 = vmatpush.msrb.mxu1 %v1691_v60 }
 0x55c   : > { %v1823_v15 = vld [vmem:[%s5553_s5 + $0x2ff0] sm:$0xff]  ;;  %4149 = vmatpush.msrb.mxu2 %v1755_v51 }
 0x55d   : > { %v1623_v32 = vld [vmem:[%s5553_s5 + $0x29b0] sm:$0xff]  ;;  %4168 = vmatpush.msrb.mxu3 %v1823_v15 }
 0x55e   : > { %v1687_v9 = vld [vmem:[%s5553_s5 + $0x2bb0] sm:$0xff]  ;;  %4110 = vmatpush.msrb.mxu0 %v1623_v32 }
 0x55f   : > { %v1751_v22 = vld [vmem:[%s5553_s5 + $0x2db0] sm:$0xff]  ;;  %4130 = vmatpush.msrb.mxu1 %v1687_v9 }
 0x560   : > { %v1819_v52 = vld [vmem:[%s5553_s5 + $0x2fd0] sm:$0xff]  ;;  %4150 = vmatpush.msrb.mxu2 %v1751_v22 }
 0x561   : > { %v1619_v27 = vld [vmem:[%s5553_s5 + $0x2990] sm:$0xff]  ;;  %4169 = vmatpush.msrb.mxu3 %v1819_v52 }
 0x562   : > { %v1683_v53 = vld [vmem:[%s5553_s5 + $0x2b90] sm:$0xff]  ;;  %4111 = vmatpush.msrb.mxu0 %v1619_v27 }
 0x563   : > { %v1747_v12 = vld [vmem:[%s5553_s5 + $0x2d90] sm:$0xff]  ;;  %4131 = vmatpush.msrb.mxu1 %v1683_v53 }
 0x564   : > { %v1815_v45 = vld [vmem:[%s5553_s5 + $0x2fb0] sm:$0xff]  ;;  %4151 = vmatpush.msrb.mxu2 %v1747_v12 }
 0x565   : > { %v1615_v35 = vld [vmem:[%s5553_s5 + $0x2970] sm:$0xff]  ;;  %4170 = vmatpush.msrb.mxu3 %v1815_v45 }
 0x566   : > { %v1679_v40 = vld [vmem:[%s5553_s5 + $0x2b70] sm:$0xff]  ;;  %4112 = vmatpush.msrb.mxu0 %v1615_v35 }
 0x567   : > { %v1743_v18 = vld [vmem:[%s5553_s5 + $0x2d70] sm:$0xff]  ;;  %4132 = vmatpush.msrb.mxu1 %v1679_v40 }
 0x568   : > { %v1811_v57 = vld [vmem:[%s5553_s5 + $0x2f90] sm:$0xff]  ;;  %4152 = vmatpush.msrb.mxu2 %v1743_v18 }
 0x569   : > { %v1611_v54 = vld [vmem:[%s5553_s5 + $0x2950] sm:$0xff]  ;;  %4171 = vmatpush.msrb.mxu3 %v1811_v57 }
 0x56a   : > { %v1675_v60 = vld [vmem:[%s5553_s5 + $0x2b50] sm:$0xff]  ;;  %4113 = vmatpush.msrb.mxu0 %v1611_v54 }
 0x56b   : > { %v1739_v51 = vld [vmem:[%s5553_s5 + $0x2d50] sm:$0xff]  ;;  %4133 = vmatpush.msrb.mxu1 %v1675_v60 }
 0x56c   : > { %v1807_v15 = vld [vmem:[%s5553_s5 + $0x2f70] sm:$0xff]  ;;  %4153 = vmatpush.msrb.mxu2 %v1739_v51 }
 0x56d   : > { %v1607_v32 = vld [vmem:[%s5553_s5 + $0x2930] sm:$0xff]  ;;  %4172 = vmatpush.msrb.mxu3 %v1807_v15 }
 0x56e   : > { %v1671_v9 = vld [vmem:[%s5553_s5 + $0x2b30] sm:$0xff]  ;;  %4114 = vmatpush.msrb.mxu0 %v1607_v32 }
 0x56f   : > { %v1735_v22 = vld [vmem:[%s5553_s5 + $0x2d30] sm:$0xff]  ;;  %4134 = vmatpush.msrb.mxu1 %v1671_v9 }
 0x570   : > { %v1803_v52 = vld [vmem:[%s5553_s5 + $0x2f50] sm:$0xff]  ;;  %4154 = vmatpush.msrb.mxu2 %v1735_v22 }
 0x571   : > { %v1603_v27 = vld [vmem:[%s5553_s5 + $0x2910] sm:$0xff]  ;;  %4173 = vmatpush.msrb.mxu3 %v1803_v52 }
 0x572   : > { %v1667_v53 = vld [vmem:[%s5553_s5 + $0x2b10] sm:$0xff]  ;;  %4115 = vmatpush.msrb.mxu0 %v1603_v27 }
 0x573   : > { %v1731_v12 = vld [vmem:[%s5553_s5 + $0x2d10] sm:$0xff]  ;;  %4135 = vmatpush.msrb.mxu1 %v1667_v53 }
 0x574   : > { %v1799_v45 = vld [vmem:[%s5553_s5 + $0x2f30] sm:$0xff]  ;;  %4155 = vmatpush.msrb.mxu2 %v1731_v12 }
 0x575   : > { %v1599_v35 = vld [vmem:[%s5553_s5 + $0x28f0] sm:$0xff]  ;;  %4174 = vmatpush.msrb.mxu3 %v1799_v45 }
 0x576   : > { %v1663_v40 = vld [vmem:[%s5553_s5 + $0x2af0] sm:$0xff]  ;;  %4116 = vmatpush.msrb.mxu0 %v1599_v35 }
 0x577   : > { %v1727_v18 = vld [vmem:[%s5553_s5 + $0x2cf0] sm:$0xff]  ;;  %4136 = vmatpush.msrb.mxu1 %v1663_v40 }
 0x578   : > { %v1795_v57 = vld [vmem:[%s5553_s5 + $0x2f10] sm:$0xff]  ;;  %4156 = vmatpush.msrb.mxu2 %v1727_v18 }
 0x579   : > { %v1595_v54 = vld [vmem:[%s5553_s5 + $0x28d0] sm:$0xff]  ;;  %4175 = vmatpush.msrb.mxu3 %v1795_v57 }
 0x57a   : > { %v1659_v60 = vld [vmem:[%s5553_s5 + $0x2ad0] sm:$0xff]  ;;  %4117 = vmatpush.msrb.mxu0 %v1595_v54 }
 0x57b   : > { %v1723_v51 = vld [vmem:[%s5553_s5 + $0x2cd0] sm:$0xff]  ;;  %4137 = vmatpush.msrb.mxu1 %v1659_v60 }
 0x57c   : > { %v1791_v15 = vld [vmem:[%s5553_s5 + $0x2ef0] sm:$0xff]  ;;  %4157 = vmatpush.msrb.mxu2 %v1723_v51 }
 0x57d   : > { %v1591_v32 = vld [vmem:[%s5553_s5 + $0x28b0] sm:$0xff]  ;;  %4176 = vmatpush.msrb.mxu3 %v1791_v15 }
 0x57e   : > { %v1655_v9 = vld [vmem:[%s5553_s5 + $0x2ab0] sm:$0xff]  ;;  %4118 = vmatpush.msrb.mxu0 %v1591_v32 }
 0x57f   : > { %v1719_v22 = vld [vmem:[%s5553_s5 + $0x2cb0] sm:$0xff]  ;;  %4138 = vmatpush.msrb.mxu1 %v1655_v9 }
 0x580   : > { %v1787_v52 = vld [vmem:[%s5553_s5 + $0x2ed0] sm:$0xff]  ;;  %4158 = vmatpush.msrb.mxu2 %v1719_v22 }
 0x581   : > { %v1587_v27 = vld [vmem:[%s5553_s5 + $0x2890] sm:$0xff]  ;;  %4177 = vmatpush.msrb.mxu3 %v1787_v52 }
 0x582   : > { %v1651_v53 = vld [vmem:[%s5553_s5 + $0x2a90] sm:$0xff]  ;;  %4119 = vmatpush.msrb.mxu0 %v1587_v27 }
 0x583   : > { %v1715_v12 = vld [vmem:[%s5553_s5 + $0x2c90] sm:$0xff]  ;;  %4139 = vmatpush.msrb.mxu1 %v1651_v53 }
 0x584   : > { %v1783_v45 = vld [vmem:[%s5553_s5 + $0x2eb0] sm:$0xff]  ;;  %4159 = vmatpush.msrb.mxu2 %v1715_v12 }
 0x585   : > { %v1583_v35 = vld [vmem:[%s5553_s5 + $0x2870] sm:$0xff]  ;;  %4178 = vmatpush.msrb.mxu3 %v1783_v45 }
 0x586   : > { %v1647_v40 = vld [vmem:[%s5553_s5 + $0x2a70] sm:$0xff]  ;;  %4120 = vmatpush.msrb.mxu0 %v1583_v35 }
 0x587   : > { %v1711_v18 = vld [vmem:[%s5553_s5 + $0x2c70] sm:$0xff]  ;;  %4140 = vmatpush.msrb.mxu1 %v1647_v40 }
 0x588   : > { %v1779_v57 = vld [vmem:[%s5553_s5 + $0x2e90] sm:$0xff]  ;;  %4160 = vmatpush.msrb.mxu2 %v1711_v18 }
 0x589   : > { %v1579_v54 = vld [vmem:[%s5553_s5 + $0x2850] sm:$0xff]  ;;  %4179 = vmatpush.msrb.mxu3 %v1779_v57 }
 0x58a   : > { %v1643_v60 = vld [vmem:[%s5553_s5 + $0x2a50] sm:$0xff]  ;;  %4121 = vmatpush.msrb.mxu0 %v1579_v54 }
 0x58b   : > { %v1707_v51 = vld [vmem:[%s5553_s5 + $0x2c50] sm:$0xff]  ;;  %4141 = vmatpush.msrb.mxu1 %v1643_v60 }
 0x58c   : > { %v1775_v15 = vld [vmem:[%s5553_s5 + $0x2e70] sm:$0xff]  ;;  %4161 = vmatpush.msrb.mxu2 %v1707_v51 }
 0x58d   : > { %v1575_v32 = vld [vmem:[%s5553_s5 + $0x2830] sm:$0xff]  ;;  %4180 = vmatpush.msrb.mxu3 %v1775_v15 }
 0x58e   : > { %v1639_v9 = vld [vmem:[%s5553_s5 + $0x2a30] sm:$0xff]  ;;  %4122 = vmatpush.msrb.mxu0 %v1575_v32 }
 0x58f   : > { %v1703_v22 = vld [vmem:[%s5553_s5 + $0x2c30] sm:$0xff]  ;;  %4142 = vmatpush.msrb.mxu1 %v1639_v9 }
 0x590   : > { %v1771_v52 = vld [vmem:[%s5553_s5 + $0x2e50] sm:$0xff]  ;;  %4162 = vmatpush.msrb.mxu2 %v1703_v22 }
 0x591   : > { %v1571_v27 = vld [vmem:[%s5553_s5 + $0x2810] sm:$0xff]  ;;  %4181 = vmatpush.msrb.mxu3 %v1771_v52 }
 0x592   : > { %v1635_v53 = vld [vmem:[%s5553_s5 + $0x2a10] sm:$0xff]  ;;  %4123 = vmatpush.msrb.mxu0 %v1571_v27 }
 0x593   : > { %v1699_v12 = vld [vmem:[%s5553_s5 + $0x2c10] sm:$0xff]  ;;  %4143 = vmatpush.msrb.mxu1 %v1635_v53  ;;  %4124 = vmatmul.f32.vlgmr.msrb.gmra.mxu0 %v6029_v30 }
 0x594   : > { %v1767_v45 = vld [vmem:[%s5553_s5 + $0x2e30] sm:$0xff]  ;;  %4163 = vmatpush.msrb.mxu2 %v1699_v12  ;;  %4144 = vmatmul.f32.vlgmr.msrb.gmra.mxu1 %v6039_v38 }
 0x595   : > { %v1887_v35 = vld [vmem:[%s5553_s5 + $0x31f0] sm:$0xff]  ;;  %4182 = vmatpush.msrb.mxu3 %v1767_v45  ;;  %4164 = vmatmul.f32.vlgmr.msrb.gmra.mxu2 %v6031_v31 }
 0x596   : > { %v1951_v40 = vld [vmem:[%s5553_s5 + $0x33f0] sm:$0xff]  ;;  %4188 = vmatpush.msra.mxu0 %v1887_v35 }
 0x597   : > { %v2015_v18 = vld [vmem:[%s5553_s5 + $0x35f0] sm:$0xff]  ;;  %4208 = vmatpush.msra.mxu1 %v1951_v40 }
 0x598   : > { %v1763_v57 = vld [vmem:[%s5553_s5 + $0x2e10] sm:$0xff]  ;;  %4228 = vmatpush.msra.mxu2 %v2015_v18 }
 0x599   : > { %v1883_v54 = vld [vmem:[%s5553_s5 + $0x31d0] sm:$0xff]  ;;  %4183 = vmatpush.msrb.mxu3 %v1763_v57 }
 0x59a   : > { %v1947_v60 = vld [vmem:[%s5553_s5 + $0x33d0] sm:$0xff]  ;;  %4184 = vmatmul.f32.vlgmr.msrb.gmra.mxu3 %v6041_v39  ;;  %4189 = vmatpush.msra.mxu0 %v1883_v54 }
 0x59b   : > { %v2011_v51 = vld [vmem:[%s5553_s5 + $0x35d0] sm:$0xff]  ;;  %4209 = vmatpush.msra.mxu1 %v1947_v60 }
 0x59c   : > { %v2079_v15 = vld [vmem:[%s5553_s5 + $0x37f0] sm:$0xff]  ;;  %4229 = vmatpush.msra.mxu2 %v2011_v51 }
 0x59d   : > { %v1879_v32 = vld [vmem:[%s5553_s5 + $0x31b0] sm:$0xff]  ;;  %4248 = vmatpush.msra.mxu3 %v2079_v15 }
 0x59e   : > { %v1943_v9 = vld [vmem:[%s5553_s5 + $0x33b0] sm:$0xff]  ;;  %4190 = vmatpush.msra.mxu0 %v1879_v32 }
 0x59f   : > { %v2007_v22 = vld [vmem:[%s5553_s5 + $0x35b0] sm:$0xff]  ;;  %4210 = vmatpush.msra.mxu1 %v1943_v9 }
 0x5a0   : > { %v2075_v52 = vld [vmem:[%s5553_s5 + $0x37d0] sm:$0xff]  ;;  %4230 = vmatpush.msra.mxu2 %v2007_v22 }
 0x5a1   : > { %v1875_v27 = vld [vmem:[%s5553_s5 + $0x3190] sm:$0xff]  ;;  %4249 = vmatpush.msra.mxu3 %v2075_v52 }
 0x5a2   : > { %v1939_v53 = vld [vmem:[%s5553_s5 + $0x3390] sm:$0xff]  ;;  %4191 = vmatpush.msra.mxu0 %v1875_v27 }
 0x5a3   : > { %v2003_v12 = vld [vmem:[%s5553_s5 + $0x3590] sm:$0xff]  ;;  %4211 = vmatpush.msra.mxu1 %v1939_v53 }
 0x5a4   : > { %v2071_v45 = vld [vmem:[%s5553_s5 + $0x37b0] sm:$0xff]  ;;  %4231 = vmatpush.msra.mxu2 %v2003_v12 }
 0x5a5   : > { %v1871_v35 = vld [vmem:[%s5553_s5 + $0x3170] sm:$0xff]  ;;  %4250 = vmatpush.msra.mxu3 %v2071_v45 }
 0x5a6   : > { %v1935_v40 = vld [vmem:[%s5553_s5 + $0x3370] sm:$0xff]  ;;  %4192 = vmatpush.msra.mxu0 %v1871_v35 }
 0x5a7   : > { %v1999_v18 = vld [vmem:[%s5553_s5 + $0x3570] sm:$0xff]  ;;  %4212 = vmatpush.msra.mxu1 %v1935_v40 }
 0x5a8   : > { %v2067_v57 = vld [vmem:[%s5553_s5 + $0x3790] sm:$0xff]  ;;  %4232 = vmatpush.msra.mxu2 %v1999_v18 }
 0x5a9   : > { %v1867_v54 = vld [vmem:[%s5553_s5 + $0x3150] sm:$0xff]  ;;  %4251 = vmatpush.msra.mxu3 %v2067_v57 }
 0x5aa   : > { %v1931_v60 = vld [vmem:[%s5553_s5 + $0x3350] sm:$0xff]  ;;  %4193 = vmatpush.msra.mxu0 %v1867_v54 }
 0x5ab   : > { %v1995_v51 = vld [vmem:[%s5553_s5 + $0x3550] sm:$0xff]  ;;  %4213 = vmatpush.msra.mxu1 %v1931_v60 }
 0x5ac   : > { %v2063_v15 = vld [vmem:[%s5553_s5 + $0x3770] sm:$0xff]  ;;  %4233 = vmatpush.msra.mxu2 %v1995_v51 }
 0x5ad   : > { %v1863_v32 = vld [vmem:[%s5553_s5 + $0x3130] sm:$0xff]  ;;  %4252 = vmatpush.msra.mxu3 %v2063_v15 }
 0x5ae   : > { %v1927_v9 = vld [vmem:[%s5553_s5 + $0x3330] sm:$0xff]  ;;  %4194 = vmatpush.msra.mxu0 %v1863_v32 }
 0x5af   : > { %v1991_v22 = vld [vmem:[%s5553_s5 + $0x3530] sm:$0xff]  ;;  %4214 = vmatpush.msra.mxu1 %v1927_v9 }
 0x5b0   : > { %v2059_v52 = vld [vmem:[%s5553_s5 + $0x3750] sm:$0xff]  ;;  %4234 = vmatpush.msra.mxu2 %v1991_v22 }
 0x5b1   : > { %v1859_v27 = vld [vmem:[%s5553_s5 + $0x3110] sm:$0xff]  ;;  %4253 = vmatpush.msra.mxu3 %v2059_v52 }
 0x5b2   : > { %v1923_v53 = vld [vmem:[%s5553_s5 + $0x3310] sm:$0xff]  ;;  %4195 = vmatpush.msra.mxu0 %v1859_v27 }
 0x5b3   : > { %v1987_v12 = vld [vmem:[%s5553_s5 + $0x3510] sm:$0xff]  ;;  %4215 = vmatpush.msra.mxu1 %v1923_v53 }
 0x5b4   : > { %v2055_v45 = vld [vmem:[%s5553_s5 + $0x3730] sm:$0xff]  ;;  %4235 = vmatpush.msra.mxu2 %v1987_v12 }
 0x5b5   : > { %v1855_v35 = vld [vmem:[%s5553_s5 + $0x30f0] sm:$0xff]  ;;  %4254 = vmatpush.msra.mxu3 %v2055_v45 }
 0x5b6   : > { %v1919_v40 = vld [vmem:[%s5553_s5 + $0x32f0] sm:$0xff]  ;;  %4196 = vmatpush.msra.mxu0 %v1855_v35 }
 0x5b7   : > { %v1983_v18 = vld [vmem:[%s5553_s5 + $0x34f0] sm:$0xff]  ;;  %4216 = vmatpush.msra.mxu1 %v1919_v40 }
 0x5b8   : > { %v2051_v57 = vld [vmem:[%s5553_s5 + $0x3710] sm:$0xff]  ;;  %4236 = vmatpush.msra.mxu2 %v1983_v18 }
 0x5b9   : > { %v1851_v54 = vld [vmem:[%s5553_s5 + $0x30d0] sm:$0xff]  ;;  %4255 = vmatpush.msra.mxu3 %v2051_v57 }
 0x5ba   : > { %v1915_v60 = vld [vmem:[%s5553_s5 + $0x32d0] sm:$0xff]  ;;  %4197 = vmatpush.msra.mxu0 %v1851_v54 }
 0x5bb   : > { %v1979_v51 = vld [vmem:[%s5553_s5 + $0x34d0] sm:$0xff]  ;;  %4217 = vmatpush.msra.mxu1 %v1915_v60 }
 0x5bc   : > { %v2047_v15 = vld [vmem:[%s5553_s5 + $0x36f0] sm:$0xff]  ;;  %4237 = vmatpush.msra.mxu2 %v1979_v51 }
 0x5bd   : > { %v1847_v32 = vld [vmem:[%s5553_s5 + $0x30b0] sm:$0xff]  ;;  %4256 = vmatpush.msra.mxu3 %v2047_v15 }
 0x5be   : > { %v1911_v9 = vld [vmem:[%s5553_s5 + $0x32b0] sm:$0xff]  ;;  %4198 = vmatpush.msra.mxu0 %v1847_v32 }
 0x5bf   : > { %v1975_v22 = vld [vmem:[%s5553_s5 + $0x34b0] sm:$0xff]  ;;  %4218 = vmatpush.msra.mxu1 %v1911_v9 }
 0x5c0   : > { %v2043_v52 = vld [vmem:[%s5553_s5 + $0x36d0] sm:$0xff]  ;;  %4238 = vmatpush.msra.mxu2 %v1975_v22 }
 0x5c1   : > { %v1843_v27 = vld [vmem:[%s5553_s5 + $0x3090] sm:$0xff]  ;;  %4257 = vmatpush.msra.mxu3 %v2043_v52 }
 0x5c2   : > { %v1907_v53 = vld [vmem:[%s5553_s5 + $0x3290] sm:$0xff]  ;;  %4199 = vmatpush.msra.mxu0 %v1843_v27 }
 0x5c3   : > { %v1971_v12 = vld [vmem:[%s5553_s5 + $0x3490] sm:$0xff]  ;;  %4219 = vmatpush.msra.mxu1 %v1907_v53 }
 0x5c4   : > { %v2039_v45 = vld [vmem:[%s5553_s5 + $0x36b0] sm:$0xff]  ;;  %4239 = vmatpush.msra.mxu2 %v1971_v12 }
 0x5c5   : > { %v1839_v35 = vld [vmem:[%s5553_s5 + $0x3070] sm:$0xff]  ;;  %4258 = vmatpush.msra.mxu3 %v2039_v45 }
 0x5c6   : > { %v1903_v40 = vld [vmem:[%s5553_s5 + $0x3270] sm:$0xff]  ;;  %4200 = vmatpush.msra.mxu0 %v1839_v35 }
 0x5c7   : > { %v1967_v18 = vld [vmem:[%s5553_s5 + $0x3470] sm:$0xff]  ;;  %4220 = vmatpush.msra.mxu1 %v1903_v40 }
 0x5c8   : > { %v2035_v57 = vld [vmem:[%s5553_s5 + $0x3690] sm:$0xff]  ;;  %4240 = vmatpush.msra.mxu2 %v1967_v18 }
 0x5c9   : > { %v1835_v54 = vld [vmem:[%s5553_s5 + $0x3050] sm:$0xff]  ;;  %4259 = vmatpush.msra.mxu3 %v2035_v57 }
 0x5ca   : > { %v1899_v60 = vld [vmem:[%s5553_s5 + $0x3250] sm:$0xff]  ;;  %4201 = vmatpush.msra.mxu0 %v1835_v54  ;;  %v5310_v54 = vld.sshfl [vmem:[#allocation1] sm:$0xff pattern:$0x73625140] }
 0x5cb   : > { %v1963_v51 = vld [vmem:[%s5553_s5 + $0x3450] sm:$0xff]  ;;  %4221 = vmatpush.msra.mxu1 %v1899_v60  ;;  %v5311_v60 = vld.sshfl [vmem:[#allocation1 + $0x10] sm:$0xff pattern:$0x73625140] }
 0x5cc   : > { %v2031_v15 = vld [vmem:[%s5553_s5 + $0x3670] sm:$0xff]  ;;  %4241 = vmatpush.msra.mxu2 %v1963_v51 }
 0x5cd   : > { %v1831_v32 = vld [vmem:[%s5553_s5 + $0x3030] sm:$0xff]  ;;  %4260 = vmatpush.msra.mxu3 %v2031_v15 }
 0x5ce   : > { %v1895_v9 = vld [vmem:[%s5553_s5 + $0x3230] sm:$0xff]  ;;  %4202 = vmatpush.msra.mxu0 %v1831_v32 }
 0x5cf   : > { %v1959_v22 = vld [vmem:[%s5553_s5 + $0x3430] sm:$0xff]  ;;  %4222 = vmatpush.msra.mxu1 %v1895_v9 }
 0x5d0   : > { %v2027_v52 = vld [vmem:[%s5553_s5 + $0x3650] sm:$0xff]  ;;  %4242 = vmatpush.msra.mxu2 %v1959_v22  ;;  %v5312_v22 = vld.sshfl [vmem:[#allocation1 + $0x8] sm:$0xff pattern:$0x73625140] }
 0x5d1   : > { %v1827_v27 = vld [vmem:[%s5553_s5 + $0x3010] sm:$0xff]  ;;  %4261 = vmatpush.msra.mxu3 %v2027_v52 }
 0x5d2   : > { %v1891_v53 = vld [vmem:[%s5553_s5 + $0x3210] sm:$0xff]  ;;  %4203 = vmatpush.msra.mxu0 %v1827_v27 }
 0x5d3   : > { %v1955_v12 = vld [vmem:[%s5553_s5 + $0x3410] sm:$0xff]  ;;  %4223 = vmatpush.msra.mxu1 %v1891_v53  ;;  %4204 = vmatmul.f32.vlgmr.msra.gmra.mxu0 %v5310_v54 }
 0x5d4   : > { %v2023_v45 = vld [vmem:[%s5553_s5 + $0x3630] sm:$0xff]  ;;  %4243 = vmatpush.msra.mxu2 %v1955_v12  ;;  %4224 = vmatmul.f32.vlgmr.msra.gmra.mxu1 %v5312_v22 }
 0x5d5   : > { %v2143_v35 = vld [vmem:[%s5553_s5 + $0x39f0] sm:$0xff]  ;;  %4262 = vmatpush.msra.mxu3 %v2023_v45  ;;  %4244 = vmatmul.f32.vlgmr.msra.gmra.mxu2 %v5311_v60 }
 0x5d6   : > { %v2207_v40 = vld [vmem:[%s5553_s5 + $0x3bf0] sm:$0xff]  ;;  %4268 = vmatpush.msrb.mxu0 %v2143_v35 }
 0x5d7   : > { %v2271_v18 = vld [vmem:[%s5553_s5 + $0x3df0] sm:$0xff]  ;;  %4288 = vmatpush.msrb.mxu1 %v2207_v40 }
 0x5d8   : > { %v2019_v57 = vld [vmem:[%s5553_s5 + $0x3610] sm:$0xff]  ;;  %4308 = vmatpush.msrb.mxu2 %v2271_v18 }
 0x5d9   : > { %v2139_v51 = vld [vmem:[%s5553_s5 + $0x39d0] sm:$0xff]  ;;  %4263 = vmatpush.msra.mxu3 %v2019_v57 }
 0x5da   : > { %v2203_v15 = vld [vmem:[%s5553_s5 + $0x3bd0] sm:$0xff]  ;;  %4269 = vmatpush.msrb.mxu0 %v2139_v51 }
 0x5db   : > { %v2267_v32 = vld [vmem:[%s5553_s5 + $0x3dd0] sm:$0xff]  ;;  %4289 = vmatpush.msrb.mxu1 %v2203_v15 }
 0x5dc   : > { %v2335_v9 = vld [vmem:[%s5553_s5 + $0x3ff0] sm:$0xff]  ;;  %4309 = vmatpush.msrb.mxu2 %v2267_v32 }
 0x5dd   : > { %v5313_v52 = vld.sshfl [vmem:[#allocation1 + $0x18] sm:$0xff pattern:$0x73625140]  ;;  %4328 = vmatpush.msrb.mxu3 %v2335_v9 }
 0x5de   : > { %4264 = vmatmul.f32.vlgmr.msra.gmra.mxu3 %v5313_v52  ;;  %v2135_v27 = vld [vmem:[%s5553_s5 + $0x39b0] sm:$0xff] }
 0x5df   : > { %v2199_v53 = vld [vmem:[%s5553_s5 + $0x3bb0] sm:$0xff]  ;;  %4270 = vmatpush.msrb.mxu0 %v2135_v27 }
 0x5e0   : > { %v2263_v12 = vld [vmem:[%s5553_s5 + $0x3db0] sm:$0xff]  ;;  %4290 = vmatpush.msrb.mxu1 %v2199_v53 }
 0x5e1   : > { %v2331_v45 = vld [vmem:[%s5553_s5 + $0x3fd0] sm:$0xff]  ;;  %4310 = vmatpush.msrb.mxu2 %v2263_v12 }
 0x5e2   : > { %v2131_v35 = vld [vmem:[%s5553_s5 + $0x3990] sm:$0xff]  ;;  %4329 = vmatpush.msrb.mxu3 %v2331_v45 }
 0x5e3   : > { %v2195_v40 = vld [vmem:[%s5553_s5 + $0x3b90] sm:$0xff]  ;;  %4271 = vmatpush.msrb.mxu0 %v2131_v35 }
 0x5e4   : > { %v2259_v18 = vld [vmem:[%s5553_s5 + $0x3d90] sm:$0xff]  ;;  %4291 = vmatpush.msrb.mxu1 %v2195_v40 }
 0x5e5   : > { %v2327_v57 = vld [vmem:[%s5553_s5 + $0x3fb0] sm:$0xff]  ;;  %4311 = vmatpush.msrb.mxu2 %v2259_v18 }
 0x5e6   : > { %v2127_v54 = vld [vmem:[%s5553_s5 + $0x3970] sm:$0xff]  ;;  %4330 = vmatpush.msrb.mxu3 %v2327_v57 }
 0x5e7   : > { %v2191_v60 = vld [vmem:[%s5553_s5 + $0x3b70] sm:$0xff]  ;;  %4272 = vmatpush.msrb.mxu0 %v2127_v54 }
 0x5e8   : > { %v2255_v51 = vld [vmem:[%s5553_s5 + $0x3d70] sm:$0xff]  ;;  %4292 = vmatpush.msrb.mxu1 %v2191_v60 }
 0x5e9   : > { %v2323_v15 = vld [vmem:[%s5553_s5 + $0x3f90] sm:$0xff]  ;;  %4312 = vmatpush.msrb.mxu2 %v2255_v51 }
 0x5ea   : > { %v2123_v32 = vld [vmem:[%s5553_s5 + $0x3950] sm:$0xff]  ;;  %4331 = vmatpush.msrb.mxu3 %v2323_v15 }
 0x5eb   : > { %v2187_v9 = vld [vmem:[%s5553_s5 + $0x3b50] sm:$0xff]  ;;  %4273 = vmatpush.msrb.mxu0 %v2123_v32 }
 0x5ec   : > { %v2251_v22 = vld [vmem:[%s5553_s5 + $0x3d50] sm:$0xff]  ;;  %4293 = vmatpush.msrb.mxu1 %v2187_v9 }
 0x5ed   : > { %v2319_v52 = vld [vmem:[%s5553_s5 + $0x3f70] sm:$0xff]  ;;  %4313 = vmatpush.msrb.mxu2 %v2251_v22 }
 0x5ee   : > { %v2119_v27 = vld [vmem:[%s5553_s5 + $0x3930] sm:$0xff]  ;;  %4332 = vmatpush.msrb.mxu3 %v2319_v52 }
 0x5ef   : > { %v2183_v53 = vld [vmem:[%s5553_s5 + $0x3b30] sm:$0xff]  ;;  %4274 = vmatpush.msrb.mxu0 %v2119_v27 }
 0x5f0   : > { %v2247_v12 = vld [vmem:[%s5553_s5 + $0x3d30] sm:$0xff]  ;;  %4294 = vmatpush.msrb.mxu1 %v2183_v53 }
 0x5f1   : > { %v2315_v45 = vld [vmem:[%s5553_s5 + $0x3f50] sm:$0xff]  ;;  %4314 = vmatpush.msrb.mxu2 %v2247_v12 }
 0x5f2   : > { %v2115_v35 = vld [vmem:[%s5553_s5 + $0x3910] sm:$0xff]  ;;  %4333 = vmatpush.msrb.mxu3 %v2315_v45 }
 0x5f3   : > { %v2179_v40 = vld [vmem:[%s5553_s5 + $0x3b10] sm:$0xff]  ;;  %4275 = vmatpush.msrb.mxu0 %v2115_v35 }
 0x5f4   : > { %v2243_v18 = vld [vmem:[%s5553_s5 + $0x3d10] sm:$0xff]  ;;  %4295 = vmatpush.msrb.mxu1 %v2179_v40 }
 0x5f5   : > { %v2311_v57 = vld [vmem:[%s5553_s5 + $0x3f30] sm:$0xff]  ;;  %4315 = vmatpush.msrb.mxu2 %v2243_v18 }
 0x5f6   : > { %v2111_v54 = vld [vmem:[%s5553_s5 + $0x38f0] sm:$0xff]  ;;  %4334 = vmatpush.msrb.mxu3 %v2311_v57 }
 0x5f7   : > { %v2175_v60 = vld [vmem:[%s5553_s5 + $0x3af0] sm:$0xff]  ;;  %4276 = vmatpush.msrb.mxu0 %v2111_v54 }
 0x5f8   : > { %v2239_v51 = vld [vmem:[%s5553_s5 + $0x3cf0] sm:$0xff]  ;;  %4296 = vmatpush.msrb.mxu1 %v2175_v60 }
 0x5f9   : > { %v2307_v15 = vld [vmem:[%s5553_s5 + $0x3f10] sm:$0xff]  ;;  %4316 = vmatpush.msrb.mxu2 %v2239_v51 }
 0x5fa   : > { %v2107_v32 = vld [vmem:[%s5553_s5 + $0x38d0] sm:$0xff]  ;;  %4335 = vmatpush.msrb.mxu3 %v2307_v15 }
 0x5fb   : > { %v2171_v9 = vld [vmem:[%s5553_s5 + $0x3ad0] sm:$0xff]  ;;  %4277 = vmatpush.msrb.mxu0 %v2107_v32 }
 0x5fc   : > { %v2235_v22 = vld [vmem:[%s5553_s5 + $0x3cd0] sm:$0xff]  ;;  %4297 = vmatpush.msrb.mxu1 %v2171_v9 }
 0x5fd   : > { %v2303_v52 = vld [vmem:[%s5553_s5 + $0x3ef0] sm:$0xff]  ;;  %4317 = vmatpush.msrb.mxu2 %v2235_v22 }
 0x5fe   : > { %v2103_v27 = vld [vmem:[%s5553_s5 + $0x38b0] sm:$0xff]  ;;  %4336 = vmatpush.msrb.mxu3 %v2303_v52 }
 0x5ff   : > { %v2167_v53 = vld [vmem:[%s5553_s5 + $0x3ab0] sm:$0xff]  ;;  %4278 = vmatpush.msrb.mxu0 %v2103_v27 }
 0x600   : > { %v2231_v12 = vld [vmem:[%s5553_s5 + $0x3cb0] sm:$0xff]  ;;  %4298 = vmatpush.msrb.mxu1 %v2167_v53 }
 0x601   : > { %v2299_v45 = vld [vmem:[%s5553_s5 + $0x3ed0] sm:$0xff]  ;;  %4318 = vmatpush.msrb.mxu2 %v2231_v12 }
 0x602   : > { %v2099_v35 = vld [vmem:[%s5553_s5 + $0x3890] sm:$0xff]  ;;  %4337 = vmatpush.msrb.mxu3 %v2299_v45 }
 0x603   : > { %v2163_v40 = vld [vmem:[%s5553_s5 + $0x3a90] sm:$0xff]  ;;  %4279 = vmatpush.msrb.mxu0 %v2099_v35 }
 0x604   : > { %v2227_v18 = vld [vmem:[%s5553_s5 + $0x3c90] sm:$0xff]  ;;  %4299 = vmatpush.msrb.mxu1 %v2163_v40 }
 0x605   : > { %v2295_v57 = vld [vmem:[%s5553_s5 + $0x3eb0] sm:$0xff]  ;;  %4319 = vmatpush.msrb.mxu2 %v2227_v18 }
 0x606   : > { %v2095_v54 = vld [vmem:[%s5553_s5 + $0x3870] sm:$0xff]  ;;  %4338 = vmatpush.msrb.mxu3 %v2295_v57 }
 0x607   : > { %v2159_v60 = vld [vmem:[%s5553_s5 + $0x3a70] sm:$0xff]  ;;  %4280 = vmatpush.msrb.mxu0 %v2095_v54  ;;  %v352_v54 = vld [vmem:[%s5553_s5 + $0x1f8] sm:$0xff] }
 0x608   : > { %v2223_v51 = vld [vmem:[%s5553_s5 + $0x3c70] sm:$0xff]  ;;  %4300 = vmatpush.msrb.mxu1 %v2159_v60  ;;  %v416_v60 = vld [vmem:[%s5553_s5 + $0x3f8] sm:$0xff] }
 0x609   : > { %v2291_v15 = vld [vmem:[%s5553_s5 + $0x3e90] sm:$0xff]  ;;  %4320 = vmatpush.msrb.mxu2 %v2223_v51  ;;  %v480_v51 = vld [vmem:[%s5553_s5 + $0x5f8] sm:$0xff] }
 0x60a   : > { %v2091_v32 = vld [vmem:[%s5553_s5 + $0x3850] sm:$0xff]  ;;  %4339 = vmatpush.msrb.mxu3 %v2291_v15 }
 0x60b   : > { %v2155_v9 = vld [vmem:[%s5553_s5 + $0x3a50] sm:$0xff]  ;;  %4281 = vmatpush.msrb.mxu0 %v2091_v32  ;;  %v5314_v32 = vld.sshfl [vmem:[#allocation1 + $0x20] sm:$0xff pattern:$0x73625140] }
 0x60c   : > { %v2219_v22 = vld [vmem:[%s5553_s5 + $0x3c50] sm:$0xff]  ;;  %4301 = vmatpush.msrb.mxu1 %v2155_v9  ;;  %v5315_v9 = vld.sshfl [vmem:[#allocation1 + $0x30] sm:$0xff pattern:$0x73625140] }
 0x60d   : > { %v2287_v52 = vld [vmem:[%s5553_s5 + $0x3e70] sm:$0xff]  ;;  %4321 = vmatpush.msrb.mxu2 %v2219_v22  ;;  %v348_v22 = vld [vmem:[%s5553_s5 + $0x1d8] sm:$0xff] }
 0x60e   : > { %v2087_v27 = vld [vmem:[%s5553_s5 + $0x3830] sm:$0xff]  ;;  %4340 = vmatpush.msrb.mxu3 %v2287_v52  ;;  %v412_v52 = vld [vmem:[%s5553_s5 + $0x3d8] sm:$0xff] }
 0x60f   : > { %v2151_v53 = vld [vmem:[%s5553_s5 + $0x3a30] sm:$0xff]  ;;  %4282 = vmatpush.msrb.mxu0 %v2087_v27  ;;  %v476_v27 = vld [vmem:[%s5553_s5 + $0x5d8] sm:$0xff] }
 0x610   : > { %v2215_v12 = vld [vmem:[%s5553_s5 + $0x3c30] sm:$0xff]  ;;  %4302 = vmatpush.msrb.mxu1 %v2151_v53  ;;  %v544_v53 = vld [vmem:[%s5553_s5 + $0x7f8] sm:$0xff] }
 0x611   : > { %v2283_v45 = vld [vmem:[%s5553_s5 + $0x3e50] sm:$0xff]  ;;  %4322 = vmatpush.msrb.mxu2 %v2215_v12  ;;  %v5316_v12 = vld.sshfl [vmem:[#allocation1 + $0x28] sm:$0xff pattern:$0x73625140] }
 0x612   : > { %v2083_v35 = vld [vmem:[%s5553_s5 + $0x3810] sm:$0xff]  ;;  %4341 = vmatpush.msrb.mxu3 %v2283_v45 }
 0x613   : > { %v2147_v40 = vld [vmem:[%s5553_s5 + $0x3a10] sm:$0xff]  ;;  %4283 = vmatpush.msrb.mxu0 %v2083_v35  ;;  %v344_v35 = vld [vmem:[%s5553_s5 + $0x1b8] sm:$0xff] }
 0x614   : > { %v2211_v18 = vld [vmem:[%s5553_s5 + $0x3c10] sm:$0xff]  ;;  %4303 = vmatpush.msrb.mxu1 %v2147_v40  ;;  %4284 = vmatmul.f32.vlgmr.msrb.gmra.mxu0 %v5314_v32  ;;  %v408_v40 = vld [vmem:[%s5553_s5 + $0x3b8] sm:$0xff] }
 0x615   : > { %v2279_v57 = vld [vmem:[%s5553_s5 + $0x3e30] sm:$0xff]  ;;  %4323 = vmatpush.msrb.mxu2 %v2211_v18  ;;  %4348 = vmatpush.msra.mxu0 %v352_v54  ;;  %v472_v18 = vld [vmem:[%s5553_s5 + $0x5b8] sm:$0xff] }
 0x616   : > { %4342 = vmatpush.msrb.mxu3 %v2279_v57  ;;  %v2275_v15 = vld [vmem:[%s5553_s5 + $0x3e10] sm:$0xff]  ;;  %4324 = vmatmul.f32.vlgmr.msrb.gmra.mxu2 %v5315_v9  ;;  %v540_v57 = vld [vmem:[%s5553_s5 + $0x7d8] sm:$0xff] }
 0x617   : > { %4368 = vmatpush.msra.mxu1 %v416_v60  ;;  %4388 = vmatpush.msra.mxu2 %v480_v51  ;;  %v5317_v45 = vld.sshfl [vmem:[#allocation1 + $0x38] sm:$0xff pattern:$0x73625140]  ;;  %v340_v54 = vld [vmem:[%s5553_s5 + $0x198] sm:$0xff] }
 0x618   : > { %4343 = vmatpush.msrb.mxu3 %v2275_v15  ;;  %4304 = vmatmul.f32.vlgmr.msrb.gmra.mxu1 %v5316_v12  ;;  %v404_v60 = vld [vmem:[%s5553_s5 + $0x398] sm:$0xff] }
 0x619   : > { %4344 = vmatmul.f32.vlgmr.msrb.gmra.mxu3 %v5317_v45  ;;  %4349 = vmatpush.msra.mxu0 %v348_v22  ;;  %v468_v51 = vld [vmem:[%s5553_s5 + $0x598] sm:$0xff] }
 0x61a   : > { %4369 = vmatpush.msra.mxu1 %v412_v52  ;;  %4389 = vmatpush.msra.mxu2 %v476_v27  ;;  %v536_v15 = vld [vmem:[%s5553_s5 + $0x7b8] sm:$0xff] }
 0x61b   : > { %4408 = vmatpush.msra.mxu3 %v544_v53  ;;  %4350 = vmatpush.msra.mxu0 %v344_v35  ;;  %v336_v32 = vld [vmem:[%s5553_s5 + $0x178] sm:$0xff] }
 0x61c   : > { %4370 = vmatpush.msra.mxu1 %v408_v40  ;;  %4390 = vmatpush.msra.mxu2 %v472_v18  ;;  %v400_v9 = vld [vmem:[%s5553_s5 + $0x378] sm:$0xff] }
 0x61d   : > { %4409 = vmatpush.msra.mxu3 %v540_v57  ;;  %4351 = vmatpush.msra.mxu0 %v340_v54  ;;  %v464_v22 = vld [vmem:[%s5553_s5 + $0x578] sm:$0xff] }
 0x61e   : > { %4371 = vmatpush.msra.mxu1 %v404_v60  ;;  %v532_v52 = vld [vmem:[%s5553_s5 + $0x798] sm:$0xff]  ;;  %4391 = vmatpush.msra.mxu2 %v468_v51 }
 0x61f   : > { %4410 = vmatpush.msra.mxu3 %v536_v15  ;;  %v332_v27 = vld [vmem:[%s5553_s5 + $0x158] sm:$0xff]  ;;  %4352 = vmatpush.msra.mxu0 %v336_v32 }
 0x620   : > { %v396_v53 = vld [vmem:[%s5553_s5 + $0x358] sm:$0xff]  ;;  %4372 = vmatpush.msra.mxu1 %v400_v9  ;;  %4392 = vmatpush.msra.mxu2 %v464_v22 }
 0x621   : > { %v460_v12 = vld [vmem:[%s5553_s5 + $0x558] sm:$0xff]  ;;  %4411 = vmatpush.msra.mxu3 %v532_v52  ;;  %4353 = vmatpush.msra.mxu0 %v332_v27 }
 0x622   : > { %v528_v45 = vld [vmem:[%s5553_s5 + $0x778] sm:$0xff]  ;;  %4373 = vmatpush.msra.mxu1 %v396_v53  ;;  %4393 = vmatpush.msra.mxu2 %v460_v12 }
 0x623   : > { %v328_v35 = vld [vmem:[%s5553_s5 + $0x138] sm:$0xff]  ;;  %4412 = vmatpush.msra.mxu3 %v528_v45 }
 0x624   : > { %v392_v40 = vld [vmem:[%s5553_s5 + $0x338] sm:$0xff]  ;;  %4354 = vmatpush.msra.mxu0 %v328_v35 }
 0x625   : > { %v456_v18 = vld [vmem:[%s5553_s5 + $0x538] sm:$0xff]  ;;  %4374 = vmatpush.msra.mxu1 %v392_v40 }
 0x626   : > { %v524_v57 = vld [vmem:[%s5553_s5 + $0x758] sm:$0xff]  ;;  %4394 = vmatpush.msra.mxu2 %v456_v18 }
 0x627   : > { %v324_v54 = vld [vmem:[%s5553_s5 + $0x118] sm:$0xff]  ;;  %4413 = vmatpush.msra.mxu3 %v524_v57 }
 0x628   : > { %v388_v60 = vld [vmem:[%s5553_s5 + $0x318] sm:$0xff]  ;;  %4355 = vmatpush.msra.mxu0 %v324_v54 }
 0x629   : > { %v452_v51 = vld [vmem:[%s5553_s5 + $0x518] sm:$0xff]  ;;  %4375 = vmatpush.msra.mxu1 %v388_v60 }
 0x62a   : > { %v520_v15 = vld [vmem:[%s5553_s5 + $0x738] sm:$0xff]  ;;  %4395 = vmatpush.msra.mxu2 %v452_v51 }
 0x62b   : > { %v320_v32 = vld [vmem:[%s5553_s5 + $0xf8] sm:$0xff]  ;;  %4414 = vmatpush.msra.mxu3 %v520_v15 }
 0x62c   : > { %v384_v9 = vld [vmem:[%s5553_s5 + $0x2f8] sm:$0xff]  ;;  %4356 = vmatpush.msra.mxu0 %v320_v32 }
 0x62d   : > { %v448_v22 = vld [vmem:[%s5553_s5 + $0x4f8] sm:$0xff]  ;;  %4376 = vmatpush.msra.mxu1 %v384_v9 }
 0x62e   : > { %v516_v52 = vld [vmem:[%s5553_s5 + $0x718] sm:$0xff]  ;;  %4396 = vmatpush.msra.mxu2 %v448_v22 }
 0x62f   : > { %v316_v27 = vld [vmem:[%s5553_s5 + $0xd8] sm:$0xff]  ;;  %4415 = vmatpush.msra.mxu3 %v516_v52 }
 0x630   : > { %v380_v53 = vld [vmem:[%s5553_s5 + $0x2d8] sm:$0xff]  ;;  %4357 = vmatpush.msra.mxu0 %v316_v27 }
 0x631   : > { %v444_v12 = vld [vmem:[%s5553_s5 + $0x4d8] sm:$0xff]  ;;  %4377 = vmatpush.msra.mxu1 %v380_v53 }
 0x632   : > { %v512_v45 = vld [vmem:[%s5553_s5 + $0x6f8] sm:$0xff]  ;;  %4397 = vmatpush.msra.mxu2 %v444_v12 }
 0x633   : > { %v312_v35 = vld [vmem:[%s5553_s5 + $0xb8] sm:$0xff]  ;;  %4416 = vmatpush.msra.mxu3 %v512_v45 }
 0x634   : > { %v376_v40 = vld [vmem:[%s5553_s5 + $0x2b8] sm:$0xff]  ;;  %4358 = vmatpush.msra.mxu0 %v312_v35 }
 0x635   : > { %v440_v18 = vld [vmem:[%s5553_s5 + $0x4b8] sm:$0xff]  ;;  %4378 = vmatpush.msra.mxu1 %v376_v40 }
 0x636   : > { %v508_v57 = vld [vmem:[%s5553_s5 + $0x6d8] sm:$0xff]  ;;  %4398 = vmatpush.msra.mxu2 %v440_v18 }
 0x637   : > { %v308_v54 = vld [vmem:[%s5553_s5 + $0x98] sm:$0xff]  ;;  %4417 = vmatpush.msra.mxu3 %v508_v57 }
 0x638   : > { %v372_v60 = vld [vmem:[%s5553_s5 + $0x298] sm:$0xff]  ;;  %4359 = vmatpush.msra.mxu0 %v308_v54 }
 0x639   : > { %v436_v51 = vld [vmem:[%s5553_s5 + $0x498] sm:$0xff]  ;;  %4379 = vmatpush.msra.mxu1 %v372_v60 }
 0x63a   : > { %v504_v15 = vld [vmem:[%s5553_s5 + $0x6b8] sm:$0xff]  ;;  %4399 = vmatpush.msra.mxu2 %v436_v51 }
 0x63b   : > { %v304_v32 = vld [vmem:[%s5553_s5 + $0x78] sm:$0xff]  ;;  %4418 = vmatpush.msra.mxu3 %v504_v15 }
 0x63c   : > { %v368_v9 = vld [vmem:[%s5553_s5 + $0x278] sm:$0xff]  ;;  %4360 = vmatpush.msra.mxu0 %v304_v32 }
 0x63d   : > { %v432_v22 = vld [vmem:[%s5553_s5 + $0x478] sm:$0xff]  ;;  %4380 = vmatpush.msra.mxu1 %v368_v9 }
 0x63e   : > { %v500_v52 = vld [vmem:[%s5553_s5 + $0x698] sm:$0xff]  ;;  %4400 = vmatpush.msra.mxu2 %v432_v22 }
 0x63f   : > { %v300_v27 = vld [vmem:[%s5553_s5 + $0x58] sm:$0xff]  ;;  %4419 = vmatpush.msra.mxu3 %v500_v52 }
 0x640   : > { %v364_v53 = vld [vmem:[%s5553_s5 + $0x258] sm:$0xff]  ;;  %4361 = vmatpush.msra.mxu0 %v300_v27 }
 0x641   : > { %v428_v12 = vld [vmem:[%s5553_s5 + $0x458] sm:$0xff]  ;;  %4381 = vmatpush.msra.mxu1 %v364_v53 }
 0x642   : > { %v496_v45 = vld [vmem:[%s5553_s5 + $0x678] sm:$0xff]  ;;  %4401 = vmatpush.msra.mxu2 %v428_v12 }
 0x643   : > { %v296_v35 = vld [vmem:[%s5553_s5 + $0x38] sm:$0xff]  ;;  %4420 = vmatpush.msra.mxu3 %v496_v45 }
 0x644   : > { %v360_v40 = vld [vmem:[%s5553_s5 + $0x238] sm:$0xff]  ;;  %4362 = vmatpush.msra.mxu0 %v296_v35 }
 0x645   : > { %v424_v18 = vld [vmem:[%s5553_s5 + $0x438] sm:$0xff]  ;;  %4382 = vmatpush.msra.mxu1 %v360_v40 }
 0x646   : > { %v492_v57 = vld [vmem:[%s5553_s5 + $0x658] sm:$0xff]  ;;  %4402 = vmatpush.msra.mxu2 %v424_v18 }
 0x647   : > { %v292_v54 = vld [vmem:[%s5553_s5 + $0x18] sm:$0xff]  ;;  %4421 = vmatpush.msra.mxu3 %v492_v57 }
 0x648   : > { %v356_v60 = vld [vmem:[%s5553_s5 + $0x218] sm:$0xff]  ;;  %4363 = vmatpush.msra.mxu0 %v292_v54 }
 0x649   : > { %v420_v51 = vld [vmem:[%s5553_s5 + $0x418] sm:$0xff]  ;;  %4383 = vmatpush.msra.mxu1 %v356_v60  ;;  %4364 = vmatmul.f32.vlgmr.msra.gmra.mxu0 %v5682_v47 }
 0x64a   : > { %v488_v15 = vld [vmem:[%s5553_s5 + $0x638] sm:$0xff]  ;;  %4403 = vmatpush.msra.mxu2 %v420_v51  ;;  %4384 = vmatmul.f32.vlgmr.msra.gmra.mxu1 %v5684_v48 }
 0x64b   : > { %v608_v32 = vld [vmem:[%s5553_s5 + $0x9f8] sm:$0xff]  ;;  %4422 = vmatpush.msra.mxu3 %v488_v15  ;;  %4404 = vmatmul.f32.vlgmr.msra.gmra.mxu2 %v5686_v49 }
 0x64c   : > { %v672_v9 = vld [vmem:[%s5553_s5 + $0xbf8] sm:$0xff]  ;;  %4428 = vmatpush.msrb.mxu0 %v608_v32 }
 0x64d   : > { %v736_v22 = vld [vmem:[%s5553_s5 + $0xdf8] sm:$0xff]  ;;  %4448 = vmatpush.msrb.mxu1 %v672_v9 }
 0x64e   : > { %v484_v52 = vld [vmem:[%s5553_s5 + $0x618] sm:$0xff]  ;;  %4468 = vmatpush.msrb.mxu2 %v736_v22 }
 0x64f   : > { %v604_v27 = vld [vmem:[%s5553_s5 + $0x9d8] sm:$0xff]  ;;  %4423 = vmatpush.msra.mxu3 %v484_v52 }
 0x650   : > { %v668_v53 = vld [vmem:[%s5553_s5 + $0xbd8] sm:$0xff]  ;;  %4429 = vmatpush.msrb.mxu0 %v604_v27  ;;  %4424 = vmatmul.f32.vlgmr.msra.gmra.mxu3 %v5688_v50 }
 0x651   : > { %v732_v12 = vld [vmem:[%s5553_s5 + $0xdd8] sm:$0xff]  ;;  %4449 = vmatpush.msrb.mxu1 %v668_v53 }
 0x652   : > { %v800_v45 = vld [vmem:[%s5553_s5 + $0xff8] sm:$0xff]  ;;  %4469 = vmatpush.msrb.mxu2 %v732_v12 }
 0x653   : > { %v600_v35 = vld [vmem:[%s5553_s5 + $0x9b8] sm:$0xff]  ;;  %4488 = vmatpush.msrb.mxu3 %v800_v45 }
 0x654   : > { %v664_v40 = vld [vmem:[%s5553_s5 + $0xbb8] sm:$0xff]  ;;  %4430 = vmatpush.msrb.mxu0 %v600_v35 }
 0x655   : > { %v728_v18 = vld [vmem:[%s5553_s5 + $0xdb8] sm:$0xff]  ;;  %4450 = vmatpush.msrb.mxu1 %v664_v40 }
 0x656   : > { %v796_v57 = vld [vmem:[%s5553_s5 + $0xfd8] sm:$0xff]  ;;  %4470 = vmatpush.msrb.mxu2 %v728_v18 }
 0x657   : > { %v596_v54 = vld [vmem:[%s5553_s5 + $0x998] sm:$0xff]  ;;  %4489 = vmatpush.msrb.mxu3 %v796_v57 }
 0x658   : > { %v660_v60 = vld [vmem:[%s5553_s5 + $0xb98] sm:$0xff]  ;;  %4431 = vmatpush.msrb.mxu0 %v596_v54 }
 0x659   : > { %v724_v51 = vld [vmem:[%s5553_s5 + $0xd98] sm:$0xff]  ;;  %4451 = vmatpush.msrb.mxu1 %v660_v60 }
 0x65a   : > { %v792_v15 = vld [vmem:[%s5553_s5 + $0xfb8] sm:$0xff]  ;;  %4471 = vmatpush.msrb.mxu2 %v724_v51 }
 0x65b   : > { %v592_v32 = vld [vmem:[%s5553_s5 + $0x978] sm:$0xff]  ;;  %4490 = vmatpush.msrb.mxu3 %v792_v15 }
 0x65c   : > { %v656_v9 = vld [vmem:[%s5553_s5 + $0xb78] sm:$0xff]  ;;  %4432 = vmatpush.msrb.mxu0 %v592_v32 }
 0x65d   : > { %v720_v22 = vld [vmem:[%s5553_s5 + $0xd78] sm:$0xff]  ;;  %4452 = vmatpush.msrb.mxu1 %v656_v9 }
 0x65e   : > { %v788_v52 = vld [vmem:[%s5553_s5 + $0xf98] sm:$0xff]  ;;  %4472 = vmatpush.msrb.mxu2 %v720_v22 }
 0x65f   : > { %v588_v27 = vld [vmem:[%s5553_s5 + $0x958] sm:$0xff]  ;;  %4491 = vmatpush.msrb.mxu3 %v788_v52 }
 0x660   : > { %v652_v53 = vld [vmem:[%s5553_s5 + $0xb58] sm:$0xff]  ;;  %4433 = vmatpush.msrb.mxu0 %v588_v27 }
 0x661   : > { %v716_v12 = vld [vmem:[%s5553_s5 + $0xd58] sm:$0xff]  ;;  %4453 = vmatpush.msrb.mxu1 %v652_v53 }
 0x662   : > { %v784_v45 = vld [vmem:[%s5553_s5 + $0xf78] sm:$0xff]  ;;  %4473 = vmatpush.msrb.mxu2 %v716_v12 }
 0x663   : > { %v584_v35 = vld [vmem:[%s5553_s5 + $0x938] sm:$0xff]  ;;  %4492 = vmatpush.msrb.mxu3 %v784_v45 }
 0x664   : > { %v648_v40 = vld [vmem:[%s5553_s5 + $0xb38] sm:$0xff]  ;;  %4434 = vmatpush.msrb.mxu0 %v584_v35 }
 0x665   : > { %v712_v18 = vld [vmem:[%s5553_s5 + $0xd38] sm:$0xff]  ;;  %4454 = vmatpush.msrb.mxu1 %v648_v40 }
 0x666   : > { %v780_v57 = vld [vmem:[%s5553_s5 + $0xf58] sm:$0xff]  ;;  %4474 = vmatpush.msrb.mxu2 %v712_v18 }
 0x667   : > { %v580_v54 = vld [vmem:[%s5553_s5 + $0x918] sm:$0xff]  ;;  %4493 = vmatpush.msrb.mxu3 %v780_v57 }
 0x668   : > { %v644_v60 = vld [vmem:[%s5553_s5 + $0xb18] sm:$0xff]  ;;  %4435 = vmatpush.msrb.mxu0 %v580_v54 }
 0x669   : > { %v708_v51 = vld [vmem:[%s5553_s5 + $0xd18] sm:$0xff]  ;;  %4455 = vmatpush.msrb.mxu1 %v644_v60 }
 0x66a   : > { %v776_v15 = vld [vmem:[%s5553_s5 + $0xf38] sm:$0xff]  ;;  %4475 = vmatpush.msrb.mxu2 %v708_v51 }
 0x66b   : > { %v576_v32 = vld [vmem:[%s5553_s5 + $0x8f8] sm:$0xff]  ;;  %4494 = vmatpush.msrb.mxu3 %v776_v15 }
 0x66c   : > { %v640_v9 = vld [vmem:[%s5553_s5 + $0xaf8] sm:$0xff]  ;;  %4436 = vmatpush.msrb.mxu0 %v576_v32 }
 0x66d   : > { %v704_v22 = vld [vmem:[%s5553_s5 + $0xcf8] sm:$0xff]  ;;  %4456 = vmatpush.msrb.mxu1 %v640_v9 }
 0x66e   : > { %v772_v52 = vld [vmem:[%s5553_s5 + $0xf18] sm:$0xff]  ;;  %4476 = vmatpush.msrb.mxu2 %v704_v22 }
 0x66f   : > { %v572_v27 = vld [vmem:[%s5553_s5 + $0x8d8] sm:$0xff]  ;;  %4495 = vmatpush.msrb.mxu3 %v772_v52 }
 0x670   : > { %v636_v53 = vld [vmem:[%s5553_s5 + $0xad8] sm:$0xff]  ;;  %4437 = vmatpush.msrb.mxu0 %v572_v27 }
 0x671   : > { %v700_v12 = vld [vmem:[%s5553_s5 + $0xcd8] sm:$0xff]  ;;  %4457 = vmatpush.msrb.mxu1 %v636_v53 }
 0x672   : > { %v768_v45 = vld [vmem:[%s5553_s5 + $0xef8] sm:$0xff]  ;;  %4477 = vmatpush.msrb.mxu2 %v700_v12 }
 0x673   : > { %v568_v35 = vld [vmem:[%s5553_s5 + $0x8b8] sm:$0xff]  ;;  %4496 = vmatpush.msrb.mxu3 %v768_v45 }
 0x674   : > { %v632_v40 = vld [vmem:[%s5553_s5 + $0xab8] sm:$0xff]  ;;  %4438 = vmatpush.msrb.mxu0 %v568_v35 }
 0x675   : > { %v696_v18 = vld [vmem:[%s5553_s5 + $0xcb8] sm:$0xff]  ;;  %4458 = vmatpush.msrb.mxu1 %v632_v40 }
 0x676   : > { %v764_v57 = vld [vmem:[%s5553_s5 + $0xed8] sm:$0xff]  ;;  %4478 = vmatpush.msrb.mxu2 %v696_v18 }
 0x677   : > { %v564_v54 = vld [vmem:[%s5553_s5 + $0x898] sm:$0xff]  ;;  %4497 = vmatpush.msrb.mxu3 %v764_v57 }
 0x678   : > { %v628_v60 = vld [vmem:[%s5553_s5 + $0xa98] sm:$0xff]  ;;  %4439 = vmatpush.msrb.mxu0 %v564_v54 }
 0x679   : > { %v692_v51 = vld [vmem:[%s5553_s5 + $0xc98] sm:$0xff]  ;;  %4459 = vmatpush.msrb.mxu1 %v628_v60 }
 0x67a   : > { %v760_v15 = vld [vmem:[%s5553_s5 + $0xeb8] sm:$0xff]  ;;  %4479 = vmatpush.msrb.mxu2 %v692_v51 }
 0x67b   : > { %v560_v32 = vld [vmem:[%s5553_s5 + $0x878] sm:$0xff]  ;;  %4498 = vmatpush.msrb.mxu3 %v760_v15 }
 0x67c   : > { %v624_v9 = vld [vmem:[%s5553_s5 + $0xa78] sm:$0xff]  ;;  %4440 = vmatpush.msrb.mxu0 %v560_v32 }
 0x67d   : > { %v688_v22 = vld [vmem:[%s5553_s5 + $0xc78] sm:$0xff]  ;;  %4460 = vmatpush.msrb.mxu1 %v624_v9 }
 0x67e   : > { %v756_v52 = vld [vmem:[%s5553_s5 + $0xe98] sm:$0xff]  ;;  %4480 = vmatpush.msrb.mxu2 %v688_v22 }
 0x67f   : > { %v556_v27 = vld [vmem:[%s5553_s5 + $0x858] sm:$0xff]  ;;  %4499 = vmatpush.msrb.mxu3 %v756_v52 }
 0x680   : > { %v620_v53 = vld [vmem:[%s5553_s5 + $0xa58] sm:$0xff]  ;;  %4441 = vmatpush.msrb.mxu0 %v556_v27 }
 0x681   : > { %v684_v12 = vld [vmem:[%s5553_s5 + $0xc58] sm:$0xff]  ;;  %4461 = vmatpush.msrb.mxu1 %v620_v53 }
 0x682   : > { %v752_v45 = vld [vmem:[%s5553_s5 + $0xe78] sm:$0xff]  ;;  %4481 = vmatpush.msrb.mxu2 %v684_v12 }
 0x683   : > { %v552_v35 = vld [vmem:[%s5553_s5 + $0x838] sm:$0xff]  ;;  %4500 = vmatpush.msrb.mxu3 %v752_v45 }
 0x684   : > { %v616_v40 = vld [vmem:[%s5553_s5 + $0xa38] sm:$0xff]  ;;  %4442 = vmatpush.msrb.mxu0 %v552_v35 }
 0x685   : > { %v680_v18 = vld [vmem:[%s5553_s5 + $0xc38] sm:$0xff]  ;;  %4462 = vmatpush.msrb.mxu1 %v616_v40 }
 0x686   : > { %v748_v57 = vld [vmem:[%s5553_s5 + $0xe58] sm:$0xff]  ;;  %4482 = vmatpush.msrb.mxu2 %v680_v18 }
 0x687   : > { %v548_v54 = vld [vmem:[%s5553_s5 + $0x818] sm:$0xff]  ;;  %4501 = vmatpush.msrb.mxu3 %v748_v57 }
 0x688   : > { %v612_v60 = vld [vmem:[%s5553_s5 + $0xa18] sm:$0xff]  ;;  %4443 = vmatpush.msrb.mxu0 %v548_v54 }
 0x689   : > { %v676_v51 = vld [vmem:[%s5553_s5 + $0xc18] sm:$0xff]  ;;  %4463 = vmatpush.msrb.mxu1 %v612_v60  ;;  %4444 = vmatmul.f32.vlgmr.msrb.gmra.mxu0 %v5706_v0 }
 0x68a   : > { %v744_v15 = vld [vmem:[%s5553_s5 + $0xe38] sm:$0xff]  ;;  %4483 = vmatpush.msrb.mxu2 %v676_v51  ;;  %4464 = vmatmul.f32.vlgmr.msrb.gmra.mxu1 %v5710_v2 }
 0x68b   : > { %v864_v32 = vld [vmem:[%s5553_s5 + $0x11f8] sm:$0xff]  ;;  %4502 = vmatpush.msrb.mxu3 %v744_v15  ;;  %4484 = vmatmul.f32.vlgmr.msrb.gmra.mxu2 %v5704_v63 }
 0x68c   : > { %v928_v9 = vld [vmem:[%s5553_s5 + $0x13f8] sm:$0xff]  ;;  %4508 = vmatpush.msra.mxu0 %v864_v32 }
 0x68d   : > { %v992_v22 = vld [vmem:[%s5553_s5 + $0x15f8] sm:$0xff]  ;;  %4528 = vmatpush.msra.mxu1 %v928_v9 }
 0x68e   : > { %v740_v52 = vld [vmem:[%s5553_s5 + $0xe18] sm:$0xff]  ;;  %4548 = vmatpush.msra.mxu2 %v992_v22 }
 0x68f   : > { %v860_v27 = vld [vmem:[%s5553_s5 + $0x11d8] sm:$0xff]  ;;  %4503 = vmatpush.msrb.mxu3 %v740_v52 }
 0x690   : > { %v924_v53 = vld [vmem:[%s5553_s5 + $0x13d8] sm:$0xff]  ;;  %4509 = vmatpush.msra.mxu0 %v860_v27  ;;  %4504 = vmatmul.f32.vlgmr.msrb.gmra.mxu3 %v5708_v1 }
 0x691   : > { %v988_v12 = vld [vmem:[%s5553_s5 + $0x15d8] sm:$0xff]  ;;  %4529 = vmatpush.msra.mxu1 %v924_v53 }
 0x692   : > { %v1056_v45 = vld [vmem:[%s5553_s5 + $0x17f8] sm:$0xff]  ;;  %4549 = vmatpush.msra.mxu2 %v988_v12 }
 0x693   : > { %v856_v47 = vld [vmem:[%s5553_s5 + $0x11b8] sm:$0xff]  ;;  %4568 = vmatpush.msra.mxu3 %v1056_v45 }
 0x694   : > { %v920_v48 = vld [vmem:[%s5553_s5 + $0x13b8] sm:$0xff]  ;;  %4510 = vmatpush.msra.mxu0 %v856_v47 }
 0x695   : > { %v984_v49 = vld [vmem:[%s5553_s5 + $0x15b8] sm:$0xff]  ;;  %4530 = vmatpush.msra.mxu1 %v920_v48 }
 0x696   : > { %v1052_v35 = vld [vmem:[%s5553_s5 + $0x17d8] sm:$0xff]  ;;  %4550 = vmatpush.msra.mxu2 %v984_v49 }
 0x697   : > { %v852_v40 = vld [vmem:[%s5553_s5 + $0x1198] sm:$0xff]  ;;  %4569 = vmatpush.msra.mxu3 %v1052_v35 }
 0x698   : > { %v916_v18 = vld [vmem:[%s5553_s5 + $0x1398] sm:$0xff]  ;;  %4511 = vmatpush.msra.mxu0 %v852_v40 }
 0x699   : > { %v980_v57 = vld [vmem:[%s5553_s5 + $0x1598] sm:$0xff]  ;;  %4531 = vmatpush.msra.mxu1 %v916_v18 }
 0x69a   : > { %v1048_v54 = vld [vmem:[%s5553_s5 + $0x17b8] sm:$0xff]  ;;  %4551 = vmatpush.msra.mxu2 %v980_v57 }
 0x69b   : > { %v848_v50 = vld [vmem:[%s5553_s5 + $0x1178] sm:$0xff]  ;;  %4570 = vmatpush.msra.mxu3 %v1048_v54 }
 0x69c   : > { %v912_v60 = vld [vmem:[%s5553_s5 + $0x1378] sm:$0xff]  ;;  %4512 = vmatpush.msra.mxu0 %v848_v50 }
 0x69d   : > { %v976_v51 = vld [vmem:[%s5553_s5 + $0x1578] sm:$0xff]  ;;  %4532 = vmatpush.msra.mxu1 %v912_v60 }
 0x69e   : > { %v1044_v15 = vld [vmem:[%s5553_s5 + $0x1798] sm:$0xff]  ;;  %4552 = vmatpush.msra.mxu2 %v976_v51 }
 0x69f   : > { %v844_v32 = vld [vmem:[%s5553_s5 + $0x1158] sm:$0xff]  ;;  %4571 = vmatpush.msra.mxu3 %v1044_v15 }
 0x6a0   : > { %v908_v9 = vld [vmem:[%s5553_s5 + $0x1358] sm:$0xff]  ;;  %4513 = vmatpush.msra.mxu0 %v844_v32 }
 0x6a1   : > { %v972_v22 = vld [vmem:[%s5553_s5 + $0x1558] sm:$0xff]  ;;  %4533 = vmatpush.msra.mxu1 %v908_v9 }
 0x6a2   : > { %v1040_v52 = vld [vmem:[%s5553_s5 + $0x1778] sm:$0xff]  ;;  %4553 = vmatpush.msra.mxu2 %v972_v22 }
 0x6a3   : > { %v840_v63 = vld [vmem:[%s5553_s5 + $0x1138] sm:$0xff]  ;;  %4572 = vmatpush.msra.mxu3 %v1040_v52 }
 0x6a4   : > { %v904_v27 = vld [vmem:[%s5553_s5 + $0x1338] sm:$0xff]  ;;  %4514 = vmatpush.msra.mxu0 %v840_v63 }
 0x6a5   : > { %v968_v53 = vld [vmem:[%s5553_s5 + $0x1538] sm:$0xff]  ;;  %4534 = vmatpush.msra.mxu1 %v904_v27 }
 0x6a6   : > { %v1036_v12 = vld [vmem:[%s5553_s5 + $0x1758] sm:$0xff]  ;;  %4554 = vmatpush.msra.mxu2 %v968_v53 }
 0x6a7   : > { %v836_v0 = vld [vmem:[%s5553_s5 + $0x1118] sm:$0xff]  ;;  %4573 = vmatpush.msra.mxu3 %v1036_v12 }
 0x6a8   : > { %v900_v45 = vld [vmem:[%s5553_s5 + $0x1318] sm:$0xff]  ;;  %4515 = vmatpush.msra.mxu0 %v836_v0 }
 0x6a9   : > { %v964_v1 = vld [vmem:[%s5553_s5 + $0x1518] sm:$0xff]  ;;  %4535 = vmatpush.msra.mxu1 %v900_v45 }
 0x6aa   : > { %v1032_v47 = vld [vmem:[%s5553_s5 + $0x1738] sm:$0xff]  ;;  %4555 = vmatpush.msra.mxu2 %v964_v1 }
 0x6ab   : > { %v832_v48 = vld [vmem:[%s5553_s5 + $0x10f8] sm:$0xff]  ;;  %4574 = vmatpush.msra.mxu3 %v1032_v47 }
 0x6ac   : > { %v896_v49 = vld [vmem:[%s5553_s5 + $0x12f8] sm:$0xff]  ;;  %4516 = vmatpush.msra.mxu0 %v832_v48 }
 0x6ad   : > { %v960_v35 = vld [vmem:[%s5553_s5 + $0x14f8] sm:$0xff]  ;;  %4536 = vmatpush.msra.mxu1 %v896_v49 }
 0x6ae   : > { %v1028_v2 = vld [vmem:[%s5553_s5 + $0x1718] sm:$0xff]  ;;  %4556 = vmatpush.msra.mxu2 %v960_v35 }
 0x6af   : > { %v828_v40 = vld [vmem:[%s5553_s5 + $0x10d8] sm:$0xff]  ;;  %4575 = vmatpush.msra.mxu3 %v1028_v2 }
 0x6b0   : > { %v892_v18 = vld [vmem:[%s5553_s5 + $0x12d8] sm:$0xff]  ;;  %4517 = vmatpush.msra.mxu0 %v828_v40 }
 0x6b1   : > { %v956_v57 = vld [vmem:[%s5553_s5 + $0x14d8] sm:$0xff]  ;;  %4537 = vmatpush.msra.mxu1 %v892_v18 }
 0x6b2   : > { %v1024_v54 = vld [vmem:[%s5553_s5 + $0x16f8] sm:$0xff]  ;;  %4557 = vmatpush.msra.mxu2 %v956_v57 }
 0x6b3   : > { %v824_v50 = vld [vmem:[%s5553_s5 + $0x10b8] sm:$0xff]  ;;  %4576 = vmatpush.msra.mxu3 %v1024_v54 }
 0x6b4   : > { %v888_v60 = vld [vmem:[%s5553_s5 + $0x12b8] sm:$0xff]  ;;  %4518 = vmatpush.msra.mxu0 %v824_v50 }
 0x6b5   : > { %v952_v51 = vld [vmem:[%s5553_s5 + $0x14b8] sm:$0xff]  ;;  %4538 = vmatpush.msra.mxu1 %v888_v60 }
 0x6b6   : > { %v1020_v15 = vld [vmem:[%s5553_s5 + $0x16d8] sm:$0xff]  ;;  %4558 = vmatpush.msra.mxu2 %v952_v51 }
 0x6b7   : > { %v820_v32 = vld [vmem:[%s5553_s5 + $0x1098] sm:$0xff]  ;;  %4577 = vmatpush.msra.mxu3 %v1020_v15 }
 0x6b8   : > { %v884_v9 = vld [vmem:[%s5553_s5 + $0x1298] sm:$0xff]  ;;  %4519 = vmatpush.msra.mxu0 %v820_v32 }
 0x6b9   : > { %v948_v22 = vld [vmem:[%s5553_s5 + $0x1498] sm:$0xff]  ;;  %4539 = vmatpush.msra.mxu1 %v884_v9 }
 0x6ba   : > { %v1016_v52 = vld [vmem:[%s5553_s5 + $0x16b8] sm:$0xff]  ;;  %4559 = vmatpush.msra.mxu2 %v948_v22 }
 0x6bb   : > { %v816_v63 = vld [vmem:[%s5553_s5 + $0x1078] sm:$0xff]  ;;  %4578 = vmatpush.msra.mxu3 %v1016_v52 }
 0x6bc   : > { %v880_v27 = vld [vmem:[%s5553_s5 + $0x1278] sm:$0xff]  ;;  %4520 = vmatpush.msra.mxu0 %v816_v63 }
 0x6bd   : > { %v944_v53 = vld [vmem:[%s5553_s5 + $0x1478] sm:$0xff]  ;;  %4540 = vmatpush.msra.mxu1 %v880_v27 }
 0x6be   : > { %v1012_v12 = vld [vmem:[%s5553_s5 + $0x1698] sm:$0xff]  ;;  %4560 = vmatpush.msra.mxu2 %v944_v53 }
 0x6bf   : > { %v812_v0 = vld [vmem:[%s5553_s5 + $0x1058] sm:$0xff]  ;;  %4579 = vmatpush.msra.mxu3 %v1012_v12 }
 0x6c0   : > { %v876_v45 = vld [vmem:[%s5553_s5 + $0x1258] sm:$0xff]  ;;  %4521 = vmatpush.msra.mxu0 %v812_v0 }
 0x6c1   : > { %v940_v1 = vld [vmem:[%s5553_s5 + $0x1458] sm:$0xff]  ;;  %4541 = vmatpush.msra.mxu1 %v876_v45 }
 0x6c2   : > { %v1008_v47 = vld [vmem:[%s5553_s5 + $0x1678] sm:$0xff]  ;;  %4561 = vmatpush.msra.mxu2 %v940_v1 }
 0x6c3   : > { %v808_v48 = vld [vmem:[%s5553_s5 + $0x1038] sm:$0xff]  ;;  %4580 = vmatpush.msra.mxu3 %v1008_v47 }
 0x6c4   : > { %v872_v49 = vld [vmem:[%s5553_s5 + $0x1238] sm:$0xff]  ;;  %4522 = vmatpush.msra.mxu0 %v808_v48 }
 0x6c5   : > { %v936_v35 = vld [vmem:[%s5553_s5 + $0x1438] sm:$0xff]  ;;  %4542 = vmatpush.msra.mxu1 %v872_v49 }
 0x6c6   : > { %v1004_v2 = vld [vmem:[%s5553_s5 + $0x1658] sm:$0xff]  ;;  %4562 = vmatpush.msra.mxu2 %v936_v35 }
 0x6c7   : > { %v804_v40 = vld [vmem:[%s5553_s5 + $0x1018] sm:$0xff]  ;;  %4581 = vmatpush.msra.mxu3 %v1004_v2 }
 0x6c8   : > { %v868_v18 = vld [vmem:[%s5553_s5 + $0x1218] sm:$0xff]  ;;  %4523 = vmatpush.msra.mxu0 %v804_v40 }
 0x6c9   : > { %v932_v57 = vld [vmem:[%s5553_s5 + $0x1418] sm:$0xff]  ;;  %4543 = vmatpush.msra.mxu1 %v868_v18  ;;  %4524 = vmatmul.f32.vlgmr.msra.gmra.mxu0 %v5792_v19 }
 0x6ca   : > { %v1000_v54 = vld [vmem:[%s5553_s5 + $0x1638] sm:$0xff]  ;;  %4563 = vmatpush.msra.mxu2 %v932_v57  ;;  %4544 = vmatmul.f32.vlgmr.msra.gmra.mxu1 %v5802_v25 }
 0x6cb   : > { %v1120_v50 = vld [vmem:[%s5553_s5 + $0x19f8] sm:$0xff]  ;;  %4582 = vmatpush.msra.mxu3 %v1000_v54  ;;  %4564 = vmatmul.f32.vlgmr.msra.gmra.mxu2 %v5794_v20 }
 0x6cc   : > { %v1184_v60 = vld [vmem:[%s5553_s5 + $0x1bf8] sm:$0xff]  ;;  %4588 = vmatpush.msrb.mxu0 %v1120_v50 }
 0x6cd   : > { %v1248_v51 = vld [vmem:[%s5553_s5 + $0x1df8] sm:$0xff]  ;;  %4608 = vmatpush.msrb.mxu1 %v1184_v60 }
 0x6ce   : > { %v996_v15 = vld [vmem:[%s5553_s5 + $0x1618] sm:$0xff]  ;;  %4628 = vmatpush.msrb.mxu2 %v1248_v51 }
 0x6cf   : > { %v1116_v32 = vld [vmem:[%s5553_s5 + $0x19d8] sm:$0xff]  ;;  %4583 = vmatpush.msra.mxu3 %v996_v15 }
 0x6d0   : > { %v1180_v9 = vld [vmem:[%s5553_s5 + $0x1bd8] sm:$0xff]  ;;  %4584 = vmatmul.f32.vlgmr.msra.gmra.mxu3 %v5804_v26  ;;  %4589 = vmatpush.msrb.mxu0 %v1116_v32 }
 0x6d1   : > { %v1244_v22 = vld [vmem:[%s5553_s5 + $0x1dd8] sm:$0xff]  ;;  %4609 = vmatpush.msrb.mxu1 %v1180_v9 }
 0x6d2   : > { %v1312_v52 = vld [vmem:[%s5553_s5 + $0x1ff8] sm:$0xff]  ;;  %4629 = vmatpush.msrb.mxu2 %v1244_v22 }
 0x6d3   : > { %v1112_v19 = vld [vmem:[%s5553_s5 + $0x19b8] sm:$0xff]  ;;  %4648 = vmatpush.msrb.mxu3 %v1312_v52 }
 0x6d4   : > { %v1176_v20 = vld [vmem:[%s5553_s5 + $0x1bb8] sm:$0xff]  ;;  %4590 = vmatpush.msrb.mxu0 %v1112_v19 }
 0x6d5   : > { %v1240_v63 = vld [vmem:[%s5553_s5 + $0x1db8] sm:$0xff]  ;;  %4610 = vmatpush.msrb.mxu1 %v1176_v20 }
 0x6d6   : > { %v1308_v27 = vld [vmem:[%s5553_s5 + $0x1fd8] sm:$0xff]  ;;  %4630 = vmatpush.msrb.mxu2 %v1240_v63 }
 0x6d7   : > { %v1108_v53 = vld [vmem:[%s5553_s5 + $0x1998] sm:$0xff]  ;;  %4649 = vmatpush.msrb.mxu3 %v1308_v27 }
 0x6d8   : > { %v1172_v12 = vld [vmem:[%s5553_s5 + $0x1b98] sm:$0xff]  ;;  %4591 = vmatpush.msrb.mxu0 %v1108_v53 }
 0x6d9   : > { %v1236_v25 = vld [vmem:[%s5553_s5 + $0x1d98] sm:$0xff]  ;;  %4611 = vmatpush.msrb.mxu1 %v1172_v12 }
 0x6da   : > { %v1304_v26 = vld [vmem:[%s5553_s5 + $0x1fb8] sm:$0xff]  ;;  %4631 = vmatpush.msrb.mxu2 %v1236_v25 }
 0x6db   : > { %v1104_v0 = vld [vmem:[%s5553_s5 + $0x1978] sm:$0xff]  ;;  %4650 = vmatpush.msrb.mxu3 %v1304_v26 }
 0x6dc   : > { %v1168_v45 = vld [vmem:[%s5553_s5 + $0x1b78] sm:$0xff]  ;;  %4592 = vmatpush.msrb.mxu0 %v1104_v0 }
 0x6dd   : > { %v1232_v1 = vld [vmem:[%s5553_s5 + $0x1d78] sm:$0xff]  ;;  %4612 = vmatpush.msrb.mxu1 %v1168_v45 }
 0x6de   : > { %v1300_v47 = vld [vmem:[%s5553_s5 + $0x1f98] sm:$0xff]  ;;  %4632 = vmatpush.msrb.mxu2 %v1232_v1 }
 0x6df   : > { %v1100_v48 = vld [vmem:[%s5553_s5 + $0x1958] sm:$0xff]  ;;  %4651 = vmatpush.msrb.mxu3 %v1300_v47 }
 0x6e0   : > { %v1164_v49 = vld [vmem:[%s5553_s5 + $0x1b58] sm:$0xff]  ;;  %4593 = vmatpush.msrb.mxu0 %v1100_v48 }
 0x6e1   : > { %v1228_v35 = vld [vmem:[%s5553_s5 + $0x1d58] sm:$0xff]  ;;  %4613 = vmatpush.msrb.mxu1 %v1164_v49 }
 0x6e2   : > { %v1296_v2 = vld [vmem:[%s5553_s5 + $0x1f78] sm:$0xff]  ;;  %4633 = vmatpush.msrb.mxu2 %v1228_v35 }
 0x6e3   : > { %v1096_v40 = vld [vmem:[%s5553_s5 + $0x1938] sm:$0xff]  ;;  %4652 = vmatpush.msrb.mxu3 %v1296_v2 }
 0x6e4   : > { %v1160_v18 = vld [vmem:[%s5553_s5 + $0x1b38] sm:$0xff]  ;;  %4594 = vmatpush.msrb.mxu0 %v1096_v40 }
 0x6e5   : > { %v1224_v57 = vld [vmem:[%s5553_s5 + $0x1d38] sm:$0xff]  ;;  %4614 = vmatpush.msrb.mxu1 %v1160_v18 }
 0x6e6   : > { %v1292_v54 = vld [vmem:[%s5553_s5 + $0x1f58] sm:$0xff]  ;;  %4634 = vmatpush.msrb.mxu2 %v1224_v57 }
 0x6e7   : > { %v1092_v50 = vld [vmem:[%s5553_s5 + $0x1918] sm:$0xff]  ;;  %4653 = vmatpush.msrb.mxu3 %v1292_v54 }
 0x6e8   : > { %v1156_v60 = vld [vmem:[%s5553_s5 + $0x1b18] sm:$0xff]  ;;  %4595 = vmatpush.msrb.mxu0 %v1092_v50 }
 0x6e9   : > { %v1220_v51 = vld [vmem:[%s5553_s5 + $0x1d18] sm:$0xff]  ;;  %4615 = vmatpush.msrb.mxu1 %v1156_v60 }
 0x6ea   : > { %v1288_v15 = vld [vmem:[%s5553_s5 + $0x1f38] sm:$0xff]  ;;  %4635 = vmatpush.msrb.mxu2 %v1220_v51 }
 0x6eb   : > { %v1088_v32 = vld [vmem:[%s5553_s5 + $0x18f8] sm:$0xff]  ;;  %4654 = vmatpush.msrb.mxu3 %v1288_v15 }
 0x6ec   : > { %v1152_v9 = vld [vmem:[%s5553_s5 + $0x1af8] sm:$0xff]  ;;  %4596 = vmatpush.msrb.mxu0 %v1088_v32 }
 0x6ed   : > { %v1216_v22 = vld [vmem:[%s5553_s5 + $0x1cf8] sm:$0xff]  ;;  %4616 = vmatpush.msrb.mxu1 %v1152_v9 }
 0x6ee   : > { %v1284_v52 = vld [vmem:[%s5553_s5 + $0x1f18] sm:$0xff]  ;;  %4636 = vmatpush.msrb.mxu2 %v1216_v22 }
 0x6ef   : > { %v1084_v19 = vld [vmem:[%s5553_s5 + $0x18d8] sm:$0xff]  ;;  %4655 = vmatpush.msrb.mxu3 %v1284_v52 }
 0x6f0   : > { %v1148_v20 = vld [vmem:[%s5553_s5 + $0x1ad8] sm:$0xff]  ;;  %4597 = vmatpush.msrb.mxu0 %v1084_v19 }
 0x6f1   : > { %v1212_v63 = vld [vmem:[%s5553_s5 + $0x1cd8] sm:$0xff]  ;;  %4617 = vmatpush.msrb.mxu1 %v1148_v20 }
 0x6f2   : > { %v1280_v27 = vld [vmem:[%s5553_s5 + $0x1ef8] sm:$0xff]  ;;  %4637 = vmatpush.msrb.mxu2 %v1212_v63 }
 0x6f3   : > { %v1080_v53 = vld [vmem:[%s5553_s5 + $0x18b8] sm:$0xff]  ;;  %4656 = vmatpush.msrb.mxu3 %v1280_v27 }
 0x6f4   : > { %v1144_v12 = vld [vmem:[%s5553_s5 + $0x1ab8] sm:$0xff]  ;;  %4598 = vmatpush.msrb.mxu0 %v1080_v53 }
 0x6f5   : > { %v1208_v25 = vld [vmem:[%s5553_s5 + $0x1cb8] sm:$0xff]  ;;  %4618 = vmatpush.msrb.mxu1 %v1144_v12 }
 0x6f6   : > { %v1276_v26 = vld [vmem:[%s5553_s5 + $0x1ed8] sm:$0xff]  ;;  %4638 = vmatpush.msrb.mxu2 %v1208_v25 }
 0x6f7   : > { %v1076_v0 = vld [vmem:[%s5553_s5 + $0x1898] sm:$0xff]  ;;  %4657 = vmatpush.msrb.mxu3 %v1276_v26 }
 0x6f8   : > { %v1140_v45 = vld [vmem:[%s5553_s5 + $0x1a98] sm:$0xff]  ;;  %4599 = vmatpush.msrb.mxu0 %v1076_v0 }
 0x6f9   : > { %v1204_v1 = vld [vmem:[%s5553_s5 + $0x1c98] sm:$0xff]  ;;  %4619 = vmatpush.msrb.mxu1 %v1140_v45 }
 0x6fa   : > { %v1272_v47 = vld [vmem:[%s5553_s5 + $0x1eb8] sm:$0xff]  ;;  %4639 = vmatpush.msrb.mxu2 %v1204_v1 }
 0x6fb   : > { %v1072_v48 = vld [vmem:[%s5553_s5 + $0x1878] sm:$0xff]  ;;  %4658 = vmatpush.msrb.mxu3 %v1272_v47 }
 0x6fc   : > { %v1136_v49 = vld [vmem:[%s5553_s5 + $0x1a78] sm:$0xff]  ;;  %4600 = vmatpush.msrb.mxu0 %v1072_v48 }
 0x6fd   : > { %v1200_v35 = vld [vmem:[%s5553_s5 + $0x1c78] sm:$0xff]  ;;  %4620 = vmatpush.msrb.mxu1 %v1136_v49 }
 0x6fe   : > { %v1268_v2 = vld [vmem:[%s5553_s5 + $0x1e98] sm:$0xff]  ;;  %4640 = vmatpush.msrb.mxu2 %v1200_v35 }
 0x6ff   : > { %v1068_v40 = vld [vmem:[%s5553_s5 + $0x1858] sm:$0xff]  ;;  %4659 = vmatpush.msrb.mxu3 %v1268_v2 }
 0x700   : > { %v1132_v18 = vld [vmem:[%s5553_s5 + $0x1a58] sm:$0xff]  ;;  %4601 = vmatpush.msrb.mxu0 %v1068_v40 }
 0x701   : > { %v1196_v57 = vld [vmem:[%s5553_s5 + $0x1c58] sm:$0xff]  ;;  %4621 = vmatpush.msrb.mxu1 %v1132_v18 }
 0x702   : > { %v1264_v54 = vld [vmem:[%s5553_s5 + $0x1e78] sm:$0xff]  ;;  %4641 = vmatpush.msrb.mxu2 %v1196_v57 }
 0x703   : > { %v1064_v50 = vld [vmem:[%s5553_s5 + $0x1838] sm:$0xff]  ;;  %4660 = vmatpush.msrb.mxu3 %v1264_v54 }
 0x704   : > { %v1128_v60 = vld [vmem:[%s5553_s5 + $0x1a38] sm:$0xff]  ;;  %4602 = vmatpush.msrb.mxu0 %v1064_v50 }
 0x705   : > { %v1192_v51 = vld [vmem:[%s5553_s5 + $0x1c38] sm:$0xff]  ;;  %4622 = vmatpush.msrb.mxu1 %v1128_v60 }
 0x706   : > { %v1260_v15 = vld [vmem:[%s5553_s5 + $0x1e58] sm:$0xff]  ;;  %4642 = vmatpush.msrb.mxu2 %v1192_v51 }
 0x707   : > { %v1060_v32 = vld [vmem:[%s5553_s5 + $0x1818] sm:$0xff]  ;;  %4661 = vmatpush.msrb.mxu3 %v1260_v15 }
 0x708   : > { %v1124_v9 = vld [vmem:[%s5553_s5 + $0x1a18] sm:$0xff]  ;;  %4603 = vmatpush.msrb.mxu0 %v1060_v32 }
 0x709   : > { %v1188_v22 = vld [vmem:[%s5553_s5 + $0x1c18] sm:$0xff]  ;;  %4623 = vmatpush.msrb.mxu1 %v1124_v9  ;;  %4604 = vmatmul.f32.vlgmr.msrb.gmra.mxu0 %v5871_v36 }
 0x70a   : > { %v1256_v52 = vld [vmem:[%s5553_s5 + $0x1e38] sm:$0xff]  ;;  %4643 = vmatpush.msrb.mxu2 %v1188_v22  ;;  %4624 = vmatmul.f32.vlgmr.msrb.gmra.mxu1 %v5881_v42 }
 0x70b   : > { %v1376_v19 = vld [vmem:[%s5553_s5 + $0x21f8] sm:$0xff]  ;;  %4662 = vmatpush.msrb.mxu3 %v1256_v52  ;;  %4644 = vmatmul.f32.vlgmr.msrb.gmra.mxu2 %v5873_v37 }
 0x70c   : > { %v1440_v20 = vld [vmem:[%s5553_s5 + $0x23f8] sm:$0xff]  ;;  %4668 = vmatpush.msra.mxu0 %v1376_v19 }
 0x70d   : > { %v1504_v63 = vld [vmem:[%s5553_s5 + $0x25f8] sm:$0xff]  ;;  %4688 = vmatpush.msra.mxu1 %v1440_v20 }
 0x70e   : > { %v1252_v27 = vld [vmem:[%s5553_s5 + $0x1e18] sm:$0xff]  ;;  %4708 = vmatpush.msra.mxu2 %v1504_v63 }
 0x70f   : > { %v1372_v53 = vld [vmem:[%s5553_s5 + $0x21d8] sm:$0xff]  ;;  %4663 = vmatpush.msrb.mxu3 %v1252_v27 }
 0x710   : > { %v1436_v12 = vld [vmem:[%s5553_s5 + $0x23d8] sm:$0xff]  ;;  %4664 = vmatmul.f32.vlgmr.msrb.gmra.mxu3 %v5883_v43  ;;  %4669 = vmatpush.msra.mxu0 %v1372_v53 }
 0x711   : > { %v1500_v25 = vld [vmem:[%s5553_s5 + $0x25d8] sm:$0xff]  ;;  %4689 = vmatpush.msra.mxu1 %v1436_v12 }
 0x712   : > { %v1568_v26 = vld [vmem:[%s5553_s5 + $0x27f8] sm:$0xff]  ;;  %4709 = vmatpush.msra.mxu2 %v1500_v25 }
 0x713   : > { %v1368_v36 = vld [vmem:[%s5553_s5 + $0x21b8] sm:$0xff]  ;;  %4728 = vmatpush.msra.mxu3 %v1568_v26 }
 0x714   : > { %v1432_v37 = vld [vmem:[%s5553_s5 + $0x23b8] sm:$0xff]  ;;  %4670 = vmatpush.msra.mxu0 %v1368_v36 }
 0x715   : > { %v1496_v0 = vld [vmem:[%s5553_s5 + $0x25b8] sm:$0xff]  ;;  %4690 = vmatpush.msra.mxu1 %v1432_v37 }
 0x716   : > { %v1564_v45 = vld [vmem:[%s5553_s5 + $0x27d8] sm:$0xff]  ;;  %4710 = vmatpush.msra.mxu2 %v1496_v0 }
 0x717   : > { %v1364_v1 = vld [vmem:[%s5553_s5 + $0x2198] sm:$0xff]  ;;  %4729 = vmatpush.msra.mxu3 %v1564_v45 }
 0x718   : > { %v1428_v47 = vld [vmem:[%s5553_s5 + $0x2398] sm:$0xff]  ;;  %4671 = vmatpush.msra.mxu0 %v1364_v1 }
 0x719   : > { %v1492_v42 = vld [vmem:[%s5553_s5 + $0x2598] sm:$0xff]  ;;  %4691 = vmatpush.msra.mxu1 %v1428_v47 }
 0x71a   : > { %v1560_v43 = vld [vmem:[%s5553_s5 + $0x27b8] sm:$0xff]  ;;  %4711 = vmatpush.msra.mxu2 %v1492_v42 }
 0x71b   : > { %v1360_v48 = vld [vmem:[%s5553_s5 + $0x2178] sm:$0xff]  ;;  %4730 = vmatpush.msra.mxu3 %v1560_v43 }
 0x71c   : > { %v1424_v49 = vld [vmem:[%s5553_s5 + $0x2378] sm:$0xff]  ;;  %4672 = vmatpush.msra.mxu0 %v1360_v48 }
 0x71d   : > { %v1488_v35 = vld [vmem:[%s5553_s5 + $0x2578] sm:$0xff]  ;;  %4692 = vmatpush.msra.mxu1 %v1424_v49 }
 0x71e   : > { %v1556_v2 = vld [vmem:[%s5553_s5 + $0x2798] sm:$0xff]  ;;  %4712 = vmatpush.msra.mxu2 %v1488_v35 }
 0x71f   : > { %v1356_v40 = vld [vmem:[%s5553_s5 + $0x2158] sm:$0xff]  ;;  %4731 = vmatpush.msra.mxu3 %v1556_v2 }
 0x720   : > { %v1420_v18 = vld [vmem:[%s5553_s5 + $0x2358] sm:$0xff]  ;;  %4673 = vmatpush.msra.mxu0 %v1356_v40 }
 0x721   : > { %v1484_v57 = vld [vmem:[%s5553_s5 + $0x2558] sm:$0xff]  ;;  %4693 = vmatpush.msra.mxu1 %v1420_v18 }
 0x722   : > { %v1552_v54 = vld [vmem:[%s5553_s5 + $0x2778] sm:$0xff]  ;;  %4713 = vmatpush.msra.mxu2 %v1484_v57 }
 0x723   : > { %v1352_v50 = vld [vmem:[%s5553_s5 + $0x2138] sm:$0xff]  ;;  %4732 = vmatpush.msra.mxu3 %v1552_v54 }
 0x724   : > { %v1416_v60 = vld [vmem:[%s5553_s5 + $0x2338] sm:$0xff]  ;;  %4674 = vmatpush.msra.mxu0 %v1352_v50 }
 0x725   : > { %v1480_v51 = vld [vmem:[%s5553_s5 + $0x2538] sm:$0xff]  ;;  %4694 = vmatpush.msra.mxu1 %v1416_v60 }
 0x726   : > { %v1548_v15 = vld [vmem:[%s5553_s5 + $0x2758] sm:$0xff]  ;;  %4714 = vmatpush.msra.mxu2 %v1480_v51 }
 0x727   : > { %v1348_v32 = vld [vmem:[%s5553_s5 + $0x2118] sm:$0xff]  ;;  %4733 = vmatpush.msra.mxu3 %v1548_v15 }
 0x728   : > { %v1412_v9 = vld [vmem:[%s5553_s5 + $0x2318] sm:$0xff]  ;;  %4675 = vmatpush.msra.mxu0 %v1348_v32 }
 0x729   : > { %v1476_v22 = vld [vmem:[%s5553_s5 + $0x2518] sm:$0xff]  ;;  %4695 = vmatpush.msra.mxu1 %v1412_v9 }
 0x72a   : > { %v1544_v52 = vld [vmem:[%s5553_s5 + $0x2738] sm:$0xff]  ;;  %4715 = vmatpush.msra.mxu2 %v1476_v22 }
 0x72b   : > { %v1344_v19 = vld [vmem:[%s5553_s5 + $0x20f8] sm:$0xff]  ;;  %4734 = vmatpush.msra.mxu3 %v1544_v52 }
 0x72c   : > { %v1408_v20 = vld [vmem:[%s5553_s5 + $0x22f8] sm:$0xff]  ;;  %4676 = vmatpush.msra.mxu0 %v1344_v19 }
 0x72d   : > { %v1472_v63 = vld [vmem:[%s5553_s5 + $0x24f8] sm:$0xff]  ;;  %4696 = vmatpush.msra.mxu1 %v1408_v20 }
 0x72e   : > { %v1540_v27 = vld [vmem:[%s5553_s5 + $0x2718] sm:$0xff]  ;;  %4716 = vmatpush.msra.mxu2 %v1472_v63 }
 0x72f   : > { %v1340_v53 = vld [vmem:[%s5553_s5 + $0x20d8] sm:$0xff]  ;;  %4735 = vmatpush.msra.mxu3 %v1540_v27 }
 0x730   : > { %v1404_v12 = vld [vmem:[%s5553_s5 + $0x22d8] sm:$0xff]  ;;  %4677 = vmatpush.msra.mxu0 %v1340_v53 }
 0x731   : > { %v1468_v25 = vld [vmem:[%s5553_s5 + $0x24d8] sm:$0xff]  ;;  %4697 = vmatpush.msra.mxu1 %v1404_v12 }
 0x732   : > { %v1536_v26 = vld [vmem:[%s5553_s5 + $0x26f8] sm:$0xff]  ;;  %4717 = vmatpush.msra.mxu2 %v1468_v25 }
 0x733   : > { %v1336_v36 = vld [vmem:[%s5553_s5 + $0x20b8] sm:$0xff]  ;;  %4736 = vmatpush.msra.mxu3 %v1536_v26 }
 0x734   : > { %v1400_v37 = vld [vmem:[%s5553_s5 + $0x22b8] sm:$0xff]  ;;  %4678 = vmatpush.msra.mxu0 %v1336_v36 }
 0x735   : > { %v1464_v0 = vld [vmem:[%s5553_s5 + $0x24b8] sm:$0xff]  ;;  %4698 = vmatpush.msra.mxu1 %v1400_v37 }
 0x736   : > { %v1532_v45 = vld [vmem:[%s5553_s5 + $0x26d8] sm:$0xff]  ;;  %4718 = vmatpush.msra.mxu2 %v1464_v0 }
 0x737   : > { %v1332_v1 = vld [vmem:[%s5553_s5 + $0x2098] sm:$0xff]  ;;  %4737 = vmatpush.msra.mxu3 %v1532_v45 }
 0x738   : > { %v1396_v47 = vld [vmem:[%s5553_s5 + $0x2298] sm:$0xff]  ;;  %4679 = vmatpush.msra.mxu0 %v1332_v1 }
 0x739   : > { %v1460_v42 = vld [vmem:[%s5553_s5 + $0x2498] sm:$0xff]  ;;  %4699 = vmatpush.msra.mxu1 %v1396_v47 }
 0x73a   : > { %v1528_v43 = vld [vmem:[%s5553_s5 + $0x26b8] sm:$0xff]  ;;  %4719 = vmatpush.msra.mxu2 %v1460_v42 }
 0x73b   : > { %v1328_v48 = vld [vmem:[%s5553_s5 + $0x2078] sm:$0xff]  ;;  %4738 = vmatpush.msra.mxu3 %v1528_v43 }
 0x73c   : > { %v1392_v49 = vld [vmem:[%s5553_s5 + $0x2278] sm:$0xff]  ;;  %4680 = vmatpush.msra.mxu0 %v1328_v48 }
 0x73d   : > { %v1456_v35 = vld [vmem:[%s5553_s5 + $0x2478] sm:$0xff]  ;;  %4700 = vmatpush.msra.mxu1 %v1392_v49 }
 0x73e   : > { %v1524_v2 = vld [vmem:[%s5553_s5 + $0x2698] sm:$0xff]  ;;  %4720 = vmatpush.msra.mxu2 %v1456_v35 }
 0x73f   : > { %v1324_v40 = vld [vmem:[%s5553_s5 + $0x2058] sm:$0xff]  ;;  %4739 = vmatpush.msra.mxu3 %v1524_v2 }
 0x740   : > { %v1388_v18 = vld [vmem:[%s5553_s5 + $0x2258] sm:$0xff]  ;;  %4681 = vmatpush.msra.mxu0 %v1324_v40 }
 0x741   : > { %v1452_v57 = vld [vmem:[%s5553_s5 + $0x2458] sm:$0xff]  ;;  %4701 = vmatpush.msra.mxu1 %v1388_v18 }
 0x742   : > { %v1520_v54 = vld [vmem:[%s5553_s5 + $0x2678] sm:$0xff]  ;;  %4721 = vmatpush.msra.mxu2 %v1452_v57 }
 0x743   : > { %v1320_v50 = vld [vmem:[%s5553_s5 + $0x2038] sm:$0xff]  ;;  %4740 = vmatpush.msra.mxu3 %v1520_v54 }
 0x744   : > { %v1384_v60 = vld [vmem:[%s5553_s5 + $0x2238] sm:$0xff]  ;;  %4682 = vmatpush.msra.mxu0 %v1320_v50 }
 0x745   : > { %v1448_v51 = vld [vmem:[%s5553_s5 + $0x2438] sm:$0xff]  ;;  %4702 = vmatpush.msra.mxu1 %v1384_v60 }
 0x746   : > { %v1516_v15 = vld [vmem:[%s5553_s5 + $0x2658] sm:$0xff]  ;;  %4722 = vmatpush.msra.mxu2 %v1448_v51 }
 0x747   : > { %v1316_v32 = vld [vmem:[%s5553_s5 + $0x2018] sm:$0xff]  ;;  %4741 = vmatpush.msra.mxu3 %v1516_v15 }
 0x748   : > { %v1380_v9 = vld [vmem:[%s5553_s5 + $0x2218] sm:$0xff]  ;;  %4683 = vmatpush.msra.mxu0 %v1316_v32 }
 0x749   : > { %v1444_v22 = vld [vmem:[%s5553_s5 + $0x2418] sm:$0xff]  ;;  %4703 = vmatpush.msra.mxu1 %v1380_v9  ;;  %4684 = vmatmul.f32.vlgmr.msra.gmra.mxu0 %v5950_v61 }
 0x74a   : > { %v1512_v52 = vld [vmem:[%s5553_s5 + $0x2638] sm:$0xff]  ;;  %4723 = vmatpush.msra.mxu2 %v1444_v22  ;;  %4704 = vmatmul.f32.vlgmr.msra.gmra.mxu1 %v5960_v7 }
 0x74b   : > { %v1632_v19 = vld [vmem:[%s5553_s5 + $0x29f8] sm:$0xff]  ;;  %4742 = vmatpush.msra.mxu3 %v1512_v52  ;;  %4724 = vmatmul.f32.vlgmr.msra.gmra.mxu2 %v5952_v62 }
 0x74c   : > { %v1696_v20 = vld [vmem:[%s5553_s5 + $0x2bf8] sm:$0xff]  ;;  %4748 = vmatpush.msrb.mxu0 %v1632_v19 }
 0x74d   : > { %v1760_v63 = vld [vmem:[%s5553_s5 + $0x2df8] sm:$0xff]  ;;  %4768 = vmatpush.msrb.mxu1 %v1696_v20 }
 0x74e   : > { %v1508_v27 = vld [vmem:[%s5553_s5 + $0x2618] sm:$0xff]  ;;  %4788 = vmatpush.msrb.mxu2 %v1760_v63 }
 0x74f   : > { %v1628_v53 = vld [vmem:[%s5553_s5 + $0x29d8] sm:$0xff]  ;;  %4743 = vmatpush.msra.mxu3 %v1508_v27 }
 0x750   : > { %v1692_v12 = vld [vmem:[%s5553_s5 + $0x2bd8] sm:$0xff]  ;;  %4744 = vmatmul.f32.vlgmr.msra.gmra.mxu3 %v5962_v8  ;;  %4749 = vmatpush.msrb.mxu0 %v1628_v53 }
 0x751   : > { %v1756_v25 = vld [vmem:[%s5553_s5 + $0x2dd8] sm:$0xff]  ;;  %4769 = vmatpush.msrb.mxu1 %v1692_v12 }
 0x752   : > { %v1824_v26 = vld [vmem:[%s5553_s5 + $0x2ff8] sm:$0xff]  ;;  %4789 = vmatpush.msrb.mxu2 %v1756_v25 }
 0x753   : > { %v1624_v61 = vld [vmem:[%s5553_s5 + $0x29b8] sm:$0xff]  ;;  %4808 = vmatpush.msrb.mxu3 %v1824_v26 }
 0x754   : > { %v1688_v62 = vld [vmem:[%s5553_s5 + $0x2bb8] sm:$0xff]  ;;  %4750 = vmatpush.msrb.mxu0 %v1624_v61 }
 0x755   : > { %v1752_v36 = vld [vmem:[%s5553_s5 + $0x2db8] sm:$0xff]  ;;  %4770 = vmatpush.msrb.mxu1 %v1688_v62 }
 0x756   : > { %v1820_v37 = vld [vmem:[%s5553_s5 + $0x2fd8] sm:$0xff]  ;;  %4790 = vmatpush.msrb.mxu2 %v1752_v36 }
 0x757   : > { %v1620_v0 = vld [vmem:[%s5553_s5 + $0x2998] sm:$0xff]  ;;  %4809 = vmatpush.msrb.mxu3 %v1820_v37 }
 0x758   : > { %v1684_v45 = vld [vmem:[%s5553_s5 + $0x2b98] sm:$0xff]  ;;  %4751 = vmatpush.msrb.mxu0 %v1620_v0 }
 0x759   : > { %v1748_v7 = vld [vmem:[%s5553_s5 + $0x2d98] sm:$0xff]  ;;  %4771 = vmatpush.msrb.mxu1 %v1684_v45 }
 0x75a   : > { %v1816_v8 = vld [vmem:[%s5553_s5 + $0x2fb8] sm:$0xff]  ;;  %4791 = vmatpush.msrb.mxu2 %v1748_v7 }
 0x75b   : > { %v1616_v1 = vld [vmem:[%s5553_s5 + $0x2978] sm:$0xff]  ;;  %4810 = vmatpush.msrb.mxu3 %v1816_v8 }
 0x75c   : > { %v1680_v47 = vld [vmem:[%s5553_s5 + $0x2b78] sm:$0xff]  ;;  %4752 = vmatpush.msrb.mxu0 %v1616_v1  ;;  %v7722_v1 = vld [vmem:[%s5559_s9] sm:$0xf] }
 0x75d   : > { %v1744_v42 = vld [vmem:[%s5553_s5 + $0x2d78] sm:$0xff]  ;;  %4772 = vmatpush.msrb.mxu1 %v1680_v47  ;;  %v2339_v47 = vperm.slane %v7722_v1, 0 }
 0x75e   : > { %v1812_v43 = vld [vmem:[%s5553_s5 + $0x2f98] sm:$0xff]  ;;  %4792 = vmatpush.msrb.mxu2 %v1744_v42 }
 0x75f   : > { %v1612_v48 = vld [vmem:[%s5553_s5 + $0x2958] sm:$0xff]  ;;  %4811 = vmatpush.msrb.mxu3 %v1812_v43 }
 0x760   : > { %v1676_v49 = vld [vmem:[%s5553_s5 + $0x2b58] sm:$0xff]  ;;  %4753 = vmatpush.msrb.mxu0 %v1612_v48  ;;  %v2341_v48 = vperm.slane %v7722_v1, 2 }
 0x761   : > { %v1740_v35 = vld [vmem:[%s5553_s5 + $0x2d58] sm:$0xff]  ;;  %4773 = vmatpush.msrb.mxu1 %v1676_v49 }
 0x762   : > { %v1808_v2 = vld [vmem:[%s5553_s5 + $0x2f78] sm:$0xff]  ;;  %4793 = vmatpush.msrb.mxu2 %v1740_v35 }
 0x763   : > { %v1608_v40 = vld [vmem:[%s5553_s5 + $0x2938] sm:$0xff]  ;;  %4812 = vmatpush.msrb.mxu3 %v1808_v2  ;;  %v3725_v2 = vpop.f32.mrf.mxu0 }
 0x764   : > { %v1672_v18 = vld [vmem:[%s5553_s5 + $0x2b38] sm:$0xff]  ;;  %4754 = vmatpush.msrb.mxu0 %v1608_v40 }
 0x765   : > { %v1736_v57 = vld [vmem:[%s5553_s5 + $0x2d38] sm:$0xff]  ;;  %4774 = vmatpush.msrb.mxu1 %v1672_v18 }
 0x766   : > { %v1804_v54 = vld [vmem:[%s5553_s5 + $0x2f58] sm:$0xff]  ;;  %4794 = vmatpush.msrb.mxu2 %v1736_v57 }
 0x767   : > { %v1604_v50 = vld [vmem:[%s5553_s5 + $0x2918] sm:$0xff]  ;;  %4813 = vmatpush.msrb.mxu3 %v1804_v54 }
 0x768   : > { %v1668_v60 = vld [vmem:[%s5553_s5 + $0x2b18] sm:$0xff]  ;;  %4755 = vmatpush.msrb.mxu0 %v1604_v50  ;;  %v2446_v50 = vadd.f32 %v6424_v59, %v2339_v47 }
 0x769   : > { %v1732_v51 = vld [vmem:[%s5553_s5 + $0x2d18] sm:$0xff]  ;;  %4775 = vmatpush.msrb.mxu1 %v1668_v60 }
 0x76a   : > { %v1800_v15 = vld [vmem:[%s5553_s5 + $0x2f38] sm:$0xff]  ;;  %4795 = vmatpush.msrb.mxu2 %v1732_v51 }
 0x76b   : > { %v1600_v32 = vld [vmem:[%s5553_s5 + $0x28f8] sm:$0xff]  ;;  %4814 = vmatpush.msrb.mxu3 %v1800_v15  ;;  %v3726_v15 = vadd.f32 %v3725_v2, %v2341_v48 }
 0x76c   : > { %v1664_v9 = vld [vmem:[%s5553_s5 + $0x2af8] sm:$0xff]  ;;  %4756 = vmatpush.msrb.mxu0 %v1600_v32 }
 0x76d   : > { %v1728_v22 = vld [vmem:[%s5553_s5 + $0x2cf8] sm:$0xff]  ;;  %4776 = vmatpush.msrb.mxu1 %v1664_v9 }
 0x76e   : > { %v1796_v52 = vld [vmem:[%s5553_s5 + $0x2f18] sm:$0xff]  ;;  %4796 = vmatpush.msrb.mxu2 %v1728_v22  ;;  %v3745_v22 = vpop.f32.mrf.mxu1 }
 0x76f   : > { %v1596_v19 = vld [vmem:[%s5553_s5 + $0x28d8] sm:$0xff]  ;;  %4815 = vmatpush.msrb.mxu3 %v1796_v52 }
 0x770   : > { %v1660_v20 = vld [vmem:[%s5553_s5 + $0x2ad8] sm:$0xff]  ;;  %4757 = vmatpush.msrb.mxu0 %v1596_v19  ;;  %v2466_v19 = vadd.f32 %v6428_v4, %v2446_v50 }
 0x771   : > { %v1724_v63 = vld [vmem:[%s5553_s5 + $0x2cd8] sm:$0xff]  ;;  %4777 = vmatpush.msrb.mxu1 %v1660_v20 }
 0x772   : > { %v1792_v27 = vld [vmem:[%s5553_s5 + $0x2ef8] sm:$0xff]  ;;  %4797 = vmatpush.msrb.mxu2 %v1724_v63 }
 0x773   : > { %v1592_v53 = vld [vmem:[%s5553_s5 + $0x28b8] sm:$0xff]  ;;  %4816 = vmatpush.msrb.mxu3 %v1792_v27  ;;  %v3746_v27 = vadd.f32 %v3745_v22, %v3726_v15 }
 0x774   : > { %v1656_v12 = vld [vmem:[%s5553_s5 + $0x2ab8] sm:$0xff]  ;;  %4758 = vmatpush.msrb.mxu0 %v1592_v53  ;;  %v3765_v53 = vpop.f32.mrf.mxu2 }
 0x775   : > { %v1720_v25 = vld [vmem:[%s5553_s5 + $0x2cb8] sm:$0xff]  ;;  %4778 = vmatpush.msrb.mxu1 %v1656_v12 }
 0x776   : > { %v1788_v26 = vld [vmem:[%s5553_s5 + $0x2ed8] sm:$0xff]  ;;  %4798 = vmatpush.msrb.mxu2 %v1720_v25  ;;  %v3825_v15 = vpop.f32.mrf.mxu1 }
 0x777   : > { %v1588_v61 = vld [vmem:[%s5553_s5 + $0x2898] sm:$0xff]  ;;  %4817 = vmatpush.msrb.mxu3 %v1788_v26 }
 0x778   : > { %v1652_v62 = vld [vmem:[%s5553_s5 + $0x2a98] sm:$0xff]  ;;  %4759 = vmatpush.msrb.mxu0 %v1588_v61  ;;  %v2486_v61 = vadd.f32 %v6442_v21, %v2466_v19 }
 0x779   : > { %v1716_v36 = vld [vmem:[%s5553_s5 + $0x2c98] sm:$0xff]  ;;  %4779 = vmatpush.msrb.mxu1 %v1652_v62  ;;  %v3766_v62 = vadd.f32 %v3765_v53, %v3746_v27 }
 0x77a   : > { %v1784_v37 = vld [vmem:[%s5553_s5 + $0x2eb8] sm:$0xff]  ;;  %4799 = vmatpush.msrb.mxu2 %v1716_v36 }
 0x77b   : > { %v1584_v0 = vld [vmem:[%s5553_s5 + $0x2878] sm:$0xff]  ;;  %4818 = vmatpush.msrb.mxu3 %v1784_v37 }
 0x77c   : > { %v1648_v45 = vld [vmem:[%s5553_s5 + $0x2a78] sm:$0xff]  ;;  %4760 = vmatpush.msrb.mxu0 %v1584_v0  ;;  %v3785_v0 = vpop.f32.mrf.mxu3  ;;  %v3845_v53 = vpop.f32.mrf.mxu2 }
 0x77d   : > { %v1712_v7 = vld [vmem:[%s5553_s5 + $0x2c78] sm:$0xff]  ;;  %4780 = vmatpush.msrb.mxu1 %v1648_v45 }
 0x77e   : > { %v1780_v8 = vld [vmem:[%s5553_s5 + $0x2e98] sm:$0xff]  ;;  %4800 = vmatpush.msrb.mxu2 %v1712_v7  ;;  %v2506_v7 = vadd.f32 %v6448_v28, %v2486_v61 }
 0x77f   : > { %v1580_v42 = vld [vmem:[%s5553_s5 + $0x2858] sm:$0xff]  ;;  %4819 = vmatpush.msrb.mxu3 %v1780_v8 }
 0x780   : > { %v1644_v43 = vld [vmem:[%s5553_s5 + $0x2a58] sm:$0xff]  ;;  %4761 = vmatpush.msrb.mxu0 %v1580_v42  ;;  %v3786_v42 = vadd.f32 %v3785_v0, %v3766_v62 }
 0x781   : > { %v1708_v49 = vld [vmem:[%s5553_s5 + $0x2c58] sm:$0xff]  ;;  %4781 = vmatpush.msrb.mxu1 %v1644_v43 }
 0x782   : > { %v1776_v35 = vld [vmem:[%s5553_s5 + $0x2e78] sm:$0xff]  ;;  %4801 = vmatpush.msrb.mxu2 %v1708_v49  ;;  %v3805_v49 = vpop.f32.mrf.mxu0 }
 0x783   : > { %v1576_v40 = vld [vmem:[%s5553_s5 + $0x2838] sm:$0xff]  ;;  %4820 = vmatpush.msrb.mxu3 %v1776_v35  ;;  %v3806_v50 = vadd.f32 %v3805_v49, %v3786_v42 }
 0x784   : > { %v1640_v18 = vld [vmem:[%s5553_s5 + $0x2a38] sm:$0xff]  ;;  %4762 = vmatpush.msrb.mxu0 %v1576_v40 }
 0x785   : > { %v1704_v57 = vld [vmem:[%s5553_s5 + $0x2c38] sm:$0xff]  ;;  %4782 = vmatpush.msrb.mxu1 %v1640_v18  ;;  %v2526_v18 = vadd.f32 %v6450_v29, %v2506_v7 }
 0x786   : > { %v1772_v54 = vld [vmem:[%s5553_s5 + $0x2e58] sm:$0xff]  ;;  %4802 = vmatpush.msrb.mxu2 %v1704_v57 }
 0x787   : > { %v1572_v60 = vld [vmem:[%s5553_s5 + $0x2818] sm:$0xff]  ;;  %4821 = vmatpush.msrb.mxu3 %v1772_v54 }
 0x788   : > { %v1636_v51 = vld [vmem:[%s5553_s5 + $0x2a18] sm:$0xff]  ;;  %4763 = vmatpush.msrb.mxu0 %v1572_v60 }
 0x789   : > { %v1700_v32 = vld [vmem:[%s5553_s5 + $0x2c18] sm:$0xff]  ;;  %4783 = vmatpush.msrb.mxu1 %v1636_v51  ;;  %4764 = vmatmul.f32.vlgmr.msrb.gmra.mxu0 %v6029_v30 }
 0x78a   : > { %v1768_v9 = vld [vmem:[%s5553_s5 + $0x2e38] sm:$0xff]  ;;  %4803 = vmatpush.msrb.mxu2 %v1700_v32  ;;  %4784 = vmatmul.f32.vlgmr.msrb.gmra.mxu1 %v6039_v38 }
 0x78b   : > { %v1888_v59 = vld [vmem:[%s5553_s5 + $0x31f8] sm:$0xff]  ;;  %4822 = vmatpush.msrb.mxu3 %v1768_v9  ;;  %4804 = vmatmul.f32.vlgmr.msrb.gmra.mxu2 %v6031_v31 }
 0x78c   : > { %v1952_v52 = vld [vmem:[%s5553_s5 + $0x33f8] sm:$0xff]  ;;  %4828 = vmatpush.msra.mxu0 %v1888_v59  ;;  %v2546_v59 = vadd.f32 %v6454_v34, %v2526_v18 }
 0x78d   : > { %v2016_v20 = vld [vmem:[%s5553_s5 + $0x35f8] sm:$0xff]  ;;  %4848 = vmatpush.msra.mxu1 %v1952_v52 }
 0x78e   : > { %v1764_v63 = vld [vmem:[%s5553_s5 + $0x2e18] sm:$0xff]  ;;  %4868 = vmatpush.msra.mxu2 %v2016_v20  ;;  %v3826_v20 = vadd.f32 %v3825_v15, %v3806_v50 }
 0x78f   : > { %v1884_v12 = vld [vmem:[%s5553_s5 + $0x31d8] sm:$0xff]  ;;  %4823 = vmatpush.msrb.mxu3 %v1764_v63 }
 0x790   : > { %v1948_v25 = vld [vmem:[%s5553_s5 + $0x33d8] sm:$0xff]  ;;  %4824 = vmatmul.f32.vlgmr.msrb.gmra.mxu3 %v6041_v39  ;;  %4829 = vmatpush.msra.mxu0 %v1884_v12 }
 0x791   : > { %v2012_v4 = vld [vmem:[%s5553_s5 + $0x35d8] sm:$0xff]  ;;  %4849 = vmatpush.msra.mxu1 %v1948_v25 }
 0x792   : > { %v2080_v26 = vld [vmem:[%s5553_s5 + $0x37f8] sm:$0xff]  ;;  %4869 = vmatpush.msra.mxu2 %v2012_v4 }
 0x793   : > { %v1880_v30 = vld [vmem:[%s5553_s5 + $0x31b8] sm:$0xff]  ;;  %4888 = vmatpush.msra.mxu3 %v2080_v26  ;;  %v2566_v26 = vadd.f32 %v6470_v55, %v2546_v59 }
 0x794   : > { %v1944_v31 = vld [vmem:[%s5553_s5 + $0x33b8] sm:$0xff]  ;;  %4830 = vmatpush.msra.mxu0 %v1880_v30 }
 0x795   : > { %v2008_v36 = vld [vmem:[%s5553_s5 + $0x35b8] sm:$0xff]  ;;  %4850 = vmatpush.msra.mxu1 %v1944_v31  ;;  %v3846_v31 = vadd.f32 %v3845_v53, %v3826_v20  ;;  %v5320_v53 = vld.sshfl [vmem:[#allocation1 + $0x10] sm:$0xff pattern:$0x73625140] }
 0x796   : > { %v2076_v37 = vld [vmem:[%s5553_s5 + $0x37d8] sm:$0xff]  ;;  %4870 = vmatpush.msra.mxu2 %v2008_v36 }
 0x797   : > { %v1876_v21 = vld [vmem:[%s5553_s5 + $0x3198] sm:$0xff]  ;;  %4889 = vmatpush.msra.mxu3 %v2076_v37  ;;  %v3865_v37 = vpop.f32.mrf.mxu3 }
 0x798   : > { %v1940_v38 = vld [vmem:[%s5553_s5 + $0x3398] sm:$0xff]  ;;  %4831 = vmatpush.msra.mxu0 %v1876_v21 }
 0x799   : > { %v2004_v39 = vld [vmem:[%s5553_s5 + $0x3598] sm:$0xff]  ;;  %4851 = vmatpush.msra.mxu1 %v1940_v38 }
 0x79a   : > { %v2072_v45 = vld [vmem:[%s5553_s5 + $0x37b8] sm:$0xff]  ;;  %4871 = vmatpush.msra.mxu2 %v2004_v39  ;;  %v2586_v39 = vadd.f32 %v6482_v10, %v2566_v26 }
 0x79b   : > { %v1872_v8 = vld [vmem:[%s5553_s5 + $0x3178] sm:$0xff]  ;;  %4890 = vmatpush.msra.mxu3 %v2072_v45  ;;  %v3885_v45 = vpop.f32.mrf.mxu0 }
 0x79c   : > { %v1936_v47 = vld [vmem:[%s5553_s5 + $0x3378] sm:$0xff]  ;;  %4832 = vmatpush.msra.mxu0 %v1872_v8 }
 0x79d   : > { %v2000_v43 = vld [vmem:[%s5553_s5 + $0x3578] sm:$0xff]  ;;  %4852 = vmatpush.msra.mxu1 %v1936_v47  ;;  %v3866_v47 = vadd.f32 %v3865_v37, %v3846_v31  ;;  %v5321_v31 = vld.sshfl [vmem:[#allocation1 + $0x8] sm:$0xff pattern:$0x73625140] }
 0x79e   : > { %v2068_v48 = vld [vmem:[%s5553_s5 + $0x3798] sm:$0xff]  ;;  %4872 = vmatpush.msra.mxu2 %v2000_v43 }
 0x79f   : > { %v1868_v35 = vld [vmem:[%s5553_s5 + $0x3158] sm:$0xff]  ;;  %4891 = vmatpush.msra.mxu3 %v2068_v48  ;;  %v2606_v48 = vadd.f32 %v6474_v58, %v2586_v39 }
 0x7a0   : > { %v1932_v28 = vld [vmem:[%s5553_s5 + $0x3358] sm:$0xff]  ;;  %4833 = vmatpush.msra.mxu0 %v1868_v35  ;;  %v3886_v35 = vadd.f32 %v3885_v45, %v3866_v47 }
 0x7a1   : > { %v1996_v2 = vld [vmem:[%s5553_s5 + $0x3558] sm:$0xff]  ;;  %4853 = vmatpush.msra.mxu1 %v1932_v28  ;;  %v2626_v50 = vadd.f32 %v6478_v5, %v2606_v48 }
 0x7a2   : > { %v2064_v40 = vld [vmem:[%s5553_s5 + $0x3778] sm:$0xff]  ;;  %4873 = vmatpush.msra.mxu2 %v1996_v2 }
 0x7a3   : > { %v1864_v57 = vld [vmem:[%s5553_s5 + $0x3138] sm:$0xff]  ;;  %4892 = vmatpush.msra.mxu3 %v2064_v40  ;;  %v3905_v40 = vpop.f32.mrf.mxu1 }
 0x7a4   : > { %v1928_v54 = vld [vmem:[%s5553_s5 + $0x3338] sm:$0xff]  ;;  %4834 = vmatpush.msra.mxu0 %v1864_v57 }
 0x7a5   : > { %v1992_v60 = vld [vmem:[%s5553_s5 + $0x3538] sm:$0xff]  ;;  %4854 = vmatpush.msra.mxu1 %v1928_v54 }
 0x7a6   : > { %v2060_v51 = vld [vmem:[%s5553_s5 + $0x3758] sm:$0xff]  ;;  %4874 = vmatpush.msra.mxu2 %v1992_v60  ;;  %v3925_v60 = vpop.f32.mrf.mxu2 }
 0x7a7   : > { %v1860_v32 = vld [vmem:[%s5553_s5 + $0x3118] sm:$0xff]  ;;  %4893 = vmatpush.msra.mxu3 %v2060_v51 }
 0x7a8   : > { %v1924_v29 = vld [vmem:[%s5553_s5 + $0x3318] sm:$0xff]  ;;  %4835 = vmatpush.msra.mxu0 %v1860_v32  ;;  %v3906_v32 = vadd.f32 %v3905_v40, %v3886_v35 }
 0x7a9   : > { %v1988_v9 = vld [vmem:[%s5553_s5 + $0x3518] sm:$0xff]  ;;  %4855 = vmatpush.msra.mxu1 %v1924_v29 }
 0x7aa   : > { %v2056_v22 = vld [vmem:[%s5553_s5 + $0x3738] sm:$0xff]  ;;  %4875 = vmatpush.msra.mxu2 %v1988_v9  ;;  %v3926_v59 = vadd.f32 %v3925_v60, %v3906_v32 }
 0x7ab   : > { %v1856_v52 = vld [vmem:[%s5553_s5 + $0x30f8] sm:$0xff]  ;;  %4894 = vmatpush.msra.mxu3 %v2056_v22  ;;  %v2646_v22 = vadd.f32 %v6494_v24, %v2626_v50 }
 0x7ac   : > { %v1920_v19 = vld [vmem:[%s5553_s5 + $0x32f8] sm:$0xff]  ;;  %4836 = vmatpush.msra.mxu0 %v1856_v52 }
 0x7ad   : > { %v1984_v63 = vld [vmem:[%s5553_s5 + $0x34f8] sm:$0xff]  ;;  %4856 = vmatpush.msra.mxu1 %v1920_v19  ;;  %v3945_v19 = vpop.f32.mrf.mxu3  ;;  %v2666_v24 = vadd.f32 %v6506_v46, %v2646_v22  ;;  %v5322_v46 = vld.sshfl [vmem:[#allocation1 + $0x18] sm:$0xff pattern:$0x73625140] }
 0x7ae   : > { %v2052_v27 = vld [vmem:[%s5553_s5 + $0x3718] sm:$0xff]  ;;  %4876 = vmatpush.msra.mxu2 %v1984_v63 }
 0x7af   : > { %v1852_v12 = vld [vmem:[%s5553_s5 + $0x30d8] sm:$0xff]  ;;  %4895 = vmatpush.msra.mxu3 %v2052_v27 }
 0x7b0   : > { %v1916_v34 = vld [vmem:[%s5553_s5 + $0x32d8] sm:$0xff]  ;;  %4837 = vmatpush.msra.mxu0 %v1852_v12  ;;  %v3965_v12 = vpop.f32.mrf.mxu0 }
 0x7b1   : > { %v1980_v25 = vld [vmem:[%s5553_s5 + $0x34d8] sm:$0xff]  ;;  %4857 = vmatpush.msra.mxu1 %v1916_v34 }
 0x7b2   : > { %v2048_v4 = vld [vmem:[%s5553_s5 + $0x36f8] sm:$0xff]  ;;  %4877 = vmatpush.msra.mxu2 %v1980_v25 }
 0x7b3   : > { %v1848_v61 = vld [vmem:[%s5553_s5 + $0x30b8] sm:$0xff]  ;;  %4896 = vmatpush.msra.mxu3 %v2048_v4  ;;  %v3946_v4 = vadd.f32 %v3945_v19, %v3926_v59 }
 0x7b4   : > { %v1912_v30 = vld [vmem:[%s5553_s5 + $0x32b8] sm:$0xff]  ;;  %4838 = vmatpush.msra.mxu0 %v1848_v61 }
 0x7b5   : > { %v1976_v62 = vld [vmem:[%s5553_s5 + $0x34b8] sm:$0xff]  ;;  %4858 = vmatpush.msra.mxu1 %v1912_v30  ;;  %v2686_v30 = vadd.f32 %v6498_v33, %v2666_v24  ;;  %v3966_v37 = vadd.f32 %v3965_v12, %v3946_v4 }
 0x7b6   : > { %v2044_v36 = vld [vmem:[%s5553_s5 + $0x36d8] sm:$0xff]  ;;  %4878 = vmatpush.msra.mxu2 %v1976_v62 }
 0x7b7   : > { %v1844_v0 = vld [vmem:[%s5553_s5 + $0x3098] sm:$0xff]  ;;  %4897 = vmatpush.msra.mxu3 %v2044_v36 }
 0x7b8   : > { %v1908_v55 = vld [vmem:[%s5553_s5 + $0x3298] sm:$0xff]  ;;  %4839 = vmatpush.msra.mxu0 %v1844_v0  ;;  %v4045_v60 = vpop.f32.mrf.mxu0 }
 0x7b9   : > { %v1972_v21 = vld [vmem:[%s5553_s5 + $0x3498] sm:$0xff]  ;;  %4859 = vmatpush.msra.mxu1 %v1908_v55 }
 0x7ba   : > { %v2040_v38 = vld [vmem:[%s5553_s5 + $0x36b8] sm:$0xff]  ;;  %4879 = vmatpush.msra.mxu2 %v1972_v21  ;;  %v3985_v21 = vpop.f32.mrf.mxu1 }
 0x7bb   : > { %v1840_v7 = vld [vmem:[%s5553_s5 + $0x3078] sm:$0xff]  ;;  %4898 = vmatpush.msra.mxu3 %v2040_v38 }
 0x7bc   : > { %v1904_v8 = vld [vmem:[%s5553_s5 + $0x3278] sm:$0xff]  ;;  %4840 = vmatpush.msra.mxu0 %v1840_v7  ;;  %v2706_v7 = vadd.f32 %v6502_v41, %v2686_v30 }
 0x7bd   : > { %v1968_v42 = vld [vmem:[%s5553_s5 + $0x3478] sm:$0xff]  ;;  %4860 = vmatpush.msra.mxu1 %v1904_v8  ;;  %v4005_v8 = vpop.f32.mrf.mxu2 }
 0x7be   : > { %v2036_v43 = vld [vmem:[%s5553_s5 + $0x3698] sm:$0xff]  ;;  %4880 = vmatpush.msra.mxu2 %v1968_v42 }
 0x7bf   : > { %v1836_v10 = vld [vmem:[%s5553_s5 + $0x3058] sm:$0xff]  ;;  %4899 = vmatpush.msra.mxu3 %v2036_v43  ;;  %v3986_v43 = vadd.f32 %v3985_v21, %v3966_v37 }
 0x7c0   : > { %v1900_v49 = vld [vmem:[%s5553_s5 + $0x3258] sm:$0xff]  ;;  %4841 = vmatpush.msra.mxu0 %v1836_v10 }
 0x7c1   : > { %v1964_v28 = vld [vmem:[%s5553_s5 + $0x3458] sm:$0xff]  ;;  %4861 = vmatpush.msra.mxu1 %v1900_v49  ;;  %v2726_v49 = vadd.f32 %v6518_v11, %v2706_v7 }
 0x7c2   : > { %v2032_v2 = vld [vmem:[%s5553_s5 + $0x3678] sm:$0xff]  ;;  %4881 = vmatpush.msra.mxu2 %v1964_v28  ;;  %v4006_v28 = vadd.f32 %v4005_v8, %v3986_v43 }
 0x7c3   : > { %v1832_v18 = vld [vmem:[%s5553_s5 + $0x3038] sm:$0xff]  ;;  %4900 = vmatpush.msra.mxu3 %v2032_v2  ;;  %v2746_v50 = vadd.f32 %v6530_v23, %v2726_v49 }
 0x7c4   : > { %v1896_v58 = vld [vmem:[%s5553_s5 + $0x3238] sm:$0xff]  ;;  %4842 = vmatpush.msra.mxu0 %v1832_v18  ;;  %v4025_v18 = vpop.f32.mrf.mxu3 }
 0x7c5   : > { %v1960_v57 = vld [vmem:[%s5553_s5 + $0x3438] sm:$0xff]  ;;  %4862 = vmatpush.msra.mxu1 %v1896_v58  ;;  %v4026_v32 = vadd.f32 %v4025_v18, %v4006_v28  ;;  %v2766_v22 = vadd.f32 %v6522_v14, %v2746_v50  ;;  %v4085_v12 = vpop.f32.mrf.mxu2  ;;  %v5039_v50 = vld [vmem:[%s7906_s30 + $0x178] sm:$0xff] }
 0x7c6   : > { %v2028_v54 = vld [vmem:[%s5553_s5 + $0x3658] sm:$0xff]  ;;  %4882 = vmatpush.msra.mxu2 %v1960_v57 }
 0x7c7   : > { %v1828_v51 = vld [vmem:[%s5553_s5 + $0x3018] sm:$0xff]  ;;  %4901 = vmatpush.msra.mxu3 %v2028_v54  ;;  %v2786_v24 = vadd.f32 %v6526_v17, %v2766_v22 }
 0x7c8   : > { %v1892_v15 = vld [vmem:[%s5553_s5 + $0x3218] sm:$0xff]  ;;  %4843 = vmatpush.msra.mxu0 %v1828_v51 }
 0x7c9   : > { %v1956_v29 = vld [vmem:[%s5553_s5 + $0x3418] sm:$0xff]  ;;  %4863 = vmatpush.msra.mxu1 %v1892_v15  ;;  %v2806_v30 = vadd.f32 %v6542_v56, %v2786_v24 }
 0x7ca   : > { %v2024_v9 = vld [vmem:[%s5553_s5 + $0x3638] sm:$0xff]  ;;  %4883 = vmatpush.msra.mxu2 %v1956_v29  ;;  %4864 = vmatmul.f32.vlgmr.msra.gmra.mxu1 %v5321_v31 }
 0x7cb   : > { %v2144_v5 = vld [vmem:[%s5553_s5 + $0x39f8] sm:$0xff]  ;;  %4902 = vmatpush.msra.mxu3 %v2024_v9  ;;  %4884 = vmatmul.f32.vlgmr.msra.gmra.mxu2 %v5320_v53 }
 0x7cc   : > { %v2208_v52 = vld [vmem:[%s5553_s5 + $0x3bf8] sm:$0xff]  ;;  %4908 = vmatpush.msrb.mxu0 %v2144_v5  ;;  %v4046_v5 = vadd.f32 %v4045_v60, %v4026_v32  ;;  %v4105_v37 = vpop.f32.mrf.mxu3 }
 0x7cd   : > { %v2272_v20 = vld [vmem:[%s5553_s5 + $0x3df8] sm:$0xff]  ;;  %4928 = vmatpush.msrb.mxu1 %v2208_v52  ;;  %v4165_v18 = vpop.f32.mrf.mxu2 }
 0x7ce   : > { %v2020_v63 = vld [vmem:[%s5553_s5 + $0x3618] sm:$0xff]  ;;  %4948 = vmatpush.msrb.mxu2 %v2272_v20  ;;  %v4065_v20 = vpop.f32.mrf.mxu1 }
 0x7cf   : > { %v5319_v27 = vld.sshfl [vmem:[#allocation1] sm:$0xff pattern:$0x73625140]  ;;  %4903 = vmatpush.msra.mxu3 %v2020_v63  ;;  %v4066_v4 = vadd.f32 %v4065_v20, %v4046_v5  ;;  %v5325_v5 = vld.sshfl [vmem:[#allocation1 + $0x28] sm:$0xff pattern:$0x73625140] }
 0x7d0   : > { %4844 = vmatmul.f32.vlgmr.msra.gmra.mxu0 %v5319_v27  ;;  %v2140_v34 = vld [vmem:[%s5553_s5 + $0x39d8] sm:$0xff]  ;;  %4904 = vmatmul.f32.vlgmr.msra.gmra.mxu3 %v5322_v46  ;;  %v5021_v20 = vld [vmem:[%s7906_s30 + $0xe8] sm:$0xff] }
 0x7d1   : > { %v2204_v25 = vld [vmem:[%s5553_s5 + $0x3bd8] sm:$0xff]  ;;  %4909 = vmatpush.msrb.mxu0 %v2140_v34  ;;  %v4086_v46 = vadd.f32 %v4085_v12, %v4066_v4 }
 0x7d2   : > { %v2268_v26 = vld [vmem:[%s5553_s5 + $0x3dd8] sm:$0xff]  ;;  %4929 = vmatpush.msrb.mxu1 %v2204_v25 }
 0x7d3   : > { %v2336_v61 = vld [vmem:[%s5553_s5 + $0x3ff8] sm:$0xff]  ;;  %4949 = vmatpush.msrb.mxu2 %v2268_v26  ;;  %v4106_v7 = vadd.f32 %v4105_v37, %v4086_v46 }
 0x7d4   : > { %v2136_v62 = vld [vmem:[%s5553_s5 + $0x39b8] sm:$0xff]  ;;  %4968 = vmatpush.msrb.mxu3 %v2336_v61  ;;  %v4185_v32 = vpop.f32.mrf.mxu3 }
 0x7d5   : > { %v2200_v36 = vld [vmem:[%s5553_s5 + $0x3bb8] sm:$0xff]  ;;  %4910 = vmatpush.msrb.mxu0 %v2136_v62  ;;  %v4245_v46 = vpop.f32.mrf.mxu2 }
 0x7d6   : > { %v2264_v0 = vld [vmem:[%s5553_s5 + $0x3db8] sm:$0xff]  ;;  %4930 = vmatpush.msrb.mxu1 %v2200_v36 }
 0x7d7   : > { %v2332_v55 = vld [vmem:[%s5553_s5 + $0x3fd8] sm:$0xff]  ;;  %4950 = vmatpush.msrb.mxu2 %v2264_v0 }
 0x7d8   : > { %v2132_v33 = vld [vmem:[%s5553_s5 + $0x3998] sm:$0xff]  ;;  %4969 = vmatpush.msrb.mxu3 %v2332_v55 }
 0x7d9   : > { %v2196_v38 = vld [vmem:[%s5553_s5 + $0x3b98] sm:$0xff]  ;;  %4911 = vmatpush.msrb.mxu0 %v2132_v33  ;;  %v2826_v33 = vadd.f32 %v6552_v13, %v2806_v30  ;;  %v5035_v30 = vld [vmem:[%s7906_s30 + $0x158] sm:$0xff] }
 0x7da   : > { %v2260_v39 = vld [vmem:[%s5553_s5 + $0x3d98] sm:$0xff]  ;;  %4931 = vmatpush.msrb.mxu1 %v2196_v38  ;;  %v4125_v38 = vpop.f32.mrf.mxu0 }
 0x7db   : > { %v2328_v45 = vld [vmem:[%s5553_s5 + $0x3fb8] sm:$0xff]  ;;  %4951 = vmatpush.msrb.mxu2 %v2260_v39 }
 0x7dc   : > { %v2128_v47 = vld [vmem:[%s5553_s5 + $0x3978] sm:$0xff]  ;;  %4970 = vmatpush.msrb.mxu3 %v2328_v45 }
 0x7dd   : > { %v2192_v42 = vld [vmem:[%s5553_s5 + $0x3b78] sm:$0xff]  ;;  %4912 = vmatpush.msrb.mxu0 %v2128_v47 }
 0x7de   : > { %v2256_v48 = vld [vmem:[%s5553_s5 + $0x3d78] sm:$0xff]  ;;  %4932 = vmatpush.msrb.mxu1 %v2192_v42  ;;  %v2846_v42 = vadd.f32 %v6546_v3, %v2826_v33  ;;  %v5017_v33 = vld [vmem:[%s7906_s30 + $0xc8] sm:$0xff] }
 0x7df   : > { %v2324_v10 = vld [vmem:[%s5553_s5 + $0x3f98] sm:$0xff]  ;;  %4952 = vmatpush.msrb.mxu2 %v2256_v48  ;;  %v4126_v48 = vadd.f32 %v4125_v38, %v4106_v7 }
 0x7e0   : > { %v2124_v41 = vld [vmem:[%s5553_s5 + $0x3958] sm:$0xff]  ;;  %4971 = vmatpush.msrb.mxu3 %v2324_v10 }
 0x7e1   : > { %v2188_v35 = vld [vmem:[%s5553_s5 + $0x3b58] sm:$0xff]  ;;  %4913 = vmatpush.msrb.mxu0 %v2124_v41  ;;  %v4145_v41 = vpop.f32.mrf.mxu1 }
 0x7e2   : > { %v2252_v2 = vld [vmem:[%s5553_s5 + $0x3d58] sm:$0xff]  ;;  %4933 = vmatpush.msrb.mxu1 %v2188_v35 }
 0x7e3   : > { %v2320_v40 = vld [vmem:[%s5553_s5 + $0x3f78] sm:$0xff]  ;;  %4953 = vmatpush.msrb.mxu2 %v2252_v2 }
 0x7e4   : > { %v2120_v58 = vld [vmem:[%s5553_s5 + $0x3938] sm:$0xff]  ;;  %4972 = vmatpush.msrb.mxu3 %v2320_v40  ;;  %v2866_v40 = vadd.f32 %v6548_v6, %v2846_v42  ;;  %v5324_v6 = vld.sshfl [vmem:[#allocation1 + $0x30] sm:$0xff pattern:$0x73625140] }
 0x7e5   : > { %v2184_v11 = vld [vmem:[%s5553_s5 + $0x3b38] sm:$0xff]  ;;  %4914 = vmatpush.msrb.mxu0 %v2120_v58  ;;  %v4146_v58 = vadd.f32 %v4145_v41, %v4126_v48  ;;  %v4999_v48 = vld [vmem:[%s7906_s30 + $0x38] sm:$0xff] }
 0x7e6   : > { %v2248_v57 = vld [vmem:[%s5553_s5 + $0x3d38] sm:$0xff]  ;;  %4934 = vmatpush.msrb.mxu1 %v2184_v11  ;;  %v5007_v11 = vld [vmem:[%s7906_s30 + $0x78] sm:$0xff] }
 0x7e7   : > { %v2316_v54 = vld [vmem:[%s5553_s5 + $0x3f58] sm:$0xff]  ;;  %4954 = vmatpush.msrb.mxu2 %v2248_v57  ;;  %v5023_v57 = vld [vmem:[%s7906_s30 + $0xf8] sm:$0xff] }
 0x7e8   : > { %v2116_v51 = vld [vmem:[%s5553_s5 + $0x3918] sm:$0xff]  ;;  %4973 = vmatpush.msrb.mxu3 %v2316_v54  ;;  %v2886_v54 = vadd.f32 %v6566_v44, %v2866_v40  ;;  %v5038_v44 = vld [vmem:[%s7906_s30 + $0x170] sm:$0xff]  ;;  %v5031_v41 = vld [vmem:[%s7906_s30 + $0x138] sm:$0xff] }
 0x7e9   : > { %v2180_v15 = vld [vmem:[%s5553_s5 + $0x3b18] sm:$0xff]  ;;  %4915 = vmatpush.msrb.mxu0 %v2116_v51  ;;  %v4166_v51 = vadd.f32 %v4165_v18, %v4146_v58  ;;  %v4225_v4 = vpop.f32.mrf.mxu1  ;;  %v5030_v18 = vld [vmem:[%s7906_s30 + $0x130] sm:$0xff] }
 0x7ea   : > { %v2244_v29 = vld [vmem:[%s5553_s5 + $0x3d18] sm:$0xff]  ;;  %4935 = vmatpush.msrb.mxu1 %v2180_v15 }
 0x7eb   : > { %v2312_v9 = vld [vmem:[%s5553_s5 + $0x3f38] sm:$0xff]  ;;  %4955 = vmatpush.msrb.mxu2 %v2244_v29  ;;  %v5006_v29 = vld [vmem:[%s7906_s30 + $0x70] sm:$0xff] }
 0x7ec   : > { %v2112_v23 = vld [vmem:[%s5553_s5 + $0x38f8] sm:$0xff]  ;;  %4974 = vmatpush.msrb.mxu3 %v2312_v9  ;;  %v5022_v9 = vld [vmem:[%s7906_s30 + $0xf0] sm:$0xff] }
 0x7ed   : > { %v2176_v59 = vld [vmem:[%s5553_s5 + $0x3af8] sm:$0xff]  ;;  %4916 = vmatpush.msrb.mxu0 %v2112_v23 }
 0x7ee   : > { %v2240_v52 = vld [vmem:[%s5553_s5 + $0x3cf8] sm:$0xff]  ;;  %4936 = vmatpush.msrb.mxu1 %v2176_v59  ;;  %v4205_v59 = vpop.f32.mrf.mxu0 }
 0x7ef   : > { %v2308_v19 = vld [vmem:[%s5553_s5 + $0x3f18] sm:$0xff]  ;;  %4956 = vmatpush.msrb.mxu2 %v2240_v52  ;;  %v5326_v52 = vld.sshfl [vmem:[#allocation1 + $0x38] sm:$0xff pattern:$0x73625140] }
 0x7f0   : > { %v2108_v63 = vld [vmem:[%s5553_s5 + $0x38d8] sm:$0xff]  ;;  %4975 = vmatpush.msrb.mxu3 %v2308_v19  ;;  %v5005_v19 = vld [vmem:[%s7906_s30 + $0x68] sm:$0xff] }
 0x7f1   : > { %v2172_v14 = vld [vmem:[%s5553_s5 + $0x3ad8] sm:$0xff]  ;;  %4917 = vmatpush.msrb.mxu0 %v2108_v63  ;;  %v4186_v63 = vadd.f32 %v4185_v32, %v4166_v51  ;;  %v4305_v58 = vpop.f32.mrf.mxu1  ;;  %v4325_v51 = vpop.f32.mrf.mxu2 }
 0x7f2   : > { %v2236_v27 = vld [vmem:[%s5553_s5 + $0x3cd8] sm:$0xff]  ;;  %4937 = vmatpush.msrb.mxu1 %v2172_v14  ;;  %v5037_v14 = vld [vmem:[%s7906_s30 + $0x168] sm:$0xff] }
 0x7f3   : > { %v2304_v53 = vld [vmem:[%s5553_s5 + $0x3ef8] sm:$0xff]  ;;  %4957 = vmatpush.msrb.mxu2 %v2236_v27  ;;  %v8026_v27 = vld [vmem:[#allocation8_spill] sm:$0xff] }
 0x7f4   : > { %v2104_v34 = vld [vmem:[%s5553_s5 + $0x38b8] sm:$0xff]  ;;  %4976 = vmatpush.msrb.mxu3 %v2304_v53 }
 0x7f5   : > { %v2168_v25 = vld [vmem:[%s5553_s5 + $0x3ab8] sm:$0xff]  ;;  %4918 = vmatpush.msrb.mxu0 %v2104_v34  ;;  %v4206_v34 = vadd.f32 %v4205_v59, %v4186_v63  ;;  %v5026_v63 = vld [vmem:[%s7906_s30 + $0x110] sm:$0xff] }
 0x7f6   : > { %v2232_v26 = vld [vmem:[%s5553_s5 + $0x3cb8] sm:$0xff]  ;;  %4938 = vmatpush.msrb.mxu1 %v2168_v25 }
 0x7f7   : > { %v2300_v61 = vld [vmem:[%s5553_s5 + $0x3ed8] sm:$0xff]  ;;  %4958 = vmatpush.msrb.mxu2 %v2232_v26  ;;  %v5003_v26 = vld [vmem:[%s7906_s30 + $0x58] sm:$0xff]  ;;  %v4226_v37 = vadd.f32 %v4225_v4, %v4206_v34  ;;  %v5025_v34 = vld [vmem:[%s7906_s30 + $0x108] sm:$0xff] }
 0x7f8   : > { %v2100_v17 = vld [vmem:[%s5553_s5 + $0x3898] sm:$0xff]  ;;  %4977 = vmatpush.msrb.mxu3 %v2300_v61  ;;  %v5019_v61 = vld [vmem:[%s7906_s30 + $0xd8] sm:$0xff] }
 0x7f9   : > { %v2164_v31 = vld [vmem:[%s5553_s5 + $0x3a98] sm:$0xff]  ;;  %4919 = vmatpush.msrb.mxu0 %v2100_v17  ;;  %v8027_v17 = vld [vmem:[#allocation9_spill] sm:$0xff]  ;;  %v4246_v38 = vadd.f32 %v4245_v46, %v4226_v37 }
 0x7fa   : > { %v2228_v62 = vld [vmem:[%s5553_s5 + $0x3c98] sm:$0xff]  ;;  %4939 = vmatpush.msrb.mxu1 %v2164_v31 }
 0x7fb   : > { %v2296_v36 = vld [vmem:[%s5553_s5 + $0x3eb8] sm:$0xff]  ;;  %4959 = vmatpush.msrb.mxu2 %v2228_v62  ;;  %v5002_v62 = vld [vmem:[%s7906_s30 + $0x50] sm:$0xff] }
 0x7fc   : > { %v2096_v56 = vld [vmem:[%s5553_s5 + $0x3878] sm:$0xff]  ;;  %4978 = vmatpush.msrb.mxu3 %v2296_v36  ;;  %v5018_v36 = vld [vmem:[%s7906_s30 + $0xd0] sm:$0xff] }
 0x7fd   : > { %v2160_v0 = vld [vmem:[%s5553_s5 + $0x3a78] sm:$0xff]  ;;  %4920 = vmatpush.msrb.mxu0 %v2096_v56  ;;  %v5034_v56 = vld [vmem:[%s7906_s30 + $0x150] sm:$0xff] }
 0x7fe   : > { %v2224_v55 = vld [vmem:[%s5553_s5 + $0x3c78] sm:$0xff]  ;;  %4940 = vmatpush.msrb.mxu1 %v2160_v0  ;;  %v8028_v0 = vld [vmem:[#allocation11_spill] sm:$0xff] }
 0x7ff   : > { %v2292_v21 = vld [vmem:[%s5553_s5 + $0x3e98] sm:$0xff]  ;;  %4960 = vmatpush.msrb.mxu2 %v2224_v55 }
 0x800   : > { %v2092_v39 = vld [vmem:[%s5553_s5 + $0x3858] sm:$0xff]  ;;  %4979 = vmatpush.msrb.mxu3 %v2292_v21  ;;  %v5001_v21 = vld [vmem:[%s7906_s30 + $0x48] sm:$0xff] }
 0x801   : > { %v2156_v45 = vld [vmem:[%s5553_s5 + $0x3a58] sm:$0xff]  ;;  %4921 = vmatpush.msrb.mxu0 %v2092_v39  ;;  %v5033_v39 = vld [vmem:[%s7906_s30 + $0x148] sm:$0xff] }
 0x802   : > { %v2220_v8 = vld [vmem:[%s5553_s5 + $0x3c58] sm:$0xff]  ;;  %4941 = vmatpush.msrb.mxu1 %v2156_v45  ;;  %v4265_v45 = vpop.f32.mrf.mxu3 }
 0x803   : > { %v2288_v47 = vld [vmem:[%s5553_s5 + $0x3e78] sm:$0xff]  ;;  %4961 = vmatpush.msrb.mxu2 %v2220_v8 }
 0x804   : > { %v2088_v13 = vld [vmem:[%s5553_s5 + $0x3838] sm:$0xff]  ;;  %4980 = vmatpush.msrb.mxu3 %v2288_v47 }
 0x805   : > { %v2152_v43 = vld [vmem:[%s5553_s5 + $0x3a38] sm:$0xff]  ;;  %4922 = vmatpush.msrb.mxu0 %v2088_v13 }
 0x806   : > { %v2216_v10 = vld [vmem:[%s5553_s5 + $0x3c38] sm:$0xff]  ;;  %4942 = vmatpush.msrb.mxu1 %v2152_v43  ;;  %v4285_v43 = vpop.f32.mrf.mxu0 }
 0x807   : > { %v2284_v49 = vld [vmem:[%s5553_s5 + $0x3e58] sm:$0xff]  ;;  %4962 = vmatpush.msrb.mxu2 %v2216_v10  ;;  %v5015_v10 = vld [vmem:[%s7906_s30 + $0xb8] sm:$0xff] }
 0x808   : > { %v2084_v35 = vld [vmem:[%s5553_s5 + $0x3818] sm:$0xff]  ;;  %4981 = vmatpush.msrb.mxu3 %v2284_v49  ;;  %v4266_v49 = vadd.f32 %v4265_v45, %v4246_v38 }
 0x809   : > { %v2148_v28 = vld [vmem:[%s5553_s5 + $0x3a18] sm:$0xff]  ;;  %4923 = vmatpush.msrb.mxu0 %v2084_v35  ;;  %v8030_v35 = vld [vmem:[#allocation12_spill] sm:$0xff] }
 0x80a   : > { %v2212_v3 = vld [vmem:[%s5553_s5 + $0x3c18] sm:$0xff]  ;;  %4943 = vmatpush.msrb.mxu1 %v2148_v28  ;;  %v4286_v40 = vadd.f32 %v4285_v43, %v4266_v49 }
 0x80b   : > { %v2280_v2 = vld [vmem:[%s5553_s5 + $0x3e38] sm:$0xff]  ;;  %4963 = vmatpush.msrb.mxu2 %v2212_v3  ;;  %5056 = vmatpush.msra.mxu0 %v5007_v11  ;;  %v4998_v3 = vld [vmem:[%s7906_s30 + $0x30] sm:$0xff]  ;;  %v4997_v11 = vld [vmem:[%s7906_s30 + $0x28] sm:$0xff] }
 0x80c   : > { %4982 = vmatpush.msrb.mxu3 %v2280_v2  ;;  %v2276_v60 = vld [vmem:[%s5553_s5 + $0x3e18] sm:$0xff]  ;;  %4964 = vmatmul.f32.vlgmr.msrb.gmra.mxu2 %v5324_v6  ;;  %v5014_v2 = vld [vmem:[%s7906_s30 + $0xb0] sm:$0xff]  ;;  %v4306_v32 = vadd.f32 %v4305_v58, %v4286_v40  ;;  %v5051_v40 = vld [vmem:[%s7906_s30 + $0x1d8] sm:$0xff]  ;;  %s5251_s5 = sshll.u32 %s8041_s19, 1 }
 0x80d   : > { %v5323_v15 = vld.sshfl [vmem:[#allocation1 + $0x20] sm:$0xff pattern:$0x73625140]  ;;  %5076 = vmatpush.msra.mxu1 %v5023_v57  ;;  %5096 = vmatpush.msra.mxu2 %v5039_v50  ;;  %v5013_v57 = vld [vmem:[%s7906_s30 + $0xa8] sm:$0xff]  ;;  %v8031_v50 = vld [vmem:[#allocation13_spill] sm:$0xff]  ;;  %s280_s14 = scalar_lea.vmem %s8010_s4, %s5251_s5 }
 0x80e   : > { %4924 = vmatmul.f32.vlgmr.msrb.gmra.mxu0 %v5323_v15  ;;  %4983 = vmatpush.msrb.mxu3 %v2276_v60  ;;  %v8025_v22 = vld [vmem:[#allocation10_spill] sm:$0xff]  ;;  %v4326_v59 = vadd.f32 %v4325_v51, %v4306_v32  ;;  %v4365_v46 = vpop.f32.mrf.mxu0  ;;  %v5050_v58 = vld [vmem:[%s7906_s30 + $0x1d0] sm:$0xff] }
 0x80f   : > { %v2906_v23 = vadd.f32 %v8025_v22, %v2886_v54  ;;  %4944 = vmatmul.f32.vlgmr.msrb.gmra.mxu1 %v5325_v5  ;;  %4984 = vmatmul.f32.vlgmr.msrb.gmra.mxu3 %v5326_v52  ;;  %v5004_v24 = vld [vmem:[%s7906_s30 + $0x60] sm:$0xff]  ;;  %v5029_v54 = vld [vmem:[%s7906_s30 + $0x128] sm:$0xff]  ;;  %v4995_v22 = vld [vmem:[%s7906_s30 + $0x18] sm:$0xff]  ;;  %v4345_v52 = vpop.f32.mrf.mxu3 }
 0x810   : > { %5057 = vmatpush.msra.mxu0 %v5006_v29  ;;  %5077 = vmatpush.msra.mxu1 %v5022_v9  ;;  %v5020_v12 = vld [vmem:[%s7906_s30 + $0xe0] sm:$0xff]  ;;  %v8032_v9 = vld [vmem:[#allocation15_spill] sm:$0xff]  ;;  %v5027_v5 = vld [vmem:[%s7906_s30 + $0x118] sm:$0xff] }
 0x811   : > { %v2926_v53 = vadd.f32 %v8026_v27, %v2906_v23  ;;  %5097 = vmatpush.msra.mxu2 %v5038_v44  ;;  %v5036_v25 = vld [vmem:[%s7906_s30 + $0x160] sm:$0xff]  ;;  %v5011_v23 = vld [vmem:[%s7906_s30 + $0x98] sm:$0xff] }
 0x812   : > { %5058 = vmatpush.msra.mxu0 %v5005_v19  ;;  %5078 = vmatpush.msra.mxu1 %v5021_v20  ;;  %v5000_v7 = vld [vmem:[%s7906_s30 + $0x40] sm:$0xff]  ;;  %v4994_v19 = vld [vmem:[%s7906_s30 + $0x10] sm:$0xff] }
 0x813   : > { %5098 = vmatpush.msra.mxu2 %v5037_v14  ;;  %v2946_v31 = vadd.f32 %v8027_v17, %v2926_v53  ;;  %v5016_v8 = vld [vmem:[%s7906_s30 + $0xc0] sm:$0xff]  ;;  %v5010_v20 = vld [vmem:[%s7906_s30 + $0x90] sm:$0xff]  ;;  %v4993_v53 = vld [vmem:[%s7906_s30 + $0x8] sm:$0xff] }
 0x814   : > { %5059 = vmatpush.msra.mxu0 %v5004_v24  ;;  %5079 = vmatpush.msra.mxu1 %v5020_v12  ;;  %v5032_v47 = vld [vmem:[%s7906_s30 + $0x140] sm:$0xff]  ;;  %v8033_v14 = vld [vmem:[#allocation16_spill] sm:$0xff]  ;;  %v5009_v24 = vld [vmem:[%s7906_s30 + $0x88] sm:$0xff]  ;;  %v4346_v12 = vadd.f32 %v4345_v52, %v4326_v59 }
 0x815   : > { %5099 = vmatpush.msra.mxu2 %v5036_v25  ;;  %v2966_v55 = vadd.f32 %v8028_v0, %v2946_v31  ;;  %v8029_v42 = vld [vmem:[#allocation14_spill] sm:$0xff]  ;;  %v2342_v31 = vperm.slane %v7722_v1, 3 }
 0x816   : > { %5060 = vmatpush.msra.mxu0 %v5003_v26  ;;  %5080 = vmatpush.msra.mxu1 %v5019_v61  ;;  %v4996_v15 = vld [vmem:[%s7906_s30 + $0x20] sm:$0xff]  ;;  %v4990_v17 = vmax.f32 %v4346_v12, 0.0 }
 0x817   : > { %5100 = vmatpush.msra.mxu2 %v5035_v30  ;;  %v2986_v13 = vadd.f32 %v8029_v42, %v2966_v55  ;;  %v5012_v6 = vld [vmem:[%s7906_s30 + $0xa0] sm:$0xff]  ;;  %v4989_v30 = vmax.f32 %v7063_v16, 0.0  ;;  %v4425_v55 = vpop.f32.mrf.mxu3  ;;  %v4445_v16 = vpop.f32.mrf.mxu0 }
 0x818   : > { %5061 = vmatpush.msra.mxu0 %v5002_v62  ;;  %5081 = vmatpush.msra.mxu1 %v5018_v36  ;;  %v5028_v29 = vld [vmem:[%s7906_s30 + $0x120] sm:$0xff]  ;;  %v4366_v62 = vadd.f32 %v4365_v46, %v2342_v31  ;;  %v4385_v36 = vpop.f32.mrf.mxu1 }
 0x819   : > { %5101 = vmatpush.msra.mxu2 %v5034_v56  ;;  %v3006_v28 = vadd.f32 %v8030_v35, %v2986_v13  ;;  %v4992_v25 = vld [vmem:[%s7906_s30] sm:$0xff]  ;;  %v4405_v56 = vpop.f32.mrf.mxu2 }
 0x81a   : > { %5062 = vmatpush.msra.mxu0 %v5001_v21  ;;  %5082 = vmatpush.msra.mxu1 %v5017_v33  ;;  %v5008_v4 = vld [vmem:[%s7906_s30 + $0x80] sm:$0xff]  ;;  %v4386_v37 = vadd.f32 %v4385_v36, %v4366_v62 }
 0x81b   : > { %5102 = vmatpush.msra.mxu2 %v5033_v39  ;;  %v3026_v60 = vadd.f32 %v8031_v50, %v3006_v28  ;;  %v5024_v26 = vld [vmem:[%s7906_s30 + $0x100] sm:$0xff] }
 0x81c   : > { %5063 = vmatpush.msra.mxu0 %v5000_v7  ;;  %5083 = vmatpush.msra.mxu1 %v5016_v8  ;;  %v4406_v0 = vadd.f32 %v4405_v56, %v4386_v37 }
 0x81d   : > { %5103 = vmatpush.msra.mxu2 %v5032_v47  ;;  %v3046_v44 = vadd.f32 %v8032_v9, %v3026_v60  ;;  %v5048_v60 = vld [vmem:[%s7906_s30 + $0x1c0] sm:$0xff] }
 0x81e   : > { %5064 = vmatpush.msra.mxu0 %v4999_v48  ;;  %5084 = vmatpush.msra.mxu1 %v5015_v10  ;;  %v4426_v21 = vadd.f32 %v4425_v55, %v4406_v0  ;;  %v5055_v48 = vld [vmem:[%s7906_s30 + $0x1f8] sm:$0xff]  ;;  %v5054_v10 = vld [vmem:[%s7906_s30 + $0x1f0] sm:$0xff] }
 0x81f   : > { %5104 = vmatpush.msra.mxu2 %v5031_v41  ;;  %v3066_v27 = vadd.f32 %v8033_v14, %v3046_v44  ;;  %v4505_v7 = vpop.f32.mrf.mxu3  ;;  %v4525_v8 = vpop.f32.mrf.mxu0  ;;  %5116 = vmatpush.msra.mxu3 %v5055_v48  ;;  %v5053_v41 = vld [vmem:[%s7906_s30 + $0x1e8] sm:$0xff] }
 0x820   : > { %5065 = vmatpush.msra.mxu0 %v4998_v3  ;;  %5085 = vmatpush.msra.mxu1 %v5014_v2  ;;  %v4446_v33 = vadd.f32 %v4445_v16, %v4426_v21  ;;  %v4465_v1 = vpop.f32.mrf.mxu1  ;;  %v5052_v3 = vld [vmem:[%s7906_s30 + $0x1e0] sm:$0xff] }
 0x821   : > { %5105 = vmatpush.msra.mxu2 %v5030_v18  ;;  %v4988_v61 = vmax.f32 %v3066_v27, 0.0  ;;  %v4485_v39 = vpop.f32.mrf.mxu2  ;;  %5117 = vmatpush.msra.mxu3 %v5054_v10 }
 0x822   : > { %5066 = vmatpush.msra.mxu0 %v4997_v11  ;;  %5086 = vmatpush.msra.mxu1 %v5013_v57  ;;  %v4466_v38 = vadd.f32 %v4465_v1, %v4446_v33 }
 0x823   : > { %5106 = vmatpush.msra.mxu2 %v5029_v54  ;;  %5118 = vmatpush.msra.mxu3 %v5053_v41  ;;  %v5049_v54 = vld [vmem:[%s7906_s30 + $0x1c8] sm:$0xff] }
 0x824   : > { %5067 = vmatpush.msra.mxu0 %v4996_v15  ;;  %5087 = vmatpush.msra.mxu1 %v5012_v6  ;;  %v4486_v45 = vadd.f32 %v4485_v39, %v4466_v38  ;;  %v5047_v15 = vld [vmem:[%s7906_s30 + $0x1b8] sm:$0xff] }
 0x825   : > { %5107 = vmatpush.msra.mxu2 %v5028_v29  ;;  %5119 = vmatpush.msra.mxu3 %v5052_v3 }
 0x826   : > { %5068 = vmatpush.msra.mxu0 %v4995_v22  ;;  %5088 = vmatpush.msra.mxu1 %v5011_v23  ;;  %v4506_v47 = vadd.f32 %v4505_v7, %v4486_v45 }
 0x827   : > { %5108 = vmatpush.msra.mxu2 %v5027_v5  ;;  %v4585_v28 = vpop.f32.mrf.mxu3  ;;  %v4605_v2 = vpop.f32.mrf.mxu0  ;;  %5120 = vmatpush.msra.mxu3 %v5051_v40  ;;  %v5046_v5 = vld [vmem:[%s7906_s30 + $0x1b0] sm:$0xff] }
 0x828   : > { %5069 = vmatpush.msra.mxu0 %v4994_v19  ;;  %5089 = vmatpush.msra.mxu1 %v5010_v20  ;;  %v4526_v42 = vadd.f32 %v4525_v8, %v4506_v47  ;;  %v4545_v13 = vpop.f32.mrf.mxu1  ;;  %v5045_v20 = vld [vmem:[%s7906_s30 + $0x1a8] sm:$0xff] }
 0x829   : > { %5109 = vmatpush.msra.mxu2 %v5026_v63  ;;  %v4565_v43 = vpop.f32.mrf.mxu2  ;;  %5121 = vmatpush.msra.mxu3 %v5050_v58  ;;  %v5044_v63 = vld [vmem:[%s7906_s30 + $0x1a0] sm:$0xff] }
 0x82a   : > { %5070 = vmatpush.msra.mxu0 %v4993_v53  ;;  %5090 = vmatpush.msra.mxu1 %v5009_v24  ;;  %v4546_v49 = vadd.f32 %v4545_v13, %v4526_v42  ;;  %v5043_v53 = vld [vmem:[%s7906_s30 + $0x198] sm:$0xff] }
 0x82b   : > { %5110 = vmatpush.msra.mxu2 %v5025_v34  ;;  %5122 = vmatpush.msra.mxu3 %v5049_v54  ;;  %v5042_v34 = vld [vmem:[%s7906_s30 + $0x190] sm:$0xff] }
 0x82c   : > { %5071 = vmatpush.msra.mxu0 %v4992_v25  ;;  %5091 = vmatpush.msra.mxu1 %v5008_v4  ;;  %v4566_v35 = vadd.f32 %v4565_v43, %v4546_v49  ;;  %v5041_v4 = vld [vmem:[%s7906_s30 + $0x188] sm:$0xff] }
 0x82d   : > { %5111 = vmatpush.msra.mxu2 %v5024_v26  ;;  %5072 = vmatmul.f32.vlgmr.msra.gmra.mxu0 %v4988_v61  ;;  %v5040_v26 = vld [vmem:[%s7906_s30 + $0x180] sm:$0xff] }
 0x82e   : > { %5092 = vmatmul.f32.vlgmr.msra.gmra.mxu1 %v4989_v30  ;;  %5112 = vmatmul.f32.vlgmr.msra.gmra.mxu2 %v4990_v17  ;;  %v4586_v18 = vadd.f32 %v4585_v28, %v4566_v35 }
 0x82f   : > { %5123 = vmatpush.msra.mxu3 %v5048_v60  ;;  %v4665_v32 = vpop.f32.mrf.mxu3  ;;  %v4685_v29 = vpop.f32.mrf.mxu0 }
 0x830   : > { %v4606_v11 = vadd.f32 %v4605_v2, %v4586_v18  ;;  %v4625_v57 = vpop.f32.mrf.mxu1 }
 0x831   : > { %v4645_v50 = vpop.f32.mrf.mxu2  ;;  %5124 = vmatpush.msra.mxu3 %v5047_v15 }
 0x832   : > { %v4626_v51 = vadd.f32 %v4625_v57, %v4606_v11 }
 0x833   : > { %5125 = vmatpush.msra.mxu3 %v5046_v5 }
 0x834   : > { %v4646_v6 = vadd.f32 %v4645_v50, %v4626_v51 }
 0x835   : > { %5126 = vmatpush.msra.mxu3 %v5045_v20 }
 0x836   : > { %v4666_v9 = vadd.f32 %v4665_v32, %v4646_v6 }
 0x837   : > { %v4745_v19 = vpop.f32.mrf.mxu3  ;;  %v4765_v14 = vpop.f32.mrf.mxu0  ;;  %5127 = vmatpush.msra.mxu3 %v5044_v63 }
 0x838   : > { %v4686_v44 = vadd.f32 %v4685_v29, %v4666_v9  ;;  %v4705_v22 = vpop.f32.mrf.mxu1 }
 0x839   : > { %v4725_v23 = vpop.f32.mrf.mxu2  ;;  %5128 = vmatpush.msra.mxu3 %v5043_v53 }
 0x83a   : > { %v4706_v59 = vadd.f32 %v4705_v22, %v4686_v44 }
 0x83b   : > { %5129 = vmatpush.msra.mxu3 %v5042_v34 }
 0x83c   : > { %v4726_v52 = vadd.f32 %v4725_v23, %v4706_v59 }
 0x83d   : > { %5130 = vmatpush.msra.mxu3 %v5041_v4 }
 0x83e   : > { %v4746_v27 = vadd.f32 %v4745_v19, %v4726_v52 }
 0x83f   : > { %5131 = vmatpush.msra.mxu3 %v5040_v26  ;;  %v4825_v17 = vpop.f32.mrf.mxu3 }
 0x840   : > { %v4766_v24 = vadd.f32 %v4765_v14, %v4746_v27  ;;  %v4785_v12 = vpop.f32.mrf.mxu1 }
 0x841   : > { %v4805_v25 = vpop.f32.mrf.mxu2 }
 0x842   : > { %v4786_v61 = vadd.f32 %v4785_v12, %v4766_v24 }
 0x844   : > { %v4806_v30 = vadd.f32 %v4805_v25, %v4786_v61 }
 0x846   : > { %v4826_v46 = vadd.f32 %v4825_v17, %v4806_v30 }
 0x848   : > { %v4865_v36 = vpop.f32.mrf.mxu1 }
 0x84d   : > { %v4845_v31 = vpop.f32.mrf.mxu0 }
 0x84e   : > { %v4846_v62 = vadd.f32 %v4845_v31, %v4826_v46  ;;  %v4885_v37 = vpop.f32.mrf.mxu2 }
 0x850   : > { %v4866_v56 = vadd.f32 %v4865_v36, %v4846_v62 }
 0x852   : > { %v4886_v0 = vadd.f32 %v4885_v37, %v4866_v56 }
 0x853   : > { %v4905_v55 = vpop.f32.mrf.mxu3 }
 0x854   : > { %v4906_v21 = vadd.f32 %v4905_v55, %v4886_v0 }
 0x88b   : > { %v4925_v16 = vpop.f32.mrf.mxu0 }
 0x88c   : > { %v4926_v33 = vadd.f32 %v4925_v16, %v4906_v21  ;;  %v4945_v1 = vpop.f32.mrf.mxu1 }
 0x88e   : > { %v4946_v38 = vadd.f32 %v4945_v1, %v4926_v33 }
 0x88f   : > { %v4965_v39 = vpop.f32.mrf.mxu2 }
 0x890   : > { %v4966_v45 = vadd.f32 %v4965_v39, %v4946_v38 }
 0x892   : > { %v4985_v7 = vpop.f32.mrf.mxu3 }
 0x893   : > { %v4986_v8 = vadd.f32 %v4985_v7, %v4966_v45 }
 0x895   : > { %v4991_v47 = vmax.f32 %v4986_v8, 0.0 }
 0x897   : > { %5132 = vmatmul.f32.vlgmr.msra.gmra.mxu3 %v4991_v47 }
 0x8aa   : > { %v5073_v42 = vpop.f32.mrf.mxu0 }
 0x8ab   : > { %v5093_v13 = vpop.f32.mrf.mxu1 }
 0x8ac   : > { %v5094_v48 = vadd.f32 %v5093_v13, %v5073_v42 }
 0x8b1   : > { %v5113_v43 = vpop.f32.mrf.mxu2 }
 0x8b2   : > { %v5114_v10 = vadd.f32 %v5113_v43, %v5094_v48 }
 0x91a   : > { %v5133_v49 = vpop.f32.mrf.mxu3 }
 0x91b   : > { %v5134_v41 = vadd.f32 %v5133_v49, %v5114_v10 }
 0x91d   : > { %5137 = vst.msk [vmem:[%s280_s14] sm:$0x3] %vm5136_vm0, %v5134_v41 }
 0x91e PF: > { %p17_p10 = scmp.ge.s32.totalorder %s5477_s20, 10   ;;  %s8034_s15 = smov %s5417_s16 }
 0x91f   : > { %s8035_s16 = smov %s5421_s17  ;;  %s8036_s17 = smov %s5487_s23 }
 0x920   : > { %s8037_s18 = smov %s5477_s20  ;;  %19 = sbr.rel (!%p17_p10) target bundleno = 5 (0x5), region = 93 }
 0x925   :  { %5157 = vsyncpa [#allocation3], 1 }
 0x926   :  { %5159 = vsyncpa [#allocation3 + $0x1], 1 }
 0x927   :  { %5160 = vsyncpa [#allocation5], 1 }
 0x928   :  { %5162 = vsyncpa [#allocation5 + $0x1], 1 }

</bundles_post_ra>
